<compile_context>
chip_gen: v7x
topology: tpu7x:2x2x1
jax: 0.10.0
libtpu: 0.0.40
codegen_flags: <defaults>
</compile_context>

<pallas_src>
import jax
import jax.numpy as jnp
from jax.experimental import pallas as pl
from jax.experimental.pallas import tpu as pltpu

_NUM_CLASSES = 10
_FC_PAD = 128  # classifier output padded to one full lane group

_CONV_SPECS = [
    # (Cout, Cin, K, stride, pad)
    (64, 3, 11, 4, 5),
    (192, 64, 5, 1, 2),
    (384, 192, 3, 1, 1),
    (256, 384, 3, 1, 1),
    (256, 256, 3, 1, 1),
]


# ----------------------------------------------------------------------------
# In-kernel helpers (all static Python loops -> straight-line Mosaic code)
# ----------------------------------------------------------------------------
def _conv_taps(xpad, w_ref, b_ref, kh, kw, oh, ow):
    """Stride-1 'valid' conv over an already-padded activation.

    xpad:  (>= oh+kh-1, >= ow+kw-1, Cin) bf16 value
    w_ref: (kh*kw, Cin, Cout) bf16 ref
    b_ref: (1, Cout) f32 ref
    returns ReLU(conv + bias) as a flat (oh*ow, Cout) f32 value (row = y*ow + x).
    """
    assert xpad.shape[0] >= oh + kh - 1 and xpad.shape[1] >= ow + kw - 1
    cin = xpad.shape[-1]
    cout = w_ref.shape[-1]
    acc = jnp.zeros((oh * ow, cout), jnp.float32)
    for ki in range(kh):
        for kj in range(kw):
            patch = xpad[ki:ki + oh, kj:kj + ow, :].reshape(oh * ow, cin)
            acc = acc + jnp.dot(patch, w_ref[ki * kw + kj],
                                preferred_element_type=jnp.float32)
    return jnp.maximum(acc + b_ref[...], 0.0)


def _pool2x2_into(yflat, oh, ow, dst_ref, off):
    """2x2/stride-2 max-pool of a flat (oh*ow, C) conv output, written into the
    interior of a zero-padded scratch buffer dst_ref at offset `off`."""
    for yy in range(oh // 2):
        for xx in range(ow // 2):
            r0 = (2 * yy) * ow + 2 * xx
            r2 = r0 + ow
            v = jnp.maximum(
                jnp.maximum(yflat[r0:r0 + 1, :], yflat[r0 + 1:r0 + 2, :]),
                jnp.maximum(yflat[r2:r2 + 1, :], yflat[r2 + 1:r2 + 2, :]))
            dst_ref[off + yy, off + xx:off + xx + 1, :] = v


def _write_rows_into(yflat, oh, ow, dst_ref, off):
    """Write a flat (oh*ow, C) activation into the interior of a padded buffer."""
    for yy in range(oh):
        dst_ref[off + yy, off:off + ow, :] = yflat[yy * ow:(yy + 1) * ow, :]


# ----------------------------------------------------------------------------
# The fused kernel: one image per grid step, all weights VMEM-resident.
# ----------------------------------------------------------------------------
def _alexnet_kernel(x_ref, w0, b0, w1, b1, w2, b2, w3, b3, w4, b4, wfc, bfc,
                    out_ref, p1, p2, p3, p4):
    bf16 = jnp.bfloat16

    # conv0: 11x11 s4 p5, expressed as a 3x3 s1 conv over the space-to-depth input.
    x0 = x_ref[0]                                    # (11, 11, 48) bf16
    y = _conv_taps(x0, w0, b0, 3, 3, 8, 8)           # (64, 64) f32, ReLU'd
    p1[...] = jnp.zeros_like(p1)                     # conv1 padded input (pad=2)
    _pool2x2_into(y, 8, 8, p1, 2)                    # pool -> (4,4,64) interior

    # conv1: 5x5 s1 p2 -> (4,4,192), ReLU, pool -> (2,2,192)
    y = _conv_taps(p1[...].astype(bf16), w1, b1, 5, 5, 4, 4)
    p2[...] = jnp.zeros_like(p2)                     # conv2 padded input (pad=1)
    _pool2x2_into(y, 4, 4, p2, 1)

    # conv2: 3x3 s1 p1 -> (2,2,384), ReLU
    y = _conv_taps(p2[...].astype(bf16), w2, b2, 3, 3, 2, 2)
    p3[...] = jnp.zeros_like(p3)
    _write_rows_into(y, 2, 2, p3, 1)

    # conv3: 3x3 s1 p1 -> (2,2,256), ReLU
    y = _conv_taps(p3[...].astype(bf16), w3, b3, 3, 3, 2, 2)
    p4[...] = jnp.zeros_like(p4)
    _write_rows_into(y, 2, 2, p4, 1)

    # conv4: 3x3 s1 p1 -> (2,2,256), ReLU, 2x2 pool == global max over the 4 rows
    y = _conv_taps(p4[...].astype(bf16), w4, b4, 3, 3, 2, 2)   # (4, 256)
    feat = jnp.max(y, axis=0, keepdims=True)                   # (1, 256)

    # classifier (fused, output lane-padded 10 -> 128 so the HBM store is unmasked)
    logits = jnp.dot(feat.astype(bf16), wfc[...],
                     preferred_element_type=jnp.float32) + bfc[...]
    out_ref[0] = logits


# ----------------------------------------------------------------------------
# Parameter init (PyTorch layout) and one-time packing for the kernel.
# ----------------------------------------------------------------------------
def init_raw_params(key):
    raw = {}
    for idx, (cout, cin, k, _, _) in enumerate(_CONV_SPECS):
        key, k1, k2 = jax.random.split(key, 3)
        fan_in = cin * k * k
        raw[f"conv{idx}_w"] = (jax.random.normal(k1, (cout, cin, k, k), jnp.float32)
                               * (2.0 / fan_in) ** 0.5)
        raw[f"conv{idx}_b"] = jax.random.normal(k2, (cout,), jnp.float32) * 0.01
    key, k1, k2 = jax.random.split(key, 3)
    raw["fc_w"] = jax.random.normal(k1, (_NUM_CLASSES, 256), jnp.float32) * (1.0 / 256.0) ** 0.5
    raw["fc_b"] = jax.random.normal(k2, (_NUM_CLASSES,), jnp.float32) * 0.01
    return raw


def pack_params(raw):
    """Hoisted one-time repacking: conv0 -> space-to-depth 3x3 taps, conv1..4 ->
    (kh*kw, Cin, Cout), fc -> lane-padded (256, 128); matmul operands pre-cast to bf16."""
    p = {}
    # conv0: W0[co, c, 4a+p, 4b+q] -> W0s2d[a*3+b, p*12+q*3+c, co] (zero where tap > 10)
    w0 = jnp.pad(raw["conv0_w"], ((0, 0), (0, 0), (0, 1), (0, 1)))  # (64,3,12,12)
    w0 = w0.reshape(64, 3, 3, 4, 3, 4)          # [co, c, a, p, b, q]
    w0 = w0.transpose(2, 4, 3, 5, 1, 0)         # [a, b, p, q, c, co]
    p["w0"] = w0.reshape(9, 48, 64).astype(jnp.bfloat16)
    p["b0"] = raw["conv0_b"].reshape(1, 64).astype(jnp.float32)
    for idx in range(1, 5):
        cout, cin, k, _, _ = _CONV_SPECS[idx]
        w = raw[f"conv{idx}_w"]                                   # (cout, cin, k, k)
        wt = jnp.transpose(w, (2, 3, 1, 0)).reshape(k * k, cin, cout)
        p[f"w{idx}"] = wt.astype(jnp.bfloat16)
        p[f"b{idx}"] = raw[f"conv{idx}_b"].reshape(1, cout).astype(jnp.float32)
    wfc = jnp.zeros((256, _FC_PAD), jnp.float32).at[:, :_NUM_CLASSES].set(raw["fc_w"].T)
    p["wfc"] = wfc.astype(jnp.bfloat16)
    p["bfc"] = jnp.zeros((1, _FC_PAD), jnp.float32).at[0, :_NUM_CLASSES].set(raw["fc_b"])
    return p


# ----------------------------------------------------------------------------
# Forward wrapper
# ----------------------------------------------------------------------------
def alexnet_forward(params, x_nchw):
    x = jnp.transpose(x_nchw, (0, 2, 3, 1)).astype(jnp.float32)   # NCHW -> NHWC
    n, h, w, c = x.shape
    assert (h, w, c) == (32, 32, 3), (h, w, c)

    # conv0 layout prep: pad=5 (+2 extra zero rows/cols so dims divide by 4), then
    # space-to-depth with 4x4 blocks -> (N, 11, 11, 48) bf16.
    xp = jnp.pad(x, ((0, 0), (5, 7), (5, 7), (0, 0)))
    xs = (xp.reshape(n, 11, 4, 11, 4, 3)
            .transpose(0, 1, 3, 2, 4, 5)
            .reshape(n, 11, 11, 48)
            .astype(jnp.bfloat16))

    out = pl.pallas_call(
        _alexnet_kernel,
        out_shape=jax.ShapeDtypeStruct((n, 1, _FC_PAD), jnp.float32),
        grid_spec=pltpu.PrefetchScalarGridSpec(
            num_scalar_prefetch=0,
            grid=(n,),
            in_specs=[
                pl.BlockSpec((1, 11, 11, 48), lambda i: (i, 0, 0, 0)),   # s2d input
                pl.BlockSpec((9, 48, 64), lambda i: (0, 0, 0)),          # w0
                pl.BlockSpec((1, 64), lambda i: (0, 0)),                 # b0
                pl.BlockSpec((25, 64, 192), lambda i: (0, 0, 0)),        # w1
                pl.BlockSpec((1, 192), lambda i: (0, 0)),                # b1
                pl.BlockSpec((9, 192, 384), lambda i: (0, 0, 0)),        # w2
                pl.BlockSpec((1, 384), lambda i: (0, 0)),                # b2
                pl.BlockSpec((9, 384, 256), lambda i: (0, 0, 0)),        # w3
                pl.BlockSpec((1, 256), lambda i: (0, 0)),                # b3
                pl.BlockSpec((9, 256, 256), lambda i: (0, 0, 0)),        # w4
                pl.BlockSpec((1, 256), lambda i: (0, 0)),                # b4
                pl.BlockSpec((256, _FC_PAD), lambda i: (0, 0)),          # wfc
                pl.BlockSpec((1, _FC_PAD), lambda i: (0, 0)),            # bfc
            ],
            out_specs=pl.BlockSpec((1, 1, _FC_PAD), lambda i: (i, 0, 0)),
            scratch_shapes=[
                pltpu.VMEM((8, 8, 64), jnp.float32),    # conv1 padded input (pad 2)
                pltpu.VMEM((4, 4, 192), jnp.float32),   # conv2 padded input (pad 1)
                pltpu.VMEM((4, 4, 384), jnp.float32),   # conv3 padded input (pad 1)
                pltpu.VMEM((4, 4, 256), jnp.float32),   # conv4 padded input (pad 1)
            ],
        ),
        compiler_params=pltpu.CompilerParams(
            dimension_semantics=("parallel",),          # shard batch over v7x's 2 TCs
            vmem_limit_bytes=40 * 1024 * 1024,          # ~10 MB used; headroom vs 64 MiB
        ),
    )(xs, params["w0"], params["b0"], params["w1"], params["b1"],
      params["w2"], params["b2"], params["w3"], params["b3"],
      params["w4"], params["b4"], params["wfc"], params["bfc"])

    return out.reshape(n, _FC_PAD)[:, :_NUM_CLASSES]


# ----------------------------------------------------------------------------
# Pure-JAX reference (f32) for a numerical sanity check
# ----------------------------------------------------------------------------
def _reference_forward(raw, x_nchw):
    x = jnp.transpose(x_nchw, (0, 2, 3, 1)).astype(jnp.float32)

    def conv(x, w, b, stride, pad):
        w_hwio = jnp.transpose(w, (2, 3, 1, 0))
        y = jax.lax.conv_general_dilated(
            x, w_hwio, window_strides=(stride, stride),
            padding=[(pad, pad), (pad, pad)],
            dimension_numbers=("NHWC", "HWIO", "NHWC"),
            precision=jax.lax.Precision.HIGHEST)
        return jnp.maximum(y + b, 0.0)

    def pool(x):
        return jax.lax.reduce_window(x, -jnp.inf, jax.lax.max,
                                     (1, 2, 2, 1), (1, 2, 2, 1), "VALID")

    x = pool(conv(x, raw["conv0_w"], raw["conv0_b"], 4, 5))
    x = pool(conv(x, raw["conv1_w"], raw["conv1_b"], 1, 2))
    x = conv(x, raw["conv2_w"], raw["conv2_b"], 1, 1)
    x = conv(x, raw["conv3_w"], raw["conv3_b"], 1, 1)
    x = pool(conv(x, raw["conv4_w"], raw["conv4_b"], 1, 1))
    x = x.reshape(x.shape[0], -1)
    return x @ raw["fc_w"].T + raw["fc_b"]


if __name__ == "__main__":
    key = jax.random.PRNGKey(0)
    kp, kx = jax.random.split(key)
    raw = init_raw_params(kp)
    params = pack_params(raw)

    # CIFAR-style input (32x32x3 is required so the flatten yields 256 features).
    x = jax.random.normal(kx, (2, 3, 32, 32), jnp.float32)

    fwd = jax.jit(alexnet_forward)
    out = fwd(params, x)
    jax.block_until_ready(out)
    assert out.shape == (2, _NUM_CLASSES), out.shape
    assert out.dtype == jnp.float32

    # Loose sanity check vs f32 reference (kernel computes in bf16 on the MXU).
    ref = jax.jit(_reference_forward)(raw, x)
    jax.block_until_ready(ref)
    err = float(jnp.max(jnp.abs(out - ref)))
    scale = max(1.0, float(jnp.max(jnp.abs(ref))))
    assert err <= 0.1 * scale + 0.05, (err, scale)

    print("KERNEL_OK")
</pallas_src>

<mosaic_0001>
module attributes {stable_mosaic.version = 11 : i64} {
  func.func @_alexnet_kernel(%arg0: i32, %arg1: memref<1x11x11x48xbf16, #tpu.memory_space<vmem>>, %arg2: memref<9x48x64xbf16, #tpu.memory_space<vmem>>, %arg3: memref<1x64xf32, #tpu.memory_space<vmem>>, %arg4: memref<25x64x192xbf16, #tpu.memory_space<vmem>>, %arg5: memref<1x192xf32, #tpu.memory_space<vmem>>, %arg6: memref<9x192x384xbf16, #tpu.memory_space<vmem>>, %arg7: memref<1x384xf32, #tpu.memory_space<vmem>>, %arg8: memref<9x384x256xbf16, #tpu.memory_space<vmem>>, %arg9: memref<1x256xf32, #tpu.memory_space<vmem>>, %arg10: memref<9x256x256xbf16, #tpu.memory_space<vmem>>, %arg11: memref<1x256xf32, #tpu.memory_space<vmem>>, %arg12: memref<256x128xbf16, #tpu.memory_space<vmem>>, %arg13: memref<1x128xf32, #tpu.memory_space<vmem>>, %arg14: memref<1x1x128xf32, #tpu.memory_space<vmem>>, %arg15: memref<8x8x64xf32, #tpu.memory_space<vmem>>, %arg16: memref<4x4x192xf32, #tpu.memory_space<vmem>>, %arg17: memref<4x4x384xf32, #tpu.memory_space<vmem>>, %arg18: memref<4x4x256xf32, #tpu.memory_space<vmem>>) attributes {dimension_semantics = [#tpu.dimension_semantics<parallel>], iteration_bounds = array<i64: 2>, scalar_prefetch = 0 : i64, scratch_operands = 4 : i64, tpu.core_type = #tpu.core_type<tc>, window_params = [{transform_indices = @transform_0, window_bounds = array<i64: 1, 11, 11, 48>}, {pipeline_mode = #tpu.pipeline_mode<synchronous>, transform_indices = @transform_1, window_bounds = array<i64: 9, 48, 64>}, {pipeline_mode = #tpu.pipeline_mode<synchronous>, transform_indices = @transform_2, window_bounds = array<i64: 1, 64>}, {pipeline_mode = #tpu.pipeline_mode<synchronous>, transform_indices = @transform_3, window_bounds = array<i64: 25, 64, 192>}, {pipeline_mode = #tpu.pipeline_mode<synchronous>, transform_indices = @transform_4, window_bounds = array<i64: 1, 192>}, {pipeline_mode = #tpu.pipeline_mode<synchronous>, transform_indices = @transform_5, window_bounds = array<i64: 9, 192, 384>}, {pipeline_mode = #tpu.pipeline_mode<synchronous>, transform_indices = @transform_6, window_bounds = array<i64: 1, 384>}, {pipeline_mode = #tpu.pipeline_mode<synchronous>, transform_indices = @transform_7, window_bounds = array<i64: 9, 384, 256>}, {pipeline_mode = #tpu.pipeline_mode<synchronous>, transform_indices = @transform_8, window_bounds = array<i64: 1, 256>}, {pipeline_mode = #tpu.pipeline_mode<synchronous>, transform_indices = @transform_9, window_bounds = array<i64: 9, 256, 256>}, {pipeline_mode = #tpu.pipeline_mode<synchronous>, transform_indices = @transform_10, window_bounds = array<i64: 1, 256>}, {pipeline_mode = #tpu.pipeline_mode<synchronous>, transform_indices = @transform_11, window_bounds = array<i64: 256, 128>}, {pipeline_mode = #tpu.pipeline_mode<synchronous>, transform_indices = @transform_12, window_bounds = array<i64: 1, 128>}, {transform_indices = @transform_13, window_bounds = array<i64: 1, 1, 128>}]} {
    %c0 = arith.constant 0 : index
    %c0_0 = arith.constant 0 : index
    %c0_1 = arith.constant 0 : index
    %c0_2 = arith.constant 0 : index
    %0 = vector.load %arg1[%c0, %c0_0, %c0_1, %c0_2] : memref<1x11x11x48xbf16, #tpu.memory_space<vmem>>, vector<1x11x11x48xbf16>
    %1 = vector.shape_cast %0 : vector<1x11x11x48xbf16> to vector<11x11x48xbf16>
    %cst = arith.constant 0.000000e+00 : f32
    %2 = vector.broadcast %cst : f32 to vector<64x64xf32>
    %3 = vector.extract_strided_slice %1 {offsets = [0, 0, 0], sizes = [8, 8, 48], strides = [1, 1, 1]} : vector<11x11x48xbf16> to vector<8x8x48xbf16>
    %4 = vector.shape_cast %3 : vector<8x8x48xbf16> to vector<64x48xbf16>
    %c0_3 = arith.constant 0 : index
    %c0_4 = arith.constant 0 : index
    %c0_5 = arith.constant 0 : index
    %5 = vector.load %arg2[%c0_3, %c0_4, %c0_5] : memref<9x48x64xbf16, #tpu.memory_space<vmem>>, vector<1x48x64xbf16>
    %6 = vector.shape_cast %5 : vector<1x48x64xbf16> to vector<48x64xbf16>
    %cst_6 = arith.constant dense<0.000000e+00> : vector<64x64xf32>
    %7 = tpu.matmul %4, %6, %cst_6 {dimension_numbers = #tpu.dot_dimension_numbers<[1], [0], [0], [1], [0, 0, 1, 1], [], []>} : vector<64x48xbf16>, vector<48x64xbf16>, vector<64x64xf32> -> vector<64x64xf32>
    %8 = arith.addf %2, %7 : vector<64x64xf32>
    %9 = vector.extract_strided_slice %1 {offsets = [0, 1, 0], sizes = [8, 8, 48], strides = [1, 1, 1]} : vector<11x11x48xbf16> to vector<8x8x48xbf16>
    %10 = vector.shape_cast %9 : vector<8x8x48xbf16> to vector<64x48xbf16>
    %c1 = arith.constant 1 : index
    %c0_7 = arith.constant 0 : index
    %c0_8 = arith.constant 0 : index
    %11 = vector.load %arg2[%c1, %c0_7, %c0_8] : memref<9x48x64xbf16, #tpu.memory_space<vmem>>, vector<1x48x64xbf16>
    %12 = vector.shape_cast %11 : vector<1x48x64xbf16> to vector<48x64xbf16>
    %cst_9 = arith.constant dense<0.000000e+00> : vector<64x64xf32>
    %13 = tpu.matmul %10, %12, %cst_9 {dimension_numbers = #tpu.dot_dimension_numbers<[1], [0], [0], [1], [0, 0, 1, 1], [], []>} : vector<64x48xbf16>, vector<48x64xbf16>, vector<64x64xf32> -> vector<64x64xf32>
    %14 = arith.addf %8, %13 : vector<64x64xf32>
    %15 = vector.extract_strided_slice %1 {offsets = [0, 2, 0], sizes = [8, 8, 48], strides = [1, 1, 1]} : vector<11x11x48xbf16> to vector<8x8x48xbf16>
    %16 = vector.shape_cast %15 : vector<8x8x48xbf16> to vector<64x48xbf16>
    %c2 = arith.constant 2 : index
    %c0_10 = arith.constant 0 : index
    %c0_11 = arith.constant 0 : index
    %17 = vector.load %arg2[%c2, %c0_10, %c0_11] : memref<9x48x64xbf16, #tpu.memory_space<vmem>>, vector<1x48x64xbf16>
    %18 = vector.shape_cast %17 : vector<1x48x64xbf16> to vector<48x64xbf16>
    %cst_12 = arith.constant dense<0.000000e+00> : vector<64x64xf32>
    %19 = tpu.matmul %16, %18, %cst_12 {dimension_numbers = #tpu.dot_dimension_numbers<[1], [0], [0], [1], [0, 0, 1, 1], [], []>} : vector<64x48xbf16>, vector<48x64xbf16>, vector<64x64xf32> -> vector<64x64xf32>
    %20 = arith.addf %14, %19 : vector<64x64xf32>
    %21 = vector.extract_strided_slice %1 {offsets = [1, 0, 0], sizes = [8, 8, 48], strides = [1, 1, 1]} : vector<11x11x48xbf16> to vector<8x8x48xbf16>
    %22 = vector.shape_cast %21 : vector<8x8x48xbf16> to vector<64x48xbf16>
    %c3 = arith.constant 3 : index
    %c0_13 = arith.constant 0 : index
    %c0_14 = arith.constant 0 : index
    %23 = vector.load %arg2[%c3, %c0_13, %c0_14] : memref<9x48x64xbf16, #tpu.memory_space<vmem>>, vector<1x48x64xbf16>
    %24 = vector.shape_cast %23 : vector<1x48x64xbf16> to vector<48x64xbf16>
    %cst_15 = arith.constant dense<0.000000e+00> : vector<64x64xf32>
    %25 = tpu.matmul %22, %24, %cst_15 {dimension_numbers = #tpu.dot_dimension_numbers<[1], [0], [0], [1], [0, 0, 1, 1], [], []>} : vector<64x48xbf16>, vector<48x64xbf16>, vector<64x64xf32> -> vector<64x64xf32>
    %26 = arith.addf %20, %25 : vector<64x64xf32>
    %27 = vector.extract_strided_slice %1 {offsets = [1, 1, 0], sizes = [8, 8, 48], strides = [1, 1, 1]} : vector<11x11x48xbf16> to vector<8x8x48xbf16>
    %28 = vector.shape_cast %27 : vector<8x8x48xbf16> to vector<64x48xbf16>
    %c4 = arith.constant 4 : index
    %c0_16 = arith.constant 0 : index
    %c0_17 = arith.constant 0 : index
    %29 = vector.load %arg2[%c4, %c0_16, %c0_17] : memref<9x48x64xbf16, #tpu.memory_space<vmem>>, vector<1x48x64xbf16>
    %30 = vector.shape_cast %29 : vector<1x48x64xbf16> to vector<48x64xbf16>
    %cst_18 = arith.constant dense<0.000000e+00> : vector<64x64xf32>
    %31 = tpu.matmul %28, %30, %cst_18 {dimension_numbers = #tpu.dot_dimension_numbers<[1], [0], [0], [1], [0, 0, 1, 1], [], []>} : vector<64x48xbf16>, vector<48x64xbf16>, vector<64x64xf32> -> vector<64x64xf32>
    %32 = arith.addf %26, %31 : vector<64x64xf32>
    %33 = vector.extract_strided_slice %1 {offsets = [1, 2, 0], sizes = [8, 8, 48], strides = [1, 1, 1]} : vector<11x11x48xbf16> to vector<8x8x48xbf16>
    %34 = vector.shape_cast %33 : vector<8x8x48xbf16> to vector<64x48xbf16>
    %c5 = arith.constant 5 : index
    %c0_19 = arith.constant 0 : index
    %c0_20 = arith.constant 0 : index
    %35 = vector.load %arg2[%c5, %c0_19, %c0_20] : memref<9x48x64xbf16, #tpu.memory_space<vmem>>, vector<1x48x64xbf16>
    %36 = vector.shape_cast %35 : vector<1x48x64xbf16> to vector<48x64xbf16>
    %cst_21 = arith.constant dense<0.000000e+00> : vector<64x64xf32>
    %37 = tpu.matmul %34, %36, %cst_21 {dimension_numbers = #tpu.dot_dimension_numbers<[1], [0], [0], [1], [0, 0, 1, 1], [], []>} : vector<64x48xbf16>, vector<48x64xbf16>, vector<64x64xf32> -> vector<64x64xf32>
    %38 = arith.addf %32, %37 : vector<64x64xf32>
    %39 = vector.extract_strided_slice %1 {offsets = [2, 0, 0], sizes = [8, 8, 48], strides = [1, 1, 1]} : vector<11x11x48xbf16> to vector<8x8x48xbf16>
    %40 = vector.shape_cast %39 : vector<8x8x48xbf16> to vector<64x48xbf16>
    %c6 = arith.constant 6 : index
    %c0_22 = arith.constant 0 : index
    %c0_23 = arith.constant 0 : index
    %41 = vector.load %arg2[%c6, %c0_22, %c0_23] : memref<9x48x64xbf16, #tpu.memory_space<vmem>>, vector<1x48x64xbf16>
    %42 = vector.shape_cast %41 : vector<1x48x64xbf16> to vector<48x64xbf16>
    %cst_24 = arith.constant dense<0.000000e+00> : vector<64x64xf32>
    %43 = tpu.matmul %40, %42, %cst_24 {dimension_numbers = #tpu.dot_dimension_numbers<[1], [0], [0], [1], [0, 0, 1, 1], [], []>} : vector<64x48xbf16>, vector<48x64xbf16>, vector<64x64xf32> -> vector<64x64xf32>
    %44 = arith.addf %38, %43 : vector<64x64xf32>
    %45 = vector.extract_strided_slice %1 {offsets = [2, 1, 0], sizes = [8, 8, 48], strides = [1, 1, 1]} : vector<11x11x48xbf16> to vector<8x8x48xbf16>
    %46 = vector.shape_cast %45 : vector<8x8x48xbf16> to vector<64x48xbf16>
    %c7 = arith.constant 7 : index
    %c0_25 = arith.constant 0 : index
    %c0_26 = arith.constant 0 : index
    %47 = vector.load %arg2[%c7, %c0_25, %c0_26] : memref<9x48x64xbf16, #tpu.memory_space<vmem>>, vector<1x48x64xbf16>
    %48 = vector.shape_cast %47 : vector<1x48x64xbf16> to vector<48x64xbf16>
    %cst_27 = arith.constant dense<0.000000e+00> : vector<64x64xf32>
    %49 = tpu.matmul %46, %48, %cst_27 {dimension_numbers = #tpu.dot_dimension_numbers<[1], [0], [0], [1], [0, 0, 1, 1], [], []>} : vector<64x48xbf16>, vector<48x64xbf16>, vector<64x64xf32> -> vector<64x64xf32>
    %50 = arith.addf %44, %49 : vector<64x64xf32>
    %51 = vector.extract_strided_slice %1 {offsets = [2, 2, 0], sizes = [8, 8, 48], strides = [1, 1, 1]} : vector<11x11x48xbf16> to vector<8x8x48xbf16>
    %52 = vector.shape_cast %51 : vector<8x8x48xbf16> to vector<64x48xbf16>
    %c8 = arith.constant 8 : index
    %c0_28 = arith.constant 0 : index
    %c0_29 = arith.constant 0 : index
    %53 = vector.load %arg2[%c8, %c0_28, %c0_29] : memref<9x48x64xbf16, #tpu.memory_space<vmem>>, vector<1x48x64xbf16>
    %54 = vector.shape_cast %53 : vector<1x48x64xbf16> to vector<48x64xbf16>
    %cst_30 = arith.constant dense<0.000000e+00> : vector<64x64xf32>
    %55 = tpu.matmul %52, %54, %cst_30 {dimension_numbers = #tpu.dot_dimension_numbers<[1], [0], [0], [1], [0, 0, 1, 1], [], []>} : vector<64x48xbf16>, vector<48x64xbf16>, vector<64x64xf32> -> vector<64x64xf32>
    %56 = arith.addf %50, %55 : vector<64x64xf32>
    %c0_31 = arith.constant 0 : index
    %c0_32 = arith.constant 0 : index
    %57 = vector.load %arg3[%c0_31, %c0_32] : memref<1x64xf32, #tpu.memory_space<vmem>>, vector<1x64xf32>
    %58 = vector.broadcast %57 : vector<1x64xf32> to vector<64x64xf32>
    %59 = arith.addf %56, %58 : vector<64x64xf32>
    %cst_33 = arith.constant 0.000000e+00 : f32
    %60 = vector.broadcast %cst_33 : f32 to vector<64x64xf32>
    %61 = arith.maximumf %59, %60 : vector<64x64xf32>
    %cst_34 = arith.constant 0.000000e+00 : f32
    %62 = vector.broadcast %cst_34 : f32 to vector<8x8x64xf32>
    %c0_35 = arith.constant 0 : index
    %c0_36 = arith.constant 0 : index
    %c0_37 = arith.constant 0 : index
    %63 = vector.load %arg15[%c0_35, %c0_36, %c0_37] : memref<8x8x64xf32, #tpu.memory_space<vmem>>, vector<8x8x64xf32>
    tpu.vector_store %arg15[%c0_35, %c0_36, %c0_37], %62 {strides = array<i32>} : memref<8x8x64xf32, #tpu.memory_space<vmem>>, vector<8x8x64xf32>,
    %64 = vector.extract_strided_slice %61 {offsets = [0, 0], sizes = [1, 64], strides = [1, 1]} : vector<64x64xf32> to vector<1x64xf32>
    %65 = vector.extract_strided_slice %61 {offsets = [1, 0], sizes = [1, 64], strides = [1, 1]} : vector<64x64xf32> to vector<1x64xf32>
    %66 = arith.maximumf %64, %65 : vector<1x64xf32>
    %67 = vector.extract_strided_slice %61 {offsets = [8, 0], sizes = [1, 64], strides = [1, 1]} : vector<64x64xf32> to vector<1x64xf32>
    %68 = vector.extract_strided_slice %61 {offsets = [9, 0], sizes = [1, 64], strides = [1, 1]} : vector<64x64xf32> to vector<1x64xf32>
    %69 = arith.maximumf %67, %68 : vector<1x64xf32>
    %70 = arith.maximumf %66, %69 : vector<1x64xf32>
    %c2_38 = arith.constant 2 : index
    %c2_39 = arith.constant 2 : index
    %c0_40 = arith.constant 0 : index
    %71 = vector.load %arg15[%c2_38, %c2_39, %c0_40] : memref<8x8x64xf32, #tpu.memory_space<vmem>>, vector<1x1x64xf32>
    %72 = vector.shape_cast %71 : vector<1x1x64xf32> to vector<1x64xf32>
    %73 = vector.shape_cast %70 : vector<1x64xf32> to vector<1x1x64xf32>
    tpu.vector_store %arg15[%c2_38, %c2_39, %c0_40], %73 {strides = array<i32>} : memref<8x8x64xf32, #tpu.memory_space<vmem>>, vector<1x1x64xf32>,
    %74 = vector.extract_strided_slice %61 {offsets = [2, 0], sizes = [1, 64], strides = [1, 1]} : vector<64x64xf32> to vector<1x64xf32>
    %75 = vector.extract_strided_slice %61 {offsets = [3, 0], sizes = [1, 64], strides = [1, 1]} : vector<64x64xf32> to vector<1x64xf32>
    %76 = arith.maximumf %74, %75 : vector<1x64xf32>
    %77 = vector.extract_strided_slice %61 {offsets = [10, 0], sizes = [1, 64], strides = [1, 1]} : vector<64x64xf32> to vector<1x64xf32>
    %78 = vector.extract_strided_slice %61 {offsets = [11, 0], sizes = [1, 64], strides = [1, 1]} : vector<64x64xf32> to vector<1x64xf32>
    %79 = arith.maximumf %77, %78 : vector<1x64xf32>
    %80 = arith.maximumf %76, %79 : vector<1x64xf32>
    %c2_41 = arith.constant 2 : index
    %c3_42 = arith.constant 3 : index
    %c0_43 = arith.constant 0 : index
    %81 = vector.load %arg15[%c2_41, %c3_42, %c0_43] : memref<8x8x64xf32, #tpu.memory_space<vmem>>, vector<1x1x64xf32>
    %82 = vector.shape_cast %81 : vector<1x1x64xf32> to vector<1x64xf32>
    %83 = vector.shape_cast %80 : vector<1x64xf32> to vector<1x1x64xf32>
    tpu.vector_store %arg15[%c2_41, %c3_42, %c0_43], %83 {strides = array<i32>} : memref<8x8x64xf32, #tpu.memory_space<vmem>>, vector<1x1x64xf32>,
    %84 = vector.extract_strided_slice %61 {offsets = [4, 0], sizes = [1, 64], strides = [1, 1]} : vector<64x64xf32> to vector<1x64xf32>
    %85 = vector.extract_strided_slice %61 {offsets = [5, 0], sizes = [1, 64], strides = [1, 1]} : vector<64x64xf32> to vector<1x64xf32>
    %86 = arith.maximumf %84, %85 : vector<1x64xf32>
    %87 = vector.extract_strided_slice %61 {offsets = [12, 0], sizes = [1, 64], strides = [1, 1]} : vector<64x64xf32> to vector<1x64xf32>
    %88 = vector.extract_strided_slice %61 {offsets = [13, 0], sizes = [1, 64], strides = [1, 1]} : vector<64x64xf32> to vector<1x64xf32>
    %89 = arith.maximumf %87, %88 : vector<1x64xf32>
    %90 = arith.maximumf %86, %89 : vector<1x64xf32>
    %c2_44 = arith.constant 2 : index
    %c4_45 = arith.constant 4 : index
    %c0_46 = arith.constant 0 : index
    %91 = vector.load %arg15[%c2_44, %c4_45, %c0_46] : memref<8x8x64xf32, #tpu.memory_space<vmem>>, vector<1x1x64xf32>
    %92 = vector.shape_cast %91 : vector<1x1x64xf32> to vector<1x64xf32>
    %93 = vector.shape_cast %90 : vector<1x64xf32> to vector<1x1x64xf32>
    tpu.vector_store %arg15[%c2_44, %c4_45, %c0_46], %93 {strides = array<i32>} : memref<8x8x64xf32, #tpu.memory_space<vmem>>, vector<1x1x64xf32>,
    %94 = vector.extract_strided_slice %61 {offsets = [6, 0], sizes = [1, 64], strides = [1, 1]} : vector<64x64xf32> to vector<1x64xf32>
    %95 = vector.extract_strided_slice %61 {offsets = [7, 0], sizes = [1, 64], strides = [1, 1]} : vector<64x64xf32> to vector<1x64xf32>
    %96 = arith.maximumf %94, %95 : vector<1x64xf32>
    %97 = vector.extract_strided_slice %61 {offsets = [14, 0], sizes = [1, 64], strides = [1, 1]} : vector<64x64xf32> to vector<1x64xf32>
    %98 = vector.extract_strided_slice %61 {offsets = [15, 0], sizes = [1, 64], strides = [1, 1]} : vector<64x64xf32> to vector<1x64xf32>
    %99 = arith.maximumf %97, %98 : vector<1x64xf32>
    %100 = arith.maximumf %96, %99 : vector<1x64xf32>
    %c2_47 = arith.constant 2 : index
    %c5_48 = arith.constant 5 : index
    %c0_49 = arith.constant 0 : index
    %101 = vector.load %arg15[%c2_47, %c5_48, %c0_49] : memref<8x8x64xf32, #tpu.memory_space<vmem>>, vector<1x1x64xf32>
    %102 = vector.shape_cast %101 : vector<1x1x64xf32> to vector<1x64xf32>
    %103 = vector.shape_cast %100 : vector<1x64xf32> to vector<1x1x64xf32>
    tpu.vector_store %arg15[%c2_47, %c5_48, %c0_49], %103 {strides = array<i32>} : memref<8x8x64xf32, #tpu.memory_space<vmem>>, vector<1x1x64xf32>,
    %104 = vector.extract_strided_slice %61 {offsets = [16, 0], sizes = [1, 64], strides = [1, 1]} : vector<64x64xf32> to vector<1x64xf32>
    %105 = vector.extract_strided_slice %61 {offsets = [17, 0], sizes = [1, 64], strides = [1, 1]} : vector<64x64xf32> to vector<1x64xf32>
    %106 = arith.maximumf %104, %105 : vector<1x64xf32>
    %107 = vector.extract_strided_slice %61 {offsets = [24, 0], sizes = [1, 64], strides = [1, 1]} : vector<64x64xf32> to vector<1x64xf32>
    %108 = vector.extract_strided_slice %61 {offsets = [25, 0], sizes = [1, 64], strides = [1, 1]} : vector<64x64xf32> to vector<1x64xf32>
    %109 = arith.maximumf %107, %108 : vector<1x64xf32>
    %110 = arith.maximumf %106, %109 : vector<1x64xf32>
    %c3_50 = arith.constant 3 : index
    %c2_51 = arith.constant 2 : index
    %c0_52 = arith.constant 0 : index
    %111 = vector.load %arg15[%c3_50, %c2_51, %c0_52] : memref<8x8x64xf32, #tpu.memory_space<vmem>>, vector<1x1x64xf32>
    %112 = vector.shape_cast %111 : vector<1x1x64xf32> to vector<1x64xf32>
    %113 = vector.shape_cast %110 : vector<1x64xf32> to vector<1x1x64xf32>
    tpu.vector_store %arg15[%c3_50, %c2_51, %c0_52], %113 {strides = array<i32>} : memref<8x8x64xf32, #tpu.memory_space<vmem>>, vector<1x1x64xf32>,
    %114 = vector.extract_strided_slice %61 {offsets = [18, 0], sizes = [1, 64], strides = [1, 1]} : vector<64x64xf32> to vector<1x64xf32>
    %115 = vector.extract_strided_slice %61 {offsets = [19, 0], sizes = [1, 64], strides = [1, 1]} : vector<64x64xf32> to vector<1x64xf32>
    %116 = arith.maximumf %114, %115 : vector<1x64xf32>
    %117 = vector.extract_strided_slice %61 {offsets = [26, 0], sizes = [1, 64], strides = [1, 1]} : vector<64x64xf32> to vector<1x64xf32>
    %118 = vector.extract_strided_slice %61 {offsets = [27, 0], sizes = [1, 64], strides = [1, 1]} : vector<64x64xf32> to vector<1x64xf32>
    %119 = arith.maximumf %117, %118 : vector<1x64xf32>
    %120 = arith.maximumf %116, %119 : vector<1x64xf32>
    %c3_53 = arith.constant 3 : index
    %c3_54 = arith.constant 3 : index
    %c0_55 = arith.constant 0 : index
    %121 = vector.load %arg15[%c3_53, %c3_54, %c0_55] : memref<8x8x64xf32, #tpu.memory_space<vmem>>, vector<1x1x64xf32>
    %122 = vector.shape_cast %121 : vector<1x1x64xf32> to vector<1x64xf32>
    %123 = vector.shape_cast %120 : vector<1x64xf32> to vector<1x1x64xf32>
    tpu.vector_store %arg15[%c3_53, %c3_54, %c0_55], %123 {strides = array<i32>} : memref<8x8x64xf32, #tpu.memory_space<vmem>>, vector<1x1x64xf32>,
    %124 = vector.extract_strided_slice %61 {offsets = [20, 0], sizes = [1, 64], strides = [1, 1]} : vector<64x64xf32> to vector<1x64xf32>
    %125 = vector.extract_strided_slice %61 {offsets = [21, 0], sizes = [1, 64], strides = [1, 1]} : vector<64x64xf32> to vector<1x64xf32>
    %126 = arith.maximumf %124, %125 : vector<1x64xf32>
    %127 = vector.extract_strided_slice %61 {offsets = [28, 0], sizes = [1, 64], strides = [1, 1]} : vector<64x64xf32> to vector<1x64xf32>
    %128 = vector.extract_strided_slice %61 {offsets = [29, 0], sizes = [1, 64], strides = [1, 1]} : vector<64x64xf32> to vector<1x64xf32>
    %129 = arith.maximumf %127, %128 : vector<1x64xf32>
    %130 = arith.maximumf %126, %129 : vector<1x64xf32>
    %c3_56 = arith.constant 3 : index
    %c4_57 = arith.constant 4 : index
    %c0_58 = arith.constant 0 : index
    %131 = vector.load %arg15[%c3_56, %c4_57, %c0_58] : memref<8x8x64xf32, #tpu.memory_space<vmem>>, vector<1x1x64xf32>
    %132 = vector.shape_cast %131 : vector<1x1x64xf32> to vector<1x64xf32>
    %133 = vector.shape_cast %130 : vector<1x64xf32> to vector<1x1x64xf32>
    tpu.vector_store %arg15[%c3_56, %c4_57, %c0_58], %133 {strides = array<i32>} : memref<8x8x64xf32, #tpu.memory_space<vmem>>, vector<1x1x64xf32>,
    %134 = vector.extract_strided_slice %61 {offsets = [22, 0], sizes = [1, 64], strides = [1, 1]} : vector<64x64xf32> to vector<1x64xf32>
    %135 = vector.extract_strided_slice %61 {offsets = [23, 0], sizes = [1, 64], strides = [1, 1]} : vector<64x64xf32> to vector<1x64xf32>
    %136 = arith.maximumf %134, %135 : vector<1x64xf32>
    %137 = vector.extract_strided_slice %61 {offsets = [30, 0], sizes = [1, 64], strides = [1, 1]} : vector<64x64xf32> to vector<1x64xf32>
    %138 = vector.extract_strided_slice %61 {offsets = [31, 0], sizes = [1, 64], strides = [1, 1]} : vector<64x64xf32> to vector<1x64xf32>
    %139 = arith.maximumf %137, %138 : vector<1x64xf32>
    %140 = arith.maximumf %136, %139 : vector<1x64xf32>
    %c3_59 = arith.constant 3 : index
    %c5_60 = arith.constant 5 : index
    %c0_61 = arith.constant 0 : index
    %141 = vector.load %arg15[%c3_59, %c5_60, %c0_61] : memref<8x8x64xf32, #tpu.memory_space<vmem>>, vector<1x1x64xf32>
    %142 = vector.shape_cast %141 : vector<1x1x64xf32> to vector<1x64xf32>
    %143 = vector.shape_cast %140 : vector<1x64xf32> to vector<1x1x64xf32>
    tpu.vector_store %arg15[%c3_59, %c5_60, %c0_61], %143 {strides = array<i32>} : memref<8x8x64xf32, #tpu.memory_space<vmem>>, vector<1x1x64xf32>,
    %144 = vector.extract_strided_slice %61 {offsets = [32, 0], sizes = [1, 64], strides = [1, 1]} : vector<64x64xf32> to vector<1x64xf32>
    %145 = vector.extract_strided_slice %61 {offsets = [33, 0], sizes = [1, 64], strides = [1, 1]} : vector<64x64xf32> to vector<1x64xf32>
    %146 = arith.maximumf %144, %145 : vector<1x64xf32>
    %147 = vector.extract_strided_slice %61 {offsets = [40, 0], sizes = [1, 64], strides = [1, 1]} : vector<64x64xf32> to vector<1x64xf32>
    %148 = vector.extract_strided_slice %61 {offsets = [41, 0], sizes = [1, 64], strides = [1, 1]} : vector<64x64xf32> to vector<1x64xf32>
    %149 = arith.maximumf %147, %148 : vector<1x64xf32>
    %150 = arith.maximumf %146, %149 : vector<1x64xf32>
    %c4_62 = arith.constant 4 : index
    %c2_63 = arith.constant 2 : index
    %c0_64 = arith.constant 0 : index
    %151 = vector.load %arg15[%c4_62, %c2_63, %c0_64] : memref<8x8x64xf32, #tpu.memory_space<vmem>>, vector<1x1x64xf32>
    %152 = vector.shape_cast %151 : vector<1x1x64xf32> to vector<1x64xf32>
    %153 = vector.shape_cast %150 : vector<1x64xf32> to vector<1x1x64xf32>
    tpu.vector_store %arg15[%c4_62, %c2_63, %c0_64], %153 {strides = array<i32>} : memref<8x8x64xf32, #tpu.memory_space<vmem>>, vector<1x1x64xf32>,
    %154 = vector.extract_strided_slice %61 {offsets = [34, 0], sizes = [1, 64], strides = [1, 1]} : vector<64x64xf32> to vector<1x64xf32>
    %155 = vector.extract_strided_slice %61 {offsets = [35, 0], sizes = [1, 64], strides = [1, 1]} : vector<64x64xf32> to vector<1x64xf32>
    %156 = arith.maximumf %154, %155 : vector<1x64xf32>
    %157 = vector.extract_strided_slice %61 {offsets = [42, 0], sizes = [1, 64], strides = [1, 1]} : vector<64x64xf32> to vector<1x64xf32>
    %158 = vector.extract_strided_slice %61 {offsets = [43, 0], sizes = [1, 64], strides = [1, 1]} : vector<64x64xf32> to vector<1x64xf32>
    %159 = arith.maximumf %157, %158 : vector<1x64xf32>
    %160 = arith.maximumf %156, %159 : vector<1x64xf32>
    %c4_65 = arith.constant 4 : index
    %c3_66 = arith.constant 3 : index
    %c0_67 = arith.constant 0 : index
    %161 = vector.load %arg15[%c4_65, %c3_66, %c0_67] : memref<8x8x64xf32, #tpu.memory_space<vmem>>, vector<1x1x64xf32>
    %162 = vector.shape_cast %161 : vector<1x1x64xf32> to vector<1x64xf32>
    %163 = vector.shape_cast %160 : vector<1x64xf32> to vector<1x1x64xf32>
    tpu.vector_store %arg15[%c4_65, %c3_66, %c0_67], %163 {strides = array<i32>} : memref<8x8x64xf32, #tpu.memory_space<vmem>>, vector<1x1x64xf32>,
    %164 = vector.extract_strided_slice %61 {offsets = [36, 0], sizes = [1, 64], strides = [1, 1]} : vector<64x64xf32> to vector<1x64xf32>
    %165 = vector.extract_strided_slice %61 {offsets = [37, 0], sizes = [1, 64], strides = [1, 1]} : vector<64x64xf32> to vector<1x64xf32>
    %166 = arith.maximumf %164, %165 : vector<1x64xf32>
    %167 = vector.extract_strided_slice %61 {offsets = [44, 0], sizes = [1, 64], strides = [1, 1]} : vector<64x64xf32> to vector<1x64xf32>
    %168 = vector.extract_strided_slice %61 {offsets = [45, 0], sizes = [1, 64], strides = [1, 1]} : vector<64x64xf32> to vector<1x64xf32>
    %169 = arith.maximumf %167, %168 : vector<1x64xf32>
    %170 = arith.maximumf %166, %169 : vector<1x64xf32>
    %c4_68 = arith.constant 4 : index
    %c4_69 = arith.constant 4 : index
    %c0_70 = arith.constant 0 : index
    %171 = vector.load %arg15[%c4_68, %c4_69, %c0_70] : memref<8x8x64xf32, #tpu.memory_space<vmem>>, vector<1x1x64xf32>
    %172 = vector.shape_cast %171 : vector<1x1x64xf32> to vector<1x64xf32>
    %173 = vector.shape_cast %170 : vector<1x64xf32> to vector<1x1x64xf32>
    tpu.vector_store %arg15[%c4_68, %c4_69, %c0_70], %173 {strides = array<i32>} : memref<8x8x64xf32, #tpu.memory_space<vmem>>, vector<1x1x64xf32>,
    %174 = vector.extract_strided_slice %61 {offsets = [38, 0], sizes = [1, 64], strides = [1, 1]} : vector<64x64xf32> to vector<1x64xf32>
    %175 = vector.extract_strided_slice %61 {offsets = [39, 0], sizes = [1, 64], strides = [1, 1]} : vector<64x64xf32> to vector<1x64xf32>
    %176 = arith.maximumf %174, %175 : vector<1x64xf32>
    %177 = vector.extract_strided_slice %61 {offsets = [46, 0], sizes = [1, 64], strides = [1, 1]} : vector<64x64xf32> to vector<1x64xf32>
    %178 = vector.extract_strided_slice %61 {offsets = [47, 0], sizes = [1, 64], strides = [1, 1]} : vector<64x64xf32> to vector<1x64xf32>
    %179 = arith.maximumf %177, %178 : vector<1x64xf32>
    %180 = arith.maximumf %176, %179 : vector<1x64xf32>
    %c4_71 = arith.constant 4 : index
    %c5_72 = arith.constant 5 : index
    %c0_73 = arith.constant 0 : index
    %181 = vector.load %arg15[%c4_71, %c5_72, %c0_73] : memref<8x8x64xf32, #tpu.memory_space<vmem>>, vector<1x1x64xf32>
    %182 = vector.shape_cast %181 : vector<1x1x64xf32> to vector<1x64xf32>
    %183 = vector.shape_cast %180 : vector<1x64xf32> to vector<1x1x64xf32>
    tpu.vector_store %arg15[%c4_71, %c5_72, %c0_73], %183 {strides = array<i32>} : memref<8x8x64xf32, #tpu.memory_space<vmem>>, vector<1x1x64xf32>,
    %184 = vector.extract_strided_slice %61 {offsets = [48, 0], sizes = [1, 64], strides = [1, 1]} : vector<64x64xf32> to vector<1x64xf32>
    %185 = vector.extract_strided_slice %61 {offsets = [49, 0], sizes = [1, 64], strides = [1, 1]} : vector<64x64xf32> to vector<1x64xf32>
    %186 = arith.maximumf %184, %185 : vector<1x64xf32>
    %187 = vector.extract_strided_slice %61 {offsets = [56, 0], sizes = [1, 64], strides = [1, 1]} : vector<64x64xf32> to vector<1x64xf32>
    %188 = vector.extract_strided_slice %61 {offsets = [57, 0], sizes = [1, 64], strides = [1, 1]} : vector<64x64xf32> to vector<1x64xf32>
    %189 = arith.maximumf %187, %188 : vector<1x64xf32>
    %190 = arith.maximumf %186, %189 : vector<1x64xf32>
    %c5_74 = arith.constant 5 : index
    %c2_75 = arith.constant 2 : index
    %c0_76 = arith.constant 0 : index
    %191 = vector.load %arg15[%c5_74, %c2_75, %c0_76] : memref<8x8x64xf32, #tpu.memory_space<vmem>>, vector<1x1x64xf32>
    %192 = vector.shape_cast %191 : vector<1x1x64xf32> to vector<1x64xf32>
    %193 = vector.shape_cast %190 : vector<1x64xf32> to vector<1x1x64xf32>
    tpu.vector_store %arg15[%c5_74, %c2_75, %c0_76], %193 {strides = array<i32>} : memref<8x8x64xf32, #tpu.memory_space<vmem>>, vector<1x1x64xf32>,
    %194 = vector.extract_strided_slice %61 {offsets = [50, 0], sizes = [1, 64], strides = [1, 1]} : vector<64x64xf32> to vector<1x64xf32>
    %195 = vector.extract_strided_slice %61 {offsets = [51, 0], sizes = [1, 64], strides = [1, 1]} : vector<64x64xf32> to vector<1x64xf32>
    %196 = arith.maximumf %194, %195 : vector<1x64xf32>
    %197 = vector.extract_strided_slice %61 {offsets = [58, 0], sizes = [1, 64], strides = [1, 1]} : vector<64x64xf32> to vector<1x64xf32>
    %198 = vector.extract_strided_slice %61 {offsets = [59, 0], sizes = [1, 64], strides = [1, 1]} : vector<64x64xf32> to vector<1x64xf32>
    %199 = arith.maximumf %197, %198 : vector<1x64xf32>
    %200 = arith.maximumf %196, %199 : vector<1x64xf32>
    %c5_77 = arith.constant 5 : index
    %c3_78 = arith.constant 3 : index
    %c0_79 = arith.constant 0 : index
    %201 = vector.load %arg15[%c5_77, %c3_78, %c0_79] : memref<8x8x64xf32, #tpu.memory_space<vmem>>, vector<1x1x64xf32>
    %202 = vector.shape_cast %201 : vector<1x1x64xf32> to vector<1x64xf32>
    %203 = vector.shape_cast %200 : vector<1x64xf32> to vector<1x1x64xf32>
    tpu.vector_store %arg15[%c5_77, %c3_78, %c0_79], %203 {strides = array<i32>} : memref<8x8x64xf32, #tpu.memory_space<vmem>>, vector<1x1x64xf32>,
    %204 = vector.extract_strided_slice %61 {offsets = [52, 0], sizes = [1, 64], strides = [1, 1]} : vector<64x64xf32> to vector<1x64xf32>
    %205 = vector.extract_strided_slice %61 {offsets = [53, 0], sizes = [1, 64], strides = [1, 1]} : vector<64x64xf32> to vector<1x64xf32>
    %206 = arith.maximumf %204, %205 : vector<1x64xf32>
    %207 = vector.extract_strided_slice %61 {offsets = [60, 0], sizes = [1, 64], strides = [1, 1]} : vector<64x64xf32> to vector<1x64xf32>
    %208 = vector.extract_strided_slice %61 {offsets = [61, 0], sizes = [1, 64], strides = [1, 1]} : vector<64x64xf32> to vector<1x64xf32>
    %209 = arith.maximumf %207, %208 : vector<1x64xf32>
    %210 = arith.maximumf %206, %209 : vector<1x64xf32>
    %c5_80 = arith.constant 5 : index
    %c4_81 = arith.constant 4 : index
    %c0_82 = arith.constant 0 : index
    %211 = vector.load %arg15[%c5_80, %c4_81, %c0_82] : memref<8x8x64xf32, #tpu.memory_space<vmem>>, vector<1x1x64xf32>
    %212 = vector.shape_cast %211 : vector<1x1x64xf32> to vector<1x64xf32>
    %213 = vector.shape_cast %210 : vector<1x64xf32> to vector<1x1x64xf32>
    tpu.vector_store %arg15[%c5_80, %c4_81, %c0_82], %213 {strides = array<i32>} : memref<8x8x64xf32, #tpu.memory_space<vmem>>, vector<1x1x64xf32>,
    %214 = vector.extract_strided_slice %61 {offsets = [54, 0], sizes = [1, 64], strides = [1, 1]} : vector<64x64xf32> to vector<1x64xf32>
    %215 = vector.extract_strided_slice %61 {offsets = [55, 0], sizes = [1, 64], strides = [1, 1]} : vector<64x64xf32> to vector<1x64xf32>
    %216 = arith.maximumf %214, %215 : vector<1x64xf32>
    %217 = vector.extract_strided_slice %61 {offsets = [62, 0], sizes = [1, 64], strides = [1, 1]} : vector<64x64xf32> to vector<1x64xf32>
    %218 = vector.extract_strided_slice %61 {offsets = [63, 0], sizes = [1, 64], strides = [1, 1]} : vector<64x64xf32> to vector<1x64xf32>
    %219 = arith.maximumf %217, %218 : vector<1x64xf32>
    %220 = arith.maximumf %216, %219 : vector<1x64xf32>
    %c5_83 = arith.constant 5 : index
    %c5_84 = arith.constant 5 : index
    %c0_85 = arith.constant 0 : index
    %221 = vector.load %arg15[%c5_83, %c5_84, %c0_85] : memref<8x8x64xf32, #tpu.memory_space<vmem>>, vector<1x1x64xf32>
    %222 = vector.shape_cast %221 : vector<1x1x64xf32> to vector<1x64xf32>
    %223 = vector.shape_cast %220 : vector<1x64xf32> to vector<1x1x64xf32>
    tpu.vector_store %arg15[%c5_83, %c5_84, %c0_85], %223 {strides = array<i32>} : memref<8x8x64xf32, #tpu.memory_space<vmem>>, vector<1x1x64xf32>,
    %c0_86 = arith.constant 0 : index
    %c0_87 = arith.constant 0 : index
    %c0_88 = arith.constant 0 : index
    %224 = vector.load %arg15[%c0_86, %c0_87, %c0_88] : memref<8x8x64xf32, #tpu.memory_space<vmem>>, vector<8x8x64xf32>
    %225 = arith.truncf %224 : vector<8x8x64xf32> to vector<8x8x64xbf16>
    %cst_89 = arith.constant 0.000000e+00 : f32
    %226 = vector.broadcast %cst_89 : f32 to vector<16x192xf32>
    %227 = vector.extract_strided_slice %225 {offsets = [0, 0, 0], sizes = [4, 4, 64], strides = [1, 1, 1]} : vector<8x8x64xbf16> to vector<4x4x64xbf16>
    %228 = vector.shape_cast %227 : vector<4x4x64xbf16> to vector<16x64xbf16>
    %c0_90 = arith.constant 0 : index
    %c0_91 = arith.constant 0 : index
    %c0_92 = arith.constant 0 : index
    %229 = vector.load %arg4[%c0_90, %c0_91, %c0_92] : memref<25x64x192xbf16, #tpu.memory_space<vmem>>, vector<1x64x192xbf16>
    %230 = vector.shape_cast %229 : vector<1x64x192xbf16> to vector<64x192xbf16>
    %cst_93 = arith.constant dense<0.000000e+00> : vector<16x192xf32>
    %231 = tpu.matmul %228, %230, %cst_93 {dimension_numbers = #tpu.dot_dimension_numbers<[1], [0], [0], [1], [0, 0, 1, 1], [], []>} : vector<16x64xbf16>, vector<64x192xbf16>, vector<16x192xf32> -> vector<16x192xf32>
    %232 = arith.addf %226, %231 : vector<16x192xf32>
    %233 = vector.extract_strided_slice %225 {offsets = [0, 1, 0], sizes = [4, 4, 64], strides = [1, 1, 1]} : vector<8x8x64xbf16> to vector<4x4x64xbf16>
    %234 = vector.shape_cast %233 : vector<4x4x64xbf16> to vector<16x64xbf16>
    %c1_94 = arith.constant 1 : index
    %c0_95 = arith.constant 0 : index
    %c0_96 = arith.constant 0 : index
    %235 = vector.load %arg4[%c1_94, %c0_95, %c0_96] : memref<25x64x192xbf16, #tpu.memory_space<vmem>>, vector<1x64x192xbf16>
    %236 = vector.shape_cast %235 : vector<1x64x192xbf16> to vector<64x192xbf16>
    %cst_97 = arith.constant dense<0.000000e+00> : vector<16x192xf32>
    %237 = tpu.matmul %234, %236, %cst_97 {dimension_numbers = #tpu.dot_dimension_numbers<[1], [0], [0], [1], [0, 0, 1, 1], [], []>} : vector<16x64xbf16>, vector<64x192xbf16>, vector<16x192xf32> -> vector<16x192xf32>
    %238 = arith.addf %232, %237 : vector<16x192xf32>
    %239 = vector.extract_strided_slice %225 {offsets = [0, 2, 0], sizes = [4, 4, 64], strides = [1, 1, 1]} : vector<8x8x64xbf16> to vector<4x4x64xbf16>
    %240 = vector.shape_cast %239 : vector<4x4x64xbf16> to vector<16x64xbf16>
    %c2_98 = arith.constant 2 : index
    %c0_99 = arith.constant 0 : index
    %c0_100 = arith.constant 0 : index
    %241 = vector.load %arg4[%c2_98, %c0_99, %c0_100] : memref<25x64x192xbf16, #tpu.memory_space<vmem>>, vector<1x64x192xbf16>
    %242 = vector.shape_cast %241 : vector<1x64x192xbf16> to vector<64x192xbf16>
    %cst_101 = arith.constant dense<0.000000e+00> : vector<16x192xf32>
    %243 = tpu.matmul %240, %242, %cst_101 {dimension_numbers = #tpu.dot_dimension_numbers<[1], [0], [0], [1], [0, 0, 1, 1], [], []>} : vector<16x64xbf16>, vector<64x192xbf16>, vector<16x192xf32> -> vector<16x192xf32>
    %244 = arith.addf %238, %243 : vector<16x192xf32>
    %245 = vector.extract_strided_slice %225 {offsets = [0, 3, 0], sizes = [4, 4, 64], strides = [1, 1, 1]} : vector<8x8x64xbf16> to vector<4x4x64xbf16>
    %246 = vector.shape_cast %245 : vector<4x4x64xbf16> to vector<16x64xbf16>
    %c3_102 = arith.constant 3 : index
    %c0_103 = arith.constant 0 : index
    %c0_104 = arith.constant 0 : index
    %247 = vector.load %arg4[%c3_102, %c0_103, %c0_104] : memref<25x64x192xbf16, #tpu.memory_space<vmem>>, vector<1x64x192xbf16>
    %248 = vector.shape_cast %247 : vector<1x64x192xbf16> to vector<64x192xbf16>
    %cst_105 = arith.constant dense<0.000000e+00> : vector<16x192xf32>
    %249 = tpu.matmul %246, %248, %cst_105 {dimension_numbers = #tpu.dot_dimension_numbers<[1], [0], [0], [1], [0, 0, 1, 1], [], []>} : vector<16x64xbf16>, vector<64x192xbf16>, vector<16x192xf32> -> vector<16x192xf32>
    %250 = arith.addf %244, %249 : vector<16x192xf32>
    %251 = vector.extract_strided_slice %225 {offsets = [0, 4, 0], sizes = [4, 4, 64], strides = [1, 1, 1]} : vector<8x8x64xbf16> to vector<4x4x64xbf16>
    %252 = vector.shape_cast %251 : vector<4x4x64xbf16> to vector<16x64xbf16>
    %c4_106 = arith.constant 4 : index
    %c0_107 = arith.constant 0 : index
    %c0_108 = arith.constant 0 : index
    %253 = vector.load %arg4[%c4_106, %c0_107, %c0_108] : memref<25x64x192xbf16, #tpu.memory_space<vmem>>, vector<1x64x192xbf16>
    %254 = vector.shape_cast %253 : vector<1x64x192xbf16> to vector<64x192xbf16>
    %cst_109 = arith.constant dense<0.000000e+00> : vector<16x192xf32>
    %255 = tpu.matmul %252, %254, %cst_109 {dimension_numbers = #tpu.dot_dimension_numbers<[1], [0], [0], [1], [0, 0, 1, 1], [], []>} : vector<16x64xbf16>, vector<64x192xbf16>, vector<16x192xf32> -> vector<16x192xf32>
    %256 = arith.addf %250, %255 : vector<16x192xf32>
    %257 = vector.extract_strided_slice %225 {offsets = [1, 0, 0], sizes = [4, 4, 64], strides = [1, 1, 1]} : vector<8x8x64xbf16> to vector<4x4x64xbf16>
    %258 = vector.shape_cast %257 : vector<4x4x64xbf16> to vector<16x64xbf16>
    %c5_110 = arith.constant 5 : index
    %c0_111 = arith.constant 0 : index
    %c0_112 = arith.constant 0 : index
    %259 = vector.load %arg4[%c5_110, %c0_111, %c0_112] : memref<25x64x192xbf16, #tpu.memory_space<vmem>>, vector<1x64x192xbf16>
    %260 = vector.shape_cast %259 : vector<1x64x192xbf16> to vector<64x192xbf16>
    %cst_113 = arith.constant dense<0.000000e+00> : vector<16x192xf32>
    %261 = tpu.matmul %258, %260, %cst_113 {dimension_numbers = #tpu.dot_dimension_numbers<[1], [0], [0], [1], [0, 0, 1, 1], [], []>} : vector<16x64xbf16>, vector<64x192xbf16>, vector<16x192xf32> -> vector<16x192xf32>
    %262 = arith.addf %256, %261 : vector<16x192xf32>
    %263 = vector.extract_strided_slice %225 {offsets = [1, 1, 0], sizes = [4, 4, 64], strides = [1, 1, 1]} : vector<8x8x64xbf16> to vector<4x4x64xbf16>
    %264 = vector.shape_cast %263 : vector<4x4x64xbf16> to vector<16x64xbf16>
    %c6_114 = arith.constant 6 : index
    %c0_115 = arith.constant 0 : index
    %c0_116 = arith.constant 0 : index
    %265 = vector.load %arg4[%c6_114, %c0_115, %c0_116] : memref<25x64x192xbf16, #tpu.memory_space<vmem>>, vector<1x64x192xbf16>
    %266 = vector.shape_cast %265 : vector<1x64x192xbf16> to vector<64x192xbf16>
    %cst_117 = arith.constant dense<0.000000e+00> : vector<16x192xf32>
    %267 = tpu.matmul %264, %266, %cst_117 {dimension_numbers = #tpu.dot_dimension_numbers<[1], [0], [0], [1], [0, 0, 1, 1], [], []>} : vector<16x64xbf16>, vector<64x192xbf16>, vector<16x192xf32> -> vector<16x192xf32>
    %268 = arith.addf %262, %267 : vector<16x192xf32>
    %269 = vector.extract_strided_slice %225 {offsets = [1, 2, 0], sizes = [4, 4, 64], strides = [1, 1, 1]} : vector<8x8x64xbf16> to vector<4x4x64xbf16>
    %270 = vector.shape_cast %269 : vector<4x4x64xbf16> to vector<16x64xbf16>
    %c7_118 = arith.constant 7 : index
    %c0_119 = arith.constant 0 : index
    %c0_120 = arith.constant 0 : index
    %271 = vector.load %arg4[%c7_118, %c0_119, %c0_120] : memref<25x64x192xbf16, #tpu.memory_space<vmem>>, vector<1x64x192xbf16>
    %272 = vector.shape_cast %271 : vector<1x64x192xbf16> to vector<64x192xbf16>
    %cst_121 = arith.constant dense<0.000000e+00> : vector<16x192xf32>
    %273 = tpu.matmul %270, %272, %cst_121 {dimension_numbers = #tpu.dot_dimension_numbers<[1], [0], [0], [1], [0, 0, 1, 1], [], []>} : vector<16x64xbf16>, vector<64x192xbf16>, vector<16x192xf32> -> vector<16x192xf32>
    %274 = arith.addf %268, %273 : vector<16x192xf32>
    %275 = vector.extract_strided_slice %225 {offsets = [1, 3, 0], sizes = [4, 4, 64], strides = [1, 1, 1]} : vector<8x8x64xbf16> to vector<4x4x64xbf16>
    %276 = vector.shape_cast %275 : vector<4x4x64xbf16> to vector<16x64xbf16>
    %c8_122 = arith.constant 8 : index
    %c0_123 = arith.constant 0 : index
    %c0_124 = arith.constant 0 : index
    %277 = vector.load %arg4[%c8_122, %c0_123, %c0_124] : memref<25x64x192xbf16, #tpu.memory_space<vmem>>, vector<1x64x192xbf16>
    %278 = vector.shape_cast %277 : vector<1x64x192xbf16> to vector<64x192xbf16>
    %cst_125 = arith.constant dense<0.000000e+00> : vector<16x192xf32>
    %279 = tpu.matmul %276, %278, %cst_125 {dimension_numbers = #tpu.dot_dimension_numbers<[1], [0], [0], [1], [0, 0, 1, 1], [], []>} : vector<16x64xbf16>, vector<64x192xbf16>, vector<16x192xf32> -> vector<16x192xf32>
    %280 = arith.addf %274, %279 : vector<16x192xf32>
    %281 = vector.extract_strided_slice %225 {offsets = [1, 4, 0], sizes = [4, 4, 64], strides = [1, 1, 1]} : vector<8x8x64xbf16> to vector<4x4x64xbf16>
    %282 = vector.shape_cast %281 : vector<4x4x64xbf16> to vector<16x64xbf16>
    %c9 = arith.constant 9 : index
    %c0_126 = arith.constant 0 : index
    %c0_127 = arith.constant 0 : index
    %283 = vector.load %arg4[%c9, %c0_126, %c0_127] : memref<25x64x192xbf16, #tpu.memory_space<vmem>>, vector<1x64x192xbf16>
    %284 = vector.shape_cast %283 : vector<1x64x192xbf16> to vector<64x192xbf16>
    %cst_128 = arith.constant dense<0.000000e+00> : vector<16x192xf32>
    %285 = tpu.matmul %282, %284, %cst_128 {dimension_numbers = #tpu.dot_dimension_numbers<[1], [0], [0], [1], [0, 0, 1, 1], [], []>} : vector<16x64xbf16>, vector<64x192xbf16>, vector<16x192xf32> -> vector<16x192xf32>
    %286 = arith.addf %280, %285 : vector<16x192xf32>
    %287 = vector.extract_strided_slice %225 {offsets = [2, 0, 0], sizes = [4, 4, 64], strides = [1, 1, 1]} : vector<8x8x64xbf16> to vector<4x4x64xbf16>
    %288 = vector.shape_cast %287 : vector<4x4x64xbf16> to vector<16x64xbf16>
    %c10 = arith.constant 10 : index
    %c0_129 = arith.constant 0 : index
    %c0_130 = arith.constant 0 : index
    %289 = vector.load %arg4[%c10, %c0_129, %c0_130] : memref<25x64x192xbf16, #tpu.memory_space<vmem>>, vector<1x64x192xbf16>
    %290 = vector.shape_cast %289 : vector<1x64x192xbf16> to vector<64x192xbf16>
    %cst_131 = arith.constant dense<0.000000e+00> : vector<16x192xf32>
    %291 = tpu.matmul %288, %290, %cst_131 {dimension_numbers = #tpu.dot_dimension_numbers<[1], [0], [0], [1], [0, 0, 1, 1], [], []>} : vector<16x64xbf16>, vector<64x192xbf16>, vector<16x192xf32> -> vector<16x192xf32>
    %292 = arith.addf %286, %291 : vector<16x192xf32>
    %293 = vector.extract_strided_slice %225 {offsets = [2, 1, 0], sizes = [4, 4, 64], strides = [1, 1, 1]} : vector<8x8x64xbf16> to vector<4x4x64xbf16>
    %294 = vector.shape_cast %293 : vector<4x4x64xbf16> to vector<16x64xbf16>
    %c11 = arith.constant 11 : index
    %c0_132 = arith.constant 0 : index
    %c0_133 = arith.constant 0 : index
    %295 = vector.load %arg4[%c11, %c0_132, %c0_133] : memref<25x64x192xbf16, #tpu.memory_space<vmem>>, vector<1x64x192xbf16>
    %296 = vector.shape_cast %295 : vector<1x64x192xbf16> to vector<64x192xbf16>
    %cst_134 = arith.constant dense<0.000000e+00> : vector<16x192xf32>
    %297 = tpu.matmul %294, %296, %cst_134 {dimension_numbers = #tpu.dot_dimension_numbers<[1], [0], [0], [1], [0, 0, 1, 1], [], []>} : vector<16x64xbf16>, vector<64x192xbf16>, vector<16x192xf32> -> vector<16x192xf32>
    %298 = arith.addf %292, %297 : vector<16x192xf32>
    %299 = vector.extract_strided_slice %225 {offsets = [2, 2, 0], sizes = [4, 4, 64], strides = [1, 1, 1]} : vector<8x8x64xbf16> to vector<4x4x64xbf16>
    %300 = vector.shape_cast %299 : vector<4x4x64xbf16> to vector<16x64xbf16>
    %c12 = arith.constant 12 : index
    %c0_135 = arith.constant 0 : index
    %c0_136 = arith.constant 0 : index
    %301 = vector.load %arg4[%c12, %c0_135, %c0_136] : memref<25x64x192xbf16, #tpu.memory_space<vmem>>, vector<1x64x192xbf16>
    %302 = vector.shape_cast %301 : vector<1x64x192xbf16> to vector<64x192xbf16>
    %cst_137 = arith.constant dense<0.000000e+00> : vector<16x192xf32>
    %303 = tpu.matmul %300, %302, %cst_137 {dimension_numbers = #tpu.dot_dimension_numbers<[1], [0], [0], [1], [0, 0, 1, 1], [], []>} : vector<16x64xbf16>, vector<64x192xbf16>, vector<16x192xf32> -> vector<16x192xf32>
    %304 = arith.addf %298, %303 : vector<16x192xf32>
    %305 = vector.extract_strided_slice %225 {offsets = [2, 3, 0], sizes = [4, 4, 64], strides = [1, 1, 1]} : vector<8x8x64xbf16> to vector<4x4x64xbf16>
    %306 = vector.shape_cast %305 : vector<4x4x64xbf16> to vector<16x64xbf16>
    %c13 = arith.constant 13 : index
    %c0_138 = arith.constant 0 : index
    %c0_139 = arith.constant 0 : index
    %307 = vector.load %arg4[%c13, %c0_138, %c0_139] : memref<25x64x192xbf16, #tpu.memory_space<vmem>>, vector<1x64x192xbf16>
    %308 = vector.shape_cast %307 : vector<1x64x192xbf16> to vector<64x192xbf16>
    %cst_140 = arith.constant dense<0.000000e+00> : vector<16x192xf32>
    %309 = tpu.matmul %306, %308, %cst_140 {dimension_numbers = #tpu.dot_dimension_numbers<[1], [0], [0], [1], [0, 0, 1, 1], [], []>} : vector<16x64xbf16>, vector<64x192xbf16>, vector<16x192xf32> -> vector<16x192xf32>
    %310 = arith.addf %304, %309 : vector<16x192xf32>
    %311 = vector.extract_strided_slice %225 {offsets = [2, 4, 0], sizes = [4, 4, 64], strides = [1, 1, 1]} : vector<8x8x64xbf16> to vector<4x4x64xbf16>
    %312 = vector.shape_cast %311 : vector<4x4x64xbf16> to vector<16x64xbf16>
    %c14 = arith.constant 14 : index
    %c0_141 = arith.constant 0 : index
    %c0_142 = arith.constant 0 : index
    %313 = vector.load %arg4[%c14, %c0_141, %c0_142] : memref<25x64x192xbf16, #tpu.memory_space<vmem>>, vector<1x64x192xbf16>
    %314 = vector.shape_cast %313 : vector<1x64x192xbf16> to vector<64x192xbf16>
    %cst_143 = arith.constant dense<0.000000e+00> : vector<16x192xf32>
    %315 = tpu.matmul %312, %314, %cst_143 {dimension_numbers = #tpu.dot_dimension_numbers<[1], [0], [0], [1], [0, 0, 1, 1], [], []>} : vector<16x64xbf16>, vector<64x192xbf16>, vector<16x192xf32> -> vector<16x192xf32>
    %316 = arith.addf %310, %315 : vector<16x192xf32>
    %317 = vector.extract_strided_slice %225 {offsets = [3, 0, 0], sizes = [4, 4, 64], strides = [1, 1, 1]} : vector<8x8x64xbf16> to vector<4x4x64xbf16>
    %318 = vector.shape_cast %317 : vector<4x4x64xbf16> to vector<16x64xbf16>
    %c15 = arith.constant 15 : index
    %c0_144 = arith.constant 0 : index
    %c0_145 = arith.constant 0 : index
    %319 = vector.load %arg4[%c15, %c0_144, %c0_145] : memref<25x64x192xbf16, #tpu.memory_space<vmem>>, vector<1x64x192xbf16>
    %320 = vector.shape_cast %319 : vector<1x64x192xbf16> to vector<64x192xbf16>
    %cst_146 = arith.constant dense<0.000000e+00> : vector<16x192xf32>
    %321 = tpu.matmul %318, %320, %cst_146 {dimension_numbers = #tpu.dot_dimension_numbers<[1], [0], [0], [1], [0, 0, 1, 1], [], []>} : vector<16x64xbf16>, vector<64x192xbf16>, vector<16x192xf32> -> vector<16x192xf32>
    %322 = arith.addf %316, %321 : vector<16x192xf32>
    %323 = vector.extract_strided_slice %225 {offsets = [3, 1, 0], sizes = [4, 4, 64], strides = [1, 1, 1]} : vector<8x8x64xbf16> to vector<4x4x64xbf16>
    %324 = vector.shape_cast %323 : vector<4x4x64xbf16> to vector<16x64xbf16>
    %c16 = arith.constant 16 : index
    %c0_147 = arith.constant 0 : index
    %c0_148 = arith.constant 0 : index
    %325 = vector.load %arg4[%c16, %c0_147, %c0_148] : memref<25x64x192xbf16, #tpu.memory_space<vmem>>, vector<1x64x192xbf16>
    %326 = vector.shape_cast %325 : vector<1x64x192xbf16> to vector<64x192xbf16>
    %cst_149 = arith.constant dense<0.000000e+00> : vector<16x192xf32>
    %327 = tpu.matmul %324, %326, %cst_149 {dimension_numbers = #tpu.dot_dimension_numbers<[1], [0], [0], [1], [0, 0, 1, 1], [], []>} : vector<16x64xbf16>, vector<64x192xbf16>, vector<16x192xf32> -> vector<16x192xf32>
    %328 = arith.addf %322, %327 : vector<16x192xf32>
    %329 = vector.extract_strided_slice %225 {offsets = [3, 2, 0], sizes = [4, 4, 64], strides = [1, 1, 1]} : vector<8x8x64xbf16> to vector<4x4x64xbf16>
    %330 = vector.shape_cast %329 : vector<4x4x64xbf16> to vector<16x64xbf16>
    %c17 = arith.constant 17 : index
    %c0_150 = arith.constant 0 : index
    %c0_151 = arith.constant 0 : index
    %331 = vector.load %arg4[%c17, %c0_150, %c0_151] : memref<25x64x192xbf16, #tpu.memory_space<vmem>>, vector<1x64x192xbf16>
    %332 = vector.shape_cast %331 : vector<1x64x192xbf16> to vector<64x192xbf16>
    %cst_152 = arith.constant dense<0.000000e+00> : vector<16x192xf32>
    %333 = tpu.matmul %330, %332, %cst_152 {dimension_numbers = #tpu.dot_dimension_numbers<[1], [0], [0], [1], [0, 0, 1, 1], [], []>} : vector<16x64xbf16>, vector<64x192xbf16>, vector<16x192xf32> -> vector<16x192xf32>
    %334 = arith.addf %328, %333 : vector<16x192xf32>
    %335 = vector.extract_strided_slice %225 {offsets = [3, 3, 0], sizes = [4, 4, 64], strides = [1, 1, 1]} : vector<8x8x64xbf16> to vector<4x4x64xbf16>
    %336 = vector.shape_cast %335 : vector<4x4x64xbf16> to vector<16x64xbf16>
    %c18 = arith.constant 18 : index
    %c0_153 = arith.constant 0 : index
    %c0_154 = arith.constant 0 : index
    %337 = vector.load %arg4[%c18, %c0_153, %c0_154] : memref<25x64x192xbf16, #tpu.memory_space<vmem>>, vector<1x64x192xbf16>
    %338 = vector.shape_cast %337 : vector<1x64x192xbf16> to vector<64x192xbf16>
    %cst_155 = arith.constant dense<0.000000e+00> : vector<16x192xf32>
    %339 = tpu.matmul %336, %338, %cst_155 {dimension_numbers = #tpu.dot_dimension_numbers<[1], [0], [0], [1], [0, 0, 1, 1], [], []>} : vector<16x64xbf16>, vector<64x192xbf16>, vector<16x192xf32> -> vector<16x192xf32>
    %340 = arith.addf %334, %339 : vector<16x192xf32>
    %341 = vector.extract_strided_slice %225 {offsets = [3, 4, 0], sizes = [4, 4, 64], strides = [1, 1, 1]} : vector<8x8x64xbf16> to vector<4x4x64xbf16>
    %342 = vector.shape_cast %341 : vector<4x4x64xbf16> to vector<16x64xbf16>
    %c19 = arith.constant 19 : index
    %c0_156 = arith.constant 0 : index
    %c0_157 = arith.constant 0 : index
    %343 = vector.load %arg4[%c19, %c0_156, %c0_157] : memref<25x64x192xbf16, #tpu.memory_space<vmem>>, vector<1x64x192xbf16>
    %344 = vector.shape_cast %343 : vector<1x64x192xbf16> to vector<64x192xbf16>
    %cst_158 = arith.constant dense<0.000000e+00> : vector<16x192xf32>
    %345 = tpu.matmul %342, %344, %cst_158 {dimension_numbers = #tpu.dot_dimension_numbers<[1], [0], [0], [1], [0, 0, 1, 1], [], []>} : vector<16x64xbf16>, vector<64x192xbf16>, vector<16x192xf32> -> vector<16x192xf32>
    %346 = arith.addf %340, %345 : vector<16x192xf32>
    %347 = vector.extract_strided_slice %225 {offsets = [4, 0, 0], sizes = [4, 4, 64], strides = [1, 1, 1]} : vector<8x8x64xbf16> to vector<4x4x64xbf16>
    %348 = vector.shape_cast %347 : vector<4x4x64xbf16> to vector<16x64xbf16>
    %c20 = arith.constant 20 : index
    %c0_159 = arith.constant 0 : index
    %c0_160 = arith.constant 0 : index
    %349 = vector.load %arg4[%c20, %c0_159, %c0_160] : memref<25x64x192xbf16, #tpu.memory_space<vmem>>, vector<1x64x192xbf16>
    %350 = vector.shape_cast %349 : vector<1x64x192xbf16> to vector<64x192xbf16>
    %cst_161 = arith.constant dense<0.000000e+00> : vector<16x192xf32>
    %351 = tpu.matmul %348, %350, %cst_161 {dimension_numbers = #tpu.dot_dimension_numbers<[1], [0], [0], [1], [0, 0, 1, 1], [], []>} : vector<16x64xbf16>, vector<64x192xbf16>, vector<16x192xf32> -> vector<16x192xf32>
    %352 = arith.addf %346, %351 : vector<16x192xf32>
    %353 = vector.extract_strided_slice %225 {offsets = [4, 1, 0], sizes = [4, 4, 64], strides = [1, 1, 1]} : vector<8x8x64xbf16> to vector<4x4x64xbf16>
    %354 = vector.shape_cast %353 : vector<4x4x64xbf16> to vector<16x64xbf16>
    %c21 = arith.constant 21 : index
    %c0_162 = arith.constant 0 : index
    %c0_163 = arith.constant 0 : index
    %355 = vector.load %arg4[%c21, %c0_162, %c0_163] : memref<25x64x192xbf16, #tpu.memory_space<vmem>>, vector<1x64x192xbf16>
    %356 = vector.shape_cast %355 : vector<1x64x192xbf16> to vector<64x192xbf16>
    %cst_164 = arith.constant dense<0.000000e+00> : vector<16x192xf32>
    %357 = tpu.matmul %354, %356, %cst_164 {dimension_numbers = #tpu.dot_dimension_numbers<[1], [0], [0], [1], [0, 0, 1, 1], [], []>} : vector<16x64xbf16>, vector<64x192xbf16>, vector<16x192xf32> -> vector<16x192xf32>
    %358 = arith.addf %352, %357 : vector<16x192xf32>
    %359 = vector.extract_strided_slice %225 {offsets = [4, 2, 0], sizes = [4, 4, 64], strides = [1, 1, 1]} : vector<8x8x64xbf16> to vector<4x4x64xbf16>
    %360 = vector.shape_cast %359 : vector<4x4x64xbf16> to vector<16x64xbf16>
    %c22 = arith.constant 22 : index
    %c0_165 = arith.constant 0 : index
    %c0_166 = arith.constant 0 : index
    %361 = vector.load %arg4[%c22, %c0_165, %c0_166] : memref<25x64x192xbf16, #tpu.memory_space<vmem>>, vector<1x64x192xbf16>
    %362 = vector.shape_cast %361 : vector<1x64x192xbf16> to vector<64x192xbf16>
    %cst_167 = arith.constant dense<0.000000e+00> : vector<16x192xf32>
    %363 = tpu.matmul %360, %362, %cst_167 {dimension_numbers = #tpu.dot_dimension_numbers<[1], [0], [0], [1], [0, 0, 1, 1], [], []>} : vector<16x64xbf16>, vector<64x192xbf16>, vector<16x192xf32> -> vector<16x192xf32>
    %364 = arith.addf %358, %363 : vector<16x192xf32>
    %365 = vector.extract_strided_slice %225 {offsets = [4, 3, 0], sizes = [4, 4, 64], strides = [1, 1, 1]} : vector<8x8x64xbf16> to vector<4x4x64xbf16>
    %366 = vector.shape_cast %365 : vector<4x4x64xbf16> to vector<16x64xbf16>
    %c23 = arith.constant 23 : index
    %c0_168 = arith.constant 0 : index
    %c0_169 = arith.constant 0 : index
    %367 = vector.load %arg4[%c23, %c0_168, %c0_169] : memref<25x64x192xbf16, #tpu.memory_space<vmem>>, vector<1x64x192xbf16>
    %368 = vector.shape_cast %367 : vector<1x64x192xbf16> to vector<64x192xbf16>
    %cst_170 = arith.constant dense<0.000000e+00> : vector<16x192xf32>
    %369 = tpu.matmul %366, %368, %cst_170 {dimension_numbers = #tpu.dot_dimension_numbers<[1], [0], [0], [1], [0, 0, 1, 1], [], []>} : vector<16x64xbf16>, vector<64x192xbf16>, vector<16x192xf32> -> vector<16x192xf32>
    %370 = arith.addf %364, %369 : vector<16x192xf32>
    %371 = vector.extract_strided_slice %225 {offsets = [4, 4, 0], sizes = [4, 4, 64], strides = [1, 1, 1]} : vector<8x8x64xbf16> to vector<4x4x64xbf16>
    %372 = vector.shape_cast %371 : vector<4x4x64xbf16> to vector<16x64xbf16>
    %c24 = arith.constant 24 : index
    %c0_171 = arith.constant 0 : index
    %c0_172 = arith.constant 0 : index
    %373 = vector.load %arg4[%c24, %c0_171, %c0_172] : memref<25x64x192xbf16, #tpu.memory_space<vmem>>, vector<1x64x192xbf16>
    %374 = vector.shape_cast %373 : vector<1x64x192xbf16> to vector<64x192xbf16>
    %cst_173 = arith.constant dense<0.000000e+00> : vector<16x192xf32>
    %375 = tpu.matmul %372, %374, %cst_173 {dimension_numbers = #tpu.dot_dimension_numbers<[1], [0], [0], [1], [0, 0, 1, 1], [], []>} : vector<16x64xbf16>, vector<64x192xbf16>, vector<16x192xf32> -> vector<16x192xf32>
    %376 = arith.addf %370, %375 : vector<16x192xf32>
    %c0_174 = arith.constant 0 : index
    %c0_175 = arith.constant 0 : index
    %377 = vector.load %arg5[%c0_174, %c0_175] : memref<1x192xf32, #tpu.memory_space<vmem>>, vector<1x192xf32>
    %378 = vector.broadcast %377 : vector<1x192xf32> to vector<16x192xf32>
    %379 = arith.addf %376, %378 : vector<16x192xf32>
    %cst_176 = arith.constant 0.000000e+00 : f32
    %380 = vector.broadcast %cst_176 : f32 to vector<16x192xf32>
    %381 = arith.maximumf %379, %380 : vector<16x192xf32>
    %cst_177 = arith.constant 0.000000e+00 : f32
    %382 = vector.broadcast %cst_177 : f32 to vector<4x4x192xf32>
    %c0_178 = arith.constant 0 : index
    %c0_179 = arith.constant 0 : index
    %c0_180 = arith.constant 0 : index
    %383 = vector.load %arg16[%c0_178, %c0_179, %c0_180] : memref<4x4x192xf32, #tpu.memory_space<vmem>>, vector<4x4x192xf32>
    tpu.vector_store %arg16[%c0_178, %c0_179, %c0_180], %382 {strides = array<i32>} : memref<4x4x192xf32, #tpu.memory_space<vmem>>, vector<4x4x192xf32>,
    %384 = vector.extract_strided_slice %381 {offsets = [0, 0], sizes = [1, 192], strides = [1, 1]} : vector<16x192xf32> to vector<1x192xf32>
    %385 = vector.extract_strided_slice %381 {offsets = [1, 0], sizes = [1, 192], strides = [1, 1]} : vector<16x192xf32> to vector<1x192xf32>
    %386 = arith.maximumf %384, %385 : vector<1x192xf32>
    %387 = vector.extract_strided_slice %381 {offsets = [4, 0], sizes = [1, 192], strides = [1, 1]} : vector<16x192xf32> to vector<1x192xf32>
    %388 = vector.extract_strided_slice %381 {offsets = [5, 0], sizes = [1, 192], strides = [1, 1]} : vector<16x192xf32> to vector<1x192xf32>
    %389 = arith.maximumf %387, %388 : vector<1x192xf32>
    %390 = arith.maximumf %386, %389 : vector<1x192xf32>
    %c1_181 = arith.constant 1 : index
    %c1_182 = arith.constant 1 : index
    %c0_183 = arith.constant 0 : index
    %391 = vector.load %arg16[%c1_181, %c1_182, %c0_183] : memref<4x4x192xf32, #tpu.memory_space<vmem>>, vector<1x1x192xf32>
    %392 = vector.shape_cast %391 : vector<1x1x192xf32> to vector<1x192xf32>
    %393 = vector.shape_cast %390 : vector<1x192xf32> to vector<1x1x192xf32>
    tpu.vector_store %arg16[%c1_181, %c1_182, %c0_183], %393 {strides = array<i32>} : memref<4x4x192xf32, #tpu.memory_space<vmem>>, vector<1x1x192xf32>,
    %394 = vector.extract_strided_slice %381 {offsets = [2, 0], sizes = [1, 192], strides = [1, 1]} : vector<16x192xf32> to vector<1x192xf32>
    %395 = vector.extract_strided_slice %381 {offsets = [3, 0], sizes = [1, 192], strides = [1, 1]} : vector<16x192xf32> to vector<1x192xf32>
    %396 = arith.maximumf %394, %395 : vector<1x192xf32>
    %397 = vector.extract_strided_slice %381 {offsets = [6, 0], sizes = [1, 192], strides = [1, 1]} : vector<16x192xf32> to vector<1x192xf32>
    %398 = vector.extract_strided_slice %381 {offsets = [7, 0], sizes = [1, 192], strides = [1, 1]} : vector<16x192xf32> to vector<1x192xf32>
    %399 = arith.maximumf %397, %398 : vector<1x192xf32>
    %400 = arith.maximumf %396, %399 : vector<1x192xf32>
    %c1_184 = arith.constant 1 : index
    %c2_185 = arith.constant 2 : index
    %c0_186 = arith.constant 0 : index
    %401 = vector.load %arg16[%c1_184, %c2_185, %c0_186] : memref<4x4x192xf32, #tpu.memory_space<vmem>>, vector<1x1x192xf32>
    %402 = vector.shape_cast %401 : vector<1x1x192xf32> to vector<1x192xf32>
    %403 = vector.shape_cast %400 : vector<1x192xf32> to vector<1x1x192xf32>
    tpu.vector_store %arg16[%c1_184, %c2_185, %c0_186], %403 {strides = array<i32>} : memref<4x4x192xf32, #tpu.memory_space<vmem>>, vector<1x1x192xf32>,
    %404 = vector.extract_strided_slice %381 {offsets = [8, 0], sizes = [1, 192], strides = [1, 1]} : vector<16x192xf32> to vector<1x192xf32>
    %405 = vector.extract_strided_slice %381 {offsets = [9, 0], sizes = [1, 192], strides = [1, 1]} : vector<16x192xf32> to vector<1x192xf32>
    %406 = arith.maximumf %404, %405 : vector<1x192xf32>
    %407 = vector.extract_strided_slice %381 {offsets = [12, 0], sizes = [1, 192], strides = [1, 1]} : vector<16x192xf32> to vector<1x192xf32>
    %408 = vector.extract_strided_slice %381 {offsets = [13, 0], sizes = [1, 192], strides = [1, 1]} : vector<16x192xf32> to vector<1x192xf32>
    %409 = arith.maximumf %407, %408 : vector<1x192xf32>
    %410 = arith.maximumf %406, %409 : vector<1x192xf32>
    %c2_187 = arith.constant 2 : index
    %c1_188 = arith.constant 1 : index
    %c0_189 = arith.constant 0 : index
    %411 = vector.load %arg16[%c2_187, %c1_188, %c0_189] : memref<4x4x192xf32, #tpu.memory_space<vmem>>, vector<1x1x192xf32>
    %412 = vector.shape_cast %411 : vector<1x1x192xf32> to vector<1x192xf32>
    %413 = vector.shape_cast %410 : vector<1x192xf32> to vector<1x1x192xf32>
    tpu.vector_store %arg16[%c2_187, %c1_188, %c0_189], %413 {strides = array<i32>} : memref<4x4x192xf32, #tpu.memory_space<vmem>>, vector<1x1x192xf32>,
    %414 = vector.extract_strided_slice %381 {offsets = [10, 0], sizes = [1, 192], strides = [1, 1]} : vector<16x192xf32> to vector<1x192xf32>
    %415 = vector.extract_strided_slice %381 {offsets = [11, 0], sizes = [1, 192], strides = [1, 1]} : vector<16x192xf32> to vector<1x192xf32>
    %416 = arith.maximumf %414, %415 : vector<1x192xf32>
    %417 = vector.extract_strided_slice %381 {offsets = [14, 0], sizes = [1, 192], strides = [1, 1]} : vector<16x192xf32> to vector<1x192xf32>
    %418 = vector.extract_strided_slice %381 {offsets = [15, 0], sizes = [1, 192], strides = [1, 1]} : vector<16x192xf32> to vector<1x192xf32>
    %419 = arith.maximumf %417, %418 : vector<1x192xf32>
    %420 = arith.maximumf %416, %419 : vector<1x192xf32>
    %c2_190 = arith.constant 2 : index
    %c2_191 = arith.constant 2 : index
    %c0_192 = arith.constant 0 : index
    %421 = vector.load %arg16[%c2_190, %c2_191, %c0_192] : memref<4x4x192xf32, #tpu.memory_space<vmem>>, vector<1x1x192xf32>
    %422 = vector.shape_cast %421 : vector<1x1x192xf32> to vector<1x192xf32>
    %423 = vector.shape_cast %420 : vector<1x192xf32> to vector<1x1x192xf32>
    tpu.vector_store %arg16[%c2_190, %c2_191, %c0_192], %423 {strides = array<i32>} : memref<4x4x192xf32, #tpu.memory_space<vmem>>, vector<1x1x192xf32>,
    %c0_193 = arith.constant 0 : index
    %c0_194 = arith.constant 0 : index
    %c0_195 = arith.constant 0 : index
    %424 = vector.load %arg16[%c0_193, %c0_194, %c0_195] : memref<4x4x192xf32, #tpu.memory_space<vmem>>, vector<4x4x192xf32>
    %425 = arith.truncf %424 : vector<4x4x192xf32> to vector<4x4x192xbf16>
    %cst_196 = arith.constant 0.000000e+00 : f32
    %426 = vector.broadcast %cst_196 : f32 to vector<4x384xf32>
    %427 = vector.extract_strided_slice %425 {offsets = [0, 0, 0], sizes = [2, 2, 192], strides = [1, 1, 1]} : vector<4x4x192xbf16> to vector<2x2x192xbf16>
    %428 = vector.shape_cast %427 : vector<2x2x192xbf16> to vector<4x192xbf16>
    %c0_197 = arith.constant 0 : index
    %c0_198 = arith.constant 0 : index
    %c0_199 = arith.constant 0 : index
    %429 = vector.load %arg6[%c0_197, %c0_198, %c0_199] : memref<9x192x384xbf16, #tpu.memory_space<vmem>>, vector<1x192x384xbf16>
    %430 = vector.shape_cast %429 : vector<1x192x384xbf16> to vector<192x384xbf16>
    %cst_200 = arith.constant dense<0.000000e+00> : vector<4x384xf32>
    %431 = tpu.matmul %428, %430, %cst_200 {dimension_numbers = #tpu.dot_dimension_numbers<[1], [0], [0], [1], [0, 0, 1, 1], [], []>} : vector<4x192xbf16>, vector<192x384xbf16>, vector<4x384xf32> -> vector<4x384xf32>
    %432 = arith.addf %426, %431 : vector<4x384xf32>
    %433 = vector.extract_strided_slice %425 {offsets = [0, 1, 0], sizes = [2, 2, 192], strides = [1, 1, 1]} : vector<4x4x192xbf16> to vector<2x2x192xbf16>
    %434 = vector.shape_cast %433 : vector<2x2x192xbf16> to vector<4x192xbf16>
    %c1_201 = arith.constant 1 : index
    %c0_202 = arith.constant 0 : index
    %c0_203 = arith.constant 0 : index
    %435 = vector.load %arg6[%c1_201, %c0_202, %c0_203] : memref<9x192x384xbf16, #tpu.memory_space<vmem>>, vector<1x192x384xbf16>
    %436 = vector.shape_cast %435 : vector<1x192x384xbf16> to vector<192x384xbf16>
    %cst_204 = arith.constant dense<0.000000e+00> : vector<4x384xf32>
    %437 = tpu.matmul %434, %436, %cst_204 {dimension_numbers = #tpu.dot_dimension_numbers<[1], [0], [0], [1], [0, 0, 1, 1], [], []>} : vector<4x192xbf16>, vector<192x384xbf16>, vector<4x384xf32> -> vector<4x384xf32>
    %438 = arith.addf %432, %437 : vector<4x384xf32>
    %439 = vector.extract_strided_slice %425 {offsets = [0, 2, 0], sizes = [2, 2, 192], strides = [1, 1, 1]} : vector<4x4x192xbf16> to vector<2x2x192xbf16>
    %440 = vector.shape_cast %439 : vector<2x2x192xbf16> to vector<4x192xbf16>
    %c2_205 = arith.constant 2 : index
    %c0_206 = arith.constant 0 : index
    %c0_207 = arith.constant 0 : index
    %441 = vector.load %arg6[%c2_205, %c0_206, %c0_207] : memref<9x192x384xbf16, #tpu.memory_space<vmem>>, vector<1x192x384xbf16>
    %442 = vector.shape_cast %441 : vector<1x192x384xbf16> to vector<192x384xbf16>
    %cst_208 = arith.constant dense<0.000000e+00> : vector<4x384xf32>
    %443 = tpu.matmul %440, %442, %cst_208 {dimension_numbers = #tpu.dot_dimension_numbers<[1], [0], [0], [1], [0, 0, 1, 1], [], []>} : vector<4x192xbf16>, vector<192x384xbf16>, vector<4x384xf32> -> vector<4x384xf32>
    %444 = arith.addf %438, %443 : vector<4x384xf32>
    %445 = vector.extract_strided_slice %425 {offsets = [1, 0, 0], sizes = [2, 2, 192], strides = [1, 1, 1]} : vector<4x4x192xbf16> to vector<2x2x192xbf16>
    %446 = vector.shape_cast %445 : vector<2x2x192xbf16> to vector<4x192xbf16>
    %c3_209 = arith.constant 3 : index
    %c0_210 = arith.constant 0 : index
    %c0_211 = arith.constant 0 : index
    %447 = vector.load %arg6[%c3_209, %c0_210, %c0_211] : memref<9x192x384xbf16, #tpu.memory_space<vmem>>, vector<1x192x384xbf16>
    %448 = vector.shape_cast %447 : vector<1x192x384xbf16> to vector<192x384xbf16>
    %cst_212 = arith.constant dense<0.000000e+00> : vector<4x384xf32>
    %449 = tpu.matmul %446, %448, %cst_212 {dimension_numbers = #tpu.dot_dimension_numbers<[1], [0], [0], [1], [0, 0, 1, 1], [], []>} : vector<4x192xbf16>, vector<192x384xbf16>, vector<4x384xf32> -> vector<4x384xf32>
    %450 = arith.addf %444, %449 : vector<4x384xf32>
    %451 = vector.extract_strided_slice %425 {offsets = [1, 1, 0], sizes = [2, 2, 192], strides = [1, 1, 1]} : vector<4x4x192xbf16> to vector<2x2x192xbf16>
    %452 = vector.shape_cast %451 : vector<2x2x192xbf16> to vector<4x192xbf16>
    %c4_213 = arith.constant 4 : index
    %c0_214 = arith.constant 0 : index
    %c0_215 = arith.constant 0 : index
    %453 = vector.load %arg6[%c4_213, %c0_214, %c0_215] : memref<9x192x384xbf16, #tpu.memory_space<vmem>>, vector<1x192x384xbf16>
    %454 = vector.shape_cast %453 : vector<1x192x384xbf16> to vector<192x384xbf16>
    %cst_216 = arith.constant dense<0.000000e+00> : vector<4x384xf32>
    %455 = tpu.matmul %452, %454, %cst_216 {dimension_numbers = #tpu.dot_dimension_numbers<[1], [0], [0], [1], [0, 0, 1, 1], [], []>} : vector<4x192xbf16>, vector<192x384xbf16>, vector<4x384xf32> -> vector<4x384xf32>
    %456 = arith.addf %450, %455 : vector<4x384xf32>
    %457 = vector.extract_strided_slice %425 {offsets = [1, 2, 0], sizes = [2, 2, 192], strides = [1, 1, 1]} : vector<4x4x192xbf16> to vector<2x2x192xbf16>
    %458 = vector.shape_cast %457 : vector<2x2x192xbf16> to vector<4x192xbf16>
    %c5_217 = arith.constant 5 : index
    %c0_218 = arith.constant 0 : index
    %c0_219 = arith.constant 0 : index
    %459 = vector.load %arg6[%c5_217, %c0_218, %c0_219] : memref<9x192x384xbf16, #tpu.memory_space<vmem>>, vector<1x192x384xbf16>
    %460 = vector.shape_cast %459 : vector<1x192x384xbf16> to vector<192x384xbf16>
    %cst_220 = arith.constant dense<0.000000e+00> : vector<4x384xf32>
    %461 = tpu.matmul %458, %460, %cst_220 {dimension_numbers = #tpu.dot_dimension_numbers<[1], [0], [0], [1], [0, 0, 1, 1], [], []>} : vector<4x192xbf16>, vector<192x384xbf16>, vector<4x384xf32> -> vector<4x384xf32>
    %462 = arith.addf %456, %461 : vector<4x384xf32>
    %463 = vector.extract_strided_slice %425 {offsets = [2, 0, 0], sizes = [2, 2, 192], strides = [1, 1, 1]} : vector<4x4x192xbf16> to vector<2x2x192xbf16>
    %464 = vector.shape_cast %463 : vector<2x2x192xbf16> to vector<4x192xbf16>
    %c6_221 = arith.constant 6 : index
    %c0_222 = arith.constant 0 : index
    %c0_223 = arith.constant 0 : index
    %465 = vector.load %arg6[%c6_221, %c0_222, %c0_223] : memref<9x192x384xbf16, #tpu.memory_space<vmem>>, vector<1x192x384xbf16>
    %466 = vector.shape_cast %465 : vector<1x192x384xbf16> to vector<192x384xbf16>
    %cst_224 = arith.constant dense<0.000000e+00> : vector<4x384xf32>
    %467 = tpu.matmul %464, %466, %cst_224 {dimension_numbers = #tpu.dot_dimension_numbers<[1], [0], [0], [1], [0, 0, 1, 1], [], []>} : vector<4x192xbf16>, vector<192x384xbf16>, vector<4x384xf32> -> vector<4x384xf32>
    %468 = arith.addf %462, %467 : vector<4x384xf32>
    %469 = vector.extract_strided_slice %425 {offsets = [2, 1, 0], sizes = [2, 2, 192], strides = [1, 1, 1]} : vector<4x4x192xbf16> to vector<2x2x192xbf16>
    %470 = vector.shape_cast %469 : vector<2x2x192xbf16> to vector<4x192xbf16>
    %c7_225 = arith.constant 7 : index
    %c0_226 = arith.constant 0 : index
    %c0_227 = arith.constant 0 : index
    %471 = vector.load %arg6[%c7_225, %c0_226, %c0_227] : memref<9x192x384xbf16, #tpu.memory_space<vmem>>, vector<1x192x384xbf16>
    %472 = vector.shape_cast %471 : vector<1x192x384xbf16> to vector<192x384xbf16>
    %cst_228 = arith.constant dense<0.000000e+00> : vector<4x384xf32>
    %473 = tpu.matmul %470, %472, %cst_228 {dimension_numbers = #tpu.dot_dimension_numbers<[1], [0], [0], [1], [0, 0, 1, 1], [], []>} : vector<4x192xbf16>, vector<192x384xbf16>, vector<4x384xf32> -> vector<4x384xf32>
    %474 = arith.addf %468, %473 : vector<4x384xf32>
    %475 = vector.extract_strided_slice %425 {offsets = [2, 2, 0], sizes = [2, 2, 192], strides = [1, 1, 1]} : vector<4x4x192xbf16> to vector<2x2x192xbf16>
    %476 = vector.shape_cast %475 : vector<2x2x192xbf16> to vector<4x192xbf16>
    %c8_229 = arith.constant 8 : index
    %c0_230 = arith.constant 0 : index
    %c0_231 = arith.constant 0 : index
    %477 = vector.load %arg6[%c8_229, %c0_230, %c0_231] : memref<9x192x384xbf16, #tpu.memory_space<vmem>>, vector<1x192x384xbf16>
    %478 = vector.shape_cast %477 : vector<1x192x384xbf16> to vector<192x384xbf16>
    %cst_232 = arith.constant dense<0.000000e+00> : vector<4x384xf32>
    %479 = tpu.matmul %476, %478, %cst_232 {dimension_numbers = #tpu.dot_dimension_numbers<[1], [0], [0], [1], [0, 0, 1, 1], [], []>} : vector<4x192xbf16>, vector<192x384xbf16>, vector<4x384xf32> -> vector<4x384xf32>
    %480 = arith.addf %474, %479 : vector<4x384xf32>
    %c0_233 = arith.constant 0 : index
    %c0_234 = arith.constant 0 : index
    %481 = vector.load %arg7[%c0_233, %c0_234] : memref<1x384xf32, #tpu.memory_space<vmem>>, vector<1x384xf32>
    %482 = vector.broadcast %481 : vector<1x384xf32> to vector<4x384xf32>
    %483 = arith.addf %480, %482 : vector<4x384xf32>
    %cst_235 = arith.constant 0.000000e+00 : f32
    %484 = vector.broadcast %cst_235 : f32 to vector<4x384xf32>
    %485 = arith.maximumf %483, %484 : vector<4x384xf32>
    %cst_236 = arith.constant 0.000000e+00 : f32
    %486 = vector.broadcast %cst_236 : f32 to vector<4x4x384xf32>
    %c0_237 = arith.constant 0 : index
    %c0_238 = arith.constant 0 : index
    %c0_239 = arith.constant 0 : index
    %487 = vector.load %arg17[%c0_237, %c0_238, %c0_239] : memref<4x4x384xf32, #tpu.memory_space<vmem>>, vector<4x4x384xf32>
    tpu.vector_store %arg17[%c0_237, %c0_238, %c0_239], %486 {strides = array<i32>} : memref<4x4x384xf32, #tpu.memory_space<vmem>>, vector<4x4x384xf32>,
    %488 = vector.extract_strided_slice %485 {offsets = [0, 0], sizes = [2, 384], strides = [1, 1]} : vector<4x384xf32> to vector<2x384xf32>
    %c1_240 = arith.constant 1 : index
    %c1_241 = arith.constant 1 : index
    %c0_242 = arith.constant 0 : index
    %489 = vector.load %arg17[%c1_240, %c1_241, %c0_242] : memref<4x4x384xf32, #tpu.memory_space<vmem>>, vector<1x2x384xf32>
    %490 = vector.shape_cast %489 : vector<1x2x384xf32> to vector<2x384xf32>
    %491 = vector.shape_cast %488 : vector<2x384xf32> to vector<1x2x384xf32>
    tpu.vector_store %arg17[%c1_240, %c1_241, %c0_242], %491 {strides = array<i32>} : memref<4x4x384xf32, #tpu.memory_space<vmem>>, vector<1x2x384xf32>,
    %492 = vector.extract_strided_slice %485 {offsets = [2, 0], sizes = [2, 384], strides = [1, 1]} : vector<4x384xf32> to vector<2x384xf32>
    %c2_243 = arith.constant 2 : index
    %c1_244 = arith.constant 1 : index
    %c0_245 = arith.constant 0 : index
    %493 = vector.load %arg17[%c2_243, %c1_244, %c0_245] : memref<4x4x384xf32, #tpu.memory_space<vmem>>, vector<1x2x384xf32>
    %494 = vector.shape_cast %493 : vector<1x2x384xf32> to vector<2x384xf32>
    %495 = vector.shape_cast %492 : vector<2x384xf32> to vector<1x2x384xf32>
    tpu.vector_store %arg17[%c2_243, %c1_244, %c0_245], %495 {strides = array<i32>} : memref<4x4x384xf32, #tpu.memory_space<vmem>>, vector<1x2x384xf32>,
    %c0_246 = arith.constant 0 : index
    %c0_247 = arith.constant 0 : index
    %c0_248 = arith.constant 0 : index
    %496 = vector.load %arg17[%c0_246, %c0_247, %c0_248] : memref<4x4x384xf32, #tpu.memory_space<vmem>>, vector<4x4x384xf32>
    %497 = arith.truncf %496 : vector<4x4x384xf32> to vector<4x4x384xbf16>
    %cst_249 = arith.constant 0.000000e+00 : f32
    %498 = vector.broadcast %cst_249 : f32 to vector<4x256xf32>
    %499 = vector.extract_strided_slice %497 {offsets = [0, 0, 0], sizes = [2, 2, 384], strides = [1, 1, 1]} : vector<4x4x384xbf16> to vector<2x2x384xbf16>
    %500 = vector.shape_cast %499 : vector<2x2x384xbf16> to vector<4x384xbf16>
    %c0_250 = arith.constant 0 : index
    %c0_251 = arith.constant 0 : index
    %c0_252 = arith.constant 0 : index
    %501 = vector.load %arg8[%c0_250, %c0_251, %c0_252] : memref<9x384x256xbf16, #tpu.memory_space<vmem>>, vector<1x384x256xbf16>
    %502 = vector.shape_cast %501 : vector<1x384x256xbf16> to vector<384x256xbf16>
    %cst_253 = arith.constant dense<0.000000e+00> : vector<4x256xf32>
    %503 = tpu.matmul %500, %502, %cst_253 {dimension_numbers = #tpu.dot_dimension_numbers<[1], [0], [0], [1], [0, 0, 1, 1], [], []>} : vector<4x384xbf16>, vector<384x256xbf16>, vector<4x256xf32> -> vector<4x256xf32>
    %504 = arith.addf %498, %503 : vector<4x256xf32>
    %505 = vector.extract_strided_slice %497 {offsets = [0, 1, 0], sizes = [2, 2, 384], strides = [1, 1, 1]} : vector<4x4x384xbf16> to vector<2x2x384xbf16>
    %506 = vector.shape_cast %505 : vector<2x2x384xbf16> to vector<4x384xbf16>
    %c1_254 = arith.constant 1 : index
    %c0_255 = arith.constant 0 : index
    %c0_256 = arith.constant 0 : index
    %507 = vector.load %arg8[%c1_254, %c0_255, %c0_256] : memref<9x384x256xbf16, #tpu.memory_space<vmem>>, vector<1x384x256xbf16>
    %508 = vector.shape_cast %507 : vector<1x384x256xbf16> to vector<384x256xbf16>
    %cst_257 = arith.constant dense<0.000000e+00> : vector<4x256xf32>
    %509 = tpu.matmul %506, %508, %cst_257 {dimension_numbers = #tpu.dot_dimension_numbers<[1], [0], [0], [1], [0, 0, 1, 1], [], []>} : vector<4x384xbf16>, vector<384x256xbf16>, vector<4x256xf32> -> vector<4x256xf32>
    %510 = arith.addf %504, %509 : vector<4x256xf32>
    %511 = vector.extract_strided_slice %497 {offsets = [0, 2, 0], sizes = [2, 2, 384], strides = [1, 1, 1]} : vector<4x4x384xbf16> to vector<2x2x384xbf16>
    %512 = vector.shape_cast %511 : vector<2x2x384xbf16> to vector<4x384xbf16>
    %c2_258 = arith.constant 2 : index
    %c0_259 = arith.constant 0 : index
    %c0_260 = arith.constant 0 : index
    %513 = vector.load %arg8[%c2_258, %c0_259, %c0_260] : memref<9x384x256xbf16, #tpu.memory_space<vmem>>, vector<1x384x256xbf16>
    %514 = vector.shape_cast %513 : vector<1x384x256xbf16> to vector<384x256xbf16>
    %cst_261 = arith.constant dense<0.000000e+00> : vector<4x256xf32>
    %515 = tpu.matmul %512, %514, %cst_261 {dimension_numbers = #tpu.dot_dimension_numbers<[1], [0], [0], [1], [0, 0, 1, 1], [], []>} : vector<4x384xbf16>, vector<384x256xbf16>, vector<4x256xf32> -> vector<4x256xf32>
    %516 = arith.addf %510, %515 : vector<4x256xf32>
    %517 = vector.extract_strided_slice %497 {offsets = [1, 0, 0], sizes = [2, 2, 384], strides = [1, 1, 1]} : vector<4x4x384xbf16> to vector<2x2x384xbf16>
    %518 = vector.shape_cast %517 : vector<2x2x384xbf16> to vector<4x384xbf16>
    %c3_262 = arith.constant 3 : index
    %c0_263 = arith.constant 0 : index
    %c0_264 = arith.constant 0 : index
    %519 = vector.load %arg8[%c3_262, %c0_263, %c0_264] : memref<9x384x256xbf16, #tpu.memory_space<vmem>>, vector<1x384x256xbf16>
    %520 = vector.shape_cast %519 : vector<1x384x256xbf16> to vector<384x256xbf16>
    %cst_265 = arith.constant dense<0.000000e+00> : vector<4x256xf32>
    %521 = tpu.matmul %518, %520, %cst_265 {dimension_numbers = #tpu.dot_dimension_numbers<[1], [0], [0], [1], [0, 0, 1, 1], [], []>} : vector<4x384xbf16>, vector<384x256xbf16>, vector<4x256xf32> -> vector<4x256xf32>
    %522 = arith.addf %516, %521 : vector<4x256xf32>
    %523 = vector.extract_strided_slice %497 {offsets = [1, 1, 0], sizes = [2, 2, 384], strides = [1, 1, 1]} : vector<4x4x384xbf16> to vector<2x2x384xbf16>
    %524 = vector.shape_cast %523 : vector<2x2x384xbf16> to vector<4x384xbf16>
    %c4_266 = arith.constant 4 : index
    %c0_267 = arith.constant 0 : index
    %c0_268 = arith.constant 0 : index
    %525 = vector.load %arg8[%c4_266, %c0_267, %c0_268] : memref<9x384x256xbf16, #tpu.memory_space<vmem>>, vector<1x384x256xbf16>
    %526 = vector.shape_cast %525 : vector<1x384x256xbf16> to vector<384x256xbf16>
    %cst_269 = arith.constant dense<0.000000e+00> : vector<4x256xf32>
    %527 = tpu.matmul %524, %526, %cst_269 {dimension_numbers = #tpu.dot_dimension_numbers<[1], [0], [0], [1], [0, 0, 1, 1], [], []>} : vector<4x384xbf16>, vector<384x256xbf16>, vector<4x256xf32> -> vector<4x256xf32>
    %528 = arith.addf %522, %527 : vector<4x256xf32>
    %529 = vector.extract_strided_slice %497 {offsets = [1, 2, 0], sizes = [2, 2, 384], strides = [1, 1, 1]} : vector<4x4x384xbf16> to vector<2x2x384xbf16>
    %530 = vector.shape_cast %529 : vector<2x2x384xbf16> to vector<4x384xbf16>
    %c5_270 = arith.constant 5 : index
    %c0_271 = arith.constant 0 : index
    %c0_272 = arith.constant 0 : index
    %531 = vector.load %arg8[%c5_270, %c0_271, %c0_272] : memref<9x384x256xbf16, #tpu.memory_space<vmem>>, vector<1x384x256xbf16>
    %532 = vector.shape_cast %531 : vector<1x384x256xbf16> to vector<384x256xbf16>
    %cst_273 = arith.constant dense<0.000000e+00> : vector<4x256xf32>
    %533 = tpu.matmul %530, %532, %cst_273 {dimension_numbers = #tpu.dot_dimension_numbers<[1], [0], [0], [1], [0, 0, 1, 1], [], []>} : vector<4x384xbf16>, vector<384x256xbf16>, vector<4x256xf32> -> vector<4x256xf32>
    %534 = arith.addf %528, %533 : vector<4x256xf32>
    %535 = vector.extract_strided_slice %497 {offsets = [2, 0, 0], sizes = [2, 2, 384], strides = [1, 1, 1]} : vector<4x4x384xbf16> to vector<2x2x384xbf16>
    %536 = vector.shape_cast %535 : vector<2x2x384xbf16> to vector<4x384xbf16>
    %c6_274 = arith.constant 6 : index
    %c0_275 = arith.constant 0 : index
    %c0_276 = arith.constant 0 : index
    %537 = vector.load %arg8[%c6_274, %c0_275, %c0_276] : memref<9x384x256xbf16, #tpu.memory_space<vmem>>, vector<1x384x256xbf16>
    %538 = vector.shape_cast %537 : vector<1x384x256xbf16> to vector<384x256xbf16>
    %cst_277 = arith.constant dense<0.000000e+00> : vector<4x256xf32>
    %539 = tpu.matmul %536, %538, %cst_277 {dimension_numbers = #tpu.dot_dimension_numbers<[1], [0], [0], [1], [0, 0, 1, 1], [], []>} : vector<4x384xbf16>, vector<384x256xbf16>, vector<4x256xf32> -> vector<4x256xf32>
    %540 = arith.addf %534, %539 : vector<4x256xf32>
    %541 = vector.extract_strided_slice %497 {offsets = [2, 1, 0], sizes = [2, 2, 384], strides = [1, 1, 1]} : vector<4x4x384xbf16> to vector<2x2x384xbf16>
    %542 = vector.shape_cast %541 : vector<2x2x384xbf16> to vector<4x384xbf16>
    %c7_278 = arith.constant 7 : index
    %c0_279 = arith.constant 0 : index
    %c0_280 = arith.constant 0 : index
    %543 = vector.load %arg8[%c7_278, %c0_279, %c0_280] : memref<9x384x256xbf16, #tpu.memory_space<vmem>>, vector<1x384x256xbf16>
    %544 = vector.shape_cast %543 : vector<1x384x256xbf16> to vector<384x256xbf16>
    %cst_281 = arith.constant dense<0.000000e+00> : vector<4x256xf32>
    %545 = tpu.matmul %542, %544, %cst_281 {dimension_numbers = #tpu.dot_dimension_numbers<[1], [0], [0], [1], [0, 0, 1, 1], [], []>} : vector<4x384xbf16>, vector<384x256xbf16>, vector<4x256xf32> -> vector<4x256xf32>
    %546 = arith.addf %540, %545 : vector<4x256xf32>
    %547 = vector.extract_strided_slice %497 {offsets = [2, 2, 0], sizes = [2, 2, 384], strides = [1, 1, 1]} : vector<4x4x384xbf16> to vector<2x2x384xbf16>
    %548 = vector.shape_cast %547 : vector<2x2x384xbf16> to vector<4x384xbf16>
    %c8_282 = arith.constant 8 : index
    %c0_283 = arith.constant 0 : index
    %c0_284 = arith.constant 0 : index
    %549 = vector.load %arg8[%c8_282, %c0_283, %c0_284] : memref<9x384x256xbf16, #tpu.memory_space<vmem>>, vector<1x384x256xbf16>
    %550 = vector.shape_cast %549 : vector<1x384x256xbf16> to vector<384x256xbf16>
    %cst_285 = arith.constant dense<0.000000e+00> : vector<4x256xf32>
    %551 = tpu.matmul %548, %550, %cst_285 {dimension_numbers = #tpu.dot_dimension_numbers<[1], [0], [0], [1], [0, 0, 1, 1], [], []>} : vector<4x384xbf16>, vector<384x256xbf16>, vector<4x256xf32> -> vector<4x256xf32>
    %552 = arith.addf %546, %551 : vector<4x256xf32>
    %c0_286 = arith.constant 0 : index
    %c0_287 = arith.constant 0 : index
    %553 = vector.load %arg9[%c0_286, %c0_287] : memref<1x256xf32, #tpu.memory_space<vmem>>, vector<1x256xf32>
    %554 = vector.broadcast %553 : vector<1x256xf32> to vector<4x256xf32>
    %555 = arith.addf %552, %554 : vector<4x256xf32>
    %cst_288 = arith.constant 0.000000e+00 : f32
    %556 = vector.broadcast %cst_288 : f32 to vector<4x256xf32>
    %557 = arith.maximumf %555, %556 : vector<4x256xf32>
    %cst_289 = arith.constant 0.000000e+00 : f32
    %558 = vector.broadcast %cst_289 : f32 to vector<4x4x256xf32>
    %c0_290 = arith.constant 0 : index
    %c0_291 = arith.constant 0 : index
    %c0_292 = arith.constant 0 : index
    %559 = vector.load %arg18[%c0_290, %c0_291, %c0_292] : memref<4x4x256xf32, #tpu.memory_space<vmem>>, vector<4x4x256xf32>
    tpu.vector_store %arg18[%c0_290, %c0_291, %c0_292], %558 {strides = array<i32>} : memref<4x4x256xf32, #tpu.memory_space<vmem>>, vector<4x4x256xf32>,
    %560 = vector.extract_strided_slice %557 {offsets = [0, 0], sizes = [2, 256], strides = [1, 1]} : vector<4x256xf32> to vector<2x256xf32>
    %c1_293 = arith.constant 1 : index
    %c1_294 = arith.constant 1 : index
    %c0_295 = arith.constant 0 : index
    %561 = vector.load %arg18[%c1_293, %c1_294, %c0_295] : memref<4x4x256xf32, #tpu.memory_space<vmem>>, vector<1x2x256xf32>
    %562 = vector.shape_cast %561 : vector<1x2x256xf32> to vector<2x256xf32>
    %563 = vector.shape_cast %560 : vector<2x256xf32> to vector<1x2x256xf32>
    tpu.vector_store %arg18[%c1_293, %c1_294, %c0_295], %563 {strides = array<i32>} : memref<4x4x256xf32, #tpu.memory_space<vmem>>, vector<1x2x256xf32>,
    %564 = vector.extract_strided_slice %557 {offsets = [2, 0], sizes = [2, 256], strides = [1, 1]} : vector<4x256xf32> to vector<2x256xf32>
    %c2_296 = arith.constant 2 : index
    %c1_297 = arith.constant 1 : index
    %c0_298 = arith.constant 0 : index
    %565 = vector.load %arg18[%c2_296, %c1_297, %c0_298] : memref<4x4x256xf32, #tpu.memory_space<vmem>>, vector<1x2x256xf32>
    %566 = vector.shape_cast %565 : vector<1x2x256xf32> to vector<2x256xf32>
    %567 = vector.shape_cast %564 : vector<2x256xf32> to vector<1x2x256xf32>
    tpu.vector_store %arg18[%c2_296, %c1_297, %c0_298], %567 {strides = array<i32>} : memref<4x4x256xf32, #tpu.memory_space<vmem>>, vector<1x2x256xf32>,
    %c0_299 = arith.constant 0 : index
    %c0_300 = arith.constant 0 : index
    %c0_301 = arith.constant 0 : index
    %568 = vector.load %arg18[%c0_299, %c0_300, %c0_301] : memref<4x4x256xf32, #tpu.memory_space<vmem>>, vector<4x4x256xf32>
    %569 = arith.truncf %568 : vector<4x4x256xf32> to vector<4x4x256xbf16>
    %cst_302 = arith.constant 0.000000e+00 : f32
    %570 = vector.broadcast %cst_302 : f32 to vector<4x256xf32>
    %571 = vector.extract_strided_slice %569 {offsets = [0, 0, 0], sizes = [2, 2, 256], strides = [1, 1, 1]} : vector<4x4x256xbf16> to vector<2x2x256xbf16>
    %572 = vector.shape_cast %571 : vector<2x2x256xbf16> to vector<4x256xbf16>
    %c0_303 = arith.constant 0 : index
    %c0_304 = arith.constant 0 : index
    %c0_305 = arith.constant 0 : index
    %573 = vector.load %arg10[%c0_303, %c0_304, %c0_305] : memref<9x256x256xbf16, #tpu.memory_space<vmem>>, vector<1x256x256xbf16>
    %574 = vector.shape_cast %573 : vector<1x256x256xbf16> to vector<256x256xbf16>
    %cst_306 = arith.constant dense<0.000000e+00> : vector<4x256xf32>
    %575 = tpu.matmul %572, %574, %cst_306 {dimension_numbers = #tpu.dot_dimension_numbers<[1], [0], [0], [1], [0, 0, 1, 1], [], []>} : vector<4x256xbf16>, vector<256x256xbf16>, vector<4x256xf32> -> vector<4x256xf32>
    %576 = arith.addf %570, %575 : vector<4x256xf32>
    %577 = vector.extract_strided_slice %569 {offsets = [0, 1, 0], sizes = [2, 2, 256], strides = [1, 1, 1]} : vector<4x4x256xbf16> to vector<2x2x256xbf16>
    %578 = vector.shape_cast %577 : vector<2x2x256xbf16> to vector<4x256xbf16>
    %c1_307 = arith.constant 1 : index
    %c0_308 = arith.constant 0 : index
    %c0_309 = arith.constant 0 : index
    %579 = vector.load %arg10[%c1_307, %c0_308, %c0_309] : memref<9x256x256xbf16, #tpu.memory_space<vmem>>, vector<1x256x256xbf16>
    %580 = vector.shape_cast %579 : vector<1x256x256xbf16> to vector<256x256xbf16>
    %cst_310 = arith.constant dense<0.000000e+00> : vector<4x256xf32>
    %581 = tpu.matmul %578, %580, %cst_310 {dimension_numbers = #tpu.dot_dimension_numbers<[1], [0], [0], [1], [0, 0, 1, 1], [], []>} : vector<4x256xbf16>, vector<256x256xbf16>, vector<4x256xf32> -> vector<4x256xf32>
    %582 = arith.addf %576, %581 : vector<4x256xf32>
    %583 = vector.extract_strided_slice %569 {offsets = [0, 2, 0], sizes = [2, 2, 256], strides = [1, 1, 1]} : vector<4x4x256xbf16> to vector<2x2x256xbf16>
    %584 = vector.shape_cast %583 : vector<2x2x256xbf16> to vector<4x256xbf16>
    %c2_311 = arith.constant 2 : index
    %c0_312 = arith.constant 0 : index
    %c0_313 = arith.constant 0 : index
    %585 = vector.load %arg10[%c2_311, %c0_312, %c0_313] : memref<9x256x256xbf16, #tpu.memory_space<vmem>>, vector<1x256x256xbf16>
    %586 = vector.shape_cast %585 : vector<1x256x256xbf16> to vector<256x256xbf16>
    %cst_314 = arith.constant dense<0.000000e+00> : vector<4x256xf32>
    %587 = tpu.matmul %584, %586, %cst_314 {dimension_numbers = #tpu.dot_dimension_numbers<[1], [0], [0], [1], [0, 0, 1, 1], [], []>} : vector<4x256xbf16>, vector<256x256xbf16>, vector<4x256xf32> -> vector<4x256xf32>
    %588 = arith.addf %582, %587 : vector<4x256xf32>
    %589 = vector.extract_strided_slice %569 {offsets = [1, 0, 0], sizes = [2, 2, 256], strides = [1, 1, 1]} : vector<4x4x256xbf16> to vector<2x2x256xbf16>
    %590 = vector.shape_cast %589 : vector<2x2x256xbf16> to vector<4x256xbf16>
    %c3_315 = arith.constant 3 : index
    %c0_316 = arith.constant 0 : index
    %c0_317 = arith.constant 0 : index
    %591 = vector.load %arg10[%c3_315, %c0_316, %c0_317] : memref<9x256x256xbf16, #tpu.memory_space<vmem>>, vector<1x256x256xbf16>
    %592 = vector.shape_cast %591 : vector<1x256x256xbf16> to vector<256x256xbf16>
    %cst_318 = arith.constant dense<0.000000e+00> : vector<4x256xf32>
    %593 = tpu.matmul %590, %592, %cst_318 {dimension_numbers = #tpu.dot_dimension_numbers<[1], [0], [0], [1], [0, 0, 1, 1], [], []>} : vector<4x256xbf16>, vector<256x256xbf16>, vector<4x256xf32> -> vector<4x256xf32>
    %594 = arith.addf %588, %593 : vector<4x256xf32>
    %595 = vector.extract_strided_slice %569 {offsets = [1, 1, 0], sizes = [2, 2, 256], strides = [1, 1, 1]} : vector<4x4x256xbf16> to vector<2x2x256xbf16>
    %596 = vector.shape_cast %595 : vector<2x2x256xbf16> to vector<4x256xbf16>
    %c4_319 = arith.constant 4 : index
    %c0_320 = arith.constant 0 : index
    %c0_321 = arith.constant 0 : index
    %597 = vector.load %arg10[%c4_319, %c0_320, %c0_321] : memref<9x256x256xbf16, #tpu.memory_space<vmem>>, vector<1x256x256xbf16>
    %598 = vector.shape_cast %597 : vector<1x256x256xbf16> to vector<256x256xbf16>
    %cst_322 = arith.constant dense<0.000000e+00> : vector<4x256xf32>
    %599 = tpu.matmul %596, %598, %cst_322 {dimension_numbers = #tpu.dot_dimension_numbers<[1], [0], [0], [1], [0, 0, 1, 1], [], []>} : vector<4x256xbf16>, vector<256x256xbf16>, vector<4x256xf32> -> vector<4x256xf32>
    %600 = arith.addf %594, %599 : vector<4x256xf32>
    %601 = vector.extract_strided_slice %569 {offsets = [1, 2, 0], sizes = [2, 2, 256], strides = [1, 1, 1]} : vector<4x4x256xbf16> to vector<2x2x256xbf16>
    %602 = vector.shape_cast %601 : vector<2x2x256xbf16> to vector<4x256xbf16>
    %c5_323 = arith.constant 5 : index
    %c0_324 = arith.constant 0 : index
    %c0_325 = arith.constant 0 : index
    %603 = vector.load %arg10[%c5_323, %c0_324, %c0_325] : memref<9x256x256xbf16, #tpu.memory_space<vmem>>, vector<1x256x256xbf16>
    %604 = vector.shape_cast %603 : vector<1x256x256xbf16> to vector<256x256xbf16>
    %cst_326 = arith.constant dense<0.000000e+00> : vector<4x256xf32>
    %605 = tpu.matmul %602, %604, %cst_326 {dimension_numbers = #tpu.dot_dimension_numbers<[1], [0], [0], [1], [0, 0, 1, 1], [], []>} : vector<4x256xbf16>, vector<256x256xbf16>, vector<4x256xf32> -> vector<4x256xf32>
    %606 = arith.addf %600, %605 : vector<4x256xf32>
    %607 = vector.extract_strided_slice %569 {offsets = [2, 0, 0], sizes = [2, 2, 256], strides = [1, 1, 1]} : vector<4x4x256xbf16> to vector<2x2x256xbf16>
    %608 = vector.shape_cast %607 : vector<2x2x256xbf16> to vector<4x256xbf16>
    %c6_327 = arith.constant 6 : index
    %c0_328 = arith.constant 0 : index
    %c0_329 = arith.constant 0 : index
    %609 = vector.load %arg10[%c6_327, %c0_328, %c0_329] : memref<9x256x256xbf16, #tpu.memory_space<vmem>>, vector<1x256x256xbf16>
    %610 = vector.shape_cast %609 : vector<1x256x256xbf16> to vector<256x256xbf16>
    %cst_330 = arith.constant dense<0.000000e+00> : vector<4x256xf32>
    %611 = tpu.matmul %608, %610, %cst_330 {dimension_numbers = #tpu.dot_dimension_numbers<[1], [0], [0], [1], [0, 0, 1, 1], [], []>} : vector<4x256xbf16>, vector<256x256xbf16>, vector<4x256xf32> -> vector<4x256xf32>
    %612 = arith.addf %606, %611 : vector<4x256xf32>
    %613 = vector.extract_strided_slice %569 {offsets = [2, 1, 0], sizes = [2, 2, 256], strides = [1, 1, 1]} : vector<4x4x256xbf16> to vector<2x2x256xbf16>
    %614 = vector.shape_cast %613 : vector<2x2x256xbf16> to vector<4x256xbf16>
    %c7_331 = arith.constant 7 : index
    %c0_332 = arith.constant 0 : index
    %c0_333 = arith.constant 0 : index
    %615 = vector.load %arg10[%c7_331, %c0_332, %c0_333] : memref<9x256x256xbf16, #tpu.memory_space<vmem>>, vector<1x256x256xbf16>
    %616 = vector.shape_cast %615 : vector<1x256x256xbf16> to vector<256x256xbf16>
    %cst_334 = arith.constant dense<0.000000e+00> : vector<4x256xf32>
    %617 = tpu.matmul %614, %616, %cst_334 {dimension_numbers = #tpu.dot_dimension_numbers<[1], [0], [0], [1], [0, 0, 1, 1], [], []>} : vector<4x256xbf16>, vector<256x256xbf16>, vector<4x256xf32> -> vector<4x256xf32>
    %618 = arith.addf %612, %617 : vector<4x256xf32>
    %619 = vector.extract_strided_slice %569 {offsets = [2, 2, 0], sizes = [2, 2, 256], strides = [1, 1, 1]} : vector<4x4x256xbf16> to vector<2x2x256xbf16>
    %620 = vector.shape_cast %619 : vector<2x2x256xbf16> to vector<4x256xbf16>
    %c8_335 = arith.constant 8 : index
    %c0_336 = arith.constant 0 : index
    %c0_337 = arith.constant 0 : index
    %621 = vector.load %arg10[%c8_335, %c0_336, %c0_337] : memref<9x256x256xbf16, #tpu.memory_space<vmem>>, vector<1x256x256xbf16>
    %622 = vector.shape_cast %621 : vector<1x256x256xbf16> to vector<256x256xbf16>
    %cst_338 = arith.constant dense<0.000000e+00> : vector<4x256xf32>
    %623 = tpu.matmul %620, %622, %cst_338 {dimension_numbers = #tpu.dot_dimension_numbers<[1], [0], [0], [1], [0, 0, 1, 1], [], []>} : vector<4x256xbf16>, vector<256x256xbf16>, vector<4x256xf32> -> vector<4x256xf32>
    %624 = arith.addf %618, %623 : vector<4x256xf32>
    %c0_339 = arith.constant 0 : index
    %c0_340 = arith.constant 0 : index
    %625 = vector.load %arg11[%c0_339, %c0_340] : memref<1x256xf32, #tpu.memory_space<vmem>>, vector<1x256xf32>
    %626 = vector.broadcast %625 : vector<1x256xf32> to vector<4x256xf32>
    %627 = arith.addf %624, %626 : vector<4x256xf32>
    %cst_341 = arith.constant 0.000000e+00 : f32
    %628 = vector.broadcast %cst_341 : f32 to vector<4x256xf32>
    %629 = arith.maximumf %627, %628 : vector<4x256xf32>
    %cst_342 = arith.constant dense<0xFF800000> : vector<256xf32>
    %630 = vector.multi_reduction <maximumf>, %629, %cst_342 [0] : vector<4x256xf32> to vector<256xf32>
    %631 = vector.shape_cast %630 : vector<256xf32> to vector<1x256xf32>
    %632 = arith.truncf %631 : vector<1x256xf32> to vector<1x256xbf16>
    %c0_343 = arith.constant 0 : index
    %c0_344 = arith.constant 0 : index
    %633 = vector.load %arg12[%c0_343, %c0_344] : memref<256x128xbf16, #tpu.memory_space<vmem>>, vector<256x128xbf16>
    %cst_345 = arith.constant dense<0.000000e+00> : vector<1x128xf32>
    %634 = tpu.matmul %632, %633, %cst_345 {dimension_numbers = #tpu.dot_dimension_numbers<[1], [0], [0], [1], [0, 0, 1, 1], [], []>} : vector<1x256xbf16>, vector<256x128xbf16>, vector<1x128xf32> -> vector<1x128xf32>
    %c0_346 = arith.constant 0 : index
    %c0_347 = arith.constant 0 : index
    %635 = vector.load %arg13[%c0_346, %c0_347] : memref<1x128xf32, #tpu.memory_space<vmem>>, vector<1x128xf32>
    %636 = arith.addf %634, %635 : vector<1x128xf32>
    %c0_348 = arith.constant 0 : index
    %c0_349 = arith.constant 0 : index
    %c0_350 = arith.constant 0 : index
    %637 = vector.load %arg14[%c0_348, %c0_349, %c0_350] : memref<1x1x128xf32, #tpu.memory_space<vmem>>, vector<1x1x128xf32>
    %638 = vector.shape_cast %637 : vector<1x1x128xf32> to vector<1x128xf32>
    %639 = vector.shape_cast %636 : vector<1x128xf32> to vector<1x1x128xf32>
    tpu.vector_store %arg14[%c0_348, %c0_349, %c0_350], %639 {strides = array<i32>} : memref<1x1x128xf32, #tpu.memory_space<vmem>>, vector<1x1x128xf32>,
    return
  }
  func.func @transform_0(%arg0: i32) -> (i32, i32, i32, i32) {
    %c0_i32 = arith.constant 0 : i32
    %c0_i32_0 = arith.constant 0 : i32
    %c0_i32_1 = arith.constant 0 : i32
    %c0_i32_2 = arith.constant 0 : i32
    return %arg0, %c0_i32, %c0_i32_0, %c0_i32_1 : i32, i32, i32, i32
  }
  func.func @transform_1(%arg0: i32) -> (i32, i32, i32) {
    %c0_i32 = arith.constant 0 : i32
    %c0_i32_0 = arith.constant 0 : i32
    %c0_i32_1 = arith.constant 0 : i32
    %c0_i32_2 = arith.constant 0 : i32
    return %c0_i32, %c0_i32_0, %c0_i32_1 : i32, i32, i32
  }
  func.func @transform_2(%arg0: i32) -> (i32, i32) {
    %c0_i32 = arith.constant 0 : i32
    %c0_i32_0 = arith.constant 0 : i32
    %c0_i32_1 = arith.constant 0 : i32
    return %c0_i32, %c0_i32_0 : i32, i32
  }
  func.func @transform_3(%arg0: i32) -> (i32, i32, i32) {
    %c0_i32 = arith.constant 0 : i32
    %c0_i32_0 = arith.constant 0 : i32
    %c0_i32_1 = arith.constant 0 : i32
    %c0_i32_2 = arith.constant 0 : i32
    return %c0_i32, %c0_i32_0, %c0_i32_1 : i32, i32, i32
  }
  func.func @transform_4(%arg0: i32) -> (i32, i32) {
    %c0_i32 = arith.constant 0 : i32
    %c0_i32_0 = arith.constant 0 : i32
    %c0_i32_1 = arith.constant 0 : i32
    return %c0_i32, %c0_i32_0 : i32, i32
  }
  func.func @transform_5(%arg0: i32) -> (i32, i32, i32) {
    %c0_i32 = arith.constant 0 : i32
    %c0_i32_0 = arith.constant 0 : i32
    %c0_i32_1 = arith.constant 0 : i32
    %c0_i32_2 = arith.constant 0 : i32
    return %c0_i32, %c0_i32_0, %c0_i32_1 : i32, i32, i32
  }
  func.func @transform_6(%arg0: i32) -> (i32, i32) {
    %c0_i32 = arith.constant 0 : i32
    %c0_i32_0 = arith.constant 0 : i32
    %c0_i32_1 = arith.constant 0 : i32
    return %c0_i32, %c0_i32_0 : i32, i32
  }
  func.func @transform_7(%arg0: i32) -> (i32, i32, i32) {
    %c0_i32 = arith.constant 0 : i32
    %c0_i32_0 = arith.constant 0 : i32
    %c0_i32_1 = arith.constant 0 : i32
    %c0_i32_2 = arith.constant 0 : i32
    return %c0_i32, %c0_i32_0, %c0_i32_1 : i32, i32, i32
  }
  func.func @transform_8(%arg0: i32) -> (i32, i32) {
    %c0_i32 = arith.constant 0 : i32
    %c0_i32_0 = arith.constant 0 : i32
    %c0_i32_1 = arith.constant 0 : i32
    return %c0_i32, %c0_i32_0 : i32, i32
  }
  func.func @transform_9(%arg0: i32) -> (i32, i32, i32) {
    %c0_i32 = arith.constant 0 : i32
    %c0_i32_0 = arith.constant 0 : i32
    %c0_i32_1 = arith.constant 0 : i32
    %c0_i32_2 = arith.constant 0 : i32
    return %c0_i32, %c0_i32_0, %c0_i32_1 : i32, i32, i32
  }
  func.func @transform_10(%arg0: i32) -> (i32, i32) {
    %c0_i32 = arith.constant 0 : i32
    %c0_i32_0 = arith.constant 0 : i32
    %c0_i32_1 = arith.constant 0 : i32
    return %c0_i32, %c0_i32_0 : i32, i32
  }
  func.func @transform_11(%arg0: i32) -> (i32, i32) {
    %c0_i32 = arith.constant 0 : i32
    %c0_i32_0 = arith.constant 0 : i32
    %c0_i32_1 = arith.constant 0 : i32
    return %c0_i32, %c0_i32_0 : i32, i32
  }
  func.func @transform_12(%arg0: i32) -> (i32, i32) {
    %c0_i32 = arith.constant 0 : i32
    %c0_i32_0 = arith.constant 0 : i32
    %c0_i32_1 = arith.constant 0 : i32
    return %c0_i32, %c0_i32_0 : i32, i32
  }
  func.func @transform_13(%arg0: i32) -> (i32, i32, i32) {
    %c0_i32 = arith.constant 0 : i32
    %c0_i32_0 = arith.constant 0 : i32
    %c0_i32_1 = arith.constant 0 : i32
    return %arg0, %c0_i32, %c0_i32_0 : i32, i32, i32
  }
}

</mosaic_0001>

<bundles_post_ra>
// kernel: alexnet_forward.1
= control target key start
LH: loop header
LB: loop body
LE: loop exit
PB: predicated region body
PF: predicated region fallthrough
CT: control target
= control target key end

     0   :  { %s24091_s0 = inlined_call_operand.vmem [shape: bf16[2,11,11,48], index: 0, kind: input, shape index: {}]   ;;  %s24092_s1 = inlined_call_operand.vmem [shape: bf16[9,48,64], index: 1, kind: input, shape index: {}]   ;;  %s24093_s2 = inlined_call_operand.vmem [shape: f32[1,64], index: 2, kind: input, shape index: {}]   ;;  %s24094_s3 = inlined_call_operand.hbm [shape: bf16[25,64,192], index: 3, kind: input, shape index: {}]   ;;  %s24095_s4 = inlined_call_operand.vmem [shape: f32[1,192], index: 4, kind: input, shape index: {}]   ;;  %s24096_s5 = inlined_call_operand.vmem [shape: bf16[9,192,384], index: 5, kind: input, shape index: {}]   ;;  %s24097_s6 = inlined_call_operand.vmem [shape: f32[1,384], index: 6, kind: input, shape index: {}]   ;;  %s24098_s7 = inlined_call_operand.vmem [shape: bf16[9,384,256], index: 7, kind: input, shape index: {}]   ;;  %s24099_s8 = inlined_call_operand.vmem [shape: f32[1,256], index: 8, kind: input, shape index: {}]   ;;  %s24100_s9 = inlined_call_operand.hbm [shape: bf16[9,256,256], index: 9, kind: input, shape index: {}]   ;;  %s24101_s10 = inlined_call_operand.vmem [shape: f32[1,256], index: 10, kind: input, shape index: {}]   ;;  %s24102_s11 = inlined_call_operand.hbm [shape: bf16[256,128], index: 11, kind: input, shape index: {}]   ;;  %s24103_s12 = inlined_call_operand.vmem [shape: f32[1,128], index: 12, kind: input, shape index: {}]   ;;  %s24104_s13 = inlined_call_operand.hbm [shape: f32[2,1,128], index: 13, kind: output, shape index: {}]  }
   0x1   :  { %24120 = sst [smem:[#allocation23_spill]] %s24103_s12 }
   0x2   :  { %24121 = sst [smem:[#allocation24_spill]] %s24104_s13 }
   0x3   :  { %18 = vsyncpa [#allocation7], 0 }
   0x4   :  { %19 = vsyncpa [#allocation10], 0 }
   0x5   :  { %20 = vsyncpa [#allocation8], 0 }
   0x6   :  { %22 = vsyncpa [#allocation8 + $0x1], 0  ;;  %s19876_s25 = smov 0   ;;  %s19878_s26 = smov 0  }
   0x7   :  { %s19880_s27 = smov 0   ;;  %s19882_s28 = smov 0  }
   0x8 LB: > { %24122 = sst [smem:[#allocation16_spill]] %s19780_s25  ;;  %s19897_s29 = sadd.s32 4294967295, %s19792_s28   ;;  %s19792_s28 = sphi %s19882_s28, %s24222_s28   ;;  %s19788_s27 = sphi %s19880_s27, %s24224_s27   ;;  %s19784_s26 = sphi %s19878_s26, %s24226_s26   ;;  %s19780_s25 = sphi %s19876_s25, %s24225_s25  }
   0x9   : > { %24123 = sst [smem:[#allocation17_spill]] %s19788_s27  ;;  %s15021_s30 = sadd.s32 4294967294, %s19792_s28  }
   0xa   : > { %24124 = sst [smem:[#allocation18_spill]] %s19792_s28  ;;  %s19901_s14 = sadd.s32 1, %s19792_s28  }
   0xb   : > { %24125 = sst [smem:[#allocation19_spill]] %s19901_s14  ;;  %s313_s15 = sadd.s32 1, %s19788_s27 }
   0xc   : > { %s310_s16 = ssub.s32 %s19792_s28, %s19901_s14  ;;  %p323_p0 = scmp.ne.s32.totalorder %s19788_s27, %s19784_s26 }
   0xd   : > { %p311_p1 = scmp.eq.s32.totalorder %s310_s16, 0  ;;  %p324_p2 = scmp.eq.s32.totalorder %s19897_s29, 1 }
   0xe   : > { %p329_p3 = scmp.ne.s32.totalorder %s19784_s26, %s19780_s25  ;;  %p330_p4 = scmp.eq.s32.totalorder %s15021_s30, 1 }
   0xf   : > { %s19912_s17 = scalar_select %p311_p1, %s19788_s27, %s313_s15  }
  0x10   : > { %p19914_p5 = por %p324_p2, %p323_p0  ;;  %p19918_p6 = por %p330_p4, %p329_p3 }
  0x11   : > { %24126 = sst [smem:[#allocation20_spill]] %s19912_s17  ;;  %p15022_p7 = scmp.ge.s32.totalorder %s19792_s28, 1 }
  0x12   : > { %s24127_s18 = scalar_select %p19914_p5, 1, 0 }
  0x13   : > { %s24129_s19 = scalar_select %p19918_p6, 1, 0 }
  0x14   : > { %24128 = sst [smem:[#allocation21_spill]] %s24127_s18  ;;  %p337_p8 = scmp.lt.s32.totalorder %s19792_s28, 3 }
  0x15   : > { %24130 = sst [smem:[#allocation22_spill]] %s24129_s19  ;;  %p24110_p9 = scmp.eq.s32.totalorder %s19897_s29, 0 }
  0x16   : > { %p19925_p10 = pnand %p15022_p7, %p337_p8  ;;  %s19794_s21 = smov [#allocation9]  }
  0x17   : > { %s383_s22 = sshll.u32 %s19794_s21, 4  ;;  %s19795_s24 = smov [#allocation6]   ;;  %s19931_s22 = int_to_ptr.vmem [resolvable:$true] %s383_s22 }
  0x18   : > { %s24131_s20 = scalar_select %p19925_p10, 1, 0 }
  0x19   : > { %p17698_p11 = pneg %p19925_p10  ;;  %s355_s30 = sshll.u32 %s19795_s24, 4  ;;  %s19939_s30 = int_to_ptr.vmem [resolvable:$true] %s355_s30 }
  0x1a   : > { %s19796_s15 = smov [#allocation11]   ;;  %s19638_s14 = scalar_lea.hbm %s24100_s9, 36864 }
  0x1b   : > { %p19935_p12 = pnand %p24110_p9, %p17698_p11  ;;  %s19941_s16 = sshll.u32 %s19796_s15, 4  ;;  %s400_s16 = int_to_ptr.vmem [resolvable:$true] %s19941_s16 }
  0x1c   : > { %p19639_p13 = scmp.ne.s32.totalorder %s24100_s9, %s19638_s14  ;;  %p19645_p3 = scmp.lt.u32.totalorder %s19638_s14, %s24100_s9 }
  0x1d   : > { %p19951_p0 = pneg %p19935_p12 }
  0x1f   : > { %p19641_p1 = pnand %p19951_p0, %p19639_p13 }
  0x21   : > { %p19642_p2 = pneg %p19641_p1 }
  0x23   : > { %p19647_p4 = pnand %p19645_p3, %p19642_p2 }
  0x25   : > { %19650 = shalt.err (!%p19647_p4)
}
  0x26   : > { %s19651_s27 = scalar_lea.vmem %s19931_s22, 36864  ;;  %p19659_p9 = scmp.lt.s32.totalorder %s19931_s22, %s19931_s22 }
  0x27   : > { %p19652_p7 = scmp.ne.s32.totalorder %s19931_s22, %s19651_s27  ;;  %p19660_p6 = scmp.lt.s32.totalorder %s19651_s27, %s19651_s27 }
  0x29   : > { %p19654_p8 = pnand %p19652_p7, %p19951_p0  ;;  %p19661_p13 = por %p19660_p6, %p19659_p9 }
  0x2b   : > { %p19655_p11 = pneg %p19654_p8 }
  0x2d   : > { %p19662_p1 = pnand %p19661_p13, %p19655_p11 }
  0x2f   : > { %19665 = shalt.err (!%p19662_p1)
}
  0x30   : > { %s19797_s17 = smov 128   ;;  %s19798_s14 = smov 8  }
  0x31   : > { %17704 = dma.hbm_to_vmem [thread:$0]  (!%p19935_p12), %s24100_s9, 36864, %s19931_s22, [#allocation10], %s19797_s17, %s19797_s17, %s19798_s14  }
  0x32   : > { %s19666_s28 = scalar_lea.hbm %s24094_s3, 25600 }
  0x33   : > { %p19667_p6 = scmp.ne.s32.totalorder %s24094_s3, %s19666_s28  ;;  %p19673_p3 = scmp.lt.u32.totalorder %s19666_s28, %s24094_s3 }
  0x35   : > { %p19669_p9 = pnand %p19667_p6, %p19951_p0 }
  0x37   : > { %p19670_p2 = pneg %p19669_p9 }
  0x39   : > { %p19675_p4 = pnand %p19673_p3, %p19670_p2 }
  0x3b   : > { %19678 = shalt.err (!%p19675_p4)
}
  0x3c   : > { %s19679_s22 = scalar_lea.vmem %s19939_s30, 25600  ;;  %p19687_p13 = scmp.lt.s32.totalorder %s19939_s30, %s19939_s30 }
  0x3d   : > { %p19680_p7 = scmp.ne.s32.totalorder %s19939_s30, %s19679_s22  ;;  %p19688_p1 = scmp.lt.s32.totalorder %s19679_s22, %s19679_s22 }
  0x3f   : > { %p19682_p8 = pnand %p19680_p7, %p19951_p0  ;;  %p19689_p6 = por %p19688_p1, %p19687_p13 }
  0x41   : > { %p19683_p11 = pneg %p19682_p8 }
  0x43   : > { %p19690_p9 = pnand %p19689_p6, %p19683_p11 }
  0x45   : > { %19693 = shalt.err (!%p19690_p9)
}
  0x46   : > { %17701 = dma.hbm_to_vmem [thread:$0]  (!%p19935_p12), %s24094_s3, 25600, %s19939_s30, [#allocation7], %s19797_s17, %s19797_s17, %s19798_s14  }
  0x47   : > { %s19694_s19 = scalar_lea.hbm %s24102_s11, 2048 }
  0x48   : > { %p19695_p2 = scmp.ne.s32.totalorder %s24102_s11, %s19694_s19  ;;  %p19701_p7 = scmp.lt.u32.totalorder %s19694_s19, %s24102_s11 }
  0x4a   : > { %p19697_p3 = pnand %p19695_p2, %p19951_p0 }
  0x4c   : > { %p19698_p4 = pneg %p19697_p3 }
  0x4e   : > { %p19703_p8 = pnand %p19701_p7, %p19698_p4 }
  0x50   : > { %19706 = shalt.err (!%p19703_p8)
}
  0x51   : > { %s19707_s22 = scalar_lea.vmem %s400_s16, 2048  ;;  %p19715_p6 = scmp.lt.s32.totalorder %s400_s16, %s400_s16 }
  0x52   : > { %p19708_p11 = scmp.ne.s32.totalorder %s400_s16, %s19707_s22  ;;  %p19716_p9 = scmp.lt.s32.totalorder %s19707_s22, %s19707_s22 }
  0x54   : > { %p19710_p13 = pnand %p19708_p11, %p19951_p0  ;;  %p19717_p5 = por %p19716_p9, %p19715_p6 }
  0x56   : > { %p19711_p1 = pneg %p19710_p13 }
  0x58   : > { %p19718_p10 = pnand %p19717_p5, %p19711_p1 }
  0x5a   : > { %19721 = shalt.err (!%p19718_p10)
}
  0x5b   : > { %s19799_s30 = smov 64   ;;  %s19800_s17 = smov 4  }
  0x5c   : > { %17707 = dma.hbm_to_vmem [thread:$0]  (!%p19935_p12), %s24102_s11, 2048, %s400_s16, [#allocation10], %s19799_s30, %s19799_s30, %s19800_s17  }
  0x5d   : > { %p24134_p2 = scmp.ne.s32.totalorder %s24131_s20, 0 }
  0x5e   : > { %p24135_p3 = scmp.eq.s32.totalorder (!%p24134_p2), %s19897_s29, 0 }
  0x5f   : > { %426 = sbr.rel (%p24134_p2) target bundleno = 3273 (0xcc9), region = 72 }
  0x66   : > { %19767 = dma.done.wait (%p24135_p3), [#allocation7], 25600   ;;  %p24136_p0 = pmov %p24135_p3 }
  0x68   : > { %19769 = vsyncadd (%p24136_p0), [#allocation7], 4294941696  ;;  %p24137_p5 = pmov %p24136_p0 }
  0x69   : > { %p24138_p10 = pmov %p24136_p0 }
  0x6a   : > { %19771 = dma.done.wait (%p24137_p5), [#allocation10], 38912  }
  0x6b   : > { %19773 = vsyncadd (%p24138_p10), [#allocation10], 4294928384  ;;  %p477_p4 = scmp.lt.s32.totalorder %s19897_s29, 1  ;;  %v17762_v0 = vld [vmem:[%s24092_s1] sm:$0xff]   ;;  %v17763_v1 = vld [vmem:[%s24092_s1 + $0x8] sm:$0xff]   ;;  %vm661_vm0 = vcmask 392192  }
  0x6c   : > { %17411 = vmatprep.subr.bf16.mxu0 %v17762_v0  ;;  %v17764_v4 = vld [vmem:[%s24092_s1 + $0x10] sm:$0xff]   ;;  %vm862_vm1 = vcmask 1042432   ;;  %vm863_vm2 = vcmask 1046532   ;;  %v17768_v18 = vld [vmem:[%s24092_s1 + $0x38] sm:$0xff]   ;;  %v17771_v31 = vld [vmem:[%s24092_s1 + $0x40] sm:$0xff]   ;;  %vm24117_vm7 = vcmask 523264  }
  0x6d   : > { %s478_s25 = scalar_select %p477_p4, %s19897_s29, 1  ;;  %17412 = vmatpush3.bf16.msra.mxu0 %v17762_v0  ;;  %v17767_v8 = vld [vmem:[%s24092_s1 + $0x30] sm:$0xff]   ;;  %vm20084_vm3 = vmor %vm862_vm1, %vm863_vm2  ;;  %v17772_v39 = vld [vmem:[%s24092_s1 + $0x48] sm:$0xff]   ;;  %vm509_vm4 = vsmask.f32 3328 }
  0x6e   : > { %17413 = vmatprep.subr.bf16.mxu0 %v17763_v1  ;;  %vm510_vm5 = vsmask.f32 7440  ;;  %v17789_v19 = vld [vmem:[%s24092_s1 + $0xb0] sm:$0xff]   ;;  %vm2282_vm8 = vsmask.f32 256  ;;  %s24214_s13 = sld [smem:[#allocation21_spill]] }
  0x6f   : > { %s17683_s23 = smul.u32 88, %s478_s25  ;;  %vm20246_vm6 = vmor %vm509_vm4, %vm510_vm5  ;;  %vm5120_vm9 = vsmask.f32 1284  ;;  %vm5123_vm10 = vsmask.f32 3340  ;;  %s17309_s28 = sshll.u32 %s19897_s29, 4 }
  0x70   : > { %vm2283_vm11 = vsmask.f32 2312  ;;  %vm5121_vm12 = vmor %vm2282_vm8, %vm5120_vm9  ;;  %vm5126_vm14 = vsmask.f32 5396  ;;  %vm2285_vm15 = vsmask.f32 4368 }
  0x71   : > { %s20032_s18 = scalar_lea.vmem %s24091_s0, %s17683_s23  ;;  %17414 = vmatpush3.bf16.msra.mxu0 %v17763_v1  ;;  %vm5122_vm13 = vmor %vm5121_vm12, %vm2283_vm11  ;;  %vm2287_vm2 = vsmask.f32 6424  ;;  %vm1865_vm5 = vsmask.f32 1280  ;;  %vm2143_vm12 = vcmask 1040384   ;;  %s475_s23 = sand.u32 1, %s19784_s26  }
  0x72   : > { %v20038_v2 = vld [vmem:[%s20032_s18] sm:$0xf]  ;;  %v20041_v3 = vld [vmem:[%s20032_s18 + $0x8] sm:$0xf]  ;;  %v20049_v6 = vld [vmem:[%s20032_s18 + $0x10] sm:$0xf]  ;;  %17415 = vmatprep.subr.bf16.mxu0 %v17764_v4 }
  0x73   : > { %v15049_v5 = vcombine.low %v20038_v2, %v20041_v3  ;;  %v20053_v7 = vld [vmem:[%s20032_s18 + $0x18] sm:$0xf]  ;;  %v20059_v9 = vld [vmem:[%s20032_s18 + $0x20] sm:$0xf]  ;;  %v20062_v10 = vld [vmem:[%s20032_s18 + $0x28] sm:$0xf] }
  0x74   : > { %v20066_v11 = vcombine.low %v20049_v6, %v20053_v7  ;;  %v20069_v12 = vld [vmem:[%s20032_s18 + $0x4] sm:$0x3]  ;;  %v527_v13 = vshrl.u32 %v20041_v3, 16  ;;  %v530_v14 = vshll.u32 %v20041_v3, 16  ;;  %v20075_v15 = vcombine.low %v20059_v9, %v20062_v10  ;;  %v20078_v16 = vld [vmem:[%s20032_s18 + $0xc] sm:$0x3] }
  0x75   : > { %17417 = vmatprep.mubr.msk.bf16.mxu0 %vm661_vm0, %v15049_v5  ;;  %17416 = vmatpush3.bf16.msra.mxu0 %v17764_v4  ;;  %v15060_v17 = vrot.slane %v20038_v2, 9  ;;  %v867_v20 = vrot.slane %v20069_v12, 5  ;;  %v15061_v21 = vrot.slane %v20041_v3, 9  ;;  %v871_v22 = vrot.slane %v20078_v16, 5  ;;  %v20092_v23 = vld [vmem:[%s20032_s18 + $0x14] sm:$0x3] }
  0x76   : > { %17425 = vmatprep.subr.bf16.mxu0 %v17767_v8  ;;  %v20097_v24 = vld [vmem:[%s20032_s18 + $0x1c] sm:$0x3]  ;;  %v555_v25 = vshrl.u32 %v20053_v7, 16  ;;  %v558_v26 = vshll.u32 %v20053_v7, 16  ;;  %v20104_v27 = vld [vmem:[%s20032_s18 + $0x30] sm:$0xf] }
  0x77   : > { %v20107_v28 = vld [vmem:[%s20032_s18 + $0x38] sm:$0xf]  ;;  %v15062_v29 = vrot.slane %v20049_v6, 9  ;;  %v15063_v30 = vrot.slane %v20053_v7, 9  ;;  %v868_v32 = vsel %vm20084_vm3, %v15060_v17, %v867_v20  ;;  %v20118_v33 = vsel %vm20084_vm3, %v15061_v21, %v871_v22  ;;  %v492_v36 = vld [vmem:[%s20032_s18 + $0x24] sm:$0x3] }
  0x78   : > { %17418 = vmatmul.mubr.msk.bf16.vlgmr.msra.gmra.mrb[0].mxu0 %vm661_vm0, %v20066_v11  ;;  %v875_v34 = vrot.slane %v20092_v23, 5  ;;  %v879_v35 = vrot.slane %v20097_v24, 5  ;;  %v20124_v37 = vld [vmem:[%s20032_s18 + $0x2c] sm:$0x3]  ;;  %v20128_v38 = vcombine.low %v20104_v27, %v20107_v28  ;;  %v15064_v40 = vrot.slane %v20059_v9, 9  ;;  %v17773_v17 = vld [vmem:[%s24092_s1 + $0x50] sm:$0xff]  }
  0x79   : > { %17426 = vmatpush3.bf16.msra.mxu0 %v17767_v8  ;;  %17421 = vmatprep.mubr.msk.bf16.mxu0 %vm661_vm0, %v20075_v15  ;;  %v15065_v41 = vrot.slane %v20062_v10, 9  ;;  %v15074_v42 = vcombine.low %v868_v32, %v20118_v33  ;;  %v883_v43 = vrot.slane %v492_v36, 5  ;;  %v887_v44 = vrot.slane %v20124_v37, 5  ;;  %v20151_v51 = vld [vmem:[%s20032_s18 + $0x34] sm:$0x3]  ;;  %s476_s19 = scalar_lea.vmem [#allocation12], %s475_s23 }
  0x7a   : > { %17427 = vmatprep.subr.bf16.mxu0 %v17768_v18  ;;  %v569_v45 = vshrl.u32 %v20059_v9, 16  ;;  %v572_v46 = vshll.u32 %v20059_v9, 16  ;;  %v529_v47 = vrot.slane %v527_v13, 4  ;;  %v532_v48 = vrot.slane %v530_v14, 5  ;;  %v20164_v58 = vld [vmem:[%s20032_s18 + $0x3c] sm:$0x3] }
  0x7b   : > { %v20144_v49 = vsel %vm20084_vm3, %v15062_v29, %v875_v34  ;;  %v20148_v50 = vsel %vm20084_vm3, %v15063_v30, %v879_v35  ;;  %v541_v52 = vshrl.u32 %v20049_v6, 16  ;;  %v544_v53 = vshll.u32 %v20049_v6, 16  ;;  %s14931_s21 = sshll.u32 %s476_s19, 4  ;;  %s24215_s27 = sld [smem:[#allocation24_spill]]  ;;  %s24051_s21 = int_to_ptr.vmem [resolvable:$true] %s14931_s21 }
  0x7c   : > { %v557_v54 = vrot.slane %v555_v25, 4  ;;  %v560_v55 = vrot.slane %v558_v26, 5  ;;  %v20157_v56 = vsel %vm20084_vm3, %v15064_v40, %v883_v43  ;;  %v20161_v57 = vsel %vm20084_vm3, %v15065_v41, %v887_v44  ;;  %s14919_s17 = scalar_lea.sflag [#allocation8], %s475_s23  ;;  %s19722_s14 = scalar_lea.vmem %s24051_s21, 16 }
  0x7d   : > { %17428 = vmatpush3.bf16.msra.mxu0 %v17768_v18  ;;  %v571_v59 = vrot.slane %v569_v45, 4  ;;  %v574_v60 = vrot.slane %v572_v46, 5  ;;  %v20168_v61 = vcombine.low %v20144_v49, %v20148_v50  ;;  %v15066_v62 = vrot.slane %v20104_v27, 9  ;;  %p19723_p12 = scmp.ne.s32.totalorder %s24051_s21, %s19722_s14  ;;  %p24217_p7 = scmp.ne.s32.totalorder %s24214_s13, 0 }
  0x7e   : > { %17429 = vmatprep.subr.bf16.mxu0 %v17771_v31  ;;  %v891_v63 = vrot.slane %v20151_v51, 5  ;;  %v15067_v0 = vrot.slane %v20107_v28, 9  ;;  %v20175_v1 = vcombine.low %v20157_v56, %v20161_v57  ;;  %v895_v4 = vrot.slane %v20164_v58, 5  ;;  %s19805_s29 = smov [#allocation12]  }
  0x7f   : > { %v543_v5 = vrot.slane %v541_v52, 4  ;;  %v546_v8 = vrot.slane %v544_v53, 5  ;;  %v513_v13 = vshrl.u32 %v20038_v2, 16  ;;  %v561_v14 = vor.u32 %v560_v55, %v557_v54  ;;  %p19724_p8 = pnand %p19723_p12, %p24217_p7  ;;  %s19726_s12 = sshll.u32 %s19805_s29, 4  ;;  %s19727_s12 = int_to_ptr.vmem [resolvable:$false] %s19726_s12 }
  0x80   : > { %17422 = vmatmul.mubr.msk.bf16.gmra.mrb[4].mxu0 %vm661_vm0, %v20128_v38  ;;  %v578_v18 = vshll.u32 %v492_v36, 16  ;;  %v533_v20 = vor.u32 %v532_v48, %v529_v47  ;;  %v575_v21 = vor.u32 %v574_v60, %v571_v59  ;;  %v536_v22 = vshll.u32 %v20078_v16, 16  ;;  %v17774_v36 = vld [vmem:[%s24092_s1 + $0x58] sm:$0xff]   ;;  %v17777_v47 = vld [vmem:[%s24092_s1 + $0x60] sm:$0xff]   ;;  %v20230_v60 = vld [vmem:[%s20032_s18 + $0x48] sm:$0xf]  ;;  %p19729_p13 = scmp.lt.s32.totalorder %s24051_s21, %s19727_s12 }
  0x81   : > { %17430 = vmatpush3.bf16.msra.mxu0 %v17771_v31  ;;  %17431 = vmatprep.mubr.msk.bf16.mxu0 %vm661_vm0, %v15074_v42  ;;  %v550_v25 = vshll.u32 %v20092_v23, 16  ;;  %v564_v26 = vshll.u32 %v20097_v24, 16  ;;  %v516_v29 = vshll.u32 %v20038_v2, 16  ;;  %v20190_v30 = vsel %vm20084_vm3, %v15066_v62, %v891_v63  ;;  %v17794_v63 = vld [vmem:[%s24092_s1 + $0x20] sm:$0xff]   ;;  %s24216_s22 = smov %s24215_s27  ;;  %s24049_s30 = scalar_lea.hbm %s24215_s27, %s17309_s28 }
  0x82   : > { %17439 = vmatprep.subr.bf16.mxu0 %v17772_v39  ;;  %v583_v31 = vshrl.u32 %v20062_v10, 16  ;;  %v586_v32 = vshll.u32 %v20062_v10, 16  ;;  %v20198_v16 = vsel %vm20084_vm3, %v15067_v0, %v895_v4  ;;  %v547_v23 = vor.u32 %v546_v8, %v543_v5  ;;  %p19725_p11 = pneg %p19724_p8  ;;  %s19728_s25 = scalar_lea.vmem %s19727_s12, 32 }
  0x83   : > { %v597_v24 = vshrl.u32 %v20104_v27, 16  ;;  %v600_v34 = vshll.u32 %v20104_v27, 16  ;;  %v20202_v35 = vrot.slane %v578_v18, 5  ;;  %v20207_v40 = vrot.slane %v561_v14, 4  ;;  %p19730_p1 = scmp.lt.s32.totalorder %s19728_s25, %s19722_s14 }
  0x84   : > { %v538_v41 = vrot.slane %v536_v22, 5  ;;  %v20209_v42 = vrot.slane %v550_v25, 5  ;;  %v20211_v43 = vrot.slane %v564_v26, 5  ;;  %v20213_v44 = vrot.slane %v575_v21, 4  ;;  %v17796_v26 = vld [vmem:[%s24092_s1 + $0x28] sm:$0xff]  }
  0x85   : > { %v20217_v45 = vcombine.low %v20190_v30, %v20198_v16  ;;  %v15091_v46 = vcombine.low %v20041_v3, %v20049_v6  ;;  %v585_v48 = vrot.slane %v583_v31, 4  ;;  %v592_v52 = vshll.u32 %v20124_v37, 16  ;;  %v17793_v37 = vld [vmem:[%s24092_s1 + $0x18] sm:$0xff]   ;;  %v17778_v31 = vld [vmem:[%s24092_s1 + $0x68] sm:$0xff]   ;;  %p19731_p6 = por %p19730_p1, %p19729_p13 }
  0x86   : > { %v548_v53 = vrot.slane %v547_v23, 4  ;;  %v588_v54 = vrot.slane %v586_v32, 5  ;;  %v20225_v55 = vrot.slane %v597_v24, 4  ;;  %v20227_v59 = vrot.slane %v600_v34, 5  ;;  %17397 = vmatprep.subr.bf16.mxu1 %v17793_v37 }
  0x87   : > { %v1489_v62 = vshrl.u32 %v20230_v60, 16  ;;  %v1492_v3 = vshll.u32 %v20230_v60, 16  ;;  %v611_v6 = vshrl.u32 %v20107_v28, 16  ;;  %v614_v5 = vshll.u32 %v20107_v28, 16  ;;  %17398 = vmatpush3.bf16.msra.mxu1 %v17793_v37  ;;  %p19732_p9 = pnand %p19731_p6, %p19725_p11 }
  0x88   : > { %17432 = vmatmul.mubr.msk.bf16.vlgmr.msra.gmra.mrb[0].mxu0 %vm661_vm0, %v20168_v61  ;;  %v15092_v14 = vcombine.low %v20053_v7, %v20059_v9  ;;  %v15093_v18 = vcombine.low %v20062_v10, %v20104_v27  ;;  %v589_v21 = vor.u32 %v588_v54, %v585_v48  ;;  %17399 = vmatprep.subr.bf16.mxu1 %v17794_v63  ;;  %v515_v7 = vrot.slane %v513_v13, 4 }
  0x89   : > { %17440 = vmatpush3.bf16.msra.mxu0 %v17772_v39  ;;  %17435 = vmatprep.mubr.msk.bf16.mxu0 %vm661_vm0, %v20175_v1  ;;  %v534_v39 = vrot.slane %v533_v20, 4  ;;  %v1491_v0 = vrot.slane %v1489_v62, 4  ;;  %v1494_v8 = vrot.slane %v1492_v3, 5  ;;  %v20257_v20 = vld [vmem:[%s20032_s18 + $0x40] sm:$0xf]  ;;  %v518_v9 = vrot.slane %v516_v29, 5 }
  0x8a   : > { %17441 = vmatprep.subr.bf16.mxu0 %v17773_v17  ;;  %v522_v10 = vshll.u32 %v20069_v12, 16  ;;  %v15165_v27 = vrot.slane %v20230_v60, 9  ;;  %v17781_v12 = vld [vmem:[%s24092_s1 + $0x70] sm:$0xff]   ;;  %v613_v13 = vrot.slane %v611_v6, 4  ;;  %v616_v29 = vrot.slane %v614_v5, 5 }
  0x8b   : > { %v1495_v22 = vor.u32 %v1494_v8, %v1491_v0  ;;  %v539_v32 = vsel %vm20246_vm6, %v534_v39, %v538_v41  ;;  %17400 = vmatpush3.bf16.msra.mxu1 %v17794_v63  ;;  %v519_v48 = vor.u32 %v518_v9, %v515_v7  ;;  %v590_v54 = vrot.slane %v589_v21, 4 }
  0x8c   : > { %v524_v2 = vrot.slane %v522_v10, 5  ;;  %17401 = vmatprep.subr.bf16.mxu1 %v17796_v26  ;;  %v1139_v62 = vshll.u32 %v20257_v20, 16  ;;  %v603_v6 = vor.u32 %v20227_v59, %v20225_v55  ;;  %v606_v37 = vshll.u32 %v20151_v51, 16  ;;  %v17782_v51 = vld [vmem:[%s24092_s1 + $0x78] sm:$0xff]  }
  0x8d   : > { %17442 = vmatpush3.bf16.msra.mxu0 %v17773_v17  ;;  %v502_v17 = vld [vmem:[%s20032_s18 + $0x4c] sm:$0x3]  ;;  %v20271_v23 = vrot.slane %v1495_v22, 4  ;;  %v520_v3 = vrot.slane %v519_v48, 4  ;;  %v567_v63 = vsel %vm20246_vm6, %v20207_v40, %v20211_v43  ;;  %v617_v59 = vor.u32 %v616_v29, %v613_v13  ;;  %v17785_v48 = vld [vmem:[%s24092_s1 + $0x90] sm:$0xff]   ;;  %v17786_v13 = vld [vmem:[%s24092_s1 + $0x98] sm:$0xff]  }
  0x8e   : > { %17443 = vmatprep.subr.bf16.mxu0 %v17774_v36  ;;  %v1498_v25 = vshll.u32 %v502_v17, 16  ;;  %v1608_v34 = vrot.slane %v502_v17, 5  ;;  %v620_v0 = vshll.u32 %v20164_v58, 16  ;;  %v604_v8 = vrot.slane %v603_v6, 4 }
  0x8f   : > { %17402 = vmatpush3.bf16.msra.mxu1 %v17796_v26  ;;  %v618_v58 = vrot.slane %v617_v59, 4  ;;  %v15128_v29 = vcombine.low %v20161_v57, %v20190_v30  ;;  %v17788_v57 = vld [vmem:[%s24092_s1 + $0xa8] sm:$0xff]   ;;  %v17791_v30 = vld [vmem:[%s24092_s1 + $0xb8] sm:$0xff]   ;;  %v19803_v59 = vmov 1983009808  }
  0x90   : > { %17436 = vmatmul.mubr.msk.bf16.gmra.mrb[4].mxu0 %vm661_vm0, %v20217_v45  ;;  %v20273_v24 = vrot.slane %v1498_v25, 5  ;;  %v20286_v41 = vsel %vm20084_vm3, %v15165_v27, %v1608_v34  ;;  %v17784_v34 = vld [vmem:[%s24092_s1 + $0x88] sm:$0xff]  }
  0x91   : > { %17444 = vmatpush3.bf16.msra.mxu0 %v17774_v36  ;;  %17445 = vmatprep.mubr.msk.bf16.mxu0 %vm661_vm0, %v15091_v46  ;;  %v594_v36 = vrot.slane %v592_v52, 5  ;;  %v1136_v46 = vshrl.u32 %v20257_v20, 16  ;;  %v553_v52 = vsel %vm20246_vm6, %v548_v53, %v20209_v42  ;;  %v581_v42 = vsel %vm20246_vm6, %v20213_v44, %v20202_v35 }
  0x92   : > { %17453 = vmatprep.subr.bf16.mxu0 %v17777_v47  ;;  %v1501_v39 = vsel %vm20246_vm6, %v20271_v23, %v20273_v24  ;;  %v525_v53 = vsel %vm20246_vm6, %v520_v3, %v524_v2  ;;  %v15108_v55 = vcombine.low %v539_v32, %v553_v52  ;;  %v1141_v35 = vrot.slane %v1139_v62, 5  ;;  %v17801_v23 = vld [vmem:[#allocation6 + $0x50] ss:$8 sps:$4 sm:$0xff]   ;;  %v17812_v3 = vld [vmem:[#allocation6 + $0x4] ss:$8 sps:$4 sm:$0xff]  }
  0x93   : > { %v15038_v5 = vcombine.low %v525_v53, %v539_v32  ;;  %v595_v40 = vsel %vm20246_vm6, %v590_v54, %v594_v36  ;;  %v1138_v43 = vrot.slane %v1136_v46, 4  ;;  %v20315_v44 = vcombine.low %v553_v52, %v567_v63  ;;  %v17809_v54 = vld [vmem:[#allocation6 + $0x74] ss:$8 sps:$4 sm:$0xff]   ;;  %v17807_v62 = vld [vmem:[#allocation6 + $0x70] ss:$8 sps:$4 sm:$0xff]  }
  0x94   : > { %v20317_v17 = vcombine.low %v581_v42, %v595_v40  ;;  %v15109_v26 = vcombine.low %v567_v63, %v581_v42  ;;  %v15126_v2 = vcombine.low %v20118_v33, %v20144_v49  ;;  %v15119_v52 = vrot.slane %v20257_v20, 9  ;;  %v17787_v49 = vld [vmem:[%s24092_s1 + $0xa0] sm:$0xff]  }
  0x95   : > { %17403 = vmatprep.mubr.msk.bf16.mxu1 %vm661_vm0, %v15038_v5  ;;  %v1142_v21 = vor.u32 %v1141_v35, %v1138_v43  ;;  %v19802_v24 = vmov 0   ;;  %v24118_v5 = vlaneseq }
  0x96   : > { %17404 = vmatmul.mubr.msk.bf16.vlgmr.msra.gmra.mrb[0].mxu1 %vm661_vm0, %v20315_v44 }
  0x97   : > { %17407 = vmatprep.mubr.msk.bf16.mxu1 %vm661_vm0, %v20317_v17  ;;  %v1143_v10 = vrot.slane %v1142_v21, 4  ;;  %v20441_v35 = vshrl.u32 %v24118_v5, 7 }
  0x98   : > { %17446 = vmatmul.mubr.msk.bf16.vlgmr.msra.gmra.mrb[0].mxu0 %vm661_vm0, %v15092_v14  ;;  %v608_v14 = vrot.slane %v606_v37, 5 }
  0x99   : > { %17454 = vmatpush3.bf16.msra.mxu0 %v17777_v47  ;;  %17449 = vmatprep.mubr.msk.bf16.mxu0 %vm661_vm0, %v15093_v18  ;;  %v15094_v47 = vcombine.low %v20107_v28, %v20257_v20  ;;  %v500_v28 = vld [vmem:[%s20032_s18 + $0x44] sm:$0x3]  ;;  %v622_v18 = vrot.slane %v620_v0, 5  ;;  %v1834_v0 = vunpack.c.l.s4 %v19803_v59  ;;  %s24213_s18 = sld [smem:[#allocation23_spill]] }
  0x9a   : > { %17455 = vmatprep.subr.bf16.mxu0 %v17778_v31  ;;  %v1145_v22 = vshll.u32 %v500_v28, 16  ;;  %v609_v25 = vsel %vm20246_vm6, %v604_v8, %v608_v14  ;;  %v1267_v33 = vrot.slane %v500_v28, 5 }
  0x9b   : > { %v623_v7 = vsel %vm20246_vm6, %v618_v58, %v622_v18  ;;  %v15110_v9 = vcombine.low %v595_v40, %v609_v25  ;;  %v1835_v43 = vunpack.c.0.s8 %v1834_v0 }
  0x9c   : > { %v1147_v27 = vrot.slane %v1145_v22, 5  ;;  %v15041_v32 = vcombine.low %v609_v25, %v623_v7 }
  0x9d   : > { %17456 = vmatpush3.bf16.msra.mxu0 %v17778_v31  ;;  %v17783_v31 = vld [vmem:[%s24092_s1 + $0x80] sm:$0xff]   ;;  %v20448_v14 = vsub.s32 %v1835_v43, %v20441_v35 }
  0x9e   : > { %17457 = vmatprep.subr.bf16.mxu0 %v17781_v12  ;;  %17408 = vmatmul.mubr.msk.bf16.gmra.mrb[4].mxu1 %vm661_vm0, %v15041_v32  ;;  %v1148_v36 = vsel %vm20246_vm6, %v1143_v10, %v1147_v27  ;;  %vm1866_vm6 = vsmask.f32 3336 }
  0x9f   : > { %v15111_v46 = vcombine.low %v623_v7, %v1148_v36  ;;  %2029 = vmatprep.mubr.bf16.mxu1 %v19802_v24  ;;  %vm1867_vm9 = vmor %vm1865_vm5, %vm1866_vm6  ;;  %vm1757_vm5 = vcmask 518146   ;;  %vm1759_vm6 = vcmask 520196  }
  0xa0   : > { %17450 = vmatmul.mubr.msk.bf16.gmra.mrb[4].mxu0 %vm661_vm0, %v15094_v47 }
  0xa1   : > { %17458 = vmatpush3.bf16.msra.mxu0 %v17781_v12  ;;  %17459 = vmatprep.mubr.msk.bf16.mxu0 %vm661_vm0, %v15108_v55  ;;  %v15127_v12 = vcombine.low %v20148_v50, %v20157_v56  ;;  %v1268_v50 = vsel %vm20084_vm3, %v15119_v52, %v1267_v33 }
  0xa2   : > { %17467 = vmatprep.subr.bf16.mxu0 %v17782_v51  ;;  %v15129_v56 = vcombine.low %v20198_v16, %v1268_v50  ;;  %v17792_v16 = vld [vmem:[%s24092_s1 + $0xc0] sm:$0xff]   ;;  %v15172_v4 = vcombine.low %v1268_v50, %v20286_v41  ;;  %v17804_v41 = vld [vmem:[#allocation6 + $0x60] ss:$8 sps:$4 sm:$0xff]  }
  0xa8   : > { %17460 = vmatmul.mubr.msk.bf16.vlgmr.msra.gmra.mrb[0].mxu0 %vm661_vm0, %v15109_v26 }
  0xa9   : > { %17468 = vmatpush3.bf16.msra.mxu0 %v17782_v51  ;;  %17463 = vmatprep.mubr.msk.bf16.mxu0 %vm661_vm0, %v15110_v9 }
  0xaa   : > { %17469 = vmatprep.subr.bf16.mxu0 %v17783_v31 }
  0xad   : > { %17470 = vmatpush3.bf16.msra.mxu0 %v17783_v31 }
  0xae   : > { %17471 = vmatprep.subr.bf16.mxu0 %v17784_v34 }
  0xb0   : > { %17464 = vmatmul.mubr.msk.bf16.gmra.mrb[4].mxu0 %vm661_vm0, %v15111_v46  ;;  %v20479_v46 = vld [vmem:[%s24093_s2] ss:$0 sm:$0xff] }
  0xb1   : > { %17472 = vmatpush3.bf16.msra.mxu0 %v17784_v34  ;;  %17473 = vmatprep.mubr.msk.bf16.mxu0 %vm661_vm0, %v15126_v2 }
  0xb2   : > { %17481 = vmatprep.subr.bf16.mxu0 %v17785_v48 }
  0xb8   : > { %17474 = vmatmul.mubr.msk.bf16.vlgmr.msra.gmra.mrb[0].mxu0 %vm661_vm0, %v15127_v12 }
  0xb9   : > { %17482 = vmatpush3.bf16.msra.mxu0 %v17785_v48  ;;  %17477 = vmatprep.mubr.msk.bf16.mxu0 %vm661_vm0, %v15128_v29 }
  0xba   : > { %17483 = vmatprep.subr.bf16.mxu0 %v17786_v13 }
  0xbd   : > { %17484 = vmatpush3.bf16.msra.mxu0 %v17786_v13 }
  0xbe   : > { %17485 = vmatprep.subr.bf16.mxu0 %v17787_v49 }
  0xc0   : > { %17478 = vmatmul.mubr.msk.bf16.gmra.mrb[4].mxu0 %vm661_vm0, %v15129_v56 }
  0xc1   : > { %17486 = vmatpush3.bf16.msra.mxu0 %v17787_v49  ;;  %17487 = vmatprep.mubr.msk.bf16.mxu0 %vm661_vm0, %v20066_v11  ;;  %v15143_v11 = vcombine.low %v20257_v20, %v20230_v60  ;;  %v15157_v60 = vcombine.low %v1148_v36, %v1501_v39  ;;  %v19801_v20 = vmov 0.0   ;;  %v17806_v39 = vld [vmem:[#allocation6 + $0x64] ss:$8 sps:$4 sm:$0xff]  }
  0xc2   : > { %17495 = vmatprep.subr.bf16.mxu0 %v17788_v57  ;;  %1740 = vst.msk [vmem:[#allocation2 + $0x18] sm:$0xff] %vm24117_vm7, %v19801_v20  ;;  %1737 = vst.msk [vmem:[#allocation2] sm:$0xff] %vm24117_vm7, %v19801_v20 }
  0xc3   : > { %1738 = vst.msk [vmem:[#allocation2 + $0x8] sm:$0xff] %vm24117_vm7, %v19801_v20  ;;  %1739 = vst.msk [vmem:[#allocation2 + $0x10] sm:$0xff] %vm24117_vm7, %v19801_v20 }
  0xc4   : > { %1741 = vst.msk [vmem:[#allocation2 + $0x20] sm:$0xff] %vm24117_vm7, %v19801_v20  ;;  %1742 = vst.msk [vmem:[#allocation2 + $0x28] sm:$0xff] %vm24117_vm7, %v19801_v20 }
  0xc5   : > { %1743 = vst.msk [vmem:[#allocation2 + $0x30] sm:$0xff] %vm24117_vm7, %v19801_v20  ;;  %1744 = vst.msk [vmem:[#allocation2 + $0x38] sm:$0xff] %vm24117_vm7, %v19801_v20 }
  0xc6   : > { %8353 = vst [vmem:[#allocation4] sm:$0xff] %v19801_v20  ;;  %8354 = vst [vmem:[#allocation4 + $0x8] sm:$0xf] %v19801_v20 }
  0xc7   : > { %8355 = vst [vmem:[#allocation4 + $0xc] sm:$0xff] %v19801_v20  ;;  %8356 = vst [vmem:[#allocation4 + $0x14] sm:$0xf] %v19801_v20 }
  0xc8   : > { %17488 = vmatmul.mubr.msk.bf16.vlgmr.msra.gmra.mrb[0].mxu0 %vm661_vm0, %v20075_v15  ;;  %v17795_v15 = vld [vmem:[%s24092_s1 + $0xc8] sm:$0xff]   ;;  %8357 = vst [vmem:[#allocation4 + $0x18] sm:$0xff] %v19801_v20  ;;  %8358 = vst [vmem:[#allocation4 + $0x20] sm:$0xf] %v19801_v20 }
  0xc9   : > { %17496 = vmatpush3.bf16.msra.mxu0 %v17788_v57  ;;  %17491 = vmatprep.mubr.msk.bf16.mxu0 %vm661_vm0, %v20128_v38  ;;  %v17797_v38 = vld [vmem:[%s24092_s1 + $0xd0] sm:$0xff]   ;;  %8360 = vst [vmem:[#allocation4 + $0x2c] sm:$0xf] %v19801_v20  ;;  %12197 = vst [vmem:[#allocation5 + $0x8] sm:$0xff] %v19801_v20  ;;  %v20438_v40 = vld [vmem:[#allocation2] sm:$0xff] }
  0xca   : > { %17497 = vmatprep.subr.bf16.mxu0 %v17789_v19  ;;  %12198 = vst [vmem:[#allocation5 + $0x10] sm:$0xff] %v19801_v20  ;;  %v1813_v8 = vpack.c.bf16 %v20438_v40, %v20438_v40  ;;  %vm20540_vm7 = vmor %vm2282_vm8, %vm2283_vm11  ;;  %vm24161_vm11 = vcmask 523264  }
  0xcb   : > { %vm20566_vm8 = vmor %vm20540_vm7, %vm2285_vm15 }
  0xcc   : > { %v20453_v58 = vrot.slane %v1813_v8, %v20448_v14  ;;  %v20462_v31 = vld [vmem:[#allocation2 + $0x30] sm:$0xff]  ;;  %vm20587_vm7 = vmor %vm20566_vm8, %vm2287_vm2 }
  0xcd   : > { %17498 = vmatpush3.bf16.msra.mxu0 %v17789_v19  ;;  %v1819_v56 = vpack.c.bf16 %v20462_v31, %v20462_v31 }
  0xce   : > { %17499 = vmatprep.subr.bf16.mxu0 %v17791_v30  ;;  %v1873_v21 = vshrl.u32 %v20453_v58, 16  ;;  %v1876_v22 = vshll.u32 %v20453_v58, 16  ;;  %v20466_v7 = vcombine.high %v20453_v58, %v20453_v58 }
  0xd0   : > { %17492 = vmatmul.mubr.msk.bf16.gmra.mrb[4].mxu0 %vm661_vm0, %v15143_v11  ;;  %v1875_v9 = vrot.slane %v1873_v21, 6  ;;  %v1878_v10 = vrot.slane %v1876_v22, 7  ;;  %v24119_v2 = vshll.u32 %v20466_v7, 16 }
  0xd1   : > { %17500 = vmatpush3.bf16.msra.mxu0 %v17791_v30  ;;  %17501 = vmatprep.mubr.msk.bf16.mxu0 %vm661_vm0, %v20315_v44  ;;  %v20443_v44 = vld [vmem:[#allocation2 + $0x8] sm:$0xff] }
  0xd2   : > { %17509 = vmatprep.subr.bf16.mxu0 %v17792_v16  ;;  %v1879_v50 = vor.u32 %v1878_v10, %v1875_v9 }
  0xd8   : > { %17502 = vmatmul.mubr.msk.bf16.vlgmr.msra.gmra.mrb[0].mxu0 %vm661_vm0, %v20317_v17  ;;  %v1814_v17 = vpack.c.bf16 %v20443_v44, %v20443_v44 }
  0xd9   : > { %17510 = vmatpush3.bf16.msra.mxu0 %v17792_v16  ;;  %17505 = vmatprep.mubr.msk.bf16.mxu0 %vm661_vm0, %v15041_v32 }
  0xda   : > { %17511 = vmatprep.subr.bf16.mxu0 %v17795_v15  ;;  %v20456_v18 = vrot.slane %v1814_v17, %v20448_v14 }
  0xdc   : > { %v1887_v25 = vshrl.u32 %v20456_v18, 16  ;;  %v1890_v26 = vshll.u32 %v20456_v18, 16  ;;  %v20472_v27 = vcombine.high %v20456_v18, %v20456_v18 }
  0xdd   : > { %17512 = vmatpush3.bf16.msra.mxu0 %v17795_v15 }
  0xde   : > { %17513 = vmatprep.subr.bf16.mxu0 %v17797_v38  ;;  %v1889_v32 = vrot.slane %v1887_v25, 6  ;;  %v1892_v34 = vrot.slane %v1890_v26, 7  ;;  %v1896_v52 = vshll.u32 %v20472_v27, 16  ;;  %v2298_v0 = vshrl.u32 %v20472_v27, 16 }
  0xe0   : > { %17506 = vmatmul.mubr.msk.bf16.gmra.mrb[4].mxu0 %vm661_vm0, %v15157_v60  ;;  %v1893_v11 = vor.u32 %v1892_v34, %v1889_v32 }
  0xe1   : > { %17514 = vmatpush3.bf16.msra.mxu0 %v17797_v38  ;;  %17515 = vmatprep.mubr.msk.bf16.mxu0 %vm661_vm0, %v20168_v61  ;;  %v17798_v61 = vld [vmem:[#allocation6 + $0x40] ss:$8 sps:$4 sm:$0xff]   ;;  %v20498_v38 = vrot.slane %v24119_v2, 7 }
  0xe8   : > { %17516 = vmatmul.mubr.msk.bf16.vlgmr.msra.gmra.mrb[0].mxu0 %vm661_vm0, %v20175_v1  ;;  %v17800_v1 = vld [vmem:[#allocation6 + $0x44] ss:$8 sps:$4 sm:$0xff]  }
  0xe9   : > { %17519 = vmatprep.mubr.msk.bf16.mxu0 %vm661_vm0, %v20217_v45  ;;  %v17803_v45 = vld [vmem:[#allocation6 + $0x54] ss:$8 sps:$4 sm:$0xff]   ;;  %1997 = vmatprep.subr.bf16.mxu1 %v17800_v1 }
  0xea   : > { %1998 = vmatpush1.bf16.msra.mxu1 %v17798_v61  ;;  %v1898_v61 = vrot.slane %v1896_v52, 7 }
  0xeb   : > { %1999 = vmatprep.subr.bf16.mxu1 %v17803_v45 }
  0xee   : > { %2000 = vmatpush1.bf16.msra.mxu1 %v17801_v23  ;;  %v20511_v23 = vrot.slane %v1879_v50, 2 }
  0xef   : > { %2001 = vmatprep.subr.bf16.mxu1 %v17806_v39  ;;  %v20514_v39 = vrot.slane %v1819_v56, %v20448_v14 }
  0xf0   : > { %17520 = vmatmul.mubr.msk.bf16.gmra.mrb[4].mxu0 %vm661_vm0, %v15172_v4  ;;  %vm5124_vm0 = vmor %vm5122_vm13, %vm5123_vm10  ;;  %vm1868_vm10 = vsmask.f32 5392  ;;  %vm2144_vm13 = vcmask 1042434  }
  0xf1   : > { %vm5125_vm1 = vmor %vm5124_vm0, %vm2285_vm15  ;;  %v3855_v22 = vshrl.u32 %v20514_v39, 16  ;;  %v3858_v50 = vshll.u32 %v20514_v39, 16 }
  0xf2   : > { %2002 = vmatpush1.bf16.msra.mxu1 %v17804_v41  ;;  %vm5127_vm3 = vmor %vm5125_vm1, %vm5126_vm14  ;;  %vm2146_vm1 = vcmask 1044484  }
  0xf3   : > { %2003 = vmatprep.subr.bf16.mxu1 %v17809_v54  ;;  %vm20434_vm4 = vmor %vm5127_vm3, %vm2287_vm2  ;;  %vm1755_vm3 = vcmask 516096  }
  0xf4   : > { %vm20481_vm14 = vmor %vm1867_vm9, %vm1868_vm10  ;;  %vm1761_vm9 = vcmask 522246   ;;  %vm1870_vm10 = vsmask.f32 7448 }
  0xf5   : > { %vm20486_vm0 = vmor %vm2143_vm12, %vm2144_vm13  ;;  %vm2148_vm13 = vcmask 1046534  }
  0xf6   : > { %2004 = vmatpush1.bf16.msra.mxu1 %v17807_v62  ;;  %vm20503_vm12 = vmor %vm20486_vm0, %vm2146_vm1  ;;  %v1894_v62 = vrot.slane %v1893_v11, 2 }
  0xf7   : > { %2100 = vmatprep.subr.bf16.mxu1 %v17812_v3  ;;  %vm20525_vm0 = vmor %vm20481_vm14, %vm1870_vm10 }
  0xf8   : > { %vm20534_vm1 = vmor %vm20503_vm12, %vm2148_vm13 }
  0xf9   : > { %vm24162_vm15 = vmmov %vm24161_vm11 }
  0xfa   : > { %vm24164_vm2 = vmmov %vm24161_vm11 }
  0xfb   : > { %vm24165_vm14 = vmmov %vm24164_vm2 }
  0xfc   : > { %vm24175_vm10 = vmmov %vm24164_vm2 }
  0xfd   : > { %vm24177_vm12 = vmmov %vm24164_vm2 }
  0xfe   : > { %vm24179_vm13 = vmmov %vm24164_vm2 }
  0xff   : > { %vm24180_vm8 = vmmov %vm24164_vm2 }
 0x169   : > { %v17405_v6 = vpop.f32.mrb[0].mxu1 }
 0x16a   : > { %v708_v37 = vpop.f32.mrb[1].mxu1 }
 0x16b   : > { %v17406_v47 = vpop.f32.mrb[2].mxu1 }
 0x16c   : > { %v20420_v63 = vpop.f32.mrb[3].mxu1 }
 0x171   : > { %v20422_v42 = vpop.f32.mrb[4].mxu1 }
 0x172   : > { %v20424_v53 = vpop.f32.mrb[5].mxu1 }
 0x173   : > { %v20426_v55 = vpop.f32.mrb[6].mxu1 }
 0x174   : > { %v20428_v51 = vpop.f32.mrb[7].mxu1 }
 0x1bb   : > { %v17517_v36 = vpop.f32.mrb[0].mxu0 }
 0x1bc   : > { %v17523_v13 = vadd.f32 %v17517_v36, %v17405_v6  ;;  %v1674_v29 = vpop.f32.mrb[1].mxu0 }
 0x1bd   : > { %v17524_v33 = vadd.f32 %v1674_v29, %v708_v37  ;;  %v17518_v49 = vpop.f32.mrb[2].mxu0 }
 0x1be   : > { %v1722_v57 = vadd.f32 %v17523_v13, %v20479_v46  ;;  %v17525_v19 = vadd.f32 %v17518_v49, %v17406_v47  ;;  %v1677_v30 = vpop.f32.mrb[3].mxu0 }
 0x1bf   : > { %v1720_v16 = vadd.f32 %v17524_v33, %v20479_v46  ;;  %v17526_v15 = vadd.f32 %v1677_v30, %v20420_v63 }
 0x1c0   : > { %v1730_v4 = vmax.f32 %v1722_v57, 0.0  ;;  %v1723_v20 = vadd.f32 %v17525_v19, %v20479_v46  ;;  %v20549_v19 = vcombine.high %v20514_v39, %v20514_v39 }
 0x1c1   : > { %v1728_v1 = vmax.f32 %v1720_v16, 0.0  ;;  %v1721_v45 = vadd.f32 %v17526_v15, %v20479_v46  ;;  %v1885_v15 = vsel %vm20525_vm0, %v20511_v23, %v20498_v38  ;;  %v15190_v38 = vpack.c.bf16 %v20443_v44, %v20438_v40 }
 0x1c2   : > { %v1764_v41 = vrot.slane %v1730_v4, 1  ;;  %v1731_v54 = vmax.f32 %v1723_v20, 0.0  ;;  %v4090_v23 = vshrl.u32 %v20549_v19, 16  ;;  %v15215_v40 = vrot.slane %v1887_v25, 9 }
 0x1c3   : > { %v1746_v3 = vrot.slane %v1728_v1, 1  ;;  %v1729_v6 = vmax.f32 %v1721_v45, 0.0  ;;  %v17521_v37 = vpop.f32.mrb[4].mxu0  ;;  %v3857_v45 = vrot.slane %v3855_v22, 6 }
 0x1c4   : > { %v1768_v47 = vrot.slane %v1731_v54, 1  ;;  %v17527_v63 = vadd.f32 %v17521_v37, %v20422_v42  ;;  %v1690_v59 = vpop.f32.mrb[5].mxu0  ;;  %v1766_v26 = vmax.f32 %v1730_v4, %v1764_v41  ;;  %v2300_v4 = vrot.slane %v2298_v0, 7 }
 0x1c5   : > { %v1750_v43 = vrot.slane %v1729_v6, 1  ;;  %v17528_v8 = vadd.f32 %v1690_v59, %v20424_v53  ;;  %v17522_v17 = vpop.f32.mrb[6].mxu0  ;;  %v1748_v36 = vmax.f32 %v1728_v1, %v1746_v3  ;;  %v20572_v1 = vsel %vm20525_vm0, %v1894_v62, %v1898_v61  ;;  %v18089_v62 = vld [vmem:[#allocation6 + $0x610] ss:$8 sps:$4 sm:$0xff]  }
 0x1c6   : > { %v1770_v9 = vmax.f32 %v1731_v54, %v1768_v47  ;;  %v1726_v10 = vadd.f32 %v17527_v63, %v20479_v46  ;;  %v17529_v32 = vadd.f32 %v17522_v17, %v20426_v55  ;;  %v1693_v34 = vpop.f32.mrb[7].mxu0  ;;  %v3860_v41 = vrot.slane %v3858_v50, 7 }
 0x1c7   : > { %v1752_v12 = vmax.f32 %v1729_v6, %v1750_v43  ;;  %v1724_v53 = vadd.f32 %v17528_v8, %v20479_v46  ;;  %v17530_v13 = vadd.f32 %v1693_v34, %v20428_v51  ;;  %v15202_v37 = vrot.slane %v20456_v18, 9 }
 0x1c8   : > { %v1771_v48 = vmax.f32 %v1766_v26, %v1770_v9  ;;  %v1734_v33 = vmax.f32 %v1726_v10, 0.0  ;;  %v1727_v49 = vadd.f32 %v17529_v32, %v20479_v46  ;;  %v2156_v47 = vrot.slane %v20472_v27, 7 }
 0x1c9   : > { %v1753_v51 = vmax.f32 %v1748_v36, %v1752_v12  ;;  %v1732_v56 = vmax.f32 %v1724_v53, 0.0  ;;  %v1725_v57 = vadd.f32 %v17530_v13, %v20479_v46  ;;  %v20582_v61 = vcombine.low %v1885_v15, %v20572_v1 }
 0x1ca   : > { %1773 = vst.msk [vmem:[#allocation2 + $0x1a] sm:$0x1] %vm1755_vm3, %v1771_v48  ;;  %v1792_v30 = vrot.slane %v1734_v33, 1  ;;  %v1735_v11 = vmax.f32 %v1727_v49, 0.0  ;;  %v2301_v43 = vor.u32 %v2300_v4, %v1896_v52  ;;  %v15227_v8 = vcombine.high %v20453_v58, %v20456_v18 }
 0x1cb   : > { %1774 = vst.msk [vmem:[#allocation2 + $0x19] sm:$0x4] %vm1757_vm5, %v1771_v48  ;;  %1758 = vst.msk [vmem:[#allocation2 + $0x11] sm:$0x4] %vm1757_vm5, %v1753_v51  ;;  %v1778_v46 = vrot.slane %v1732_v56, 1  ;;  %v1733_v16 = vmax.f32 %v1725_v57, 0.0  ;;  %v3861_v17 = vor.u32 %v3860_v41, %v3857_v45  ;;  %v20600_v10 = vrot.slane %v15190_v38, %v20448_v14 }
 0x1cc   : > { %1775 = vst.msk [vmem:[#allocation2 + $0x18] sm:$0x10] %vm1759_vm6, %v1771_v48  ;;  %1760 = vst.msk [vmem:[#allocation2 + $0x10] sm:$0x10] %vm1759_vm6, %v1753_v51  ;;  %v1796_v20 = vrot.slane %v1735_v11, 1  ;;  %v1794_v3 = vmax.f32 %v1734_v33, %v1792_v30  ;;  %v3864_v32 = vshll.u32 %v20549_v19, 16  ;;  %v20613_v12 = vsel %vm20534_vm1, %v15202_v37, %v2156_v47 }
 0x1cd   : > { %1776 = vst.msk [vmem:[#allocation2 + $0x17] sm:$0x40] %vm1761_vm9, %v1771_v48  ;;  %1762 = vst.msk [vmem:[#allocation2 + $0xf] sm:$0x40] %vm1761_vm9, %v1753_v51  ;;  %v1782_v54 = vrot.slane %v1733_v16, 1  ;;  %v1780_v63 = vmax.f32 %v1732_v56, %v1778_v46  ;;  %v4092_v34 = vrot.slane %v4090_v23, 7  ;;  %v1945_v13 = vrot.slane %v20582_v61, %v20448_v14 }
 0x1ce   : > { %1756 = vst.msk [vmem:[#allocation2 + $0x12] sm:$0x1] %vm1755_vm3, %v1753_v51  ;;  %v1798_v6 = vmax.f32 %v1735_v11, %v1796_v20  ;;  %v15201_v27 = vrot.slane %v20453_v58, 9  ;;  %v2152_v52 = vrot.slane %v20466_v7, 7  ;;  %v15357_v55 = vrot.slane %v20514_v39, 9 }
 0x1cf   : > { %v1784_v59 = vmax.f32 %v1733_v16, %v1782_v54  ;;  %v3978_v48 = vrot.slane %v20549_v19, 7  ;;  %v20628_v49 = vsel %vm20587_vm7, %v15215_v40, %v2301_v43  ;;  %v20631_v50 = vrot.slane %v15227_v8, %v20448_v14 }
 0x1d0   : > { %v1799_v0 = vmax.f32 %v1794_v3, %v1798_v6  ;;  %v3862_v51 = vrot.slane %v3861_v17, 2  ;;  %v3866_v57 = vrot.slane %v3864_v32, 7  ;;  %v15367_v30 = vrot.slane %v3855_v22, 9 }
 0x1d1   : > { %v1785_v9 = vmax.f32 %v1780_v63, %v1784_v59  ;;  %v4093_v11 = vor.u32 %v4092_v34, %v3864_v32  ;;  %v20649_v22 = vsel %vm20534_vm1, %v15357_v55, %v3978_v48 }
 0x1d2   : > { %1801 = vst.msk [vmem:[#allocation2 + $0x2a] sm:$0x1] %vm1755_vm3, %v1799_v0  ;;  %v20654_v37 = vsel %vm20525_vm0, %v3862_v51, %v3866_v57 }
 0x1d3   : > { %1802 = vst.msk [vmem:[#allocation2 + $0x29] sm:$0x4] %vm1757_vm5, %v1799_v0  ;;  %1788 = vst.msk [vmem:[#allocation2 + $0x21] sm:$0x4] %vm1757_vm5, %v1785_v9  ;;  %v20662_v40 = vsel %vm20587_vm7, %v15367_v30, %v4093_v11 }
 0x1d4   : > { %v20597_v26 = vld [vmem:[#allocation2 + $0x18] sm:$0xff]  ;;  %1803 = vst.msk [vmem:[#allocation2 + $0x28] sm:$0x10] %vm1759_vm6, %v1799_v0  ;;  %1789 = vst.msk [vmem:[#allocation2 + $0x20] sm:$0x10] %vm1759_vm6, %v1785_v9 }
 0x1d5   : > { %v1816_v25 = vpack.c.bf16 %v20597_v26, %v20597_v26  ;;  %v1807_v36 = vld [vmem:[#allocation2 + $0x10] sm:$0xff]  ;;  %1804 = vst.msk [vmem:[#allocation2 + $0x27] sm:$0x40] %vm1761_vm9, %v1799_v0  ;;  %1790 = vst.msk [vmem:[#allocation2 + $0x1f] sm:$0x40] %vm1761_vm9, %v1785_v9 }
 0x1d6   : > { %v1815_v53 = vpack.c.bf16 %v1807_v36, %v1807_v36  ;;  %1787 = vst.msk [vmem:[#allocation2 + $0x22] sm:$0x1] %vm1755_vm3, %v1785_v9  ;;  %v15191_v15 = vpack.c.bf16 %v20597_v26, %v1807_v36  ;;  %v15238_v38 = vpack.c.bf16 %v1807_v36, %v20443_v44  ;;  %vm24167_vm3 = vmmov %vm24164_vm2 }
 0x1d7   : > { %v20624_v33 = vrot.slane %v1816_v25, %v20448_v14  ;;  %vm24169_vm5 = vmmov %vm24164_vm2 }
 0x1d8   : > { %v20634_v56 = vrot.slane %v1815_v53, %v20448_v14  ;;  %v20657_v63 = vrot.slane %v15191_v15, %v20448_v14  ;;  %v20667_v25 = vrot.slane %v15238_v38, %v20448_v14  ;;  %vm24171_vm6 = vmmov %vm24164_vm2 }
 0x1d9   : > { %v1864_v19 = vcombine.high %v20624_v33, %v20624_v33  ;;  %v1915_v46 = vshrl.u32 %v20624_v33, 16  ;;  %v1918_v16 = vshll.u32 %v20624_v33, 16  ;;  %v15204_v59 = vrot.slane %v20624_v33, 9  ;;  %vm24173_vm9 = vmmov %vm24164_vm2 }
 0x1da   : > { %v1856_v60 = vcombine.high %v20634_v56, %v20634_v56  ;;  %v1901_v4 = vshrl.u32 %v20634_v56, 16  ;;  %v1904_v20 = vshll.u32 %v20634_v56, 16  ;;  %v15228_v48 = vcombine.high %v20634_v56, %v20624_v33 }
 0x1db   : > { %v1917_v45 = vrot.slane %v1915_v46, 6  ;;  %v1920_v41 = vrot.slane %v1918_v16, 7  ;;  %v1924_v54 = vshll.u32 %v1864_v19, 16  ;;  %v2164_v32 = vrot.slane %v1864_v19, 7 }
 0x1dc   : > { %v1903_v23 = vrot.slane %v1901_v4, 6  ;;  %v1906_v3 = vrot.slane %v1904_v20, 7  ;;  %v1910_v6 = vshll.u32 %v1856_v60, 16  ;;  %v2160_v44 = vrot.slane %v1856_v60, 7 }
 0x1dd   : > { %v1921_v47 = vor.u32 %v1920_v41, %v1917_v45  ;;  %v1926_v43 = vrot.slane %v1924_v54, 7  ;;  %v2305_v8 = vshrl.u32 %v1856_v60, 16  ;;  %v20664_v17 = vld [vmem:[#allocation2 + $0x20] sm:$0xff]  ;;  %v2312_v34 = vshrl.u32 %v1864_v19, 16 }
 0x1de   : > { %v1907_v0 = vor.u32 %v1906_v3, %v1903_v23  ;;  %v1912_v53 = vrot.slane %v1910_v6, 7  ;;  %v1817_v30 = vpack.c.bf16 %v20664_v17, %v20664_v17  ;;  %v15239_v11 = vpack.c.bf16 %v20664_v17, %v20597_v26  ;;  %v17810_v26 = vld [vmem:[#allocation6] ss:$8 sps:$4 sm:$0xff]  }
 0x1df   : > { %v1922_v9 = vrot.slane %v1921_v47, 2  ;;  %v2307_v55 = vrot.slane %v2305_v8, 7  ;;  %v2314_v57 = vrot.slane %v2312_v34, 7  ;;  %v2056_v16 = vcombine.low %v20600_v10, %v20657_v63 }
 0x1e0   : > { %v1908_v36 = vrot.slane %v1907_v0, 2  ;;  %v15203_v15 = vrot.slane %v20634_v56, 9  ;;  %v20685_v60 = vrot.slane %v15228_v48, %v20448_v14  ;;  %v15216_v45 = vrot.slane %v1901_v4, 9  ;;  %v17827_v0 = vld [vmem:[#allocation6 + $0x94] ss:$8 sps:$4 sm:$0xff]  }
 0x1e1   : > { %v20673_v51 = vsel %vm20525_vm0, %v1922_v9, %v1926_v43  ;;  %v20689_v41 = vrot.slane %v15239_v11, %v20448_v14  ;;  %v20692_v38 = vrot.slane %v1817_v30, %v20448_v14  ;;  %v20700_v3 = vsel %vm20534_vm1, %v15204_v59, %v2164_v32  ;;  %v17815_v43 = vld [vmem:[#allocation6 + $0x14] ss:$8 sps:$4 sm:$0xff]   ;;  %v17822_v9 = vld [vmem:[#allocation6 + $0x80] ss:$8 sps:$4 sm:$0xff]  }
 0x1e2   : > { %v1913_v19 = vsel %vm20525_vm0, %v1908_v36, %v1912_v53  ;;  %v20696_v23 = vsel %vm20534_vm1, %v15203_v15, %v2160_v44  ;;  %v2308_v47 = vor.u32 %v2307_v55, %v1910_v6  ;;  %v2315_v8 = vor.u32 %v2314_v57, %v1924_v54  ;;  %v17813_v15 = vld [vmem:[#allocation6 + $0x10] ss:$8 sps:$4 sm:$0xff]  }
 0x1e3   : > { %v1938_v20 = vcombine.low %v1913_v19, %v20673_v51  ;;  %v2673_v44 = vcombine.high %v20692_v38, %v20692_v38  ;;  %v15217_v34 = vrot.slane %v1915_v46, 9  ;;  %v2675_v36 = vshrl.u32 %v20692_v38, 16 }
 0x1e4   : > { %v2678_v59 = vshll.u32 %v20692_v38, 16  ;;  %v2697_v6 = vcombine.low %v20572_v1, %v1913_v19  ;;  %v15258_v54 = vrot.slane %v20692_v38, 9  ;;  %v20721_v48 = vsel %vm20587_vm7, %v15216_v45, %v2308_v47  ;;  %v20736_v19 = vld [vmem:[#allocation2 + $0x28] sm:$0xff] }
 0x1e5   : > { %v20705_v4 = vrot.slane %v1938_v20, %v20448_v14  ;;  %v2684_v53 = vshll.u32 %v2673_v44, 16  ;;  %v2806_v55 = vrot.slane %v2673_v44, 7  ;;  %v2677_v46 = vrot.slane %v2675_v36, 6  ;;  %v17818_v20 = vld [vmem:[#allocation6 + $0x24] ss:$8 sps:$4 sm:$0xff]  }
 0x1e6   : > { %v2680_v57 = vrot.slane %v2678_v59, 7  ;;  %v2817_v30 = vcombine.low %v20613_v12, %v20696_v23  ;;  %v2176_v1 = vcombine.low %v20696_v23, %v20700_v3  ;;  %v20730_v61 = vsel %vm20587_vm7, %v15217_v34, %v2315_v8 }
 0x1e7   : > { %v1953_v32 = vcombine.low %v1945_v13, %v20705_v4  ;;  %v20734_v13 = vsel %vm20534_vm1, %v15258_v54, %v2806_v55  ;;  %v2926_v11 = vshrl.u32 %v2673_v44, 16  ;;  %v2686_v47 = vrot.slane %v2684_v53, 7 }
 0x1e8   : > { %v2681_v45 = vor.u32 %v2680_v57, %v2677_v46  ;;  %v20740_v23 = vrot.slane %v2697_v6, %v20448_v14  ;;  %v2818_v8 = vcombine.low %v20700_v3, %v20734_v13  ;;  %v20745_v34 = vrot.slane %v2817_v30, %v20448_v14 }
 0x1e9   : > { %15189 = vmatmul.mubr.msk.bf16.vlgmr.msra.gmra.mrb[8].mxu1 %vm24161_vm11, %v1953_v32  ;;  %v2928_v44 = vrot.slane %v2926_v11, 7  ;;  %v15278_v59 = vcombine.high %v20456_v18, %v20634_v56  ;;  %v15279_v6 = vcombine.high %v20624_v33, %v20692_v38  ;;  %v1818_v3 = vpack.c.bf16 %v20736_v19, %v20736_v19  ;;  %v17816_v18 = vld [vmem:[#allocation6 + $0x20] ss:$8 sps:$4 sm:$0xff]   ;;  %v17821_v56 = vld [vmem:[#allocation6 + $0x34] ss:$8 sps:$4 sm:$0xff]   ;;  %vm24181_vm11 = vmmov %vm24164_vm2 }
 0x1ea   : > { %2101 = vmatpush1.bf16.msra.mxu1 %v17810_v26  ;;  %2132 = vmatprep.mubr.bf16.mxu1 %v19802_v24  ;;  %v2940_v26 = vcombine.low %v20628_v49, %v20721_v48  ;;  %v2682_v32 = vrot.slane %v2681_v45, 2  ;;  %v20752_v54 = vrot.slane %v2818_v8, %v20448_v14  ;;  %v15289_v57 = vpack.c.bf16 %v20736_v19, %v20664_v17 }
 0x1eb   : > { %2102 = vmatprep.subr.bf16.mxu1 %v17815_v43  ;;  %v15268_v43 = vrot.slane %v2675_v36, 9  ;;  %v2929_v55 = vor.u32 %v2928_v44, %v2684_v53  ;;  %v20759_v46 = vrot.slane %v15278_v59, %v20448_v14  ;;  %v20770_v11 = vrot.slane %v15279_v6, %v20448_v14  ;;  %v17819_v6 = vld [vmem:[#allocation6 + $0x30] ss:$8 sps:$4 sm:$0xff]  }
 0x1ec   : > { %v20765_v30 = vsel %vm20525_vm0, %v2682_v32, %v2686_v47  ;;  %v3278_v36 = vrot.slane %v1818_v3, %v20448_v14  ;;  %v20783_v45 = vrot.slane %v15289_v57, %v20448_v14  ;;  %v17824_v3 = vld [vmem:[#allocation6 + $0x84] ss:$8 sps:$4 sm:$0xff]  }
 0x1ed   : > { %v2698_v53 = vcombine.low %v20673_v51, %v20765_v30  ;;  %v20777_v17 = vsel %vm20587_vm7, %v15268_v43, %v2929_v55 }
 0x1ee   : > { %2103 = vmatpush1.bf16.msra.mxu1 %v17813_v15  ;;  %v20780_v15 = vrot.slane %v2940_v26, %v20448_v14  ;;  %v2941_v47 = vcombine.low %v20730_v61, %v20777_v17  ;;  %v3281_v44 = vshrl.u32 %v3278_v36, 16  ;;  %v3284_v32 = vshll.u32 %v3278_v36, 16 }
 0x1ef   : > { %2104 = vmatprep.subr.bf16.mxu1 %v17818_v20  ;;  %v3279_v20 = vcombine.high %v3278_v36, %v3278_v36  ;;  %v20790_v51 = vrot.slane %v2698_v53, %v20448_v14  ;;  %v15338_v26 = vpack.c.bf16 %v20462_v31, %v20736_v19  ;;  %v15308_v57 = vrot.slane %v3278_v36, 9 }
 0x1f0   : > { %v20797_v43 = vrot.slane %v2941_v47, %v20448_v14  ;;  %v3283_v55 = vrot.slane %v3281_v44, 6  ;;  %v15328_v5 = vcombine.high %v20692_v38, %v3278_v36  ;;  %v3286_v8 = vrot.slane %v3284_v32, 7 }
 0x1f1   : > { %v3290_v59 = vshll.u32 %v3279_v20, 16  ;;  %v3404_v33 = vrot.slane %v3279_v20, 7  ;;  %v20803_v31 = vrot.slane %v2176_v1, %v20448_v14  ;;  %v20813_v32 = vrot.slane %v15338_v26, %v20448_v14 }
 0x1f2   : > { %2105 = vmatpush1.bf16.msra.mxu1 %v17816_v18  ;;  %v3516_v18 = vshrl.u32 %v3279_v20, 16  ;;  %v20808_v47 = vrot.slane %v15328_v5, %v20448_v14  ;;  %v3287_v38 = vor.u32 %v3286_v8, %v3283_v55  ;;  %v15377_v53 = vcombine.high %v3278_v36, %v20514_v39 }
 0x1f3   : > { %2106 = vmatprep.subr.bf16.mxu1 %v17821_v56  ;;  %v3405_v56 = vsel %vm20534_vm1, %v15308_v57, %v3404_v33  ;;  %v3292_v8 = vrot.slane %v3290_v59, 7  ;;  %v3755_v33 = vcombine.low %v20689_v41, %v20813_v32  ;;  %v18005_v32 = vld [vmem:[#allocation6 + $0x450] ss:$8 sps:$4 sm:$0xff]  }
 0x1f4   : > { %v3415_v1 = vcombine.low %v20734_v13, %v3405_v56  ;;  %v3518_v2 = vrot.slane %v3516_v18, 7  ;;  %v3646_v20 = vcombine.low %v20685_v60, %v20808_v47  ;;  %v3989_v5 = vcombine.low %v3405_v56, %v20649_v22 }
 0x1f5   : > { %v3288_v19 = vrot.slane %v3287_v38, 2  ;;  %v20823_v26 = vrot.slane %v15377_v53, %v20448_v14 }
 0x1f6   : > { %2107 = vmatpush1.bf16.msra.mxu1 %v17819_v6  ;;  %v20826_v36 = vrot.slane %v3415_v1, %v20448_v14  ;;  %v15318_v6 = vrot.slane %v3281_v44, 9  ;;  %v3519_v13 = vor.u32 %v3518_v2, %v3290_v59  ;;  %v20829_v55 = vrot.slane %v3989_v5, %v20448_v14  ;;  %v17825_v44 = vld [vmem:[#allocation6 + $0x90] ss:$8 sps:$4 sm:$0xff]   ;;  %v17830_v2 = vld [vmem:[#allocation6 + $0xa4] ss:$8 sps:$4 sm:$0xff]  }
 0x1f7   : > { %2235 = vmatprep.subr.bf16.mxu1 %v17824_v3  ;;  %v2327_v3 = vcombine.low %v20721_v48, %v20730_v61  ;;  %v3293_v57 = vsel %vm20525_vm0, %v3288_v19, %v3292_v8  ;;  %v4220_v53 = vcombine.low %v20770_v11, %v20823_v26  ;;  %v17828_v1 = vld [vmem:[#allocation6 + $0xa0] ss:$8 sps:$4 sm:$0xff]   ;;  %v17833_v5 = vld [vmem:[#allocation6 + $0xb4] ss:$8 sps:$4 sm:$0xff]  }
 0x1f8   : > { %v3303_v59 = vcombine.low %v20765_v30, %v3293_v57  ;;  %v3423_v10 = vcombine.low %v20803_v31, %v20826_v36  ;;  %v3877_v61 = vcombine.low %v3293_v57, %v20654_v37  ;;  %v2153_v30 = vsel %vm20534_vm1, %v15201_v27, %v2152_v52  ;;  %v17831_v57 = vld [vmem:[#allocation6 + $0xb0] ss:$8 sps:$4 sm:$0xff]  }
 0x1f9   : > { %15200 = vmatmul.mubr.msk.bf16.vlgmr.msra.gmra.mrb[8].mxu1 %vm24162_vm15, %v2056_v16  ;;  %v3520_v16 = vsel %vm20587_vm7, %v15318_v6, %v3519_v13  ;;  %v2175_v52 = vcombine.low %v2153_v30, %v20613_v12  ;;  %v17839_v12 = vld [vmem:[#allocation6 + $0xd4] ss:$8 sps:$4 sm:$0xff]   ;;  %vm24182_vm15 = vmmov %vm24164_vm2 }
 0x1fa   : > { %2236 = vmatpush1.bf16.msra.mxu1 %v17822_v9  ;;  %2267 = vmatprep.mubr.bf16.mxu1 %v19802_v24  ;;  %v3530_v48 = vcombine.low %v20777_v17, %v3520_v16  ;;  %v3997_v9 = vcombine.low %v20752_v54, %v20829_v55  ;;  %v4104_v19 = vcombine.low %v3520_v16, %v20662_v40  ;;  %v18029_v55 = vld [vmem:[#allocation6 + $0x4d0] ss:$8 sps:$4 sm:$0xff]  }
 0x1fb   : > { %2237 = vmatprep.subr.bf16.mxu1 %v17827_v0  ;;  %v20859_v18 = vrot.slane %v3303_v59, %v20448_v14  ;;  %v20862_v0 = vrot.slane %v2327_v3, %v20448_v14  ;;  %v20868_v38 = vrot.slane %v3877_v61, %v20448_v14  ;;  %v2291_v3 = vshrl.u32 %v20466_v7, 16 }
 0x1fc   : > { %v20865_v17 = vrot.slane %v3530_v48, %v20448_v14  ;;  %v20871_v56 = vrot.slane %v4104_v19, %v20448_v14  ;;  %v2183_v59 = vrot.slane %v2175_v52, %v20448_v14  ;;  %v15214_v61 = vrot.slane %v1873_v21, 9  ;;  %v17843_v21 = vld [vmem:[#allocation6 + $0xf0] ss:$8 sps:$4 sm:$0xff]  }
 0x1fd   : > { %v3311_v27 = vcombine.low %v20705_v4, %v20859_v18  ;;  %v3885_v6 = vcombine.low %v20790_v51, %v20868_v38  ;;  %v2293_v16 = vrot.slane %v2291_v3, 7  ;;  %v24163_v19 = vshll.u32 %v20466_v7, 16  ;;  %v17840_v3 = vld [vmem:[#allocation6 + $0xe0] ss:$8 sps:$4 sm:$0xff]   ;;  %v17848_v7 = vld [vmem:[#allocation6 + $0x104] ss:$8 sps:$4 sm:$0xff]  }
 0x1fe   : > { %2238 = vmatpush1.bf16.msra.mxu1 %v17825_v44  ;;  %v3538_v8 = vcombine.low %v20862_v0, %v20865_v17  ;;  %v4112_v13 = vcombine.low %v20797_v43, %v20871_v56  ;;  %v17836_v44 = vld [vmem:[#allocation6 + $0xc4] ss:$8 sps:$4 sm:$0xff]   ;;  %v2191_v48 = vcombine.low %v2183_v59, %v20803_v31  ;;  %v17846_v59 = vld [vmem:[#allocation6 + $0x100] ss:$8 sps:$4 sm:$0xff]   ;;  %v17957_v4 = vld [vmem:[#allocation6 + $0x350] ss:$8 sps:$4 sm:$0xff]  }
 0x1ff   : > { %2239 = vmatprep.subr.bf16.mxu1 %v17830_v2  ;;  %v17834_v2 = vld [vmem:[#allocation6 + $0xc0] ss:$8 sps:$4 sm:$0xff]   ;;  %v2294_v30 = vor.u32 %v2293_v16, %v24163_v19  ;;  %v17855_v19 = vld [vmem:[#allocation6 + $0x130] ss:$8 sps:$4 sm:$0xff]   ;;  %v17971_v31 = vld [vmem:[#allocation6 + $0x394] ss:$8 sps:$4 sm:$0xff]  }
 0x200   : > { %v18017_v38 = vld [vmem:[#allocation6 + $0x490] ss:$8 sps:$4 sm:$0xff]   ;;  %v18043_v56 = vld [vmem:[#allocation6 + $0x514] ss:$8 sps:$4 sm:$0xff]  }
 0x201   : > { %v2295_v52 = vsel %vm20587_vm7, %v15214_v61, %v2294_v30  ;;  %v17857_v61 = vld [vmem:[#allocation6 + $0x134] ss:$8 sps:$4 sm:$0xff]   ;;  %v17860_v30 = vld [vmem:[#allocation6 + $0x144] ss:$8 sps:$4 sm:$0xff]  }
 0x202   : > { %2240 = vmatpush1.bf16.msra.mxu1 %v17828_v1  ;;  %v17837_v1 = vld [vmem:[#allocation6 + $0xd0] ss:$8 sps:$4 sm:$0xff]   ;;  %v2326_v58 = vcombine.low %v2295_v52, %v20628_v49  ;;  %v17852_v49 = vld [vmem:[#allocation6 + $0x120] ss:$8 sps:$4 sm:$0xff]   ;;  %v24166_v52 = vcombine.low %v20631_v50, %v20685_v60  ;;  %v24168_v50 = vcombine.low %v20667_v25, %v20689_v41  ;;  %v24170_v25 = vcombine.low %v20740_v23, %v20790_v51  ;;  %v17995_v60 = vld [vmem:[#allocation6 + $0x414] ss:$8 sps:$4 sm:$0xff]  }
 0x203   : > { %2241 = vmatprep.subr.bf16.mxu1 %v17833_v5  ;;  %v17842_v5 = vld [vmem:[#allocation6 + $0xe4] ss:$8 sps:$4 sm:$0xff]   ;;  %v24172_v23 = vcombine.low %v20745_v34, %v20752_v54  ;;  %v24174_v34 = vcombine.low %v20780_v15, %v20797_v43  ;;  %v24176_v15 = vcombine.low %v20759_v46, %v20770_v11  ;;  %v24178_v46 = vcombine.low %v20657_v63, %v20783_v45  ;;  %v17945_v63 = vld [vmem:[#allocation6 + $0x310] ss:$8 sps:$4 sm:$0xff]   ;;  %v18007_v41 = vld [vmem:[#allocation6 + $0x454] ss:$8 sps:$4 sm:$0xff]  }
 0x204   : > { %v18019_v51 = vld [vmem:[#allocation6 + $0x494] ss:$8 sps:$4 sm:$0xff]   ;;  %v18038_v43 = vld [vmem:[#allocation6 + $0x500] ss:$8 sps:$4 sm:$0xff]  }
 0x205   : > { %v18031_v54 = vld [vmem:[#allocation6 + $0x4d4] ss:$8 sps:$4 sm:$0xff]  }
 0x206   : > { %2242 = vmatpush1.bf16.msra.mxu1 %v17831_v57  ;;  %v17845_v57 = vld [vmem:[#allocation6 + $0xf4] ss:$8 sps:$4 sm:$0xff]  }
 0x207   : > { %2386 = vmatprep.subr.bf16.mxu1 %v17836_v44  ;;  %v2334_v44 = vrot.slane %v2326_v58, %v20448_v14  ;;  %v17864_v58 = vld [vmem:[#allocation6 + $0x160] ss:$8 sps:$4 sm:$0xff]  }
 0x209   : > { %15213 = vmatmul.mubr.msk.bf16.vlgmr.msra.gmra.mrb[8].mxu1 %vm24164_vm2, %v2191_v48  ;;  %v2342_v16 = vcombine.low %v2334_v44, %v20862_v0  ;;  %v17854_v48 = vld [vmem:[#allocation6 + $0x124] ss:$8 sps:$4 sm:$0xff]   ;;  %v17983_v0 = vld [vmem:[#allocation6 + $0x3d4] ss:$8 sps:$4 sm:$0xff]  }
 0x20a   : > { %2387 = vmatpush1.bf16.msra.mxu1 %v17834_v2  ;;  %2418 = vmatprep.mubr.bf16.mxu1 %v19802_v24  ;;  %v17851_v2 = vld [vmem:[#allocation6 + $0x114] ss:$8 sps:$4 sm:$0xff]   ;;  %v17872_v44 = vld [vmem:[#allocation6 + $0x184] ss:$8 sps:$4 sm:$0xff]  }
 0x20b   : > { %2388 = vmatprep.subr.bf16.mxu1 %v17839_v12  ;;  %v17849_v12 = vld [vmem:[#allocation6 + $0x110] ss:$8 sps:$4 sm:$0xff]  }
 0x20e   : > { %2389 = vmatpush1.bf16.msra.mxu1 %v17837_v1  ;;  %v17858_v1 = vld [vmem:[#allocation6 + $0x140] ss:$8 sps:$4 sm:$0xff]  }
 0x20f   : > { %2390 = vmatprep.subr.bf16.mxu1 %v17842_v5  ;;  %v17863_v5 = vld [vmem:[#allocation6 + $0x154] ss:$8 sps:$4 sm:$0xff]  }
 0x212   : > { %2391 = vmatpush1.bf16.msra.mxu1 %v17840_v3  ;;  %v17861_v3 = vld [vmem:[#allocation6 + $0x150] ss:$8 sps:$4 sm:$0xff]  }
 0x213   : > { %2392 = vmatprep.subr.bf16.mxu1 %v17845_v57  ;;  %v17866_v57 = vld [vmem:[#allocation6 + $0x164] ss:$8 sps:$4 sm:$0xff]  }
 0x216   : > { %2393 = vmatpush1.bf16.msra.mxu1 %v17843_v21  ;;  %v17869_v21 = vld [vmem:[#allocation6 + $0x174] ss:$8 sps:$4 sm:$0xff]  }
 0x217   : > { %2502 = vmatprep.subr.bf16.mxu1 %v17848_v7  ;;  %v17867_v7 = vld [vmem:[#allocation6 + $0x170] ss:$8 sps:$4 sm:$0xff]  }
 0x219   : > { %15226 = vmatmul.mubr.msk.bf16.vlgmr.msra.gmra.mrb[8].mxu1 %vm24165_vm14, %v2342_v16  ;;  %v17873_v16 = vld [vmem:[#allocation6 + $0x190] ss:$8 sps:$4 sm:$0xff]   ;;  %vm24183_vm14 = vmmov %vm24164_vm2 }
 0x21a   : > { %2503 = vmatpush1.bf16.msra.mxu1 %v17846_v59  ;;  %2534 = vmatprep.mubr.bf16.mxu1 %v19802_v24  ;;  %v17870_v59 = vld [vmem:[#allocation6 + $0x180] ss:$8 sps:$4 sm:$0xff]  }
 0x21b   : > { %2504 = vmatprep.subr.bf16.mxu1 %v17851_v2  ;;  %v17875_v2 = vld [vmem:[#allocation6 + $0x194] ss:$8 sps:$4 sm:$0xff]  }
 0x21e   : > { %2505 = vmatpush1.bf16.msra.mxu1 %v17849_v12  ;;  %v17878_v12 = vld [vmem:[#allocation6 + $0x1a4] ss:$8 sps:$4 sm:$0xff]  }
 0x21f   : > { %2506 = vmatprep.subr.bf16.mxu1 %v17854_v48  ;;  %v17876_v48 = vld [vmem:[#allocation6 + $0x1a0] ss:$8 sps:$4 sm:$0xff]  }
 0x222   : > { %2507 = vmatpush1.bf16.msra.mxu1 %v17852_v49  ;;  %v17881_v49 = vld [vmem:[#allocation6 + $0x1b4] ss:$8 sps:$4 sm:$0xff]  }
 0x223   : > { %2508 = vmatprep.subr.bf16.mxu1 %v17857_v61  ;;  %v17879_v61 = vld [vmem:[#allocation6 + $0x1b0] ss:$8 sps:$4 sm:$0xff]  }
 0x226   : > { %2509 = vmatpush1.bf16.msra.mxu1 %v17855_v19  ;;  %v17884_v19 = vld [vmem:[#allocation6 + $0x1c4] ss:$8 sps:$4 sm:$0xff]  }
 0x227   : > { %2619 = vmatprep.subr.bf16.mxu1 %v17860_v30  ;;  %v17882_v30 = vld [vmem:[#allocation6 + $0x1c0] ss:$8 sps:$4 sm:$0xff]  }
 0x229   : > { %15237 = vmatmul.mubr.msk.bf16.vlgmr.msra.gmra.mrb[8].mxu1 %vm24167_vm3, %v24166_v52  ;;  %v17890_v52 = vld [vmem:[#allocation6 + $0x1e4] ss:$8 sps:$4 sm:$0xff]   ;;  %vm24184_vm3 = vmmov %vm24164_vm2 }
 0x22a   : > { %2620 = vmatpush1.bf16.msra.mxu1 %v17858_v1  ;;  %2651 = vmatprep.mubr.bf16.mxu1 %v19802_v24  ;;  %v17887_v1 = vld [vmem:[#allocation6 + $0x1d4] ss:$8 sps:$4 sm:$0xff]  }
 0x22b   : > { %2621 = vmatprep.subr.bf16.mxu1 %v17863_v5  ;;  %v17885_v5 = vld [vmem:[#allocation6 + $0x1d0] ss:$8 sps:$4 sm:$0xff]  }
 0x22e   : > { %2622 = vmatpush1.bf16.msra.mxu1 %v17861_v3  ;;  %v17888_v3 = vld [vmem:[#allocation6 + $0x1e0] ss:$8 sps:$4 sm:$0xff]  }
 0x22f   : > { %2623 = vmatprep.subr.bf16.mxu1 %v17866_v57  ;;  %v17893_v57 = vld [vmem:[#allocation6 + $0x1f4] ss:$8 sps:$4 sm:$0xff]  }
 0x232   : > { %2624 = vmatpush1.bf16.msra.mxu1 %v17864_v58  ;;  %v17891_v58 = vld [vmem:[#allocation6 + $0x1f0] ss:$8 sps:$4 sm:$0xff]  }
 0x233   : > { %2625 = vmatprep.subr.bf16.mxu1 %v17869_v21  ;;  %v17896_v21 = vld [vmem:[#allocation6 + $0x204] ss:$8 sps:$4 sm:$0xff]  }
 0x236   : > { %2626 = vmatpush1.bf16.msra.mxu1 %v17867_v7  ;;  %v17894_v7 = vld [vmem:[#allocation6 + $0x200] ss:$8 sps:$4 sm:$0xff]  }
 0x237   : > { %2757 = vmatprep.subr.bf16.mxu1 %v17872_v44  ;;  %v17899_v44 = vld [vmem:[#allocation6 + $0x214] ss:$8 sps:$4 sm:$0xff]  }
 0x239   : > { %15248 = vmatmul.mubr.msk.bf16.vlgmr.msra.gmra.mrb[8].mxu1 %vm24169_vm5, %v24168_v50  ;;  %v17900_v50 = vld [vmem:[#allocation6 + $0x220] ss:$8 sps:$4 sm:$0xff]   ;;  %vm24185_vm5 = vmmov %vm24164_vm2 }
 0x23a   : > { %2758 = vmatpush1.bf16.msra.mxu1 %v17870_v59  ;;  %2789 = vmatprep.mubr.bf16.mxu1 %v19802_v24  ;;  %v17897_v59 = vld [vmem:[#allocation6 + $0x210] ss:$8 sps:$4 sm:$0xff]  }
 0x23b   : > { %2759 = vmatprep.subr.bf16.mxu1 %v17875_v2  ;;  %v17902_v2 = vld [vmem:[#allocation6 + $0x224] ss:$8 sps:$4 sm:$0xff]  }
 0x23e   : > { %2760 = vmatpush1.bf16.msra.mxu1 %v17873_v16  ;;  %v17905_v16 = vld [vmem:[#allocation6 + $0x234] ss:$8 sps:$4 sm:$0xff]  }
 0x23f   : > { %2761 = vmatprep.subr.bf16.mxu1 %v17878_v12  ;;  %v17903_v12 = vld [vmem:[#allocation6 + $0x230] ss:$8 sps:$4 sm:$0xff]  }
 0x242   : > { %2762 = vmatpush1.bf16.msra.mxu1 %v17876_v48  ;;  %v17908_v48 = vld [vmem:[#allocation6 + $0x244] ss:$8 sps:$4 sm:$0xff]  }
 0x243   : > { %2763 = vmatprep.subr.bf16.mxu1 %v17881_v49  ;;  %v17906_v49 = vld [vmem:[#allocation6 + $0x240] ss:$8 sps:$4 sm:$0xff]  }
 0x246   : > { %2764 = vmatpush1.bf16.msra.mxu1 %v17879_v61  ;;  %v17911_v61 = vld [vmem:[#allocation6 + $0x254] ss:$8 sps:$4 sm:$0xff]  }
 0x247   : > { %2877 = vmatprep.subr.bf16.mxu1 %v17884_v19  ;;  %v17909_v19 = vld [vmem:[#allocation6 + $0x250] ss:$8 sps:$4 sm:$0xff]  }
 0x249   : > { %15257 = vmatmul.mubr.msk.bf16.vlgmr.msra.gmra.mrb[8].mxu1 %vm24171_vm6, %v24170_v25  ;;  %v17917_v25 = vld [vmem:[#allocation6 + $0x274] ss:$8 sps:$4 sm:$0xff]   ;;  %vm24186_vm6 = vmmov %vm24164_vm2 }
 0x24a   : > { %2878 = vmatpush1.bf16.msra.mxu1 %v17882_v30  ;;  %2909 = vmatprep.mubr.bf16.mxu1 %v19802_v24  ;;  %v17914_v30 = vld [vmem:[#allocation6 + $0x264] ss:$8 sps:$4 sm:$0xff]  }
 0x24b   : > { %2879 = vmatprep.subr.bf16.mxu1 %v17887_v1  ;;  %v17912_v1 = vld [vmem:[#allocation6 + $0x260] ss:$8 sps:$4 sm:$0xff]  }
 0x24e   : > { %2880 = vmatpush1.bf16.msra.mxu1 %v17885_v5  ;;  %v17915_v5 = vld [vmem:[#allocation6 + $0x270] ss:$8 sps:$4 sm:$0xff]  }
 0x24f   : > { %2881 = vmatprep.subr.bf16.mxu1 %v17890_v52  ;;  %v17920_v52 = vld [vmem:[#allocation6 + $0x284] ss:$8 sps:$4 sm:$0xff]  }
 0x252   : > { %2882 = vmatpush1.bf16.msra.mxu1 %v17888_v3  ;;  %v17918_v3 = vld [vmem:[#allocation6 + $0x280] ss:$8 sps:$4 sm:$0xff]  }
 0x253   : > { %2883 = vmatprep.subr.bf16.mxu1 %v17893_v57  ;;  %v17923_v57 = vld [vmem:[#allocation6 + $0x294] ss:$8 sps:$4 sm:$0xff]  }
 0x256   : > { %2884 = vmatpush1.bf16.msra.mxu1 %v17891_v58  ;;  %v17921_v58 = vld [vmem:[#allocation6 + $0x290] ss:$8 sps:$4 sm:$0xff]  }
 0x257   : > { %3000 = vmatprep.subr.bf16.mxu1 %v17896_v21  ;;  %v17926_v21 = vld [vmem:[#allocation6 + $0x2a4] ss:$8 sps:$4 sm:$0xff]  }
 0x259   : > { %15267 = vmatmul.mubr.msk.bf16.vlgmr.msra.gmra.mrb[8].mxu1 %vm24173_vm9, %v24172_v23  ;;  %v17927_v23 = vld [vmem:[#allocation6 + $0x2b0] ss:$8 sps:$4 sm:$0xff]   ;;  %vm24187_vm9 = vmmov %vm24164_vm2 }
 0x25a   : > { %3001 = vmatpush1.bf16.msra.mxu1 %v17894_v7  ;;  %3032 = vmatprep.mubr.bf16.mxu1 %v19802_v24  ;;  %v17924_v7 = vld [vmem:[#allocation6 + $0x2a0] ss:$8 sps:$4 sm:$0xff]  }
 0x25b   : > { %3002 = vmatprep.subr.bf16.mxu1 %v17899_v44  ;;  %v17929_v44 = vld [vmem:[#allocation6 + $0x2b4] ss:$8 sps:$4 sm:$0xff]  }
 0x25e   : > { %3003 = vmatpush1.bf16.msra.mxu1 %v17897_v59  ;;  %v17932_v59 = vld [vmem:[#allocation6 + $0x2c4] ss:$8 sps:$4 sm:$0xff]  }
 0x25f   : > { %3004 = vmatprep.subr.bf16.mxu1 %v17902_v2  ;;  %v17930_v2 = vld [vmem:[#allocation6 + $0x2c0] ss:$8 sps:$4 sm:$0xff]  }
 0x262   : > { %3005 = vmatpush1.bf16.msra.mxu1 %v17900_v50  ;;  %v17935_v50 = vld [vmem:[#allocation6 + $0x2d4] ss:$8 sps:$4 sm:$0xff]  }
 0x263   : > { %3006 = vmatprep.subr.bf16.mxu1 %v17905_v16  ;;  %v17933_v16 = vld [vmem:[#allocation6 + $0x2d0] ss:$8 sps:$4 sm:$0xff]  }
 0x266   : > { %3007 = vmatpush1.bf16.msra.mxu1 %v17903_v12  ;;  %v17938_v12 = vld [vmem:[#allocation6 + $0x2e4] ss:$8 sps:$4 sm:$0xff]  }
 0x267   : > { %3116 = vmatprep.subr.bf16.mxu1 %v17908_v48  ;;  %v17936_v48 = vld [vmem:[#allocation6 + $0x2e0] ss:$8 sps:$4 sm:$0xff]  }
 0x269   : > { %15277 = vmatmul.mubr.msk.bf16.vlgmr.msra.gmra.mrb[8].mxu1 %vm24175_vm10, %v24174_v34  ;;  %v17944_v34 = vld [vmem:[#allocation6 + $0x304] ss:$8 sps:$4 sm:$0xff]   ;;  %vm24188_vm10 = vmmov %vm24164_vm2 }
 0x26a   : > { %3117 = vmatpush1.bf16.msra.mxu1 %v17906_v49  ;;  %3148 = vmatprep.mubr.bf16.mxu1 %v19802_v24  ;;  %v17941_v49 = vld [vmem:[#allocation6 + $0x2f4] ss:$8 sps:$4 sm:$0xff]  }
 0x26b   : > { %3118 = vmatprep.subr.bf16.mxu1 %v17911_v61  ;;  %v17939_v61 = vld [vmem:[#allocation6 + $0x2f0] ss:$8 sps:$4 sm:$0xff]  }
 0x26e   : > { %3119 = vmatpush1.bf16.msra.mxu1 %v17909_v19  ;;  %v17942_v19 = vld [vmem:[#allocation6 + $0x300] ss:$8 sps:$4 sm:$0xff]  }
 0x26f   : > { %3120 = vmatprep.subr.bf16.mxu1 %v17914_v30  ;;  %v17947_v30 = vld [vmem:[#allocation6 + $0x314] ss:$8 sps:$4 sm:$0xff]  }
 0x272   : > { %3121 = vmatpush1.bf16.msra.mxu1 %v17912_v1  ;;  %v17950_v1 = vld [vmem:[#allocation6 + $0x324] ss:$8 sps:$4 sm:$0xff]  }
 0x273   : > { %3122 = vmatprep.subr.bf16.mxu1 %v17917_v25  ;;  %v17948_v25 = vld [vmem:[#allocation6 + $0x320] ss:$8 sps:$4 sm:$0xff]  }
 0x276   : > { %3123 = vmatpush1.bf16.msra.mxu1 %v17915_v5  ;;  %v17953_v5 = vld [vmem:[#allocation6 + $0x334] ss:$8 sps:$4 sm:$0xff]  }
 0x277   : > { %3225 = vmatprep.subr.bf16.mxu1 %v17920_v52  ;;  %v17951_v52 = vld [vmem:[#allocation6 + $0x330] ss:$8 sps:$4 sm:$0xff]  }
 0x279   : > { %15288 = vmatmul.mubr.msk.bf16.vlgmr.msra.gmra.mrb[8].mxu1 %vm24177_vm12, %v24176_v15  ;;  %v17959_v15 = vld [vmem:[#allocation6 + $0x354] ss:$8 sps:$4 sm:$0xff]  }
 0x27a   : > { %3226 = vmatpush1.bf16.msra.mxu1 %v17918_v3  ;;  %3257 = vmatprep.mubr.bf16.mxu1 %v19802_v24  ;;  %v17956_v3 = vld [vmem:[#allocation6 + $0x344] ss:$8 sps:$4 sm:$0xff]  }
 0x27b   : > { %3227 = vmatprep.subr.bf16.mxu1 %v17923_v57  ;;  %v17954_v57 = vld [vmem:[#allocation6 + $0x340] ss:$8 sps:$4 sm:$0xff]  }
 0x27e   : > { %3228 = vmatpush1.bf16.msra.mxu1 %v17921_v58  ;;  %v17960_v58 = vld [vmem:[#allocation6 + $0x360] ss:$8 sps:$4 sm:$0xff]  }
 0x27f   : > { %3229 = vmatprep.subr.bf16.mxu1 %v17926_v21  ;;  %v17965_v21 = vld [vmem:[#allocation6 + $0x374] ss:$8 sps:$4 sm:$0xff]  }
 0x282   : > { %3230 = vmatpush1.bf16.msra.mxu1 %v17924_v7  ;;  %v17963_v7 = vld [vmem:[#allocation6 + $0x370] ss:$8 sps:$4 sm:$0xff]  }
 0x283   : > { %3231 = vmatprep.subr.bf16.mxu1 %v17929_v44  ;;  %v17968_v44 = vld [vmem:[#allocation6 + $0x384] ss:$8 sps:$4 sm:$0xff]  }
 0x286   : > { %3232 = vmatpush1.bf16.msra.mxu1 %v17927_v23  ;;  %v17966_v23 = vld [vmem:[#allocation6 + $0x380] ss:$8 sps:$4 sm:$0xff]  }
 0x287   : > { %3355 = vmatprep.subr.bf16.mxu1 %v17932_v59  ;;  %v17974_v59 = vld [vmem:[#allocation6 + $0x3a4] ss:$8 sps:$4 sm:$0xff]  }
 0x289   : > { %15298 = vmatmul.mubr.msk.bf16.vlgmr.msra.gmra.mrb[8].mxu1 %vm24179_vm13, %v24178_v46  ;;  %v17975_v46 = vld [vmem:[#allocation6 + $0x3b0] ss:$8 sps:$4 sm:$0xff]   ;;  %vm4905_vm13 = vcmask 1043456  }
 0x28a   : > { %3356 = vmatpush1.bf16.msra.mxu1 %v17930_v2  ;;  %3387 = vmatprep.mubr.bf16.mxu1 %v19802_v24  ;;  %v17972_v2 = vld [vmem:[#allocation6 + $0x3a0] ss:$8 sps:$4 sm:$0xff]  }
 0x28b   : > { %3357 = vmatprep.subr.bf16.mxu1 %v17935_v50  ;;  %v17977_v50 = vld [vmem:[#allocation6 + $0x3b4] ss:$8 sps:$4 sm:$0xff]  }
 0x28e   : > { %3358 = vmatpush1.bf16.msra.mxu1 %v17933_v16  ;;  %v17980_v16 = vld [vmem:[#allocation6 + $0x3c4] ss:$8 sps:$4 sm:$0xff]  }
 0x28f   : > { %3359 = vmatprep.subr.bf16.mxu1 %v17938_v12  ;;  %v17978_v12 = vld [vmem:[#allocation6 + $0x3c0] ss:$8 sps:$4 sm:$0xff]  }
 0x292   : > { %3360 = vmatpush1.bf16.msra.mxu1 %v17936_v48  ;;  %v17986_v48 = vld [vmem:[#allocation6 + $0x3e4] ss:$8 sps:$4 sm:$0xff]  }
 0x293   : > { %3361 = vmatprep.subr.bf16.mxu1 %v17941_v49  ;;  %v17984_v49 = vld [vmem:[#allocation6 + $0x3e0] ss:$8 sps:$4 sm:$0xff]  }
 0x296   : > { %3362 = vmatpush1.bf16.msra.mxu1 %v17939_v61  ;;  %v17989_v61 = vld [vmem:[#allocation6 + $0x3f4] ss:$8 sps:$4 sm:$0xff]  }
 0x297   : > { %3467 = vmatprep.subr.bf16.mxu1 %v17944_v34  ;;  %v17987_v34 = vld [vmem:[#allocation6 + $0x3f0] ss:$8 sps:$4 sm:$0xff]  }
 0x299   : > { %15307 = vmatmul.mubr.msk.bf16.vlgmr.msra.gmra.mrb[8].mxu1 %vm24180_vm8, %v3311_v27  ;;  %v17962_v27 = vld [vmem:[#allocation6 + $0x364] ss:$8 sps:$4 sm:$0xff]   ;;  %vm4906_vm8 = vcmask 523268  }
 0x29a   : > { %3468 = vmatpush1.bf16.msra.mxu1 %v17942_v19  ;;  %3499 = vmatprep.mubr.bf16.mxu1 %v19802_v24  ;;  %v17992_v19 = vld [vmem:[#allocation6 + $0x404] ss:$8 sps:$4 sm:$0xff]  }
 0x29b   : > { %3469 = vmatprep.subr.bf16.mxu1 %v17947_v30  ;;  %v17990_v30 = vld [vmem:[#allocation6 + $0x400] ss:$8 sps:$4 sm:$0xff]  }
 0x29e   : > { %3470 = vmatpush1.bf16.msra.mxu1 %v17945_v63  ;;  %v17998_v63 = vld [vmem:[#allocation6 + $0x424] ss:$8 sps:$4 sm:$0xff]  }
 0x29f   : > { %3471 = vmatprep.subr.bf16.mxu1 %v17950_v1  ;;  %v17996_v1 = vld [vmem:[#allocation6 + $0x420] ss:$8 sps:$4 sm:$0xff]  }
 0x2a2   : > { %3472 = vmatpush1.bf16.msra.mxu1 %v17948_v25  ;;  %v18001_v25 = vld [vmem:[#allocation6 + $0x434] ss:$8 sps:$4 sm:$0xff]  }
 0x2a3   : > { %3473 = vmatprep.subr.bf16.mxu1 %v17953_v5  ;;  %v17999_v5 = vld [vmem:[#allocation6 + $0x430] ss:$8 sps:$4 sm:$0xff]  }
 0x2a6   : > { %3474 = vmatpush1.bf16.msra.mxu1 %v17951_v52  ;;  %v18004_v52 = vld [vmem:[#allocation6 + $0x444] ss:$8 sps:$4 sm:$0xff]  }
 0x2a7   : > { %3582 = vmatprep.subr.bf16.mxu1 %v17956_v3  ;;  %v18002_v3 = vld [vmem:[#allocation6 + $0x440] ss:$8 sps:$4 sm:$0xff]  }
 0x2a9   : > { %15317 = vmatmul.mubr.msk.bf16.vlgmr.msra.gmra.mrb[8].mxu1 %vm24181_vm11, %v3423_v10  ;;  %v17969_v10 = vld [vmem:[#allocation6 + $0x390] ss:$8 sps:$4 sm:$0xff]   ;;  %vm4907_vm11 = vmor %vm4906_vm8, %vm4905_vm13 }
 0x2aa   : > { %3583 = vmatpush1.bf16.msra.mxu1 %v17954_v57  ;;  %3614 = vmatprep.mubr.bf16.mxu1 %v19802_v24  ;;  %v18008_v57 = vld [vmem:[#allocation6 + $0x460] ss:$8 sps:$4 sm:$0xff]  }
 0x2ab   : > { %3584 = vmatprep.subr.bf16.mxu1 %v17959_v15  ;;  %v18013_v15 = vld [vmem:[#allocation6 + $0x474] ss:$8 sps:$4 sm:$0xff]  }
 0x2ae   : > { %3585 = vmatpush1.bf16.msra.mxu1 %v17957_v4  ;;  %v18011_v4 = vld [vmem:[#allocation6 + $0x470] ss:$8 sps:$4 sm:$0xff]  }
 0x2af   : > { %3586 = vmatprep.subr.bf16.mxu1 %v17962_v27  ;;  %v18016_v27 = vld [vmem:[#allocation6 + $0x484] ss:$8 sps:$4 sm:$0xff]  }
 0x2b2   : > { %3587 = vmatpush1.bf16.msra.mxu1 %v17960_v58  ;;  %v18014_v58 = vld [vmem:[#allocation6 + $0x480] ss:$8 sps:$4 sm:$0xff]  }
 0x2b3   : > { %3588 = vmatprep.subr.bf16.mxu1 %v17965_v21  ;;  %v18020_v21 = vld [vmem:[#allocation6 + $0x4a0] ss:$8 sps:$4 sm:$0xff]  }
 0x2b6   : > { %3589 = vmatpush1.bf16.msra.mxu1 %v17963_v7  ;;  %v18025_v7 = vld [vmem:[#allocation6 + $0x4b4] ss:$8 sps:$4 sm:$0xff]  }
 0x2b7   : > { %3690 = vmatprep.subr.bf16.mxu1 %v17968_v44  ;;  %v18023_v44 = vld [vmem:[#allocation6 + $0x4b0] ss:$8 sps:$4 sm:$0xff]  }
 0x2b9   : > { %15327 = vmatmul.mubr.msk.bf16.vlgmr.msra.gmra.mrb[8].mxu1 %vm24182_vm15, %v3538_v8  ;;  %v17981_v8 = vld [vmem:[#allocation6 + $0x3d0] ss:$8 sps:$4 sm:$0xff]  }
 0x2ba   : > { %3691 = vmatpush1.bf16.msra.mxu1 %v17966_v23  ;;  %3722 = vmatprep.mubr.bf16.mxu1 %v19802_v24  ;;  %v18028_v23 = vld [vmem:[#allocation6 + $0x4c4] ss:$8 sps:$4 sm:$0xff]  }
 0x2bb   : > { %3692 = vmatprep.subr.bf16.mxu1 %v17971_v31  ;;  %v18026_v31 = vld [vmem:[#allocation6 + $0x4c0] ss:$8 sps:$4 sm:$0xff]  }
 0x2be   : > { %3693 = vmatpush1.bf16.msra.mxu1 %v17969_v10  ;;  %v18032_v10 = vld [vmem:[#allocation6 + $0x4e0] ss:$8 sps:$4 sm:$0xff]  }
 0x2bf   : > { %3694 = vmatprep.subr.bf16.mxu1 %v17974_v59  ;;  %v18037_v59 = vld [vmem:[#allocation6 + $0x4f4] ss:$8 sps:$4 sm:$0xff]  }
 0x2c2   : > { %3695 = vmatpush1.bf16.msra.mxu1 %v17972_v2  ;;  %v1812_v2 = vld [vmem:[#allocation2 + $0x38] sm:$0xff] }
 0x2c3   : > { %3696 = vmatprep.subr.bf16.mxu1 %v17977_v50  ;;  %v18035_v50 = vld [vmem:[#allocation6 + $0x4f0] ss:$8 sps:$4 sm:$0xff]  }
 0x2c6   : > { %3697 = vmatpush1.bf16.msra.mxu1 %v17975_v46  ;;  %v18040_v46 = vld [vmem:[#allocation6 + $0x504] ss:$8 sps:$4 sm:$0xff]  }
 0x2c7   : > { %3799 = vmatprep.subr.bf16.mxu1 %v17980_v16  ;;  %v1820_v16 = vpack.c.bf16 %v1812_v2, %v1812_v2 }
 0x2c9   : > { %15337 = vmatmul.mubr.msk.bf16.vlgmr.msra.gmra.mrb[8].mxu1 %vm24164_vm2, %v3646_v20  ;;  %v17993_v20 = vld [vmem:[#allocation6 + $0x410] ss:$8 sps:$4 sm:$0xff]  }
 0x2ca   : > { %3800 = vmatpush1.bf16.msra.mxu1 %v17978_v12  ;;  %3831 = vmatprep.mubr.bf16.mxu1 %v19802_v24  ;;  %v18041_v12 = vld [vmem:[#allocation6 + $0x510] ss:$8 sps:$4 sm:$0xff]  }
 0x2cb   : > { %3801 = vmatprep.subr.bf16.mxu1 %v17983_v0  ;;  %v18046_v0 = vld [vmem:[#allocation6 + $0x524] ss:$8 sps:$4 sm:$0xff]  }
 0x2ce   : > { %3802 = vmatpush1.bf16.msra.mxu1 %v17981_v8 }
 0x2cf   : > { %3803 = vmatprep.subr.bf16.mxu1 %v17986_v48 }
 0x2d2   : > { %3804 = vmatpush1.bf16.msra.mxu1 %v17984_v49  ;;  %v18044_v49 = vld [vmem:[#allocation6 + $0x520] ss:$8 sps:$4 sm:$0xff]  }
 0x2d3   : > { %3805 = vmatprep.subr.bf16.mxu1 %v17989_v61  ;;  %v18049_v61 = vld [vmem:[#allocation6 + $0x534] ss:$8 sps:$4 sm:$0xff]  }
 0x2d6   : > { %3806 = vmatpush1.bf16.msra.mxu1 %v17987_v34  ;;  %v19634_v34 = vld [vmem:[#allocation2 + $0x30] sm:$0xff] }
 0x2d7   : > { %3929 = vmatprep.subr.bf16.mxu1 %v17992_v19  ;;  %v15387_v19 = vpack.c.bf16 %v1812_v2, %v19634_v34  ;;  %v18086_v34 = vld [vmem:[#allocation6 + $0x600] ss:$8 sps:$4 sm:$0xff]  }
 0x2d9   : > { %15347 = vmatmul.mubr.msk.bf16.vlgmr.msra.gmra.mrb[8].mxu1 %vm24183_vm14, %v3755_v33  ;;  %v18010_v33 = vld [vmem:[#allocation6 + $0x464] ss:$8 sps:$4 sm:$0xff]  }
 0x2da   : > { %3930 = vmatpush1.bf16.msra.mxu1 %v17990_v30  ;;  %3961 = vmatprep.mubr.bf16.mxu1 %v19802_v24 }
 0x2db   : > { %3931 = vmatprep.subr.bf16.mxu1 %v17995_v60  ;;  %v4328_v60 = vrot.slane %v15387_v19, %v20448_v14 }
 0x2de   : > { %3932 = vmatpush1.bf16.msra.mxu1 %v17993_v20  ;;  %v18052_v20 = vld [vmem:[#allocation6 + $0x544] ss:$8 sps:$4 sm:$0xff]  }
 0x2df   : > { %3933 = vmatprep.subr.bf16.mxu1 %v17998_v63 }
 0x2e2   : > { %3934 = vmatpush1.bf16.msra.mxu1 %v17996_v1 }
 0x2e3   : > { %3935 = vmatprep.subr.bf16.mxu1 %v18001_v25  ;;  %v18050_v25 = vld [vmem:[#allocation6 + $0x540] ss:$8 sps:$4 sm:$0xff]  }
 0x2e6   : > { %3936 = vmatpush1.bf16.msra.mxu1 %v17999_v5  ;;  %v4329_v5 = vcombine.low %v20783_v45, %v4328_v60  ;;  %v18095_v60 = vld [vmem:[#allocation6 + $0x630] ss:$8 sps:$4 sm:$0xff]  }
 0x2e7   : > { %4041 = vmatprep.subr.bf16.mxu1 %v18004_v52  ;;  %v18055_v52 = vld [vmem:[#allocation6 + $0x554] ss:$8 sps:$4 sm:$0xff]  }
 0x2e9   : > { %15356 = vmatmul.mubr.msk.bf16.vlgmr.msra.gmra.mrb[8].mxu1 %vm24184_vm3, %v3885_v6  ;;  %v18022_v6 = vld [vmem:[#allocation6 + $0x4a4] ss:$8 sps:$4 sm:$0xff]  }
 0x2ea   : > { %4042 = vmatpush1.bf16.msra.mxu1 %v18002_v3  ;;  %4073 = vmatprep.mubr.bf16.mxu1 %v19802_v24 }
 0x2eb   : > { %4043 = vmatprep.subr.bf16.mxu1 %v18007_v41 }
 0x2ee   : > { %4044 = vmatpush1.bf16.msra.mxu1 %v18005_v32  ;;  %v18053_v32 = vld [vmem:[#allocation6 + $0x550] ss:$8 sps:$4 sm:$0xff]  }
 0x2ef   : > { %4045 = vmatprep.subr.bf16.mxu1 %v18010_v33  ;;  %v18058_v33 = vld [vmem:[#allocation6 + $0x564] ss:$8 sps:$4 sm:$0xff]  }
 0x2f2   : > { %4046 = vmatpush1.bf16.msra.mxu1 %v18008_v57 }
 0x2f3   : > { %4047 = vmatprep.subr.bf16.mxu1 %v18013_v15  ;;  %v18056_v15 = vld [vmem:[#allocation6 + $0x560] ss:$8 sps:$4 sm:$0xff]  }
 0x2f6   : > { %4048 = vmatpush1.bf16.msra.mxu1 %v18011_v4  ;;  %v18061_v4 = vld [vmem:[#allocation6 + $0x574] ss:$8 sps:$4 sm:$0xff]  }
 0x2f7   : > { %4156 = vmatprep.subr.bf16.mxu1 %v18016_v27  ;;  %v18059_v27 = vld [vmem:[#allocation6 + $0x570] ss:$8 sps:$4 sm:$0xff]  }
 0x2f9   : > { %15366 = vmatmul.mubr.msk.bf16.vlgmr.msra.gmra.mrb[8].mxu1 %vm24185_vm5, %v3997_v9  ;;  %v18034_v9 = vld [vmem:[#allocation6 + $0x4e4] ss:$8 sps:$4 sm:$0xff]  }
 0x2fa   : > { %4157 = vmatpush1.bf16.msra.mxu1 %v18014_v58  ;;  %4188 = vmatprep.mubr.bf16.mxu1 %v19802_v24 }
 0x2fb   : > { %4158 = vmatprep.subr.bf16.mxu1 %v18019_v51  ;;  %v18064_v51 = vld [vmem:[#allocation6 + $0x584] ss:$8 sps:$4 sm:$0xff]  }
 0x2fe   : > { %4159 = vmatpush1.bf16.msra.mxu1 %v18017_v38  ;;  %v18062_v38 = vld [vmem:[#allocation6 + $0x580] ss:$8 sps:$4 sm:$0xff]  }
 0x2ff   : > { %4160 = vmatprep.subr.bf16.mxu1 %v18022_v6 }
 0x302   : > { %4161 = vmatpush1.bf16.msra.mxu1 %v18020_v21  ;;  %v18067_v21 = vld [vmem:[#allocation6 + $0x594] ss:$8 sps:$4 sm:$0xff]  }
 0x303   : > { %4162 = vmatprep.subr.bf16.mxu1 %v18025_v7 }
 0x306   : > { %4163 = vmatpush1.bf16.msra.mxu1 %v18023_v44  ;;  %v18070_v44 = vld [vmem:[#allocation6 + $0x5a4] ss:$8 sps:$4 sm:$0xff]  }
 0x307   : > { %4264 = vmatprep.subr.bf16.mxu1 %v18028_v23 }
 0x309   : > { %15376 = vmatmul.mubr.msk.bf16.vlgmr.msra.gmra.mrb[8].mxu1 %vm24186_vm6, %v4112_v13  ;;  %v20974_v13 = vrot.slane %v1820_v16, %v20448_v14 }
 0x30a   : > { %4265 = vmatpush1.bf16.msra.mxu1 %v18026_v31  ;;  %4296 = vmatprep.mubr.bf16.mxu1 %v19802_v24  ;;  %v18068_v31 = vld [vmem:[#allocation6 + $0x5a0] ss:$8 sps:$4 sm:$0xff]  }
 0x30b   : > { %4266 = vmatprep.subr.bf16.mxu1 %v18031_v54  ;;  %v4429_v8 = vshrl.u32 %v20974_v13, 16  ;;  %v4432_v48 = vshll.u32 %v20974_v13, 16  ;;  %v20987_v30 = vcombine.high %v20974_v13, %v20974_v13  ;;  %v15406_v42 = vrot.slane %v20974_v13, 9 }
 0x30d   : > { %v4431_v11 = vrot.slane %v4429_v8, 6  ;;  %v4434_v26 = vrot.slane %v4432_v48, 7  ;;  %v4438_v1 = vshll.u32 %v20987_v30, 16  ;;  %v4552_v7 = vrot.slane %v20987_v30, 7 }
 0x30e   : > { %4267 = vmatpush1.bf16.msra.mxu1 %v18029_v55  ;;  %v4664_v55 = vshrl.u32 %v20987_v30, 16  ;;  %v15416_v16 = vrot.slane %v4429_v8, 9  ;;  %v18083_v8 = vld [vmem:[#allocation6 + $0x5f0] ss:$8 sps:$4 sm:$0xff]   ;;  %v15426_v30 = vcombine.high %v20514_v39, %v20974_v13 }
 0x30f   : > { %4268 = vmatprep.subr.bf16.mxu1 %v18034_v9  ;;  %v4435_v63 = vor.u32 %v4434_v26, %v4431_v11  ;;  %v4440_v41 = vrot.slane %v4438_v1, 7  ;;  %v4553_v23 = vsel %vm20534_vm1, %v15406_v42, %v4552_v7  ;;  %v18071_v9 = vld [vmem:[#allocation6 + $0x5b0] ss:$8 sps:$4 sm:$0xff]   ;;  %v18091_v11 = vld [vmem:[#allocation6 + $0x614] ss:$8 sps:$4 sm:$0xff]  }
 0x310   : > { %v4563_v54 = vcombine.low %v20649_v22, %v4553_v23  ;;  %v4666_v2 = vrot.slane %v4664_v55, 7  ;;  %v18077_v22 = vld [vmem:[#allocation6 + $0x5d0] ss:$8 sps:$4 sm:$0xff]   ;;  %v18092_v26 = vld [vmem:[#allocation6 + $0x620] ss:$8 sps:$4 sm:$0xff]  }
 0x311   : > { %v4436_v3 = vrot.slane %v4435_v63, 2  ;;  %v18098_v63 = vld [vmem:[%s24096_s5 + $0x360] ss:$12 sps:$4 sm:$0xff]   ;;  %v18106_v13 = vld [vmem:[%s24096_s5 + $0x37c] ss:$12 sps:$4 sm:$0xff]  }
 0x312   : > { %4269 = vmatpush1.bf16.msra.mxu1 %v18032_v10  ;;  %v4570_v10 = vrot.slane %v4563_v54, %v20448_v14  ;;  %v19635_v39 = vld [vmem:[#allocation4] sm:$0xff]  ;;  %v18133_v42 = vld [vmem:[%s24096_s5 + $0x19c] ss:$12 sps:$4 sm:$0xff]   ;;  %v18145_v55 = vld [vmem:[%s24096_s5 + $0x1cc] ss:$12 sps:$4 sm:$0xff]  }
 0x313   : > { %4270 = vmatprep.subr.bf16.mxu1 %v18037_v59  ;;  %v4441_v57 = vsel %vm20525_vm0, %v4436_v3, %v4440_v41  ;;  %vm24189_vm0 = vmmov %vm24164_vm2  ;;  %v18076_v59 = vld [vmem:[#allocation6 + $0x5c4] ss:$8 sps:$4 sm:$0xff]   ;;  %4908 = vst.msk [vmem:[#allocation3] sm:$0xff] %vm4907_vm11, %v19635_v39  ;;  %vm5129_vm2 = vsmask.f32 7452 }
 0x314   : > { %v4451_v45 = vcombine.low %v20654_v37, %v4441_v57  ;;  %v18065_v37 = vld [vmem:[#allocation6 + $0x590] ss:$8 sps:$4 sm:$0xff]   ;;  %v4571_v29 = vcombine.low %v20826_v36, %v4570_v10  ;;  %vm24190_vm1 = vmmov %vm24189_vm0  ;;  %v18085_v36 = vld [vmem:[#allocation6 + $0x5f4] ss:$8 sps:$4 sm:$0xff]   ;;  %4909 = vst.msk [vmem:[#allocation3 + $0x8] sm:$0xff] %vm4907_vm11, %v19635_v39 }
 0x315   : > { %vm24191_vm12 = vmmov %vm24189_vm0  ;;  %4911 = vst.msk [vmem:[#allocation3 + $0x18] sm:$0xff] %vm4907_vm11, %v19635_v39  ;;  %v18112_v3 = vld [vmem:[%s24096_s5 + $0x394] ss:$12 sps:$4 sm:$0xff]   ;;  %v18110_v41 = vld [vmem:[%s24096_s5 + $0x390] ss:$12 sps:$4 sm:$0xff]  }
 0x316   : > { %4271 = vmatpush1.bf16.msra.mxu1 %v18035_v50  ;;  %v4458_v58 = vrot.slane %v4451_v45, %v20448_v14  ;;  %v18074_v50 = vld [vmem:[#allocation6 + $0x5c0] ss:$8 sps:$4 sm:$0xff]   ;;  %4910 = vst.msk [vmem:[#allocation3 + $0x10] sm:$0xff] %vm4907_vm11, %v19635_v39  ;;  %v18136_v7 = vld [vmem:[%s24096_s5 + $0x3f4] ss:$12 sps:$4 sm:$0xff]   ;;  %vm21205_vm14 = vmor %vm20434_vm4, %vm5129_vm2 }
 0x317   : > { %4373 = vmatprep.subr.bf16.mxu1 %v18040_v46  ;;  %v18079_v46 = vld [vmem:[#allocation6 + $0x5d4] ss:$8 sps:$4 sm:$0xff]   ;;  %v18113_v57 = vld [vmem:[%s24096_s5 + $0x150] ss:$12 sps:$4 sm:$0xff]   ;;  %v18139_v23 = vld [vmem:[%s24096_s5 + $0x1b4] ss:$12 sps:$4 sm:$0xff]  }
 0x318   : > { %v4459_v6 = vcombine.low %v20859_v18, %v4458_v58  ;;  %v18073_v18 = vld [vmem:[#allocation6 + $0x5b4] ss:$8 sps:$4 sm:$0xff]   ;;  %v18140_v54 = vld [vmem:[%s24096_s5 + $0x408] ss:$12 sps:$4 sm:$0xff]   ;;  %v19804_v39 = vmov 1966171168   ;;  %vm24196_vm4 = vmmov %vm24189_vm0 }
 0x319   : > { %15386 = vmatmul.mubr.msk.bf16.vlgmr.msra.gmra.mrb[8].mxu1 %vm24187_vm9, %v4220_v53  ;;  %v18047_v53 = vld [vmem:[#allocation6 + $0x530] ss:$8 sps:$4 sm:$0xff]   ;;  %v18124_v45 = vld [vmem:[%s24096_s5 + $0x3c4] ss:$12 sps:$4 sm:$0xff]   ;;  %vm24197_vm3 = vmmov %vm24189_vm0 }
 0x31a   : > { %4374 = vmatpush1.bf16.msra.mxu1 %v18038_v43  ;;  %4405 = vmatprep.mubr.bf16.mxu1 %v19802_v24  ;;  %v4667_v43 = vor.u32 %v4666_v2, %v4438_v1  ;;  %v18100_v1 = vld [vmem:[%s24096_s5 + $0x364] ss:$12 sps:$4 sm:$0xff]   ;;  %v18122_v58 = vld [vmem:[%s24096_s5 + $0x3c0] ss:$12 sps:$4 sm:$0xff]   ;;  %v18143_v10 = vld [vmem:[%s24096_s5 + $0x1c8] ss:$12 sps:$4 sm:$0xff]  }
 0x31b   : > { %4375 = vmatprep.subr.bf16.mxu1 %v18043_v56  ;;  %v18082_v56 = vld [vmem:[#allocation6 + $0x5e4] ss:$8 sps:$4 sm:$0xff]   ;;  %v18151_v2 = vld [vmem:[%s24096_s5 + $0x1e4] ss:$12 sps:$4 sm:$0xff]   ;;  %vm24198_vm5 = vmmov %vm24189_vm0 }
 0x31c   : > { %vm24199_vm6 = vmmov %vm24189_vm0 }
 0x31d   : > { %vm24200_vm9 = vmmov %vm24189_vm0 }
 0x31e   : > { %4376 = vmatpush1.bf16.msra.mxu1 %v18041_v12  ;;  %v4668_v12 = vsel %vm20587_vm7, %v15416_v16, %v4667_v43  ;;  %vm24192_vm7 = vmmov %vm24189_vm0  ;;  %v18157_v16 = vld [vmem:[%s24096_s5 + $0x1fc] ss:$12 sps:$4 sm:$0xff]   ;;  %v18160_v43 = vld [vmem:[%s24096_s5 + $0x454] ss:$12 sps:$4 sm:$0xff]  }
 0x31f   : > { %4377 = vmatprep.subr.bf16.mxu1 %v18046_v0  ;;  %v18080_v0 = vld [vmem:[#allocation6 + $0x5e0] ss:$8 sps:$4 sm:$0xff]   ;;  %v4678_v48 = vcombine.low %v20662_v40, %v4668_v12  ;;  %v18094_v40 = vld [vmem:[#allocation6 + $0x624] ss:$8 sps:$4 sm:$0xff]   ;;  %vm24205_vm8 = vmmov %vm24189_vm0 }
 0x320   : > { %v18163_v12 = vld [vmem:[%s24096_s5 + $0x214] ss:$12 sps:$4 sm:$0xff]   ;;  %vm24206_vm11 = vmmov %vm24189_vm0 }
 0x321   : > { %vm24208_vm2 = vmmov %vm24189_vm0 }
 0x322   : > { %4378 = vmatpush1.bf16.msra.mxu1 %v18044_v49  ;;  %v4685_v49 = vrot.slane %v4678_v48, %v20448_v14  ;;  %v18164_v48 = vld [vmem:[%s24096_s5 + $0x468] ss:$12 sps:$4 sm:$0xff]  }
 0x323   : > { %4379 = vmatprep.subr.bf16.mxu1 %v18049_v61  ;;  %v18088_v61 = vld [vmem:[#allocation6 + $0x604] ss:$8 sps:$4 sm:$0xff]  }
 0x324   : > { %v4686_v19 = vcombine.low %v20865_v17, %v4685_v49  ;;  %v4793_v17 = vrot.slane %v15426_v30, %v20448_v14  ;;  %v18103_v14 = vld [vmem:[%s24096_s5 + $0x124] ss:$12 sps:$4 sm:$0xff]  }
 0x325   : > { %5417 = vmatprep.subr.bf16.mxu0 %v18103_v14  ;;  %v18174_v49 = vld [vmem:[%s24096_s5 + $0x484] ss:$12 sps:$4 sm:$0xff]   ;;  %v4932_v14 = vunpack.c.l.s4 %v19804_v39 }
 0x326   : > { %4380 = vmatpush1.bf16.msra.mxu1 %v18047_v53  ;;  %v18097_v53 = vld [vmem:[#allocation6 + $0x634] ss:$8 sps:$4 sm:$0xff]  }
 0x327   : > { %4503 = vmatprep.subr.bf16.mxu1 %v18052_v20  ;;  %v4794_v20 = vcombine.low %v20808_v47, %v4793_v17  ;;  %v18101_v47 = vld [vmem:[%s24096_s5 + $0x120] ss:$12 sps:$4 sm:$0xff]  }
 0x328   : > { %5418 = vmatpush1.bf16.msra.mxu0 %v18101_v47 }
 0x329   : > { %15396 = vmatmul.mubr.msk.bf16.vlgmr.msra.gmra.mrb[8].mxu1 %vm24188_vm10, %v4329_v5  ;;  %v18109_v5 = vld [vmem:[%s24096_s5 + $0x13c] ss:$12 sps:$4 sm:$0xff]   ;;  %vm24201_vm10 = vmmov %vm24189_vm0 }
 0x32a   : > { %4504 = vmatpush1.bf16.msra.mxu1 %v18050_v25  ;;  %4535 = vmatprep.mubr.bf16.mxu1 %v19802_v24  ;;  %v18104_v25 = vld [vmem:[%s24096_s5 + $0x378] ss:$12 sps:$4 sm:$0xff]  }
 0x32b   : > { %4505 = vmatprep.subr.bf16.mxu1 %v18055_v52  ;;  %v18107_v52 = vld [vmem:[%s24096_s5 + $0x138] ss:$12 sps:$4 sm:$0xff]   ;;  %5419 = vmatprep.subr.bf16.mxu0 %v18109_v5 }
 0x32c   : > { %5420 = vmatpush1.bf16.msra.mxu0 %v18107_v52 }
 0x32e   : > { %4506 = vmatpush1.bf16.msra.mxu1 %v18053_v32  ;;  %v18115_v32 = vld [vmem:[%s24096_s5 + $0x154] ss:$12 sps:$4 sm:$0xff]  }
 0x32f   : > { %4507 = vmatprep.subr.bf16.mxu1 %v18058_v33  ;;  %v18118_v33 = vld [vmem:[%s24096_s5 + $0x3ac] ss:$12 sps:$4 sm:$0xff]   ;;  %5421 = vmatprep.subr.bf16.mxu0 %v18115_v32 }
 0x330   : > { %5422 = vmatpush1.bf16.msra.mxu0 %v18113_v57 }
 0x332   : > { %4508 = vmatpush1.bf16.msra.mxu1 %v18056_v15  ;;  %v18116_v15 = vld [vmem:[%s24096_s5 + $0x3a8] ss:$12 sps:$4 sm:$0xff]  }
 0x333   : > { %4509 = vmatprep.subr.bf16.mxu1 %v18061_v4  ;;  %v18121_v4 = vld [vmem:[%s24096_s5 + $0x16c] ss:$12 sps:$4 sm:$0xff]  }
 0x334   : > { %5423 = vmatprep.subr.bf16.mxu0 %v18121_v4 }
 0x336   : > { %4510 = vmatpush1.bf16.msra.mxu1 %v18059_v27  ;;  %v18119_v27 = vld [vmem:[%s24096_s5 + $0x168] ss:$12 sps:$4 sm:$0xff]  }
 0x337   : > { %4615 = vmatprep.subr.bf16.mxu1 %v18064_v51  ;;  %v18127_v51 = vld [vmem:[%s24096_s5 + $0x184] ss:$12 sps:$4 sm:$0xff]   ;;  %5424 = vmatpush1.bf16.msra.mxu0 %v18119_v27 }
 0x338   : > { %5425 = vmatprep.subr.bf16.mxu0 %v18127_v51 }
 0x339   : > { %15405 = vmatmul.mubr.msk.bf16.vlgmr.msra.gmra.mrb[8].mxu1 %vm24189_vm0, %v4459_v6  ;;  %v18125_v6 = vld [vmem:[%s24096_s5 + $0x180] ss:$12 sps:$4 sm:$0xff]  }
 0x33a   : > { %4616 = vmatpush1.bf16.msra.mxu1 %v18062_v38  ;;  %4647 = vmatprep.mubr.bf16.mxu1 %v19802_v24  ;;  %v18130_v38 = vld [vmem:[%s24096_s5 + $0x3dc] ss:$12 sps:$4 sm:$0xff]  }
 0x33b   : > { %4617 = vmatprep.subr.bf16.mxu1 %v18067_v21  ;;  %v18128_v21 = vld [vmem:[%s24096_s5 + $0x3d8] ss:$12 sps:$4 sm:$0xff]   ;;  %5426 = vmatpush1.bf16.msra.mxu0 %v18125_v6 }
 0x33c   : > { %5427 = vmatprep.subr.bf16.mxu0 %v18133_v42 }
 0x33e   : > { %4618 = vmatpush1.bf16.msra.mxu1 %v18065_v37  ;;  %v18131_v37 = vld [vmem:[%s24096_s5 + $0x198] ss:$12 sps:$4 sm:$0xff]  }
 0x33f   : > { %4619 = vmatprep.subr.bf16.mxu1 %v18070_v44  ;;  %v18134_v44 = vld [vmem:[%s24096_s5 + $0x3f0] ss:$12 sps:$4 sm:$0xff]   ;;  %5428 = vmatpush1.bf16.msra.mxu0 %v18131_v37 }
 0x340   : > { %5429 = vmatprep.subr.bf16.mxu0 %v18139_v23 }
 0x342   : > { %4620 = vmatpush1.bf16.msra.mxu1 %v18068_v31  ;;  %v18142_v31 = vld [vmem:[%s24096_s5 + $0x40c] ss:$12 sps:$4 sm:$0xff]  }
 0x343   : > { %4621 = vmatprep.subr.bf16.mxu1 %v18073_v18  ;;  %v18137_v18 = vld [vmem:[%s24096_s5 + $0x1b0] ss:$12 sps:$4 sm:$0xff]  }
 0x344   : > { %5430 = vmatpush1.bf16.msra.mxu0 %v18137_v18 }
 0x345   : > { %5431 = vmatprep.subr.bf16.mxu0 %v18145_v55  ;;  %v24193_v55 = vlaneseq }
 0x346   : > { %4622 = vmatpush1.bf16.msra.mxu1 %v18071_v9  ;;  %v18148_v9 = vld [vmem:[%s24096_s5 + $0x424] ss:$12 sps:$4 sm:$0xff]  }
 0x347   : > { %4730 = vmatprep.subr.bf16.mxu1 %v18076_v59  ;;  %v18146_v59 = vld [vmem:[%s24096_s5 + $0x420] ss:$12 sps:$4 sm:$0xff]   ;;  %vm4949_vm15 = vcmp.lt.s32.totalorder %v24193_v55, 192  ;;  %v18191_v55 = vld [vmem:[%s24096_s5 + $0x4e4] ss:$12 sps:$4 sm:$0xff]  }
 0x348   : > { %5432 = vmatpush1.bf16.msra.mxu0 %v18143_v10 }
 0x349   : > { %15415 = vmatmul.mubr.msk.bf16.vlgmr.msra.gmra.mrb[8].mxu1 %vm24190_vm1, %v4571_v29  ;;  %v18149_v29 = vld [vmem:[%s24096_s5 + $0x1e0] ss:$12 sps:$4 sm:$0xff]   ;;  %5433 = vmatprep.subr.bf16.mxu0 %v18151_v2  ;;  %vm24202_vm1 = vmmov %vm24189_vm0 }
 0x34a   : > { %4731 = vmatpush1.bf16.msra.mxu1 %v18074_v50  ;;  %4762 = vmatprep.mubr.bf16.mxu1 %v19802_v24  ;;  %v18154_v50 = vld [vmem:[%s24096_s5 + $0x43c] ss:$12 sps:$4 sm:$0xff]  }
 0x34b   : > { %4732 = vmatprep.subr.bf16.mxu1 %v18079_v46  ;;  %v18152_v46 = vld [vmem:[%s24096_s5 + $0x438] ss:$12 sps:$4 sm:$0xff]  }
 0x34c   : > { %5434 = vmatpush1.bf16.msra.mxu0 %v18149_v29 }
 0x34d   : > { %5435 = vmatprep.subr.bf16.mxu0 %v18157_v16 }
 0x34e   : > { %4733 = vmatpush1.bf16.msra.mxu1 %v18077_v22  ;;  %v18155_v22 = vld [vmem:[%s24096_s5 + $0x1f8] ss:$12 sps:$4 sm:$0xff]  }
 0x34f   : > { %4734 = vmatprep.subr.bf16.mxu1 %v18082_v56  ;;  %v18158_v56 = vld [vmem:[%s24096_s5 + $0x450] ss:$12 sps:$4 sm:$0xff]  }
 0x350   : > { %5436 = vmatpush1.bf16.msra.mxu0 %v18155_v22 }
 0x351   : > { %5437 = vmatprep.subr.bf16.mxu0 %v18163_v12 }
 0x352   : > { %4735 = vmatpush1.bf16.msra.mxu1 %v18080_v0  ;;  %v18166_v0 = vld [vmem:[%s24096_s5 + $0x46c] ss:$12 sps:$4 sm:$0xff]  }
 0x353   : > { %4736 = vmatprep.subr.bf16.mxu1 %v18085_v36  ;;  %v18161_v36 = vld [vmem:[%s24096_s5 + $0x210] ss:$12 sps:$4 sm:$0xff]  }
 0x354   : > { %5438 = vmatpush1.bf16.msra.mxu0 %v18161_v36 }
 0x356   : > { %4737 = vmatpush1.bf16.msra.mxu1 %v18083_v8  ;;  %v18169_v8 = vld [vmem:[%s24096_s5 + $0x22c] ss:$12 sps:$4 sm:$0xff]  }
 0x357   : > { %4838 = vmatprep.subr.bf16.mxu1 %v18088_v61  ;;  %v18167_v61 = vld [vmem:[%s24096_s5 + $0x228] ss:$12 sps:$4 sm:$0xff]   ;;  %5439 = vmatprep.subr.bf16.mxu0 %v18169_v8 }
 0x358   : > { %5440 = vmatpush1.bf16.msra.mxu0 %v18167_v61 }
 0x359   : > { %15425 = vmatmul.mubr.msk.bf16.vlgmr.msra.gmra.mrb[8].mxu1 %vm24191_vm12, %v4686_v19  ;;  %5458 = vmatprep.subr.bf16.mxu0 %v19802_v24  ;;  %v4885_v19 = vld [vmem:[%s24095_s4] sm:$0x3]  ;;  %vm24203_vm12 = vmmov %vm24189_vm0 }
 0x35a   : > { %4839 = vmatpush1.bf16.msra.mxu1 %v18086_v34  ;;  %4870 = vmatprep.mubr.bf16.mxu1 %v19802_v24  ;;  %v21175_v34 = vsub.s32 0, %v20441_v35 }
 0x35b   : > { %4840 = vmatprep.subr.bf16.mxu1 %v18091_v11  ;;  %v21181_v11 = vsub.s32 1, %v20441_v35 }
 0x35e   : > { %4841 = vmatpush1.bf16.msra.mxu1 %v18089_v62  ;;  %v4890_v62 = vrot.slane %v4885_v19, %v21175_v34 }
 0x35f   : > { %4842 = vmatprep.subr.bf16.mxu1 %v18094_v40  ;;  %v4894_v40 = vrot.slane %v4885_v19, %v21181_v11 }
 0x362   : > { %4843 = vmatpush1.bf16.msra.mxu1 %v18092_v26 }
 0x363   : > { %4844 = vmatprep.subr.bf16.mxu1 %v18097_v53 }
 0x366   : > { %4845 = vmatpush1.bf16.msra.mxu1 %v18095_v60 }
 0x367   : > { %6435 = vmatprep.subr.bf16.mxu1 %v18100_v1 }
 0x369   : > { %15435 = vmatmul.mubr.msk.bf16.vlgmr.msra.gmra.mrb[8].mxu1 %vm24192_vm7, %v4794_v20  ;;  %vm24204_vm7 = vmmov %vm24189_vm0 }
 0x36a   : > { %6436 = vmatpush1.bf16.msra.mxu1 %v18098_v63 }
 0x36b   : > { %6437 = vmatprep.subr.bf16.mxu1 %v18106_v13 }
 0x36e   : > { %6438 = vmatpush1.bf16.msra.mxu1 %v18104_v25 }
 0x36f   : > { %6439 = vmatprep.subr.bf16.mxu1 %v18112_v3 }
 0x372   : > { %6440 = vmatpush1.bf16.msra.mxu1 %v18110_v41 }
 0x373   : > { %6441 = vmatprep.subr.bf16.mxu1 %v18118_v33  ;;  %v4933_v33 = vunpack.c.0.s8 %v4932_v14 }
 0x375   : > { %v21186_v6 = vsub.s32 %v4933_v33, %v20441_v35 }
 0x376   : > { %6442 = vmatpush1.bf16.msra.mxu1 %v18116_v15 }
 0x377   : > { %6443 = vmatprep.subr.bf16.mxu1 %v18124_v45 }
 0x37a   : > { %6444 = vmatpush1.bf16.msra.mxu1 %v18122_v58 }
 0x37b   : > { %6445 = vmatprep.subr.bf16.mxu1 %v18130_v38 }
 0x37e   : > { %6446 = vmatpush1.bf16.msra.mxu1 %v18128_v21 }
 0x37f   : > { %6447 = vmatprep.subr.bf16.mxu1 %v18136_v7  ;;  %v4998_v7 = vld [vmem:[#allocation3] sm:$0xff] }
 0x382   : > { %6448 = vmatpush1.bf16.msra.mxu1 %v18134_v44 }
 0x383   : > { %6449 = vmatprep.subr.bf16.mxu1 %v18142_v31  ;;  %v5006_v31 = vcombine.high %v4998_v7, %v4998_v7 }
 0x386   : > { %6450 = vmatpush1.bf16.msra.mxu1 %v18140_v54 }
 0x387   : > { %6451 = vmatprep.subr.bf16.mxu1 %v18148_v9 }
 0x38a   : > { %6452 = vmatpush1.bf16.msra.mxu1 %v18146_v59  ;;  %v15436_v59 = vpack.c.bf16 %v5006_v31, %v4998_v7  ;;  %v18187_v31 = vld [vmem:[%s24096_s5 + $0x4cc] ss:$12 sps:$4 sm:$0xff]  }
 0x38b   : > { %6453 = vmatprep.subr.bf16.mxu1 %v18154_v50 }
 0x38e   : > { %6454 = vmatpush1.bf16.msra.mxu1 %v18152_v46  ;;  %v5033_v46 = vrot.slane %v15436_v59, %v21186_v6  ;;  %v18195_v59 = vld [vmem:[%s24096_s5 + $0x4fc] ss:$12 sps:$4 sm:$0xff]  }
 0x38f   : > { %6455 = vmatprep.subr.bf16.mxu1 %v18160_v43 }
 0x390   : > { %v5104_v16 = vcombine.high %v5033_v46, %v5033_v46 }
 0x392   : > { %6456 = vmatpush1.bf16.msra.mxu1 %v18158_v56  ;;  %v21195_v12 = vrot.slane %v5104_v16, %v21186_v6  ;;  %v18197_v16 = vld [vmem:[%s24096_s5 + $0x510] ss:$12 sps:$4 sm:$0xff]  }
 0x393   : > { %6457 = vmatprep.subr.bf16.mxu1 %v18166_v0 }
 0x394   : > { %v5137_v19 = vshll.u32 %v21195_v12, 16 }
 0x396   : > { %6458 = vmatpush1.bf16.msra.mxu1 %v18164_v48  ;;  %v21198_v48 = vrot.slane %v5033_v46, %v21186_v6  ;;  %v18196_v46 = vld [vmem:[%s24096_s5 + $0x1a0] ss:$12 sps:$4 sm:$0xff]  }
 0x397   : > { %6804 = vmatprep.subr.bf16.mxu1 %v18174_v49 }
 0x398   : > { %v5132_v61 = vshrl.u32 %v21198_v48, 16 }
 0x39a   : > { %v5139_v28 = vsel %vm21205_vm14, %v5132_v61, %v5137_v19  ;;  %v18208_v61 = vld [vmem:[%s24096_s5 + $0x1e8] ss:$12 sps:$4 sm:$0xff]   ;;  %v18209_v19 = vld [vmem:[%s24096_s5 + $0x558] ss:$12 sps:$4 sm:$0xff]  }
 0x43c   : > { %v4872_v26 = vpop.f32.mrb[8].mxu1 }
 0x43d   : > { %v4897_v53 = vadd.f32 %v4890_v62, %v4872_v26  ;;  %v4874_v30 = vpop.f32.mrb[9].mxu1 }
 0x43e   : > { %v4898_v60 = vadd.f32 %v4894_v40, %v4874_v30  ;;  %v4876_v17 = vpop.f32.mrb[10].mxu1 }
 0x43f   : > { %v4901_v20 = vmax.f32 %v4897_v53, 0.0  ;;  %v4899_v63 = vadd.f32 %v4890_v62, %v4876_v17  ;;  %v4878_v1 = vpop.f32.mrb[11].mxu1 }
 0x440   : > { %v4902_v47 = vmax.f32 %v4898_v60, 0.0  ;;  %v4900_v13 = vadd.f32 %v4894_v40, %v4878_v1 }
 0x441   : > { %v4914_v25 = vrot.slane %v4901_v20, 1  ;;  %v4903_v5 = vmax.f32 %v4899_v63, 0.0 }
 0x442   : > { %v4915_v52 = vrot.slane %v4902_v47, 1  ;;  %v4904_v3 = vmax.f32 %v4900_v13, 0.0 }
 0x443   : > { %v4918_v41 = vmax.f32 %v4901_v20, %v4914_v25  ;;  %v4959_v32 = vrot.slane %v4903_v5, 1 }
 0x444   : > { %v4919_v57 = vmax.f32 %v4902_v47, %v4915_v52  ;;  %v4960_v15 = vrot.slane %v4904_v3, 1 }
 0x445   : > { %v4922_v4 = vrot.slane %v4918_v41, 4  ;;  %v4963_v45 = vmax.f32 %v4903_v5, %v4959_v32 }
 0x446   : > { %v4923_v27 = vrot.slane %v4919_v57, 4  ;;  %v4964_v58 = vmax.f32 %v4904_v3, %v4960_v15 }
 0x447   : > { %v4926_v51 = vmax.f32 %v4918_v41, %v4922_v4  ;;  %v4967_v38 = vrot.slane %v4963_v45, 4 }
 0x448   : > { %v4927_v21 = vmax.f32 %v4919_v57, %v4923_v27  ;;  %v4968_v42 = vrot.slane %v4964_v58, 4  ;;  %v18172_v57 = vld [vmem:[%s24096_s5 + $0x480] ss:$12 sps:$4 sm:$0xff]  }
 0x449   : > { %v4971_v37 = vmax.f32 %v4963_v45, %v4967_v38  ;;  %v18179_v45 = vld [vmem:[%s24096_s5 + $0x49c] ss:$12 sps:$4 sm:$0xff]  }
 0x44a   : > { %v4930_v44 = vcombine.low %v4926_v51, %v4927_v21  ;;  %v4972_v23 = vmax.f32 %v4964_v58, %v4968_v42  ;;  %v18176_v51 = vld [vmem:[%s24096_s5 + $0x128] ss:$12 sps:$4 sm:$0xff]   ;;  %v18177_v42 = vld [vmem:[%s24096_s5 + $0x498] ss:$12 sps:$4 sm:$0xff]  }
 0x44c   : > { %v4937_v18 = vrot.slane %v4930_v44, %v21186_v6  ;;  %v4975_v54 = vcombine.low %v4971_v37, %v4972_v23  ;;  %v18183_v37 = vld [vmem:[%s24096_s5 + $0x4b4] ss:$12 sps:$4 sm:$0xff]   ;;  %v18181_v23 = vld [vmem:[%s24096_s5 + $0x4b0] ss:$12 sps:$4 sm:$0xff]  }
 0x44d   : > { %v18180_v44 = vld [vmem:[%s24096_s5 + $0x140] ss:$12 sps:$4 sm:$0xff]  }
 0x44e   : > { %v4944_v9 = vrot.slane %v4937_v18, %v21186_v6  ;;  %v4982_v10 = vrot.slane %v4975_v54, %v21186_v6  ;;  %v18184_v18 = vld [vmem:[%s24096_s5 + $0x158] ss:$12 sps:$4 sm:$0xff]   ;;  %v18185_v54 = vld [vmem:[%s24096_s5 + $0x4c8] ss:$12 sps:$4 sm:$0xff]  }
 0x450   : > { %4952 = vst.msk [vmem:[#allocation3 + $0x9] ss:$4 sm:$0x3] %vm4949_vm15, %v4944_v9  ;;  %v4953_v2 = vcombine.high %v4944_v9, %v4944_v9  ;;  %v4989_v50 = vrot.slane %v4982_v10, %v21186_v6  ;;  %v18188_v9 = vld [vmem:[%s24096_s5 + $0x170] ss:$12 sps:$4 sm:$0xff]  }
 0x451   : > { %v18189_v10 = vld [vmem:[%s24096_s5 + $0x4e0] ss:$12 sps:$4 sm:$0xff]  }
 0x452   : > { %4956 = vst.msk [vmem:[#allocation3 + $0xa] ss:$4 sm:$0x3] %vm4949_vm15, %v4953_v2  ;;  %4993 = vst.msk [vmem:[#allocation3 + $0x11] ss:$4 sm:$0x3] %vm4949_vm15, %v4989_v50  ;;  %v4994_v29 = vcombine.high %v4989_v50, %v4989_v50 }
 0x453   : > { %v18192_v2 = vld [vmem:[%s24096_s5 + $0x188] ss:$12 sps:$4 sm:$0xff]   ;;  %v18193_v50 = vld [vmem:[%s24096_s5 + $0x4f8] ss:$12 sps:$4 sm:$0xff]  }
 0x454   : > { %4997 = vst.msk [vmem:[#allocation3 + $0x12] ss:$4 sm:$0x3] %vm4949_vm15, %v4994_v29  ;;  %v18199_v29 = vld [vmem:[%s24096_s5 + $0x514] ss:$12 sps:$4 sm:$0xff]   ;;  %vm24207_vm15 = vmmov %vm24189_vm0 }
 0x459   : > { %v4999_v43 = vld [vmem:[#allocation3 + $0x8] sm:$0xff] }
 0x45a   : > { %v5007_v22 = vcombine.high %v4999_v43, %v4999_v43 }
 0x45b   : > { %v5000_v56 = vld [vmem:[#allocation3 + $0x10] sm:$0xff] }
 0x45c   : > { %v5008_v0 = vcombine.high %v5000_v56, %v5000_v56  ;;  %v15437_v36 = vpack.c.bf16 %v5007_v22, %v4999_v43  ;;  %v18203_v43 = vld [vmem:[%s24096_s5 + $0x52c] ss:$12 sps:$4 sm:$0xff]  }
 0x45d   : > { %v18200_v22 = vld [vmem:[%s24096_s5 + $0x1b8] ss:$12 sps:$4 sm:$0xff]  }
 0x45e   : > { %v5048_v8 = vrot.slane %v15437_v36, %v21186_v6  ;;  %v15650_v49 = vpack.c.bf16 %v5008_v0, %v5000_v56  ;;  %v18201_v56 = vld [vmem:[%s24096_s5 + $0x528] ss:$12 sps:$4 sm:$0xff]   ;;  %v18207_v0 = vld [vmem:[%s24096_s5 + $0x544] ss:$12 sps:$4 sm:$0xff]  }
 0x45f   : > { %v18204_v36 = vld [vmem:[%s24096_s5 + $0x1d0] ss:$12 sps:$4 sm:$0xff]  }
 0x460   : > { %v21210_v40 = vrot.slane %v5048_v8, %v21186_v6  ;;  %v5112_v26 = vcombine.high %v5048_v8, %v5048_v8  ;;  %v6159_v53 = vrot.slane %v15650_v49, %v21186_v6  ;;  %v18205_v8 = vld [vmem:[%s24096_s5 + $0x540] ss:$12 sps:$4 sm:$0xff]   ;;  %v18211_v49 = vld [vmem:[%s24096_s5 + $0x55c] ss:$12 sps:$4 sm:$0xff]  }
 0x462   : > { %v21214_v30 = vrot.slane %v6159_v53, %v21186_v6  ;;  %v6519_v60 = vcombine.high %v6159_v53, %v6159_v53  ;;  %v21217_v17 = vrot.slane %v5112_v26, %v21186_v6  ;;  %v5141_v63 = vshrl.u32 %v21210_v40, 16  ;;  %v18215_v26 = vld [vmem:[%s24096_s5 + $0x574] ss:$12 sps:$4 sm:$0xff]  }
 0x464   : > { %v6216_v20 = vcombine.low %v21210_v40, %v21214_v30  ;;  %v5146_v1 = vshll.u32 %v21217_v17, 16  ;;  %v21226_v39 = vrot.slane %v6519_v60, %v21186_v6  ;;  %v6528_v13 = vshrl.u32 %v21214_v30, 16  ;;  %v18212_v60 = vld [vmem:[%s24096_s5 + $0x200] ss:$12 sps:$4 sm:$0xff]  }
 0x466   : > { %v6223_v14 = vrot.slane %v6216_v20, %v21186_v6  ;;  %v5148_v47 = vsel %vm21205_vm14, %v5141_v63, %v5146_v1  ;;  %v6533_v25 = vshll.u32 %v21226_v39, 16  ;;  %v6937_v53 = vcombine.low %v21217_v17, %v21226_v39  ;;  %v18219_v20 = vld [vmem:[%s24096_s5 + $0x58c] ss:$12 sps:$4 sm:$0xff]  }
 0x467   : > { %v5198_v5 = vcombine.low %v5139_v28, %v5148_v47  ;;  %v18213_v28 = vld [vmem:[%s24096_s5 + $0x570] ss:$12 sps:$4 sm:$0xff]   ;;  %v5498_v63 = vcombine.low %v21198_v48, %v21210_v40 }
 0x468   : > { %v6224_v52 = vcombine.high %v6223_v14, %v6223_v14  ;;  %v21235_v3 = vsel %vm21205_vm14, %v6528_v13, %v6533_v25  ;;  %v21246_v15 = vrot.slane %v6223_v14, %v21186_v6  ;;  %v21375_v1 = vrot.slane %v6937_v53, %v21186_v6  ;;  %v18216_v14 = vld [vmem:[%s24096_s5 + $0x218] ss:$12 sps:$4 sm:$0xff]   ;;  %v18220_v25 = vld [vmem:[%s24096_s5 + $0x230] ss:$12 sps:$4 sm:$0xff]  }
 0x469   : > { %v5205_v41 = vrot.slane %v5198_v5, %v21186_v6  ;;  %v6585_v32 = vcombine.low %v5148_v47, %v21235_v3  ;;  %v18217_v47 = vld [vmem:[%s24096_s5 + $0x588] ss:$12 sps:$4 sm:$0xff]   ;;  %v18223_v48 = vld [vmem:[%s24096_s5 + $0x5a4] ss:$12 sps:$4 sm:$0xff]   ;;  %v21388_v40 = vrot.slane %v5498_v63, %v21186_v6  ;;  %v18221_v5 = vld [vmem:[%s24096_s5 + $0x5a0] ss:$12 sps:$4 sm:$0xff]  }
 0x46a   : > { %v21240_v33 = vrot.slane %v6224_v52, %v21186_v6  ;;  %v6945_v13 = vcombine.high %v21375_v1, %v21375_v1  ;;  %v18277_v63 = vld [vmem:[%s24096_s5 + $0x67c] ss:$12 sps:$4 sm:$0xff]  }
 0x46b   : > { %v5206_v4 = vcombine.high %v5205_v41, %v5205_v41  ;;  %v21252_v27 = vrot.slane %v6585_v32, %v21186_v6  ;;  %v21264_v21 = vrot.slane %v5205_v41, %v21186_v6  ;;  %v18226_v41 = vld [vmem:[%s24096_s5 + $0x4] ss:$12 sps:$4 sm:$0xff]   ;;  %v5506_v32 = vcombine.high %v21388_v40, %v21388_v40 }
 0x46c   : > { %15735 = vmatprep.mubr.msk.bf16.mxu1 %vm24196_vm4, %v21240_v33  ;;  %vm24209_vm4 = vmmov %vm24189_vm0 }
 0x46d   : > { %6468 = vmatmul.mubr.bf16.vlgmr.msra.gmra.mrb[12].mxu1 %v21246_v15  ;;  %v5220_v58 = vrot.slane %v5206_v4, %v21186_v6  ;;  %v6593_v38 = vcombine.high %v21252_v27, %v21252_v27  ;;  %v21401_v52 = vrot.slane %v21252_v27, %v21186_v6  ;;  %v21412_v4 = vrot.slane %v6945_v13, %v21186_v6  ;;  %v18227_v27 = vld [vmem:[%s24096_s5 + $0x5b8] ss:$12 sps:$4 sm:$0xff]   ;;  %v18280_v13 = vld [vmem:[%s24096_s5 + $0xdc] ss:$12 sps:$4 sm:$0xff]  }
 0x46e   : > { %6805 = vmatpush1.bf16.msra.mxu1 %v18172_v57  ;;  %v18229_v57 = vld [vmem:[%s24096_s5 + $0x5bc] ss:$12 sps:$4 sm:$0xff]  }
 0x46f   : > { %15524 = vmatprep.mubr.msk.bf16.mxu0 %vm24197_vm3, %v5220_v58  ;;  %6806 = vmatprep.subr.bf16.mxu1 %v18179_v45  ;;  %v21271_v7 = vrot.slane %v6593_v38, %v21186_v6  ;;  %v18224_v45 = vld [vmem:[%s24096_s5] ss:$12 sps:$4 sm:$0xff]   ;;  %vm24210_vm3 = vmmov %vm24189_vm0 }
 0x470   : > { %5450 = vmatmul.mubr.bf16.vlgmr.msra.gmra.mrb[8].mxu0 %v21264_v21  ;;  %v18235_v38 = vld [vmem:[%s24096_s5 + $0x5d4] ss:$12 sps:$4 sm:$0xff]  }
 0x471   : > { %5459 = vmatpush1.bf16.msra.mxu0 %v18176_v51  ;;  %15525 = vmatprep.mubr.msk.bf16.mxu0 %vm24198_vm5, %v5220_v58  ;;  %v18232_v58 = vld [vmem:[%s24096_s5 + $0x1c] ss:$12 sps:$4 sm:$0xff]   ;;  %v21427_v51 = vrot.slane %v5506_v32, %v21186_v6  ;;  %vm24211_vm5 = vmmov %vm24189_vm0 }
 0x472   : > { %6807 = vmatpush1.bf16.msra.mxu1 %v18177_v42  ;;  %15822 = vmatprep.mubr.msk.bf16.mxu1 %vm24199_vm6, %v21271_v7  ;;  %v18230_v42 = vld [vmem:[%s24096_s5 + $0x18] ss:$12 sps:$4 sm:$0xff]   ;;  %v18281_v32 = vld [vmem:[%s24096_s5 + $0x690] ss:$12 sps:$4 sm:$0xff]   ;;  %vm24212_vm6 = vmmov %vm24189_vm0 }
 0x473   : > { %5460 = vmatprep.subr.bf16.mxu0 %v19802_v24  ;;  %6808 = vmatprep.subr.bf16.mxu1 %v18183_v37  ;;  %v18233_v37 = vld [vmem:[%s24096_s5 + $0x5d0] ss:$12 sps:$4 sm:$0xff]  }
 0x475   : > { %5461 = vmatpush1.bf16.msra.mxu0 %v18180_v44  ;;  %v18238_v44 = vld [vmem:[%s24096_s5 + $0x34] ss:$12 sps:$4 sm:$0xff]  }
 0x476   : > { %6809 = vmatpush1.bf16.msra.mxu1 %v18181_v23  ;;  %5462 = vmatprep.subr.bf16.mxu0 %v19802_v24  ;;  %v18236_v23 = vld [vmem:[%s24096_s5 + $0x30] ss:$12 sps:$4 sm:$0xff]  }
 0x477   : > { %6810 = vmatprep.subr.bf16.mxu1 %v18187_v31  ;;  %v18239_v31 = vld [vmem:[%s24096_s5 + $0x5e8] ss:$12 sps:$4 sm:$0xff]  }
 0x479   : > { %5463 = vmatpush1.bf16.msra.mxu0 %v18184_v18  ;;  %v18244_v18 = vld [vmem:[%s24096_s5 + $0x4c] ss:$12 sps:$4 sm:$0xff]  }
 0x47a   : > { %6811 = vmatpush1.bf16.msra.mxu1 %v18185_v54  ;;  %5464 = vmatprep.subr.bf16.mxu0 %v19802_v24  ;;  %v18247_v54 = vld [vmem:[%s24096_s5 + $0x604] ss:$12 sps:$4 sm:$0xff]  }
 0x47b   : > { %6812 = vmatprep.subr.bf16.mxu1 %v18191_v55  ;;  %v18242_v55 = vld [vmem:[%s24096_s5 + $0x48] ss:$12 sps:$4 sm:$0xff]  }
 0x47d   : > { %5465 = vmatpush1.bf16.msra.mxu0 %v18188_v9  ;;  %v18245_v9 = vld [vmem:[%s24096_s5 + $0x600] ss:$12 sps:$4 sm:$0xff]  }
 0x47e   : > { %6813 = vmatpush1.bf16.msra.mxu1 %v18189_v10  ;;  %5466 = vmatprep.subr.bf16.mxu0 %v19802_v24  ;;  %v18250_v10 = vld [vmem:[%s24096_s5 + $0x64] ss:$12 sps:$4 sm:$0xff]  }
 0x47f   : > { %6814 = vmatprep.subr.bf16.mxu1 %v18195_v59  ;;  %v18253_v59 = vld [vmem:[%s24096_s5 + $0x61c] ss:$12 sps:$4 sm:$0xff]  }
 0x481   : > { %5467 = vmatpush1.bf16.msra.mxu0 %v18192_v2  ;;  %v18248_v2 = vld [vmem:[%s24096_s5 + $0x60] ss:$12 sps:$4 sm:$0xff]  }
 0x482   : > { %6815 = vmatpush1.bf16.msra.mxu1 %v18193_v50  ;;  %5468 = vmatprep.subr.bf16.mxu0 %v19802_v24  ;;  %v5001_v50 = vld [vmem:[#allocation3 + $0x18] sm:$0xff] }
 0x483   : > { %6816 = vmatprep.subr.bf16.mxu1 %v18199_v29  ;;  %v18251_v29 = vld [vmem:[%s24096_s5 + $0x618] ss:$12 sps:$4 sm:$0xff]  }
 0x485   : > { %5469 = vmatpush1.bf16.msra.mxu0 %v18196_v46  ;;  %v18256_v46 = vld [vmem:[%s24096_s5 + $0x7c] ss:$12 sps:$4 sm:$0xff]  }
 0x486   : > { %6817 = vmatpush1.bf16.msra.mxu1 %v18197_v16  ;;  %5470 = vmatprep.subr.bf16.mxu0 %v19802_v24  ;;  %v18259_v16 = vld [vmem:[%s24096_s5 + $0x634] ss:$12 sps:$4 sm:$0xff]  }
 0x487   : > { %6818 = vmatprep.subr.bf16.mxu1 %v18203_v43  ;;  %v5009_v43 = vcombine.high %v5001_v50, %v5001_v50 }
 0x489   : > { %5471 = vmatpush1.bf16.msra.mxu0 %v18200_v22  ;;  %v18254_v22 = vld [vmem:[%s24096_s5 + $0x78] ss:$12 sps:$4 sm:$0xff]  }
 0x48a   : > { %6819 = vmatpush1.bf16.msra.mxu1 %v18201_v56  ;;  %5472 = vmatprep.subr.bf16.mxu0 %v19802_v24  ;;  %v18257_v56 = vld [vmem:[%s24096_s5 + $0x630] ss:$12 sps:$4 sm:$0xff]  }
 0x48b   : > { %6820 = vmatprep.subr.bf16.mxu1 %v18207_v0  ;;  %v18262_v0 = vld [vmem:[%s24096_s5 + $0x94] ss:$12 sps:$4 sm:$0xff]  }
 0x48d   : > { %5473 = vmatpush1.bf16.msra.mxu0 %v18204_v36  ;;  %v18265_v36 = vld [vmem:[%s24096_s5 + $0x64c] ss:$12 sps:$4 sm:$0xff]  }
 0x48e   : > { %6821 = vmatpush1.bf16.msra.mxu1 %v18205_v8  ;;  %5474 = vmatprep.subr.bf16.mxu0 %v19802_v24  ;;  %v15910_v8 = vpack.c.bf16 %v5009_v43, %v5001_v50  ;;  %v18312_v50 = vld [vmem:[%s24096_s5 + $0x724] ss:$12 sps:$4 sm:$0xff]   ;;  %v18313_v43 = vld [vmem:[%s24096_s5 + $0x68] ss:$12 sps:$4 sm:$0xff]  }
 0x48f   : > { %6822 = vmatprep.subr.bf16.mxu1 %v18211_v49  ;;  %v18260_v49 = vld [vmem:[%s24096_s5 + $0x90] ss:$12 sps:$4 sm:$0xff]  }
 0x490   : > { %v21508_v53 = vrot.slane %v15910_v8, %v21186_v6  ;;  %v18318_v8 = vld [vmem:[%s24096_s5 + $0x750] ss:$12 sps:$4 sm:$0xff]  }
 0x491   : > { %5475 = vmatpush1.bf16.msra.mxu0 %v18208_v61  ;;  %v18263_v61 = vld [vmem:[%s24096_s5 + $0x648] ss:$12 sps:$4 sm:$0xff]  }
 0x492   : > { %6823 = vmatpush1.bf16.msra.mxu1 %v18209_v19  ;;  %5476 = vmatprep.subr.bf16.mxu0 %v19802_v24  ;;  %v18268_v19 = vld [vmem:[%s24096_s5 + $0xac] ss:$12 sps:$4 sm:$0xff]  }
 0x493   : > { %6824 = vmatprep.subr.bf16.mxu1 %v18215_v26  ;;  %v18271_v26 = vld [vmem:[%s24096_s5 + $0x664] ss:$12 sps:$4 sm:$0xff]  }
 0x495   : > { %5477 = vmatpush1.bf16.msra.mxu0 %v18212_v60  ;;  %v18266_v60 = vld [vmem:[%s24096_s5 + $0xa8] ss:$12 sps:$4 sm:$0xff]  }
 0x496   : > { %6825 = vmatpush1.bf16.msra.mxu1 %v18213_v28  ;;  %5478 = vmatprep.subr.bf16.mxu0 %v19802_v24  ;;  %v18269_v28 = vld [vmem:[%s24096_s5 + $0x660] ss:$12 sps:$4 sm:$0xff]  }
 0x497   : > { %6826 = vmatprep.subr.bf16.mxu1 %v18219_v20  ;;  %v18274_v20 = vld [vmem:[%s24096_s5 + $0xc4] ss:$12 sps:$4 sm:$0xff]  }
 0x499   : > { %5479 = vmatpush1.bf16.msra.mxu0 %v18216_v14  ;;  %v21524_v14 = vrot.slane %v21508_v53, %v21186_v6 }
 0x49a   : > { %6827 = vmatpush1.bf16.msra.mxu1 %v18217_v47  ;;  %5480 = vmatprep.subr.bf16.mxu0 %v19802_v24  ;;  %v18272_v47 = vld [vmem:[%s24096_s5 + $0xc0] ss:$12 sps:$4 sm:$0xff]  }
 0x49b   : > { %7156 = vmatprep.subr.bf16.mxu1 %v18223_v48  ;;  %v18275_v48 = vld [vmem:[%s24096_s5 + $0x678] ss:$12 sps:$4 sm:$0xff]  }
 0x49d   : > { %5481 = vmatpush1.bf16.msra.mxu0 %v18220_v25  ;;  %6837 = vmatmul.mubr.bf16.vlgmr.msra.gmra.mrb[16].mxu1 %v21401_v52  ;;  %v18283_v25 = vld [vmem:[%s24096_s5 + $0x694] ss:$12 sps:$4 sm:$0xff]  }
 0x49e   : > { %7157 = vmatpush1.bf16.msra.mxu1 %v18221_v5  ;;  %15908 = vmatprep.mubr.msk.bf16.mxu1 %vm24200_vm9, %v21412_v4  ;;  %v7306_v5 = vcombine.low %v21214_v30, %v21524_v14  ;;  %v18289_v30 = vld [vmem:[%s24096_s5 + $0x6ac] ss:$12 sps:$4 sm:$0xff]  }
 0x49f   : > { %5717 = vmatprep.subr.bf16.mxu0 %v18226_v41  ;;  %7158 = vmatprep.subr.bf16.mxu1 %v18229_v57  ;;  %v18278_v41 = vld [vmem:[%s24096_s5 + $0xd8] ss:$12 sps:$4 sm:$0xff]   ;;  %v18286_v57 = vld [vmem:[%s24096_s5 + $0xf4] ss:$12 sps:$4 sm:$0xff]  }
 0x4a0   : > { %5491 = vmatmul.mubr.bf16.vlgmr.msra.gmra.mrb[12].mxu0 %v21264_v21  ;;  %v18241_v21 = vld [vmem:[%s24096_s5 + $0x5ec] ss:$12 sps:$4 sm:$0xff]  }
 0x4a1   : > { %5718 = vmatpush1.bf16.msra.mxu0 %v18224_v45  ;;  %15562 = vmatprep.mubr.msk.bf16.mxu0 %vm24201_vm10, %v21427_v51  ;;  %v21553_v45 = vrot.slane %v7306_v5, %v21186_v6 }
 0x4a2   : > { %7159 = vmatpush1.bf16.msra.mxu1 %v18227_v27  ;;  %5719 = vmatprep.subr.bf16.mxu0 %v18232_v58  ;;  %v18284_v27 = vld [vmem:[%s24096_s5 + $0xf0] ss:$12 sps:$4 sm:$0xff]   ;;  %v18287_v58 = vld [vmem:[%s24096_s5 + $0x6a8] ss:$12 sps:$4 sm:$0xff]  }
 0x4a3   : > { %7160 = vmatprep.subr.bf16.mxu1 %v18235_v38  ;;  %v18292_v38 = vld [vmem:[%s24096_s5 + $0x10c] ss:$12 sps:$4 sm:$0xff]  }
 0x4a5   : > { %5720 = vmatpush1.bf16.msra.mxu0 %v18230_v42  ;;  %v18295_v42 = vld [vmem:[%s24096_s5 + $0x6c4] ss:$12 sps:$4 sm:$0xff]  }
 0x4a6   : > { %7161 = vmatpush1.bf16.msra.mxu1 %v18233_v37  ;;  %5721 = vmatprep.subr.bf16.mxu0 %v18238_v44  ;;  %v7314_v37 = vcombine.high %v21553_v45, %v21553_v45  ;;  %v18290_v44 = vld [vmem:[%s24096_s5 + $0x108] ss:$12 sps:$4 sm:$0xff]  }
 0x4a7   : > { %7162 = vmatprep.subr.bf16.mxu1 %v18241_v21  ;;  %v18293_v21 = vld [vmem:[%s24096_s5 + $0x6c0] ss:$12 sps:$4 sm:$0xff]  }
 0x4a9   : > { %5722 = vmatpush1.bf16.msra.mxu0 %v18236_v23  ;;  %v21577_v23 = vrot.slane %v21375_v1, %v21186_v6  ;;  %v21593_v1 = vrot.slane %v21388_v40, %v21186_v6  ;;  %v18301_v40 = vld [vmem:[%s24096_s5 + $0x20] ss:$12 sps:$4 sm:$0xff]  }
 0x4aa   : > { %7163 = vmatpush1.bf16.msra.mxu1 %v18239_v31  ;;  %5723 = vmatprep.subr.bf16.mxu0 %v18244_v18  ;;  %v18300_v31 = vld [vmem:[%s24096_s5 + $0x6dc] ss:$12 sps:$4 sm:$0xff]   ;;  %v21583_v18 = vrot.slane %v7314_v37, %v21186_v6  ;;  %v18342_v37 = vld [vmem:[%s24096_s5 + $0x7e0] ss:$12 sps:$4 sm:$0xff]  }
 0x4ab   : > { %7164 = vmatprep.subr.bf16.mxu1 %v18247_v54  ;;  %v18297_v54 = vld [vmem:[%s24096_s5 + $0x8] ss:$12 sps:$4 sm:$0xff]  }
 0x4ad   : > { %5724 = vmatpush1.bf16.msra.mxu0 %v18242_v55  ;;  %v18298_v55 = vld [vmem:[%s24096_s5 + $0x6d8] ss:$12 sps:$4 sm:$0xff]  }
 0x4ae   : > { %7165 = vmatpush1.bf16.msra.mxu1 %v18245_v9  ;;  %5725 = vmatprep.subr.bf16.mxu0 %v18250_v10  ;;  %v18304_v9 = vld [vmem:[%s24096_s5 + $0x6f4] ss:$12 sps:$4 sm:$0xff]   ;;  %v18302_v10 = vld [vmem:[%s24096_s5 + $0x6f0] ss:$12 sps:$4 sm:$0xff]  }
 0x4af   : > { %7166 = vmatprep.subr.bf16.mxu1 %v18253_v59  ;;  %v18308_v59 = vld [vmem:[%s24096_s5 + $0x70c] ss:$12 sps:$4 sm:$0xff]  }
 0x4b1   : > { %5726 = vmatpush1.bf16.msra.mxu0 %v18248_v2  ;;  %v18306_v2 = vld [vmem:[%s24096_s5 + $0x708] ss:$12 sps:$4 sm:$0xff]  }
 0x4b2   : > { %7167 = vmatpush1.bf16.msra.mxu1 %v18251_v29  ;;  %5727 = vmatprep.subr.bf16.mxu0 %v18256_v46  ;;  %v18309_v29 = vld [vmem:[%s24096_s5 + $0x50] ss:$12 sps:$4 sm:$0xff]   ;;  %v18310_v46 = vld [vmem:[%s24096_s5 + $0x720] ss:$12 sps:$4 sm:$0xff]  }
 0x4b3   : > { %7168 = vmatprep.subr.bf16.mxu1 %v18259_v16  ;;  %v18316_v16 = vld [vmem:[%s24096_s5 + $0x73c] ss:$12 sps:$4 sm:$0xff]  }
 0x4b5   : > { %5728 = vmatpush1.bf16.msra.mxu0 %v18254_v22  ;;  %v18314_v22 = vld [vmem:[%s24096_s5 + $0x738] ss:$12 sps:$4 sm:$0xff]  }
 0x4b6   : > { %7169 = vmatpush1.bf16.msra.mxu1 %v18257_v56  ;;  %5729 = vmatprep.subr.bf16.mxu0 %v18262_v0  ;;  %v18320_v56 = vld [vmem:[%s24096_s5 + $0x754] ss:$12 sps:$4 sm:$0xff]   ;;  %v7609_v0 = vcombine.high %v21508_v53, %v21508_v53  ;;  %v18328_v53 = vld [vmem:[%s24096_s5 + $0x784] ss:$12 sps:$4 sm:$0xff]  }
 0x4b7   : > { %7170 = vmatprep.subr.bf16.mxu1 %v18265_v36  ;;  %v18317_v36 = vld [vmem:[%s24096_s5 + $0x80] ss:$12 sps:$4 sm:$0xff]  }
 0x4b9   : > { %5730 = vmatpush1.bf16.msra.mxu0 %v18260_v49  ;;  %v18324_v49 = vld [vmem:[%s24096_s5 + $0x76c] ss:$12 sps:$4 sm:$0xff]  }
 0x4ba   : > { %7171 = vmatpush1.bf16.msra.mxu1 %v18263_v61  ;;  %5731 = vmatprep.subr.bf16.mxu0 %v18268_v19  ;;  %v18321_v61 = vld [vmem:[%s24096_s5 + $0x98] ss:$12 sps:$4 sm:$0xff]   ;;  %v21661_v19 = vrot.slane %v7609_v0, %v21186_v6 }
 0x4bb   : > { %7172 = vmatprep.subr.bf16.mxu1 %v18271_v26  ;;  %v18322_v26 = vld [vmem:[%s24096_s5 + $0x768] ss:$12 sps:$4 sm:$0xff]   ;;  %v18371_v0 = vld [vmem:[%s24096_s5 + $0x2a4] ss:$12 sps:$4 sm:$0xff]  }
 0x4bd   : > { %5732 = vmatpush1.bf16.msra.mxu0 %v18266_v60  ;;  %v7618_v60 = vshrl.u32 %v21524_v14, 16  ;;  %v18329_v14 = vld [vmem:[%s24096_s5 + $0xc8] ss:$12 sps:$4 sm:$0xff]  }
 0x4be   : > { %7173 = vmatpush1.bf16.msra.mxu1 %v18269_v28  ;;  %5733 = vmatprep.subr.bf16.mxu0 %v18274_v20  ;;  %v18325_v28 = vld [vmem:[%s24096_s5 + $0xb0] ss:$12 sps:$4 sm:$0xff]   ;;  %v7623_v20 = vshll.u32 %v21661_v19, 16 }
 0x4bf   : > { %7174 = vmatprep.subr.bf16.mxu1 %v18277_v63  ;;  %v18326_v63 = vld [vmem:[%s24096_s5 + $0x780] ss:$12 sps:$4 sm:$0xff]  }
 0x4c1   : > { %5734 = vmatpush1.bf16.msra.mxu0 %v18272_v47  ;;  %v18332_v47 = vld [vmem:[%s24096_s5 + $0x79c] ss:$12 sps:$4 sm:$0xff]  }
 0x4c2   : > { %7175 = vmatpush1.bf16.msra.mxu1 %v18275_v48  ;;  %5735 = vmatprep.subr.bf16.mxu0 %v18280_v13  ;;  %v7625_v48 = vsel %vm21205_vm14, %v7618_v60, %v7623_v20  ;;  %v18330_v13 = vld [vmem:[%s24096_s5 + $0x798] ss:$12 sps:$4 sm:$0xff]   ;;  %v18378_v60 = vld [vmem:[%s24096_s5 + $0x870] ss:$12 sps:$4 sm:$0xff]  }
 0x4c3   : > { %7176 = vmatprep.subr.bf16.mxu1 %v18283_v25  ;;  %v18336_v25 = vld [vmem:[%s24096_s5 + $0x7b4] ss:$12 sps:$4 sm:$0xff]   ;;  %v7675_v5 = vcombine.low %v21235_v3, %v7625_v48  ;;  %v5847_v3 = vcombine.low %v21195_v12, %v21217_v17  ;;  %v18344_v12 = vld [vmem:[%s24096_s5 + $0x7e4] ss:$12 sps:$4 sm:$0xff]   ;;  %v18386_v20 = vld [vmem:[%s24096_s5 + $0x88c] ss:$12 sps:$4 sm:$0xff]  }
 0x4c4   : > { %v18392_v48 = vld [vmem:[%s24096_s5 + $0x8a4] ss:$12 sps:$4 sm:$0xff]  }
 0x4c5   : > { %5736 = vmatpush1.bf16.msra.mxu0 %v18278_v41  ;;  %v18333_v41 = vld [vmem:[%s24096_s5 + $0xe0] ss:$12 sps:$4 sm:$0xff]   ;;  %v21721_v17 = vrot.slane %v5847_v3, %v21186_v6  ;;  %v18401_v3 = vld [vmem:[%s24096_s5 + $0x31c] ss:$12 sps:$4 sm:$0xff]  }
 0x4c6   : > { %7177 = vmatpush1.bf16.msra.mxu1 %v18281_v32  ;;  %5737 = vmatprep.subr.bf16.mxu0 %v18286_v57  ;;  %v18334_v32 = vld [vmem:[%s24096_s5 + $0x7b0] ss:$12 sps:$4 sm:$0xff]   ;;  %v18340_v57 = vld [vmem:[%s24096_s5 + $0x7cc] ss:$12 sps:$4 sm:$0xff]  }
 0x4c7   : > { %7178 = vmatprep.subr.bf16.mxu1 %v18289_v30  ;;  %v21708_v30 = vrot.slane %v7675_v5, %v21186_v6  ;;  %v18395_v5 = vld [vmem:[%s24096_s5 + $0x304] ss:$12 sps:$4 sm:$0xff]  }
 0x4c9   : > { %5738 = vmatpush1.bf16.msra.mxu0 %v18284_v27  ;;  %v18337_v27 = vld [vmem:[%s24096_s5 + $0xf8] ss:$12 sps:$4 sm:$0xff]  }
 0x4ca   : > { %7179 = vmatpush1.bf16.msra.mxu1 %v18287_v58  ;;  %5739 = vmatprep.subr.bf16.mxu0 %v18292_v38  ;;  %v18338_v58 = vld [vmem:[%s24096_s5 + $0x7c8] ss:$12 sps:$4 sm:$0xff]   ;;  %v7683_v38 = vcombine.high %v21708_v30, %v21708_v30 }
 0x4cb   : > { %7525 = vmatprep.subr.bf16.mxu1 %v18295_v42  ;;  %v18341_v42 = vld [vmem:[%s24096_s5 + $0x110] ss:$12 sps:$4 sm:$0xff]  }
 0x4cd   : > { %5740 = vmatpush1.bf16.msra.mxu0 %v18290_v44  ;;  %7189 = vmatmul.mubr.bf16.vlgmr.msra.gmra.mrb[20].mxu1 %v21577_v23  ;;  %v21734_v44 = vrot.slane %v21553_v45, %v21186_v6  ;;  %v18345_v45 = vld [vmem:[%s24096_s5 + $0x240] ss:$12 sps:$4 sm:$0xff]  }
 0x4ce   : > { %7526 = vmatpush1.bf16.msra.mxu1 %v18293_v21  ;;  %15995 = vmatprep.mubr.msk.bf16.mxu1 %vm24189_vm0, %v21583_v18  ;;  %v18347_v21 = vld [vmem:[%s24096_s5 + $0x244] ss:$12 sps:$4 sm:$0xff]  }
 0x4cf   : > { %5758 = vmatprep.subr.bf16.mxu0 %v19802_v24  ;;  %7527 = vmatprep.subr.bf16.mxu1 %v18300_v31  ;;  %v5855_v31 = vcombine.high %v21721_v17, %v21721_v17 }
 0x4d0   : > { %5750 = vmatmul.mubr.bf16.vlgmr.msra.gmra.mrb[16].mxu0 %v21593_v1 }
 0x4d1   : > { %5759 = vmatpush1.bf16.msra.mxu0 %v18297_v54  ;;  %15563 = vmatprep.mubr.msk.bf16.mxu0 %vm24202_vm1, %v21427_v51  ;;  %v18305_v51 = vld [vmem:[%s24096_s5 + $0x38] ss:$12 sps:$4 sm:$0xff]   ;;  %v18350_v54 = vld [vmem:[%s24096_s5 + $0x7fc] ss:$12 sps:$4 sm:$0xff]  }
 0x4d2   : > { %7528 = vmatpush1.bf16.msra.mxu1 %v18298_v55  ;;  %5760 = vmatprep.subr.bf16.mxu0 %v19802_v24  ;;  %v21745_v55 = vrot.slane %v7683_v38, %v21186_v6  ;;  %v18402_v38 = vld [vmem:[%s24096_s5 + $0x8d0] ss:$12 sps:$4 sm:$0xff]  }
 0x4d3   : > { %7529 = vmatprep.subr.bf16.mxu1 %v18304_v9  ;;  %v18348_v9 = vld [vmem:[%s24096_s5 + $0x7f8] ss:$12 sps:$4 sm:$0xff]  }
 0x4d5   : > { %5761 = vmatpush1.bf16.msra.mxu0 %v18301_v40  ;;  %v18353_v40 = vld [vmem:[%s24096_s5 + $0x25c] ss:$12 sps:$4 sm:$0xff]  }
 0x4d6   : > { %7530 = vmatpush1.bf16.msra.mxu1 %v18302_v10  ;;  %5762 = vmatprep.subr.bf16.mxu0 %v19802_v24  ;;  %v21760_v10 = vrot.slane %v5855_v31, %v21186_v6  ;;  %v18413_v31 = vld [vmem:[%s24096_s5 + $0x34c] ss:$12 sps:$4 sm:$0xff]  }
 0x4d7   : > { %7531 = vmatprep.subr.bf16.mxu1 %v18308_v59  ;;  %v18356_v59 = vld [vmem:[%s24096_s5 + $0x814] ss:$12 sps:$4 sm:$0xff]  }
 0x4d9   : > { %5763 = vmatpush1.bf16.msra.mxu0 %v18305_v51  ;;  %v18351_v51 = vld [vmem:[%s24096_s5 + $0x258] ss:$12 sps:$4 sm:$0xff]  }
 0x4da   : > { %7532 = vmatpush1.bf16.msra.mxu1 %v18306_v2  ;;  %5764 = vmatprep.subr.bf16.mxu0 %v19802_v24  ;;  %v18354_v2 = vld [vmem:[%s24096_s5 + $0x810] ss:$12 sps:$4 sm:$0xff]  }
 0x4db   : > { %7533 = vmatprep.subr.bf16.mxu1 %v18312_v50  ;;  %v18359_v50 = vld [vmem:[%s24096_s5 + $0x274] ss:$12 sps:$4 sm:$0xff]  }
 0x4dd   : > { %5765 = vmatpush1.bf16.msra.mxu0 %v18309_v29  ;;  %v18357_v29 = vld [vmem:[%s24096_s5 + $0x270] ss:$12 sps:$4 sm:$0xff]  }
 0x4de   : > { %7534 = vmatpush1.bf16.msra.mxu1 %v18310_v46  ;;  %5766 = vmatprep.subr.bf16.mxu0 %v19802_v24  ;;  %v18360_v46 = vld [vmem:[%s24096_s5 + $0x828] ss:$12 sps:$4 sm:$0xff]  }
 0x4df   : > { %7535 = vmatprep.subr.bf16.mxu1 %v18316_v16  ;;  %v18365_v16 = vld [vmem:[%s24096_s5 + $0x28c] ss:$12 sps:$4 sm:$0xff]  }
 0x4e1   : > { %5767 = vmatpush1.bf16.msra.mxu0 %v18313_v43  ;;  %v18368_v43 = vld [vmem:[%s24096_s5 + $0x844] ss:$12 sps:$4 sm:$0xff]  }
 0x4e2   : > { %7536 = vmatpush1.bf16.msra.mxu1 %v18314_v22  ;;  %5768 = vmatprep.subr.bf16.mxu0 %v19802_v24  ;;  %v18363_v22 = vld [vmem:[%s24096_s5 + $0x288] ss:$12 sps:$4 sm:$0xff]  }
 0x4e3   : > { %7537 = vmatprep.subr.bf16.mxu1 %v18320_v56  ;;  %v18366_v56 = vld [vmem:[%s24096_s5 + $0x840] ss:$12 sps:$4 sm:$0xff]  }
 0x4e5   : > { %5769 = vmatpush1.bf16.msra.mxu0 %v18317_v36  ;;  %v18374_v36 = vld [vmem:[%s24096_s5 + $0x85c] ss:$12 sps:$4 sm:$0xff]  }
 0x4e6   : > { %7538 = vmatpush1.bf16.msra.mxu1 %v18318_v8  ;;  %5770 = vmatprep.subr.bf16.mxu0 %v19802_v24  ;;  %v18369_v8 = vld [vmem:[%s24096_s5 + $0x2a0] ss:$12 sps:$4 sm:$0xff]  }
 0x4e7   : > { %7539 = vmatprep.subr.bf16.mxu1 %v18324_v49  ;;  %v18372_v49 = vld [vmem:[%s24096_s5 + $0x858] ss:$12 sps:$4 sm:$0xff]  }
 0x4e9   : > { %5771 = vmatpush1.bf16.msra.mxu0 %v18321_v61  ;;  %v18377_v61 = vld [vmem:[%s24096_s5 + $0x2bc] ss:$12 sps:$4 sm:$0xff]  }
 0x4ea   : > { %7540 = vmatpush1.bf16.msra.mxu1 %v18322_v26  ;;  %5772 = vmatprep.subr.bf16.mxu0 %v19802_v24  ;;  %v18380_v26 = vld [vmem:[%s24096_s5 + $0x874] ss:$12 sps:$4 sm:$0xff]  }
 0x4eb   : > { %7541 = vmatprep.subr.bf16.mxu1 %v18328_v53  ;;  %v18375_v53 = vld [vmem:[%s24096_s5 + $0x2b8] ss:$12 sps:$4 sm:$0xff]  }
 0x4ed   : > { %5773 = vmatpush1.bf16.msra.mxu0 %v18325_v28  ;;  %v18383_v28 = vld [vmem:[%s24096_s5 + $0x2d4] ss:$12 sps:$4 sm:$0xff]  }
 0x4ee   : > { %7542 = vmatpush1.bf16.msra.mxu1 %v18326_v63  ;;  %5774 = vmatprep.subr.bf16.mxu0 %v19802_v24  ;;  %v18381_v63 = vld [vmem:[%s24096_s5 + $0x2d0] ss:$12 sps:$4 sm:$0xff]  }
 0x4ef   : > { %7543 = vmatprep.subr.bf16.mxu1 %v18332_v47  ;;  %v18384_v47 = vld [vmem:[%s24096_s5 + $0x888] ss:$12 sps:$4 sm:$0xff]  }
 0x4f1   : > { %5775 = vmatpush1.bf16.msra.mxu0 %v18329_v14  ;;  %v18389_v14 = vld [vmem:[%s24096_s5 + $0x2ec] ss:$12 sps:$4 sm:$0xff]  }
 0x4f2   : > { %7544 = vmatpush1.bf16.msra.mxu1 %v18330_v13  ;;  %5776 = vmatprep.subr.bf16.mxu0 %v19802_v24  ;;  %v18387_v13 = vld [vmem:[%s24096_s5 + $0x2e8] ss:$12 sps:$4 sm:$0xff]  }
 0x4f3   : > { %7545 = vmatprep.subr.bf16.mxu1 %v18336_v25  ;;  %v18390_v25 = vld [vmem:[%s24096_s5 + $0x8a0] ss:$12 sps:$4 sm:$0xff]  }
 0x4f5   : > { %5777 = vmatpush1.bf16.msra.mxu0 %v18333_v41  ;;  %v18398_v41 = vld [vmem:[%s24096_s5 + $0x8bc] ss:$12 sps:$4 sm:$0xff]  }
 0x4f6   : > { %7546 = vmatpush1.bf16.msra.mxu1 %v18334_v32  ;;  %5778 = vmatprep.subr.bf16.mxu0 %v19802_v24  ;;  %v18393_v32 = vld [vmem:[%s24096_s5 + $0x300] ss:$12 sps:$4 sm:$0xff]  }
 0x4f7   : > { %7547 = vmatprep.subr.bf16.mxu1 %v18340_v57  ;;  %v18396_v57 = vld [vmem:[%s24096_s5 + $0x8b8] ss:$12 sps:$4 sm:$0xff]  }
 0x4f9   : > { %5779 = vmatpush1.bf16.msra.mxu0 %v18337_v27  ;;  %v18404_v27 = vld [vmem:[%s24096_s5 + $0x8d4] ss:$12 sps:$4 sm:$0xff]  }
 0x4fa   : > { %7548 = vmatpush1.bf16.msra.mxu1 %v18338_v58  ;;  %5780 = vmatprep.subr.bf16.mxu0 %v19802_v24  ;;  %v8027_v58 = vcombine.low %v21226_v39, %v21661_v19  ;;  %v18410_v39 = vld [vmem:[%s24096_s5 + $0x8ec] ss:$12 sps:$4 sm:$0xff]  }
 0x4fb   : > { %7894 = vmatprep.subr.bf16.mxu1 %v18344_v12  ;;  %v18399_v12 = vld [vmem:[%s24096_s5 + $0x318] ss:$12 sps:$4 sm:$0xff]  }
 0x4fc   : > { %v21879_v19 = vrot.slane %v8027_v58, %v21186_v6  ;;  %v18449_v58 = vld [vmem:[%s24096_s5 + $0x308] ss:$12 sps:$4 sm:$0xff]  }
 0x4fd   : > { %5781 = vmatpush1.bf16.msra.mxu0 %v18341_v42  ;;  %7558 = vmatmul.mubr.bf16.vlgmr.msra.gmra.mrb[24].mxu1 %v21734_v44  ;;  %v18407_v42 = vld [vmem:[%s24096_s5 + $0x334] ss:$12 sps:$4 sm:$0xff]  }
 0x4fe   : > { %7895 = vmatpush1.bf16.msra.mxu1 %v18342_v37  ;;  %16082 = vmatprep.mubr.msk.bf16.mxu1 %vm24203_vm12, %v21745_v55  ;;  %v18405_v37 = vld [vmem:[%s24096_s5 + $0x330] ss:$12 sps:$4 sm:$0xff]  }
 0x4ff   : > { %6066 = vmatprep.subr.bf16.mxu0 %v18347_v21  ;;  %7896 = vmatprep.subr.bf16.mxu1 %v18350_v54  ;;  %v18408_v21 = vld [vmem:[%s24096_s5 + $0x8e8] ss:$12 sps:$4 sm:$0xff]   ;;  %v18416_v54 = vld [vmem:[%s24096_s5 + $0x904] ss:$12 sps:$4 sm:$0xff]  }
 0x500   : > { %5791 = vmatmul.mubr.bf16.vlgmr.msra.gmra.mrb[20].mxu0 %v21593_v1  ;;  %v18362_v1 = vld [vmem:[%s24096_s5 + $0x82c] ss:$12 sps:$4 sm:$0xff]  }
 0x501   : > { %6067 = vmatpush1.bf16.msra.mxu0 %v18345_v45  ;;  %15648 = vmatprep.mubr.msk.bf16.mxu0 %vm24204_vm7, %v21760_v10  ;;  %v8035_v45 = vcombine.high %v21879_v19, %v21879_v19 }
 0x502   : > { %7897 = vmatpush1.bf16.msra.mxu1 %v18348_v9  ;;  %6068 = vmatprep.subr.bf16.mxu0 %v18353_v40  ;;  %v18411_v9 = vld [vmem:[%s24096_s5 + $0x348] ss:$12 sps:$4 sm:$0xff]   ;;  %v18414_v40 = vld [vmem:[%s24096_s5 + $0x900] ss:$12 sps:$4 sm:$0xff]  }
 0x503   : > { %7898 = vmatprep.subr.bf16.mxu1 %v18356_v59  ;;  %v21903_v59 = vrot.slane %v21708_v30, %v21186_v6  ;;  %v21919_v30 = vrot.slane %v21721_v17, %v21186_v6  ;;  %v18421_v17 = vld [vmem:[%s24096_s5 + $0x260] ss:$12 sps:$4 sm:$0xff]  }
 0x505   : > { %6069 = vmatpush1.bf16.msra.mxu0 %v18351_v51  ;;  %v18420_v51 = vld [vmem:[%s24096_s5 + $0x91c] ss:$12 sps:$4 sm:$0xff]  }
 0x506   : > { %7899 = vmatpush1.bf16.msra.mxu1 %v18354_v2  ;;  %6070 = vmatprep.subr.bf16.mxu0 %v18359_v50  ;;  %v21909_v2 = vrot.slane %v8035_v45, %v21186_v6  ;;  %v18417_v50 = vld [vmem:[%s24096_s5 + $0x248] ss:$12 sps:$4 sm:$0xff]   ;;  %v22042_v45 = vrot.slane %v21879_v19, %v21186_v6  ;;  %v18463_v19 = vld [vmem:[%s24096_s5 + $0x380] ss:$12 sps:$4 sm:$0xff]  }
 0x507   : > { %7900 = vmatprep.subr.bf16.mxu1 %v18362_v1  ;;  %v18418_v1 = vld [vmem:[%s24096_s5 + $0x918] ss:$12 sps:$4 sm:$0xff]  }
 0x509   : > { %6071 = vmatpush1.bf16.msra.mxu0 %v18357_v29  ;;  %v18424_v29 = vld [vmem:[%s24096_s5 + $0x934] ss:$12 sps:$4 sm:$0xff]  }
 0x50a   : > { %7901 = vmatpush1.bf16.msra.mxu1 %v18360_v46  ;;  %6072 = vmatprep.subr.bf16.mxu0 %v18365_v16  ;;  %v18422_v46 = vld [vmem:[%s24096_s5 + $0x930] ss:$12 sps:$4 sm:$0xff]   ;;  %v18428_v16 = vld [vmem:[%s24096_s5 + $0x94c] ss:$12 sps:$4 sm:$0xff]  }
 0x50b   : > { %7902 = vmatprep.subr.bf16.mxu1 %v18368_v43  ;;  %v18426_v43 = vld [vmem:[%s24096_s5 + $0x948] ss:$12 sps:$4 sm:$0xff]  }
 0x50d   : > { %6073 = vmatpush1.bf16.msra.mxu0 %v18363_v22  ;;  %v18432_v22 = vld [vmem:[%s24096_s5 + $0x964] ss:$12 sps:$4 sm:$0xff]  }
 0x50e   : > { %7903 = vmatpush1.bf16.msra.mxu1 %v18366_v56  ;;  %6074 = vmatprep.subr.bf16.mxu0 %v18371_v0  ;;  %v18429_v56 = vld [vmem:[%s24096_s5 + $0x290] ss:$12 sps:$4 sm:$0xff]   ;;  %v18430_v0 = vld [vmem:[%s24096_s5 + $0x960] ss:$12 sps:$4 sm:$0xff]  }
 0x50f   : > { %7904 = vmatprep.subr.bf16.mxu1 %v18374_v36  ;;  %v18436_v36 = vld [vmem:[%s24096_s5 + $0x97c] ss:$12 sps:$4 sm:$0xff]  }
 0x511   : > { %6075 = vmatpush1.bf16.msra.mxu0 %v18369_v8  ;;  %v18433_v8 = vld [vmem:[%s24096_s5 + $0x2a8] ss:$12 sps:$4 sm:$0xff]  }
 0x512   : > { %7905 = vmatpush1.bf16.msra.mxu1 %v18372_v49  ;;  %6076 = vmatprep.subr.bf16.mxu0 %v18377_v61  ;;  %v18434_v49 = vld [vmem:[%s24096_s5 + $0x978] ss:$12 sps:$4 sm:$0xff]   ;;  %v18440_v61 = vld [vmem:[%s24096_s5 + $0x994] ss:$12 sps:$4 sm:$0xff]  }
 0x513   : > { %7906 = vmatprep.subr.bf16.mxu1 %v18380_v26 }
 0x515   : > { %6077 = vmatpush1.bf16.msra.mxu0 %v18375_v53 }
 0x516   : > { %7907 = vmatpush1.bf16.msra.mxu1 %v18378_v60  ;;  %6078 = vmatprep.subr.bf16.mxu0 %v18383_v28  ;;  %v18437_v60 = vld [vmem:[%s24096_s5 + $0x2c0] ss:$12 sps:$4 sm:$0xff]  }
 0x517   : > { %7908 = vmatprep.subr.bf16.mxu1 %v18386_v20  ;;  %v18438_v20 = vld [vmem:[%s24096_s5 + $0x990] ss:$12 sps:$4 sm:$0xff]  }
 0x519   : > { %6079 = vmatpush1.bf16.msra.mxu0 %v18381_v63 }
 0x51a   : > { %7909 = vmatpush1.bf16.msra.mxu1 %v18384_v47  ;;  %6080 = vmatprep.subr.bf16.mxu0 %v18389_v14  ;;  %v18444_v14 = vld [vmem:[%s24096_s5 + $0x9ac] ss:$12 sps:$4 sm:$0xff]  }
 0x51b   : > { %7910 = vmatprep.subr.bf16.mxu1 %v18392_v48 }
 0x51d   : > { %6081 = vmatpush1.bf16.msra.mxu0 %v18387_v13 }
 0x51e   : > { %7911 = vmatpush1.bf16.msra.mxu1 %v18390_v25  ;;  %6082 = vmatprep.subr.bf16.mxu0 %v18395_v5  ;;  %v18441_v25 = vld [vmem:[%s24096_s5 + $0x2d8] ss:$12 sps:$4 sm:$0xff]  }
 0x51f   : > { %7912 = vmatprep.subr.bf16.mxu1 %v18398_v41  ;;  %v18442_v41 = vld [vmem:[%s24096_s5 + $0x9a8] ss:$12 sps:$4 sm:$0xff]  }
 0x521   : > { %6083 = vmatpush1.bf16.msra.mxu0 %v18393_v32  ;;  %v18448_v32 = vld [vmem:[%s24096_s5 + $0x9c4] ss:$12 sps:$4 sm:$0xff]  }
 0x522   : > { %7913 = vmatpush1.bf16.msra.mxu1 %v18396_v57  ;;  %6084 = vmatprep.subr.bf16.mxu0 %v18401_v3  ;;  %v18445_v57 = vld [vmem:[%s24096_s5 + $0x2f0] ss:$12 sps:$4 sm:$0xff]   ;;  %v18446_v3 = vld [vmem:[%s24096_s5 + $0x9c0] ss:$12 sps:$4 sm:$0xff]  }
 0x523   : > { %7914 = vmatprep.subr.bf16.mxu1 %v18404_v27  ;;  %v18452_v27 = vld [vmem:[%s24096_s5 + $0x9dc] ss:$12 sps:$4 sm:$0xff]  }
 0x525   : > { %6085 = vmatpush1.bf16.msra.mxu0 %v18399_v12  ;;  %v18450_v12 = vld [vmem:[%s24096_s5 + $0x9d8] ss:$12 sps:$4 sm:$0xff]  }
 0x526   : > { %7915 = vmatpush1.bf16.msra.mxu1 %v18402_v38  ;;  %6086 = vmatprep.subr.bf16.mxu0 %v18407_v42  ;;  %v18456_v38 = vld [vmem:[%s24096_s5 + $0x9f4] ss:$12 sps:$4 sm:$0xff]  }
 0x527   : > { %7916 = vmatprep.subr.bf16.mxu1 %v18410_v39  ;;  %v18453_v42 = vld [vmem:[%s24096_s5 + $0x320] ss:$12 sps:$4 sm:$0xff]   ;;  %v18454_v39 = vld [vmem:[%s24096_s5 + $0x9f0] ss:$12 sps:$4 sm:$0xff]  }
 0x529   : > { %6087 = vmatpush1.bf16.msra.mxu0 %v18405_v37  ;;  %v18460_v37 = vld [vmem:[%s24096_s5 + $0xa0c] ss:$12 sps:$4 sm:$0xff]  }
 0x52a   : > { %7917 = vmatpush1.bf16.msra.mxu1 %v18408_v21  ;;  %6088 = vmatprep.subr.bf16.mxu0 %v18413_v31  ;;  %v18457_v21 = vld [vmem:[%s24096_s5 + $0x338] ss:$12 sps:$4 sm:$0xff]   ;;  %v18458_v31 = vld [vmem:[%s24096_s5 + $0xa08] ss:$12 sps:$4 sm:$0xff]  }
 0x52b   : > { %8246 = vmatprep.subr.bf16.mxu1 %v18416_v54  ;;  %v18461_v54 = vld [vmem:[%s24096_s5 + $0x350] ss:$12 sps:$4 sm:$0xff]  }
 0x52d   : > { %6089 = vmatpush1.bf16.msra.mxu0 %v18411_v9  ;;  %7927 = vmatmul.mubr.bf16.vlgmr.msra.gmra.mrb[28].mxu1 %v21903_v59  ;;  %v18462_v9 = vld [vmem:[%s24096_s5 + $0x368] ss:$12 sps:$4 sm:$0xff]  }
 0x52e   : > { %8247 = vmatpush1.bf16.msra.mxu1 %v18414_v40  ;;  %16168 = vmatprep.mubr.msk.bf16.mxu1 %vm24205_vm8, %v21909_v2  ;;  %v18464_v40 = vld [vmem:[%s24096_s5 + $0x398] ss:$12 sps:$4 sm:$0xff]  }
 0x52f   : > { %6107 = vmatprep.subr.bf16.mxu0 %v19802_v24  ;;  %8248 = vmatprep.subr.bf16.mxu1 %v18420_v51  ;;  %v18465_v51 = vld [vmem:[%s24096_s5 + $0x3b0] ss:$12 sps:$4 sm:$0xff]  }
 0x530   : > { %6099 = vmatmul.mubr.bf16.vlgmr.msra.gmra.mrb[24].mxu0 %v21919_v30 }
 0x531   : > { %6108 = vmatpush1.bf16.msra.mxu0 %v18417_v50  ;;  %15649 = vmatprep.mubr.msk.bf16.mxu0 %vm24206_vm11, %v21760_v10  ;;  %v18425_v10 = vld [vmem:[%s24096_s5 + $0x278] ss:$12 sps:$4 sm:$0xff]  }
 0x532   : > { %8249 = vmatpush1.bf16.msra.mxu1 %v18418_v1  ;;  %6109 = vmatprep.subr.bf16.mxu0 %v19802_v24  ;;  %v18467_v1 = vld [vmem:[%s24096_s5 + $0x3e0] ss:$12 sps:$4 sm:$0xff]  }
 0x533   : > { %8250 = vmatprep.subr.bf16.mxu1 %v18424_v29 }
 0x535   : > { %6110 = vmatpush1.bf16.msra.mxu0 %v18421_v17 }
 0x536   : > { %8251 = vmatpush1.bf16.msra.mxu1 %v18422_v46  ;;  %6111 = vmatprep.subr.bf16.mxu0 %v19802_v24 }
 0x537   : > { %8252 = vmatprep.subr.bf16.mxu1 %v18428_v16 }
 0x539   : > { %6112 = vmatpush1.bf16.msra.mxu0 %v18425_v10 }
 0x53a   : > { %8253 = vmatpush1.bf16.msra.mxu1 %v18426_v43  ;;  %6113 = vmatprep.subr.bf16.mxu0 %v19802_v24  ;;  %v18468_v43 = vld [vmem:[%s24096_s5 + $0x3f8] ss:$12 sps:$4 sm:$0xff]  }
 0x53b   : > { %8254 = vmatprep.subr.bf16.mxu1 %v18432_v22 }
 0x53d   : > { %6114 = vmatpush1.bf16.msra.mxu0 %v18429_v56  ;;  %v18469_v56 = vld [vmem:[%s24096_s5 + $0x410] ss:$12 sps:$4 sm:$0xff]  }
 0x53e   : > { %8255 = vmatpush1.bf16.msra.mxu1 %v18430_v0  ;;  %6115 = vmatprep.subr.bf16.mxu0 %v19802_v24  ;;  %v18470_v0 = vld [vmem:[%s24096_s5 + $0x428] ss:$12 sps:$4 sm:$0xff]  }
 0x53f   : > { %8256 = vmatprep.subr.bf16.mxu1 %v18436_v36  ;;  %v18471_v36 = vld [vmem:[%s24096_s5 + $0x440] ss:$12 sps:$4 sm:$0xff]  }
 0x540   : > { %v21971_v26 = vpop.f32.mrb[12].mxu1 }
 0x541   : > { %6116 = vmatpush1.bf16.msra.mxu0 %v18433_v8  ;;  %v21973_v53 = vpop.f32.mrb[13].mxu1  ;;  %v18472_v8 = vld [vmem:[%s24096_s5 + $0x458] ss:$12 sps:$4 sm:$0xff]  }
 0x542   : > { %8257 = vmatpush1.bf16.msra.mxu1 %v18434_v49  ;;  %v6473_v28 = vpop.f32.mrb[14].mxu1  ;;  %6117 = vmatprep.subr.bf16.mxu0 %v19802_v24  ;;  %v18473_v49 = vld [vmem:[%s24096_s5 + $0x470] ss:$12 sps:$4 sm:$0xff]  }
 0x543   : > { %v21982_v63 = vpop.f32.mrb[8].mxu0  ;;  %v6474_v47 = vpop.f32.mrb[15].mxu1  ;;  %8258 = vmatprep.subr.bf16.mxu1 %v18440_v61  ;;  %v18474_v61 = vld [vmem:[%s24096_s5 + $0x488] ss:$12 sps:$4 sm:$0xff]   ;;  %v18476_v28 = vld [vmem:[%s24096_s5 + $0x4b8] ss:$12 sps:$4 sm:$0xff]  }
 0x544   : > { %v21987_v48 = vpop.f32.mrb[9].mxu0 }
 0x545   : > { %6118 = vmatpush1.bf16.msra.mxu0 %v18437_v60  ;;  %v5455_v13 = vpop.f32.mrb[10].mxu0  ;;  %v18475_v60 = vld [vmem:[%s24096_s5 + $0x4a0] ss:$12 sps:$4 sm:$0xff]  }
 0x546   : > { %8259 = vmatpush1.bf16.msra.mxu1 %v18438_v20  ;;  %v5456_v5 = vpop.f32.mrb[11].mxu0  ;;  %6119 = vmatprep.subr.bf16.mxu0 %v19802_v24 }
 0x547   : > { %8260 = vmatprep.subr.bf16.mxu1 %v18444_v14  ;;  %v18479_v14 = vld [vmem:[%s24096_s5 + $0x500] ss:$12 sps:$4 sm:$0xff]  }
 0x549   : > { %6120 = vmatpush1.bf16.msra.mxu0 %v18441_v25 }
 0x54a   : > { %8261 = vmatpush1.bf16.msra.mxu1 %v18442_v41  ;;  %6121 = vmatprep.subr.bf16.mxu0 %v19802_v24 }
 0x54b   : > { %8262 = vmatprep.subr.bf16.mxu1 %v18448_v32 }
 0x54d   : > { %6122 = vmatpush1.bf16.msra.mxu0 %v18445_v57 }
 0x54e   : > { %8263 = vmatpush1.bf16.msra.mxu1 %v18446_v3  ;;  %6123 = vmatprep.subr.bf16.mxu0 %v19802_v24 }
 0x54f   : > { %8264 = vmatprep.subr.bf16.mxu1 %v18452_v27  ;;  %v18480_v27 = vld [vmem:[%s24096_s5 + $0x518] ss:$12 sps:$4 sm:$0xff]  }
 0x551   : > { %6124 = vmatpush1.bf16.msra.mxu0 %v18449_v58 }
 0x552   : > { %8265 = vmatpush1.bf16.msra.mxu1 %v18450_v12  ;;  %6125 = vmatprep.subr.bf16.mxu0 %v19802_v24  ;;  %v18481_v12 = vld [vmem:[%s24096_s5 + $0x530] ss:$12 sps:$4 sm:$0xff]  }
 0x553   : > { %8266 = vmatprep.subr.bf16.mxu1 %v18456_v38  ;;  %v18484_v38 = vld [vmem:[%s24096_s5 + $0x578] ss:$12 sps:$4 sm:$0xff]  }
 0x555   : > { %6126 = vmatpush1.bf16.msra.mxu0 %v18453_v42  ;;  %v18485_v42 = vld [vmem:[%s24096_s5 + $0x590] ss:$12 sps:$4 sm:$0xff]  }
 0x556   : > { %8267 = vmatpush1.bf16.msra.mxu1 %v18454_v39  ;;  %6127 = vmatprep.subr.bf16.mxu0 %v19802_v24  ;;  %v18486_v39 = vld [vmem:[%s24096_s5 + $0x5a8] ss:$12 sps:$4 sm:$0xff]  }
 0x557   : > { %8268 = vmatprep.subr.bf16.mxu1 %v18460_v37  ;;  %v18487_v37 = vld [vmem:[%s24096_s5 + $0x5c0] ss:$12 sps:$4 sm:$0xff]  }
 0x559   : > { %6128 = vmatpush1.bf16.msra.mxu0 %v18457_v21  ;;  %v18488_v21 = vld [vmem:[%s24096_s5 + $0x5d8] ss:$12 sps:$4 sm:$0xff]  }
 0x55a   : > { %8269 = vmatpush1.bf16.msra.mxu1 %v18458_v31  ;;  %6129 = vmatprep.subr.bf16.mxu0 %v19802_v24 }
 0x55d   : > { %6130 = vmatpush1.bf16.msra.mxu0 %v18461_v54  ;;  %8279 = vmatmul.mubr.bf16.vlgmr.msra.gmra.mrb[32].mxu1 %v22042_v45 }
 0x55e   : > { %6476 = vmatprep.subr.bf16.mxu0 %v19802_v24 }
 0x560   : > { %6140 = vmatmul.mubr.bf16.vlgmr.msra.gmra.mrb[28].mxu0 %v21919_v30 }
 0x561   : > { %6477 = vmatpush1.bf16.msra.mxu0 %v18462_v9  ;;  %15736 = vmatprep.mubr.msk.bf16.mxu0 %vm24207_vm15, %v21240_v33  ;;  %v18466_v33 = vld [vmem:[%s24096_s5 + $0x3c8] ss:$12 sps:$4 sm:$0xff]   ;;  %v18491_v9 = vld [vmem:[%s24096_s5 + $0x620] ss:$12 sps:$4 sm:$0xff]  }
 0x562   : > { %6478 = vmatprep.subr.bf16.mxu0 %v19802_v24 }
 0x565   : > { %6479 = vmatpush1.bf16.msra.mxu0 %v18463_v19 }
 0x566   : > { %6480 = vmatprep.subr.bf16.mxu0 %v19802_v24 }
 0x569   : > { %6481 = vmatpush1.bf16.msra.mxu0 %v18464_v40 }
 0x56a   : > { %6482 = vmatprep.subr.bf16.mxu0 %v19802_v24 }
 0x56d   : > { %6483 = vmatpush1.bf16.msra.mxu0 %v18465_v51 }
 0x56e   : > { %6484 = vmatprep.subr.bf16.mxu0 %v19802_v24 }
 0x570   : > { %v22068_v50 = vpop.f32.mrb[16].mxu1 }
 0x571   : > { %6485 = vmatpush1.bf16.msra.mxu0 %v18466_v33  ;;  %v22070_v30 = vpop.f32.mrb[17].mxu1 }
 0x572   : > { %v6842_v29 = vpop.f32.mrb[18].mxu1  ;;  %6486 = vmatprep.subr.bf16.mxu0 %v19802_v24 }
 0x573   : > { %v22076_v17 = vpop.f32.mrb[12].mxu0  ;;  %v6843_v46 = vpop.f32.mrb[19].mxu1 }
 0x574   : > { %v5494_v16 = vpop.f32.mrb[13].mxu0  ;;  %v18492_v46 = vld [vmem:[%s24096_s5 + $0x638] ss:$12 sps:$4 sm:$0xff]  }
 0x575   : > { %v5495_v10 = vpop.f32.mrb[14].mxu0  ;;  %6487 = vmatpush1.bf16.msra.mxu0 %v18467_v1 }
 0x576   : > { %v5496_v22 = vpop.f32.mrb[15].mxu0  ;;  %6488 = vmatprep.subr.bf16.mxu0 %v19802_v24  ;;  %v18493_v10 = vld [vmem:[%s24096_s5 + $0x650] ss:$12 sps:$4 sm:$0xff]  }
 0x577   : > { %v18496_v22 = vld [vmem:[%s24096_s5 + $0x698] ss:$12 sps:$4 sm:$0xff]  }
 0x579   : > { %6489 = vmatpush1.bf16.msra.mxu0 %v18468_v43  ;;  %v18495_v43 = vld [vmem:[%s24096_s5 + $0x680] ss:$12 sps:$4 sm:$0xff]  }
 0x57a   : > { %6490 = vmatprep.subr.bf16.mxu0 %v19802_v24 }
 0x57d   : > { %6491 = vmatpush1.bf16.msra.mxu0 %v18469_v56  ;;  %v18497_v56 = vld [vmem:[%s24096_s5 + $0x6b0] ss:$12 sps:$4 sm:$0xff]  }
 0x57e   : > { %6492 = vmatprep.subr.bf16.mxu0 %v19802_v24 }
 0x581   : > { %6493 = vmatpush1.bf16.msra.mxu0 %v18470_v0  ;;  %v18498_v0 = vld [vmem:[%s24096_s5 + $0x6c8] ss:$12 sps:$4 sm:$0xff]  }
 0x582   : > { %6494 = vmatprep.subr.bf16.mxu0 %v19802_v24 }
 0x585   : > { %6495 = vmatpush1.bf16.msra.mxu0 %v18471_v36  ;;  %v18499_v36 = vld [vmem:[%s24096_s5 + $0x6e0] ss:$12 sps:$4 sm:$0xff]  }
 0x586   : > { %6496 = vmatprep.subr.bf16.mxu0 %v19802_v24 }
 0x589   : > { %6497 = vmatpush1.bf16.msra.mxu0 %v18472_v8  ;;  %v18500_v8 = vld [vmem:[%s24096_s5 + $0x6f8] ss:$12 sps:$4 sm:$0xff]  }
 0x58a   : > { %6498 = vmatprep.subr.bf16.mxu0 %v19802_v24 }
 0x58d   : > { %6499 = vmatpush1.bf16.msra.mxu0 %v18473_v49 }
 0x58e   : > { %6845 = vmatprep.subr.bf16.mxu0 %v19802_v24 }
 0x590   : > { %6509 = vmatmul.mubr.bf16.vlgmr.msra.gmra.mrb[32].mxu0 %v21246_v15  ;;  %v18477_v15 = vld [vmem:[%s24096_s5 + $0x4d0] ss:$12 sps:$4 sm:$0xff]  }
 0x591   : > { %6846 = vmatpush1.bf16.msra.mxu0 %v18474_v61  ;;  %15823 = vmatprep.mubr.msk.bf16.mxu0 %vm24208_vm2, %v21271_v7  ;;  %v18478_v7 = vld [vmem:[%s24096_s5 + $0x4e8] ss:$12 sps:$4 sm:$0xff]  }
 0x592   : > { %6847 = vmatprep.subr.bf16.mxu0 %v19802_v24 }
 0x595   : > { %6848 = vmatpush1.bf16.msra.mxu0 %v18475_v60  ;;  %v18503_v60 = vld [vmem:[%s24096_s5 + $0x740] ss:$12 sps:$4 sm:$0xff]  }
 0x596   : > { %6849 = vmatprep.subr.bf16.mxu0 %v19802_v24 }
 0x599   : > { %6850 = vmatpush1.bf16.msra.mxu0 %v18476_v28 }
 0x59a   : > { %6851 = vmatprep.subr.bf16.mxu0 %v19802_v24 }
 0x59d   : > { %6852 = vmatpush1.bf16.msra.mxu0 %v18477_v15 }
 0x59e   : > { %6853 = vmatprep.subr.bf16.mxu0 %v19802_v24 }
 0x5a0   : > { %v22125_v20 = vpop.f32.mrb[20].mxu1 }
 0x5a1   : > { %6854 = vmatpush1.bf16.msra.mxu0 %v18478_v7  ;;  %v22127_v47 = vpop.f32.mrb[21].mxu1 }
 0x5a2   : > { %v7194_v13 = vpop.f32.mrb[22].mxu1  ;;  %6855 = vmatprep.subr.bf16.mxu0 %v19802_v24 }
 0x5a3   : > { %v5751_v25 = vpop.f32.mrb[16].mxu0  ;;  %v7195_v5 = vpop.f32.mrb[23].mxu1 }
 0x5a4   : > { %v22134_v41 = vadd.f32 %v5751_v25, %v21982_v63  ;;  %v5753_v32 = vpop.f32.mrb[17].mxu0  ;;  %v18482_v63 = vld [vmem:[%s24096_s5 + $0x548] ss:$12 sps:$4 sm:$0xff]  }
 0x5a5   : > { %v22137_v57 = vadd.f32 %v5753_v32, %v21987_v48  ;;  %v5755_v3 = vpop.f32.mrb[18].mxu0  ;;  %6856 = vmatpush1.bf16.msra.mxu0 %v18479_v14  ;;  %v18483_v48 = vld [vmem:[%s24096_s5 + $0x560] ss:$12 sps:$4 sm:$0xff]   ;;  %v18504_v32 = vld [vmem:[%s24096_s5 + $0x758] ss:$12 sps:$4 sm:$0xff]  }
 0x5a6   : > { %v5756_v58 = vpop.f32.mrb[19].mxu0  ;;  %6857 = vmatprep.subr.bf16.mxu0 %v19802_v24 }
 0x5a9   : > { %6858 = vmatpush1.bf16.msra.mxu0 %v18480_v27 }
 0x5aa   : > { %6859 = vmatprep.subr.bf16.mxu0 %v19802_v24 }
 0x5ad   : > { %6860 = vmatpush1.bf16.msra.mxu0 %v18481_v12 }
 0x5ae   : > { %6861 = vmatprep.subr.bf16.mxu0 %v19802_v24 }
 0x5b1   : > { %6862 = vmatpush1.bf16.msra.mxu0 %v18482_v63 }
 0x5b2   : > { %6863 = vmatprep.subr.bf16.mxu0 %v19802_v24 }
 0x5b5   : > { %6864 = vmatpush1.bf16.msra.mxu0 %v18483_v48 }
 0x5b6   : > { %6865 = vmatprep.subr.bf16.mxu0 %v19802_v24 }
 0x5b9   : > { %6866 = vmatpush1.bf16.msra.mxu0 %v18484_v38 }
 0x5ba   : > { %6867 = vmatprep.subr.bf16.mxu0 %v19802_v24 }
 0x5bd   : > { %6868 = vmatpush1.bf16.msra.mxu0 %v18485_v42  ;;  %v18509_v42 = vld [vmem:[%s24096_s5 + $0x7d0] ss:$12 sps:$4 sm:$0xff]  }
 0x5be   : > { %7197 = vmatprep.subr.bf16.mxu0 %v19802_v24 }
 0x5c0   : > { %6878 = vmatmul.mubr.bf16.vlgmr.msra.gmra.mrb[36].mxu0 %v21401_v52  ;;  %v18489_v52 = vld [vmem:[%s24096_s5 + $0x5f0] ss:$12 sps:$4 sm:$0xff]  }
 0x5c1   : > { %7198 = vmatpush1.bf16.msra.mxu0 %v18486_v39  ;;  %15909 = vmatprep.mubr.msk.bf16.mxu0 %vm24209_vm4, %v21412_v4  ;;  %v18490_v4 = vld [vmem:[%s24096_s5 + $0x608] ss:$12 sps:$4 sm:$0xff]  }
 0x5c2   : > { %7199 = vmatprep.subr.bf16.mxu0 %v19802_v24  ;;  %v18510_v39 = vld [vmem:[%s24096_s5 + $0x7e8] ss:$12 sps:$4 sm:$0xff]  }
 0x5c5   : > { %7200 = vmatpush1.bf16.msra.mxu0 %v18487_v37  ;;  %v18511_v37 = vld [vmem:[%s24096_s5 + $0x800] ss:$12 sps:$4 sm:$0xff]  }
 0x5c6   : > { %7201 = vmatprep.subr.bf16.mxu0 %v19802_v24 }
 0x5c9   : > { %7202 = vmatpush1.bf16.msra.mxu0 %v18488_v21  ;;  %v18512_v21 = vld [vmem:[%s24096_s5 + $0x818] ss:$12 sps:$4 sm:$0xff]  }
 0x5ca   : > { %7203 = vmatprep.subr.bf16.mxu0 %v19802_v24 }
 0x5cd   : > { %7204 = vmatpush1.bf16.msra.mxu0 %v18489_v52  ;;  %v18514_v52 = vld [vmem:[%s24096_s5 + $0x848] ss:$12 sps:$4 sm:$0xff]  }
 0x5ce   : > { %7205 = vmatprep.subr.bf16.mxu0 %v19802_v24 }
 0x5d0   : > { %v22186_v31 = vpop.f32.mrb[24].mxu1 }
 0x5d1   : > { %7206 = vmatpush1.bf16.msra.mxu0 %v18490_v4  ;;  %v22188_v54 = vpop.f32.mrb[25].mxu1 }
 0x5d2   : > { %v7563_v19 = vpop.f32.mrb[26].mxu1  ;;  %7207 = vmatprep.subr.bf16.mxu0 %v19802_v24 }
 0x5d3   : > { %v5792_v40 = vpop.f32.mrb[20].mxu0  ;;  %v7564_v51 = vpop.f32.mrb[27].mxu1 }
 0x5d4   : > { %v22195_v33 = vadd.f32 %v5792_v40, %v22076_v17  ;;  %v5794_v1 = vpop.f32.mrb[21].mxu0  ;;  %v18494_v17 = vld [vmem:[%s24096_s5 + $0x668] ss:$12 sps:$4 sm:$0xff]   ;;  %v18515_v40 = vld [vmem:[%s24096_s5 + $0x860] ss:$12 sps:$4 sm:$0xff]  }
 0x5d5   : > { %v5795_v29 = vpop.f32.mrb[22].mxu0  ;;  %7208 = vmatpush1.bf16.msra.mxu0 %v18491_v9 }
 0x5d6   : > { %v5796_v16 = vpop.f32.mrb[23].mxu0  ;;  %7209 = vmatprep.subr.bf16.mxu0 %v19802_v24 }
 0x5d9   : > { %7210 = vmatpush1.bf16.msra.mxu0 %v18492_v46 }
 0x5da   : > { %7211 = vmatprep.subr.bf16.mxu0 %v19802_v24 }
 0x5dd   : > { %7212 = vmatpush1.bf16.msra.mxu0 %v18493_v10 }
 0x5de   : > { %7213 = vmatprep.subr.bf16.mxu0 %v19802_v24 }
 0x5e1   : > { %7214 = vmatpush1.bf16.msra.mxu0 %v18494_v17 }
 0x5e2   : > { %7215 = vmatprep.subr.bf16.mxu0 %v19802_v24 }
 0x5e5   : > { %7216 = vmatpush1.bf16.msra.mxu0 %v18495_v43 }
 0x5e6   : > { %7217 = vmatprep.subr.bf16.mxu0 %v19802_v24 }
 0x5e9   : > { %7218 = vmatpush1.bf16.msra.mxu0 %v18496_v22 }
 0x5ea   : > { %7219 = vmatprep.subr.bf16.mxu0 %v19802_v24 }
 0x5ed   : > { %7220 = vmatpush1.bf16.msra.mxu0 %v18497_v56 }
 0x5ee   : > { %7566 = vmatprep.subr.bf16.mxu0 %v19802_v24 }
 0x5f0   : > { %7230 = vmatmul.mubr.bf16.vlgmr.msra.gmra.mrb[40].mxu0 %v21577_v23  ;;  %v18501_v23 = vld [vmem:[%s24096_s5 + $0x710] ss:$12 sps:$4 sm:$0xff]  }
 0x5f1   : > { %7567 = vmatpush1.bf16.msra.mxu0 %v18498_v0  ;;  %15996 = vmatprep.mubr.msk.bf16.mxu0 %vm24210_vm3, %v21583_v18  ;;  %v18502_v18 = vld [vmem:[%s24096_s5 + $0x728] ss:$12 sps:$4 sm:$0xff]   ;;  %v18516_v0 = vld [vmem:[%s24096_s5 + $0x878] ss:$12 sps:$4 sm:$0xff]  }
 0x5f2   : > { %7568 = vmatprep.subr.bf16.mxu0 %v19802_v24 }
 0x5f5   : > { %7569 = vmatpush1.bf16.msra.mxu0 %v18499_v36 }
 0x5f6   : > { %7570 = vmatprep.subr.bf16.mxu0 %v19802_v24 }
 0x5f9   : > { %7571 = vmatpush1.bf16.msra.mxu0 %v18500_v8 }
 0x5fa   : > { %7572 = vmatprep.subr.bf16.mxu0 %v19802_v24 }
 0x5fd   : > { %7573 = vmatpush1.bf16.msra.mxu0 %v18501_v23 }
 0x5fe   : > { %7574 = vmatprep.subr.bf16.mxu0 %v19802_v24 }
 0x600   : > { %v7928_v49 = vpop.f32.mrb[28].mxu1 }
 0x601   : > { %7575 = vmatpush1.bf16.msra.mxu0 %v18502_v18  ;;  %v7930_v61 = vpop.f32.mrb[29].mxu1  ;;  %v18517_v18 = vld [vmem:[%s24096_s5 + $0x890] ss:$12 sps:$4 sm:$0xff]  }
 0x602   : > { %v7932_v28 = vpop.f32.mrb[30].mxu1  ;;  %7576 = vmatprep.subr.bf16.mxu0 %v19802_v24 }
 0x603   : > { %v6100_v15 = vpop.f32.mrb[24].mxu0  ;;  %v7933_v7 = vpop.f32.mrb[31].mxu1  ;;  %v18520_v28 = vld [vmem:[%s24096_s5 + $0x8d8] ss:$12 sps:$4 sm:$0xff]  }
 0x604   : > { %v6147_v14 = vadd.f32 %v6100_v15, %v22134_v41  ;;  %v6102_v13 = vpop.f32.mrb[25].mxu0  ;;  %v18521_v15 = vld [vmem:[%s24096_s5 + $0x8f0] ss:$12 sps:$4 sm:$0xff]   ;;  %v18522_v7 = vld [vmem:[%s24096_s5 + $0x908] ss:$12 sps:$4 sm:$0xff]  }
 0x605   : > { %v6148_v25 = vadd.f32 %v6102_v13, %v22137_v57  ;;  %v6104_v5 = vpop.f32.mrb[26].mxu0  ;;  %7577 = vmatpush1.bf16.msra.mxu0 %v18503_v60  ;;  %v18505_v57 = vld [vmem:[%s24096_s5 + $0x770] ss:$12 sps:$4 sm:$0xff]   ;;  %v18519_v60 = vld [vmem:[%s24096_s5 + $0x8c0] ss:$12 sps:$4 sm:$0xff]  }
 0x606   : > { %v6516_v3 = vadd.f32 %v21971_v26, %v6147_v14  ;;  %v6105_v27 = vpop.f32.mrb[27].mxu0  ;;  %7578 = vmatprep.subr.bf16.mxu0 %v19802_v24  ;;  %v18523_v14 = vld [vmem:[%s24096_s5 + $0x920] ss:$12 sps:$4 sm:$0xff]   ;;  %v18524_v13 = vld [vmem:[%s24096_s5 + $0x938] ss:$12 sps:$4 sm:$0xff]  }
 0x607   : > { %v6517_v58 = vadd.f32 %v21973_v53, %v6148_v25  ;;  %v18506_v53 = vld [vmem:[%s24096_s5 + $0x788] ss:$12 sps:$4 sm:$0xff]   ;;  %v18527_v25 = vld [vmem:[%s24096_s5 + $0x980] ss:$12 sps:$4 sm:$0xff]  }
 0x608   : > { %v6885_v12 = vadd.f32 %v22068_v50, %v6516_v3 }
 0x609   : > { %v6886_v41 = vadd.f32 %v22070_v30, %v6517_v58  ;;  %7579 = vmatpush1.bf16.msra.mxu0 %v18504_v32  ;;  %v18528_v58 = vld [vmem:[%s24096_s5 + $0x998] ss:$12 sps:$4 sm:$0xff]  }
 0x60a   : > { %7580 = vmatprep.subr.bf16.mxu0 %v19802_v24  ;;  %v7237_v63 = vadd.f32 %v22125_v20, %v6885_v12  ;;  %v18507_v20 = vld [vmem:[%s24096_s5 + $0x7a0] ss:$12 sps:$4 sm:$0xff]  }
 0x60b   : > { %v7238_v26 = vadd.f32 %v22127_v47, %v6886_v41  ;;  %v18508_v47 = vld [vmem:[%s24096_s5 + $0x7b8] ss:$12 sps:$4 sm:$0xff]   ;;  %v18529_v41 = vld [vmem:[%s24096_s5 + $0x9b0] ss:$12 sps:$4 sm:$0xff]  }
 0x60c   : > { %v7606_v48 = vadd.f32 %v22186_v31, %v7237_v63  ;;  %v18531_v63 = vld [vmem:[%s24096_s5 + $0x9e0] ss:$12 sps:$4 sm:$0xff]  }
 0x60d   : > { %7581 = vmatpush1.bf16.msra.mxu0 %v18505_v57  ;;  %v7607_v50 = vadd.f32 %v22188_v54, %v7238_v26  ;;  %v18530_v57 = vld [vmem:[%s24096_s5 + $0x9c8] ss:$12 sps:$4 sm:$0xff]   ;;  %v18532_v26 = vld [vmem:[%s24096_s5 + $0x9f8] ss:$12 sps:$4 sm:$0xff]  }
 0x60e   : > { %7582 = vmatprep.subr.bf16.mxu0 %v19802_v24  ;;  %v7975_v30 = vadd.f32 %v7928_v49, %v7606_v48  ;;  %v18533_v48 = vld [vmem:[%s24096_s5 + $0xa10] ss:$12 sps:$4 sm:$0xff]  }
 0x60f   : > { %v7976_v38 = vadd.f32 %v7930_v61, %v7607_v50  ;;  %v18518_v61 = vld [vmem:[%s24096_s5 + $0x8a8] ss:$12 sps:$4 sm:$0xff]  }
 0x611   : > { %7583 = vmatpush1.bf16.msra.mxu0 %v18506_v53 }
 0x612   : > { %7584 = vmatprep.subr.bf16.mxu0 %v19802_v24 }
 0x615   : > { %7585 = vmatpush1.bf16.msra.mxu0 %v18507_v20 }
 0x616   : > { %7586 = vmatprep.subr.bf16.mxu0 %v19802_v24 }
 0x619   : > { %7587 = vmatpush1.bf16.msra.mxu0 %v18508_v47  ;;  %v18534_v47 = vld [vmem:[%s24098_s7 + $0x180] ss:$8 sps:$4 sm:$0xff]  }
 0x61a   : > { %7588 = vmatprep.subr.bf16.mxu0 %v19802_v24 }
 0x61d   : > { %7589 = vmatpush1.bf16.msra.mxu0 %v18509_v42  ;;  %v18536_v42 = vld [vmem:[%s24098_s7 + $0x184] ss:$8 sps:$4 sm:$0xff]  }
 0x61e   : > { %7935 = vmatprep.subr.bf16.mxu0 %v19802_v24  ;;  %8863 = vmatprep.subr.bf16.mxu1 %v18536_v42  ;;  %v18603_v42 = vld [vmem:[%s24098_s7 + $0x270] ss:$8 sps:$4 sm:$0xff]  }
 0x61f   : > { %8864 = vmatpush1.bf16.msra.mxu1 %v18534_v47  ;;  %v18608_v47 = vld [vmem:[%s24098_s7 + $0x4] ss:$8 sps:$4 sm:$0xff]  }
 0x620   : > { %7599 = vmatmul.mubr.bf16.vlgmr.msra.gmra.mrb[44].mxu0 %v21734_v44  ;;  %v18513_v44 = vld [vmem:[%s24096_s5 + $0x830] ss:$12 sps:$4 sm:$0xff]  }
 0x621   : > { %7936 = vmatpush1.bf16.msra.mxu0 %v18510_v39  ;;  %16083 = vmatprep.mubr.msk.bf16.mxu0 %vm24211_vm5, %v21745_v55  ;;  %v22304_v55 = vld [vmem:[%s24097_s6] sm:$0x7]  ;;  %v18539_v39 = vld [vmem:[%s24098_s7 + $0x194] ss:$8 sps:$4 sm:$0xff]  }
 0x622   : > { %7937 = vmatprep.subr.bf16.mxu0 %v19802_v24  ;;  %v8335_v4 = vrot.slane %v22304_v55, %v21175_v34  ;;  %v8339_v54 = vrot.slane %v22304_v55, %v21181_v11  ;;  %8865 = vmatprep.subr.bf16.mxu1 %v18539_v39  ;;  %v18612_v39 = vld [vmem:[%s24098_s7 + $0x104] ss:$8 sps:$4 sm:$0xff]  }
 0x625   : > { %7938 = vmatpush1.bf16.msra.mxu0 %v18511_v37  ;;  %v18542_v37 = vld [vmem:[%s24098_s7 + $0x1a4] ss:$8 sps:$4 sm:$0xff]  }
 0x626   : > { %7939 = vmatprep.subr.bf16.mxu0 %v19802_v24 }
 0x629   : > { %7940 = vmatpush1.bf16.msra.mxu0 %v18512_v21  ;;  %v18540_v21 = vld [vmem:[%s24098_s7 + $0x1a0] ss:$8 sps:$4 sm:$0xff]  }
 0x62a   : > { %7941 = vmatprep.subr.bf16.mxu0 %v19802_v24 }
 0x62d   : > { %7942 = vmatpush1.bf16.msra.mxu0 %v18513_v44  ;;  %v18545_v44 = vld [vmem:[%s24098_s7 + $0x1b4] ss:$8 sps:$4 sm:$0xff]  }
 0x62e   : > { %7943 = vmatprep.subr.bf16.mxu0 %v19802_v24 }
 0x630   : > { %v8280_v31 = vpop.f32.mrb[32].mxu1 }
 0x631   : > { %v8327_v9 = vadd.f32 %v8280_v31, %v7975_v30  ;;  %7944 = vmatpush1.bf16.msra.mxu0 %v18514_v52  ;;  %v8282_v19 = vpop.f32.mrb[33].mxu1  ;;  %v18543_v52 = vld [vmem:[%s24098_s7 + $0x1b0] ss:$8 sps:$4 sm:$0xff]   ;;  %v18546_v31 = vld [vmem:[%s24098_s7 + $0x1c0] ss:$8 sps:$4 sm:$0xff]  }
 0x632   : > { %v8328_v51 = vadd.f32 %v8282_v19, %v7976_v38  ;;  %v8284_v1 = vpop.f32.mrb[34].mxu1  ;;  %7945 = vmatprep.subr.bf16.mxu0 %v19802_v24  ;;  %v18554_v19 = vld [vmem:[%s24098_s7 + $0x1e4] ss:$8 sps:$4 sm:$0xff]  }
 0x633   : > { %v8347_v29 = vadd.f32 %v8335_v4, %v8327_v9  ;;  %v6141_v46 = vpop.f32.mrb[28].mxu0  ;;  %v8285_v16 = vpop.f32.mrb[35].mxu1  ;;  %v18548_v4 = vld [vmem:[%s24098_s7 + $0x1c4] ss:$8 sps:$4 sm:$0xff]   ;;  %v18549_v9 = vld [vmem:[%s24098_s7 + $0x1d0] ss:$8 sps:$4 sm:$0xff]  }
 0x634   : > { %v8348_v10 = vadd.f32 %v8339_v54, %v8328_v51  ;;  %v6149_v17 = vadd.f32 %v6141_v46, %v22195_v33  ;;  %v6143_v43 = vpop.f32.mrb[29].mxu0  ;;  %v18551_v54 = vld [vmem:[%s24098_s7 + $0x1d4] ss:$8 sps:$4 sm:$0xff]  }
 0x635   : > { %v8350_v22 = vmax.f32 %v8347_v29, 0.0  ;;  %v6144_v56 = vpop.f32.mrb[30].mxu0  ;;  %7946 = vmatpush1.bf16.msra.mxu0 %v18515_v40  ;;  %v18552_v40 = vld [vmem:[%s24098_s7 + $0x1e0] ss:$8 sps:$4 sm:$0xff]  }
 0x636   : > { %v8351_v36 = vmax.f32 %v8348_v10, 0.0  ;;  %v6145_v8 = vpop.f32.mrb[31].mxu0  ;;  %7947 = vmatprep.subr.bf16.mxu0 %v19802_v24  ;;  %v18555_v10 = vld [vmem:[%s24098_s7 + $0x1f0] ss:$8 sps:$4 sm:$0xff]   ;;  %v18558_v43 = vld [vmem:[%s24098_s7 + $0x280] ss:$8 sps:$4 sm:$0xff]  }
 0x637   : > { %v18563_v56 = vld [vmem:[%s24098_s7 + $0x204] ss:$8 sps:$4 sm:$0xff]   ;;  %v18564_v8 = vld [vmem:[%s24098_s7 + $0x290] ss:$8 sps:$4 sm:$0xff]  }
 0x638   : > { %v8364_v23 = vcombine.low %v8350_v22, %v8351_v36  ;;  %v18560_v22 = vld [vmem:[%s24098_s7 + $0x284] ss:$8 sps:$4 sm:$0xff]   ;;  %v18561_v36 = vld [vmem:[%s24098_s7 + $0x200] ss:$8 sps:$4 sm:$0xff]  }
 0x639   : > { %7948 = vmatpush1.bf16.msra.mxu0 %v18516_v0  ;;  %v18566_v0 = vld [vmem:[%s24098_s7 + $0x294] ss:$8 sps:$4 sm:$0xff]  }
 0x63a   : > { %v8365_v49 = vrot.slane %v8364_v23, 7  ;;  %v16170_v33 = vrot.slane %v8364_v23, 9  ;;  %7949 = vmatprep.subr.bf16.mxu0 %v19802_v24  ;;  %v18569_v23 = vld [vmem:[%s24098_s7 + $0x214] ss:$8 sps:$4 sm:$0xff]  }
 0x63c   : > { %8370 = vst [vmem:[#allocation4 + $0xc] sm:$0x66] %v8365_v49  ;;  %8379 = vst [vmem:[#allocation4 + $0x18] sm:$0x66] %v16170_v33  ;;  %v18567_v49 = vld [vmem:[%s24098_s7 + $0x210] ss:$8 sps:$4 sm:$0xff]  }
 0x63d   : > { %7950 = vmatpush1.bf16.msra.mxu0 %v18517_v18  ;;  %v18572_v18 = vld [vmem:[%s24098_s7 + $0x2a4] ss:$8 sps:$4 sm:$0xff]   ;;  %v18570_v33 = vld [vmem:[%s24098_s7 + $0x2a0] ss:$8 sps:$4 sm:$0xff]  }
 0x63e   : > { %7951 = vmatprep.subr.bf16.mxu0 %v19802_v24 }
 0x641   : > { %7952 = vmatpush1.bf16.msra.mxu0 %v18518_v61  ;;  %v18575_v61 = vld [vmem:[%s24098_s7 + $0x224] ss:$8 sps:$4 sm:$0xff]  }
 0x642   : > { %7953 = vmatprep.subr.bf16.mxu0 %v19802_v24 }
 0x645   : > { %7954 = vmatpush1.bf16.msra.mxu0 %v18519_v60  ;;  %v18578_v60 = vld [vmem:[%s24098_s7 + $0x2b4] ss:$8 sps:$4 sm:$0xff]  }
 0x646   : > { %7955 = vmatprep.subr.bf16.mxu0 %v19802_v24 }
 0x649   : > { %7956 = vmatpush1.bf16.msra.mxu0 %v18520_v28  ;;  %v18573_v28 = vld [vmem:[%s24098_s7 + $0x220] ss:$8 sps:$4 sm:$0xff]  }
 0x64a   : > { %7957 = vmatprep.subr.bf16.mxu0 %v19802_v24 }
 0x64d   : > { %7958 = vmatpush1.bf16.msra.mxu0 %v18521_v15  ;;  %v18576_v15 = vld [vmem:[%s24098_s7 + $0x2b0] ss:$8 sps:$4 sm:$0xff]  }
 0x64e   : > { %8287 = vmatprep.subr.bf16.mxu0 %v19802_v24 }
 0x650   : > { %7968 = vmatmul.mubr.bf16.vlgmr.msra.gmra.mrb[48].mxu0 %v21903_v59  ;;  %v18525_v59 = vld [vmem:[%s24096_s5 + $0x950] ss:$12 sps:$4 sm:$0xff]  }
 0x651   : > { %8288 = vmatpush1.bf16.msra.mxu0 %v18522_v7  ;;  %16169 = vmatprep.mubr.msk.bf16.mxu0 %vm24212_vm6, %v21909_v2  ;;  %v18526_v2 = vld [vmem:[%s24096_s5 + $0x968] ss:$12 sps:$4 sm:$0xff]  }
 0x652   : > { %8289 = vmatprep.subr.bf16.mxu0 %v19802_v24  ;;  %v18581_v7 = vld [vmem:[%s24098_s7 + $0x234] ss:$8 sps:$4 sm:$0xff]  }
 0x655   : > { %8290 = vmatpush1.bf16.msra.mxu0 %v18523_v14  ;;  %v18584_v14 = vld [vmem:[%s24098_s7 + $0x2c4] ss:$8 sps:$4 sm:$0xff]  }
 0x656   : > { %8291 = vmatprep.subr.bf16.mxu0 %v19802_v24 }
 0x659   : > { %8292 = vmatpush1.bf16.msra.mxu0 %v18524_v13  ;;  %v18579_v13 = vld [vmem:[%s24098_s7 + $0x230] ss:$8 sps:$4 sm:$0xff]  }
 0x65a   : > { %8293 = vmatprep.subr.bf16.mxu0 %v19802_v24 }
 0x65d   : > { %8294 = vmatpush1.bf16.msra.mxu0 %v18525_v59  ;;  %v18582_v59 = vld [vmem:[%s24098_s7 + $0x2c0] ss:$8 sps:$4 sm:$0xff]  }
 0x65e   : > { %8295 = vmatprep.subr.bf16.mxu0 %v19802_v24 }
 0x661   : > { %8296 = vmatpush1.bf16.msra.mxu0 %v18526_v2  ;;  %v18587_v2 = vld [vmem:[%s24098_s7 + $0x244] ss:$8 sps:$4 sm:$0xff]  }
 0x662   : > { %8297 = vmatprep.subr.bf16.mxu0 %v19802_v24 }
 0x663   : > { %v6510_v5 = vpop.f32.mrb[32].mxu0 }
 0x664   : > { %v6518_v32 = vadd.f32 %v6510_v5, %v6149_v17  ;;  %v6512_v3 = vpop.f32.mrb[33].mxu0  ;;  %v18557_v17 = vld [vmem:[%s24098_s7 + $0x1f4] ss:$8 sps:$4 sm:$0xff]   ;;  %v18585_v5 = vld [vmem:[%s24098_s7 + $0x240] ss:$8 sps:$4 sm:$0xff]  }
 0x665   : > { %v6513_v27 = vpop.f32.mrb[34].mxu0  ;;  %8298 = vmatpush1.bf16.msra.mxu0 %v18527_v25  ;;  %v18590_v25 = vld [vmem:[%s24098_s7 + $0x2d4] ss:$8 sps:$4 sm:$0xff]  }
 0x666   : > { %v6514_v12 = vpop.f32.mrb[35].mxu0  ;;  %8299 = vmatprep.subr.bf16.mxu0 %v19802_v24  ;;  %v18593_v3 = vld [vmem:[%s24098_s7 + $0x254] ss:$8 sps:$4 sm:$0xff]   ;;  %v18596_v27 = vld [vmem:[%s24098_s7 + $0x2e4] ss:$8 sps:$4 sm:$0xff]  }
 0x667   : > { %v18591_v12 = vld [vmem:[%s24098_s7 + $0x250] ss:$8 sps:$4 sm:$0xff]  }
 0x669   : > { %8300 = vmatpush1.bf16.msra.mxu0 %v18528_v58 }
 0x66a   : > { %8301 = vmatprep.subr.bf16.mxu0 %v19802_v24 }
 0x66d   : > { %8302 = vmatpush1.bf16.msra.mxu0 %v18529_v41 }
 0x66e   : > { %8303 = vmatprep.subr.bf16.mxu0 %v19802_v24 }
 0x671   : > { %8304 = vmatpush1.bf16.msra.mxu0 %v18530_v57 }
 0x672   : > { %8305 = vmatprep.subr.bf16.mxu0 %v19802_v24 }
 0x675   : > { %8306 = vmatpush1.bf16.msra.mxu0 %v18531_v63  ;;  %v18594_v63 = vld [vmem:[%s24098_s7 + $0x2e0] ss:$8 sps:$4 sm:$0xff]  }
 0x676   : > { %8307 = vmatprep.subr.bf16.mxu0 %v19802_v24 }
 0x679   : > { %8308 = vmatpush1.bf16.msra.mxu0 %v18532_v26  ;;  %v18599_v26 = vld [vmem:[%s24098_s7 + $0x264] ss:$8 sps:$4 sm:$0xff]  }
 0x67a   : > { %8309 = vmatprep.subr.bf16.mxu0 %v19802_v24 }
 0x67d   : > { %8310 = vmatpush1.bf16.msra.mxu0 %v18533_v48 }
 0x67e   : > { %8904 = vmatprep.subr.bf16.mxu0 %v18560_v22 }
 0x680   : > { %8320 = vmatmul.mubr.bf16.vlgmr.msra.gmra.mrb[52].mxu0 %v22042_v45  ;;  %v18537_v45 = vld [vmem:[%s24098_s7 + $0x190] ss:$8 sps:$4 sm:$0xff]  }
 0x681   : > { %8936 = vmatprep.mubr.bf16.mxu0 %v19802_v24  ;;  %8866 = vmatpush1.bf16.msra.mxu1 %v18537_v45 }
 0x682   : > { %8867 = vmatprep.subr.bf16.mxu1 %v18542_v37  ;;  %8905 = vmatpush1.bf16.msra.mxu0 %v18558_v43 }
 0x683   : > { %8906 = vmatprep.subr.bf16.mxu0 %v18566_v0  ;;  %v8383_v0 = vld [vmem:[#allocation4 + $0xc] sm:$0xff] }
 0x685   : > { %8868 = vmatpush1.bf16.msra.mxu1 %v18540_v21 }
 0x686   : > { %8869 = vmatprep.subr.bf16.mxu1 %v18545_v44  ;;  %8907 = vmatpush1.bf16.msra.mxu0 %v18564_v8  ;;  %v8394_v8 = vcombine.high %v8383_v0, %v8383_v0 }
 0x687   : > { %8908 = vmatprep.subr.bf16.mxu0 %v18572_v18 }
 0x689   : > { %8870 = vmatpush1.bf16.msra.mxu1 %v18543_v52 }
 0x68a   : > { %8871 = vmatprep.subr.bf16.mxu1 %v18548_v4  ;;  %8909 = vmatpush1.bf16.msra.mxu0 %v18570_v33  ;;  %v8342_v4 = vsub.s32 2, %v20441_v35  ;;  %v16173_v33 = vpack.c.bf16 %v8394_v8, %v8383_v0  ;;  %v18631_v0 = vld [vmem:[%s24098_s7 + $0x40] ss:$8 sps:$4 sm:$0xff]   ;;  %v18642_v8 = vld [vmem:[%s24098_s7 + $0x154] ss:$8 sps:$4 sm:$0xff]  }
 0x68b   : > { %8910 = vmatprep.subr.bf16.mxu0 %v18578_v60 }
 0x68d   : > { %8872 = vmatpush1.bf16.msra.mxu1 %v18546_v31  ;;  %v8343_v31 = vrot.slane %v22304_v55, %v8342_v4  ;;  %v8385_v55 = vld [vmem:[#allocation4 + $0x18] sm:$0xff]  ;;  %v18610_v4 = vld [vmem:[%s24098_s7 + $0x100] ss:$8 sps:$4 sm:$0xff]  }
 0x68e   : > { %8873 = vmatprep.subr.bf16.mxu1 %v18551_v54  ;;  %8911 = vmatpush1.bf16.msra.mxu0 %v18576_v15 }
 0x68f   : > { %8912 = vmatprep.subr.bf16.mxu0 %v18584_v14 }
 0x691   : > { %8874 = vmatpush1.bf16.msra.mxu1 %v18549_v9  ;;  %v19636_v9 = vld [vmem:[#allocation4] sm:$0xff] }
 0x692   : > { %8875 = vmatprep.subr.bf16.mxu1 %v18554_v19  ;;  %8913 = vmatpush1.bf16.msra.mxu0 %v18582_v59  ;;  %v8393_v19 = vcombine.high %v19636_v9, %v19636_v9  ;;  %v8449_v59 = vrot.slane %v16173_v33, %v21186_v6  ;;  %v18648_v33 = vld [vmem:[%s24098_s7 + $0x164] ss:$8 sps:$4 sm:$0xff]  }
 0x693   : > { %v6879_v53 = vpop.f32.mrb[36].mxu0  ;;  %8914 = vmatprep.subr.bf16.mxu0 %v18590_v25 }
 0x694   : > { %v6887_v50 = vadd.f32 %v6879_v53, %v6518_v32  ;;  %v6881_v30 = vpop.f32.mrb[37].mxu0  ;;  %v18588_v32 = vld [vmem:[%s24098_s7 + $0x2d0] ss:$8 sps:$4 sm:$0xff]   ;;  %v18602_v53 = vld [vmem:[%s24098_s7 + $0x2f4] ss:$8 sps:$4 sm:$0xff]  }
 0x695   : > { %v6882_v38 = vpop.f32.mrb[38].mxu0  ;;  %8876 = vmatpush1.bf16.msra.mxu1 %v18552_v40  ;;  %v18597_v30 = vld [vmem:[%s24098_s7 + $0x260] ss:$8 sps:$4 sm:$0xff]  }
 0x696   : > { %v6883_v20 = vpop.f32.mrb[39].mxu0  ;;  %8877 = vmatprep.subr.bf16.mxu1 %v18557_v17  ;;  %8915 = vmatpush1.bf16.msra.mxu0 %v18588_v32  ;;  %v18600_v38 = vld [vmem:[%s24098_s7 + $0x2f0] ss:$8 sps:$4 sm:$0xff]   ;;  %v16172_v17 = vpack.c.bf16 %v8393_v19, %v19636_v9 }
 0x697   : > { %8916 = vmatprep.subr.bf16.mxu0 %v18596_v27  ;;  %v18605_v20 = vld [vmem:[%s24098_s7 + $0x274] ss:$8 sps:$4 sm:$0xff]   ;;  %v18613_v19 = vld [vmem:[%s24098_s7 + $0x10] ss:$8 sps:$4 sm:$0xff]  }
 0x699   : > { %8878 = vmatpush1.bf16.msra.mxu1 %v18555_v10 }
 0x69a   : > { %8879 = vmatprep.subr.bf16.mxu1 %v18563_v56  ;;  %8917 = vmatpush1.bf16.msra.mxu0 %v18594_v63 }
 0x69b   : > { %8918 = vmatprep.subr.bf16.mxu0 %v18602_v53 }
 0x69d   : > { %8880 = vmatpush1.bf16.msra.mxu1 %v18561_v36  ;;  %v22549_v36 = vrot.slane %v16172_v17, %v21186_v6  ;;  %v18625_v17 = vld [vmem:[%s24098_s7 + $0x30] ss:$8 sps:$4 sm:$0xff]  }
 0x69e   : > { %8881 = vmatprep.subr.bf16.mxu1 %v18569_v23  ;;  %8919 = vmatpush1.bf16.msra.mxu0 %v18600_v38  ;;  %v8395_v23 = vcombine.high %v8385_v55, %v8385_v55 }
 0x69f   : > { %9212 = vmatprep.subr.bf16.mxu0 %v18608_v47 }
 0x6a1   : > { %8882 = vmatpush1.bf16.msra.mxu1 %v18567_v49 }
 0x6a2   : > { %8883 = vmatprep.subr.bf16.mxu1 %v18575_v61  ;;  %v16416_v61 = vpack.c.bf16 %v8395_v23, %v8385_v55  ;;  %v18639_v55 = vld [vmem:[%s24098_s7 + $0x54] ss:$8 sps:$4 sm:$0xff]   ;;  %v18637_v23 = vld [vmem:[%s24098_s7 + $0x50] ss:$8 sps:$4 sm:$0xff]  }
 0x6a4   : > { %v22561_v25 = vrot.slane %v16416_v61, %v21186_v6 }
 0x6a5   : > { %8884 = vmatpush1.bf16.msra.mxu1 %v18573_v28 }
 0x6a6   : > { %8885 = vmatprep.subr.bf16.mxu1 %v18581_v7 }
 0x6a9   : > { %8886 = vmatpush1.bf16.msra.mxu1 %v18579_v13 }
 0x6aa   : > { %8887 = vmatprep.subr.bf16.mxu1 %v18587_v2 }
 0x6ad   : > { %8888 = vmatpush1.bf16.msra.mxu1 %v18585_v5 }
 0x6ae   : > { %8889 = vmatprep.subr.bf16.mxu1 %v18593_v3 }
 0x6b1   : > { %8890 = vmatpush1.bf16.msra.mxu1 %v18591_v12 }
 0x6b2   : > { %8891 = vmatprep.subr.bf16.mxu1 %v18599_v26 }
 0x6b5   : > { %8892 = vmatpush1.bf16.msra.mxu1 %v18597_v30 }
 0x6b6   : > { %8893 = vmatprep.subr.bf16.mxu1 %v18605_v20 }
 0x6b9   : > { %8894 = vmatpush1.bf16.msra.mxu1 %v18603_v42 }
 0x6ba   : > { %9253 = vmatprep.subr.bf16.mxu1 %v18612_v39 }
 0x6c3   : > { %v7231_v51 = vpop.f32.mrb[40].mxu0 }
 0x6c4   : > { %v7239_v1 = vadd.f32 %v7231_v51, %v6887_v50  ;;  %v7233_v29 = vpop.f32.mrb[41].mxu0 }
 0x6c5   : > { %v7234_v46 = vpop.f32.mrb[42].mxu0 }
 0x6c6   : > { %v7235_v16 = vpop.f32.mrb[43].mxu0 }
 0x6f3   : > { %v7600_v58 = vpop.f32.mrb[44].mxu0 }
 0x6f4   : > { %v7608_v41 = vadd.f32 %v7600_v58, %v7239_v1  ;;  %v7602_v57 = vpop.f32.mrb[45].mxu0  ;;  %v8382_v1 = vld [vmem:[#allocation4 + $0x8] sm:$0xf] }
 0x6f5   : > { %v7603_v48 = vpop.f32.mrb[46].mxu0  ;;  %v8403_v10 = vpack.c.bf16 %v8382_v1, %v8382_v1  ;;  %v18624_v1 = vld [vmem:[%s24098_s7 + $0x124] ss:$8 sps:$4 sm:$0xff]  }
 0x6f6   : > { %v7604_v50 = vpop.f32.mrb[47].mxu0 }
 0x6f7   : > { %v8433_v35 = vrot.slane %v8403_v10, %v21186_v6  ;;  %v18630_v10 = vld [vmem:[%s24098_s7 + $0x134] ss:$8 sps:$4 sm:$0xff]  }
 0x6f9   : > { %v8434_v18 = vcombine.low %v22549_v36, %v8433_v35  ;;  %v8513_v49 = vcombine.high %v22549_v36, %v8433_v35  ;;  %v18634_v35 = vld [vmem:[%s24098_s7 + $0x140] ss:$8 sps:$4 sm:$0xff]  }
 0x6fb   : > { %v8441_v28 = vrot.slane %v8434_v18, %v21186_v6  ;;  %v22556_v14 = vrot.slane %v8513_v49, %v21186_v6  ;;  %v18640_v18 = vld [vmem:[%s24098_s7 + $0x150] ss:$8 sps:$4 sm:$0xff]   ;;  %v18645_v49 = vld [vmem:[%s24098_s7 + $0x64] ss:$8 sps:$4 sm:$0xff]  }
 0x6fd   : > { %v8530_v32 = vshrl.u32 %v8441_v28, 16  ;;  %v8535_v58 = vshll.u32 %v22556_v14, 16 }
 0x6ff   : > { %v8537_v26 = vsel %vm21205_vm14, %v8530_v32, %v8535_v58  ;;  %v18655_v58 = vld [vmem:[%s24098_s7 + $0x80] ss:$8 sps:$4 sm:$0xff]  }
 0x723   : > { %v7969_v45 = vpop.f32.mrb[48].mxu0 }
 0x724   : > { %v7977_v37 = vadd.f32 %v7969_v45, %v7608_v41  ;;  %v7971_v21 = vpop.f32.mrb[49].mxu0 }
 0x725   : > { %v7972_v44 = vpop.f32.mrb[50].mxu0  ;;  %v18606_v21 = vld [vmem:[%s24098_s7] ss:$8 sps:$4 sm:$0xff]  }
 0x726   : > { %v7973_v52 = vpop.f32.mrb[51].mxu0 }
 0x753   : > { %v8321_v54 = vpop.f32.mrb[52].mxu0 }
 0x754   : > { %v8329_v40 = vadd.f32 %v8321_v54, %v7977_v37  ;;  %v8323_v51 = vpop.f32.mrb[53].mxu0  ;;  %v18618_v54 = vld [vmem:[%s24098_s7 + $0x114] ss:$8 sps:$4 sm:$0xff]  }
 0x755   : > { %v8324_v29 = vpop.f32.mrb[54].mxu0  ;;  %v18621_v51 = vld [vmem:[%s24098_s7 + $0x24] ss:$8 sps:$4 sm:$0xff]  }
 0x756   : > { %v8349_v46 = vadd.f32 %v8343_v31, %v8329_v40  ;;  %v8325_v16 = vpop.f32.mrb[55].mxu0  ;;  %v18615_v31 = vld [vmem:[%s24098_s7 + $0x14] ss:$8 sps:$4 sm:$0xff]   ;;  %v18616_v40 = vld [vmem:[%s24098_s7 + $0x110] ss:$8 sps:$4 sm:$0xff]  }
 0x757   : > { %v18619_v29 = vld [vmem:[%s24098_s7 + $0x20] ss:$8 sps:$4 sm:$0xff]   ;;  %v18627_v16 = vld [vmem:[%s24098_s7 + $0x34] ss:$8 sps:$4 sm:$0xff]  }
 0x758   : > { %v8352_v43 = vmax.f32 %v8349_v46, 0.0  ;;  %v18622_v46 = vld [vmem:[%s24098_s7 + $0x120] ss:$8 sps:$4 sm:$0xff]  }
 0x75a   : > { %v8366_v22 = vrot.slane %v8352_v43, 7  ;;  %v16171_v56 = vrot.slane %v8352_v43, 9  ;;  %v18628_v43 = vld [vmem:[%s24098_s7 + $0x130] ss:$8 sps:$4 sm:$0xff]  }
 0x75c   : > { %8371 = vst [vmem:[#allocation4 + $0x14] sm:$0x6] %v8366_v22  ;;  %8380 = vst [vmem:[#allocation4 + $0x20] sm:$0x6] %v16171_v56  ;;  %v18633_v22 = vld [vmem:[%s24098_s7 + $0x44] ss:$8 sps:$4 sm:$0xff]  }
 0x75d   : > { %v18636_v56 = vld [vmem:[%s24098_s7 + $0x144] ss:$8 sps:$4 sm:$0xff]  }
 0x763   : > { %v8384_v60 = vld [vmem:[#allocation4 + $0x14] sm:$0xf]  ;;  %v8386_v15 = vld [vmem:[#allocation4 + $0x20] sm:$0xf] }
 0x764   : > { %v8406_v7 = vpack.c.bf16 %v8384_v60, %v8384_v60  ;;  %v8409_v13 = vpack.c.bf16 %v8386_v15, %v8386_v15  ;;  %v18643_v60 = vld [vmem:[%s24098_s7 + $0x60] ss:$8 sps:$4 sm:$0xff]   ;;  %v18651_v15 = vld [vmem:[%s24098_s7 + $0x74] ss:$8 sps:$4 sm:$0xff]  }
 0x766   : > { %v8456_v2 = vrot.slane %v8406_v7, %v21186_v6  ;;  %v22564_v5 = vrot.slane %v8409_v13, %v21186_v6  ;;  %v18654_v7 = vld [vmem:[%s24098_s7 + $0x174] ss:$8 sps:$4 sm:$0xff]   ;;  %v18649_v13 = vld [vmem:[%s24098_s7 + $0x70] ss:$8 sps:$4 sm:$0xff]  }
 0x768   : > { %v8457_v3 = vcombine.low %v8449_v59, %v8456_v2  ;;  %v8521_v27 = vcombine.high %v8449_v59, %v8456_v2  ;;  %v10120_v12 = vcombine.high %v22561_v25, %v22564_v5  ;;  %v18652_v59 = vld [vmem:[%s24098_s7 + $0x170] ss:$8 sps:$4 sm:$0xff]   ;;  %v18657_v2 = vld [vmem:[%s24098_s7 + $0x84] ss:$8 sps:$4 sm:$0xff]  }
 0x76a   : > { %v22570_v41 = vrot.slane %v8457_v3, %v21186_v6  ;;  %v22573_v57 = vrot.slane %v8521_v27, %v21186_v6  ;;  %v22576_v63 = vrot.slane %v10120_v12, %v21186_v6  ;;  %v18660_v3 = vld [vmem:[%s24098_s7 + $0x304] ss:$8 sps:$4 sm:$0xff]   ;;  %v18658_v12 = vld [vmem:[%s24098_s7 + $0x300] ss:$8 sps:$4 sm:$0xff]  }
 0x76c   : > { %v8539_v48 = vshrl.u32 %v22570_v41, 16  ;;  %v8544_v53 = vshll.u32 %v22573_v57, 16  ;;  %v8945_v50 = vcombine.low %v8441_v28, %v22570_v41  ;;  %v10586_v30 = vcombine.low %v22573_v57, %v22576_v63  ;;  %v18646_v28 = vld [vmem:[%s24098_s7 + $0x160] ss:$8 sps:$4 sm:$0xff]  }
 0x76d   : > { %v9343_v61 = vcombine.low %v22556_v14, %v22573_v57  ;;  %v18898_v57 = vld [vmem:[%s24098_s7 + $0x784] ss:$8 sps:$4 sm:$0xff]  }
 0x76e   : > { %v22587_v38 = vsel %vm21205_vm14, %v8539_v48, %v8544_v53  ;;  %v22591_v47 = vrot.slane %v8945_v50, %v21186_v6  ;;  %v18663_v48 = vld [vmem:[%s24098_s7 + $0x94] ss:$8 sps:$4 sm:$0xff]  }
 0x76f   : > { %v8596_v20 = vcombine.low %v8537_v26, %v22587_v38  ;;  %v22687_v14 = vrot.slane %v9343_v61, %v21186_v6  ;;  %v18666_v53 = vld [vmem:[%s24098_s7 + $0x314] ss:$8 sps:$4 sm:$0xff]   ;;  %v18712_v61 = vld [vmem:[%s24098_s7 + $0x390] ss:$8 sps:$4 sm:$0xff]  }
 0x770   : > { %v8953_v37 = vcombine.high %v22591_v47, %v22591_v47  ;;  %v22700_v32 = vrot.slane %v22591_v47, %v21186_v6  ;;  %v18664_v47 = vld [vmem:[%s24098_s7 + $0x310] ss:$8 sps:$4 sm:$0xff]  }
 0x771   : > { %v8603_v42 = vrot.slane %v8596_v20, %v21186_v6  ;;  %v9351_v27 = vcombine.high %v22687_v14, %v22687_v14  ;;  %v18661_v20 = vld [vmem:[%s24098_s7 + $0x90] ss:$8 sps:$4 sm:$0xff]  }
 0x772   : > { %v8967_v9 = vrot.slane %v8953_v37, %v21186_v6  ;;  %v8968_v26 = vcombine.high %v22700_v32, %v22700_v32  ;;  %v18670_v37 = vld [vmem:[%s24098_s7 + $0x320] ss:$8 sps:$4 sm:$0xff]  }
 0x773   : > { %v8604_v39 = vcombine.high %v8603_v42, %v8603_v42  ;;  %v8611_v45 = vrot.slane %v8603_v42, %v21186_v6  ;;  %v9365_v50 = vrot.slane %v9351_v27, %v21186_v6  ;;  %v18669_v42 = vld [vmem:[%s24098_s7 + $0xa4] ss:$8 sps:$4 sm:$0xff]  }
 0x774   : > { %v18732_v27 = vld [vmem:[%s24098_s7 + $0x3c4] ss:$8 sps:$4 sm:$0xff]  }
 0x775   : > { %v8618_v44 = vrot.slane %v8604_v39, %v21186_v6  ;;  %v8619_v52 = vcombine.high %v8611_v45, %v8611_v45  ;;  %v18672_v39 = vld [vmem:[%s24098_s7 + $0x324] ss:$8 sps:$4 sm:$0xff]  }
 0x777   : > { %8895 = vmatprep.mubr.bf16.mxu1 %v8618_v44  ;;  %8937 = vmatmul.mubr.bf16.vlgmr.msra.gmra.mrb[56].mxu0 %v8619_v52  ;;  %v18678_v44 = vld [vmem:[%s24098_s7 + $0x334] ss:$8 sps:$4 sm:$0xff]   ;;  %v18673_v52 = vld [vmem:[%s24098_s7 + $0xb0] ss:$8 sps:$4 sm:$0xff]  }
 0x778   : > { %9213 = vmatpush1.bf16.msra.mxu0 %v18606_v21  ;;  %8896 = vmatmul.mubr.bf16.vlgmr.msra.gmra.mrb[36].mxu1 %v8611_v45  ;;  %v18667_v45 = vld [vmem:[%s24098_s7 + $0xa0] ss:$8 sps:$4 sm:$0xff]   ;;  %v18675_v21 = vld [vmem:[%s24098_s7 + $0xb4] ss:$8 sps:$4 sm:$0xff]  }
 0x779   : > { %9244 = vmatprep.mubr.bf16.mxu0 %v8967_v9  ;;  %9254 = vmatpush1.bf16.msra.mxu1 %v18610_v4  ;;  %v18676_v4 = vld [vmem:[%s24098_s7 + $0x330] ss:$8 sps:$4 sm:$0xff]   ;;  %v18679_v9 = vld [vmem:[%s24098_s7 + $0xc0] ss:$8 sps:$4 sm:$0xff]  }
 0x77a   : > { %9214 = vmatprep.subr.bf16.mxu0 %v18615_v31  ;;  %9255 = vmatprep.subr.bf16.mxu1 %v18618_v54  ;;  %v18681_v31 = vld [vmem:[%s24098_s7 + $0xc4] ss:$8 sps:$4 sm:$0xff]  }
 0x77b   : > { %9285 = vmatprep.mubr.bf16.mxu1 %v19802_v24  ;;  %v18684_v54 = vld [vmem:[%s24098_s7 + $0x344] ss:$8 sps:$4 sm:$0xff]  }
 0x77c   : > { %9215 = vmatpush1.bf16.msra.mxu0 %v18613_v19  ;;  %v18682_v19 = vld [vmem:[%s24098_s7 + $0x340] ss:$8 sps:$4 sm:$0xff]  }
 0x77d   : > { %9256 = vmatpush1.bf16.msra.mxu1 %v18616_v40  ;;  %9216 = vmatprep.subr.bf16.mxu0 %v18621_v51  ;;  %v18687_v40 = vld [vmem:[%s24098_s7 + $0xd4] ss:$8 sps:$4 sm:$0xff]  }
 0x77e   : > { %9257 = vmatprep.subr.bf16.mxu1 %v18624_v1  ;;  %v18690_v51 = vld [vmem:[%s24098_s7 + $0x354] ss:$8 sps:$4 sm:$0xff]   ;;  %v18685_v1 = vld [vmem:[%s24098_s7 + $0xd0] ss:$8 sps:$4 sm:$0xff]  }
 0x780   : > { %9217 = vmatpush1.bf16.msra.mxu0 %v18619_v29  ;;  %v18688_v29 = vld [vmem:[%s24098_s7 + $0x350] ss:$8 sps:$4 sm:$0xff]  }
 0x781   : > { %9258 = vmatpush1.bf16.msra.mxu1 %v18622_v46  ;;  %9218 = vmatprep.subr.bf16.mxu0 %v18627_v16  ;;  %v18693_v46 = vld [vmem:[%s24098_s7 + $0xe4] ss:$8 sps:$4 sm:$0xff]  }
 0x782   : > { %9259 = vmatprep.subr.bf16.mxu1 %v18630_v10  ;;  %v18696_v16 = vld [vmem:[%s24098_s7 + $0x364] ss:$8 sps:$4 sm:$0xff]   ;;  %v18691_v10 = vld [vmem:[%s24098_s7 + $0xe0] ss:$8 sps:$4 sm:$0xff]  }
 0x784   : > { %9219 = vmatpush1.bf16.msra.mxu0 %v18625_v17  ;;  %v18694_v17 = vld [vmem:[%s24098_s7 + $0x360] ss:$8 sps:$4 sm:$0xff]  }
 0x785   : > { %9260 = vmatpush1.bf16.msra.mxu1 %v18628_v43  ;;  %9220 = vmatprep.subr.bf16.mxu0 %v18633_v22  ;;  %v18699_v43 = vld [vmem:[%s24098_s7 + $0xf4] ss:$8 sps:$4 sm:$0xff]  }
 0x786   : > { %9261 = vmatprep.subr.bf16.mxu1 %v18636_v56  ;;  %v18702_v22 = vld [vmem:[%s24098_s7 + $0x374] ss:$8 sps:$4 sm:$0xff]   ;;  %v18697_v56 = vld [vmem:[%s24098_s7 + $0xf0] ss:$8 sps:$4 sm:$0xff]  }
 0x788   : > { %9221 = vmatpush1.bf16.msra.mxu0 %v18631_v0  ;;  %v18700_v0 = vld [vmem:[%s24098_s7 + $0x370] ss:$8 sps:$4 sm:$0xff]  }
 0x789   : > { %9262 = vmatpush1.bf16.msra.mxu1 %v18634_v35  ;;  %9222 = vmatprep.subr.bf16.mxu0 %v18639_v55  ;;  %v18705_v35 = vld [vmem:[%s24098_s7 + $0x404] ss:$8 sps:$4 sm:$0xff]  }
 0x78a   : > { %9263 = vmatprep.subr.bf16.mxu1 %v18642_v8  ;;  %v18708_v55 = vld [vmem:[%s24098_s7 + $0x384] ss:$8 sps:$4 sm:$0xff]   ;;  %v18703_v8 = vld [vmem:[%s24098_s7 + $0x400] ss:$8 sps:$4 sm:$0xff]  }
 0x78c   : > { %9223 = vmatpush1.bf16.msra.mxu0 %v18637_v23  ;;  %v18706_v23 = vld [vmem:[%s24098_s7 + $0x380] ss:$8 sps:$4 sm:$0xff]  }
 0x78d   : > { %9264 = vmatpush1.bf16.msra.mxu1 %v18640_v18  ;;  %9224 = vmatprep.subr.bf16.mxu0 %v18645_v49  ;;  %v18711_v18 = vld [vmem:[%s24098_s7 + $0x414] ss:$8 sps:$4 sm:$0xff]  }
 0x78e   : > { %9265 = vmatprep.subr.bf16.mxu1 %v18648_v33  ;;  %v18714_v49 = vld [vmem:[%s24098_s7 + $0x394] ss:$8 sps:$4 sm:$0xff]   ;;  %v18709_v33 = vld [vmem:[%s24098_s7 + $0x410] ss:$8 sps:$4 sm:$0xff]  }
 0x790   : > { %9225 = vmatpush1.bf16.msra.mxu0 %v18643_v60  ;;  %v18717_v60 = vld [vmem:[%s24098_s7 + $0x424] ss:$8 sps:$4 sm:$0xff]  }
 0x791   : > { %9266 = vmatpush1.bf16.msra.mxu1 %v18646_v28  ;;  %9226 = vmatprep.subr.bf16.mxu0 %v18651_v15  ;;  %v18720_v28 = vld [vmem:[%s24098_s7 + $0x3a4] ss:$8 sps:$4 sm:$0xff]   ;;  %v18715_v15 = vld [vmem:[%s24098_s7 + $0x420] ss:$8 sps:$4 sm:$0xff]  }
 0x792   : > { %9267 = vmatprep.subr.bf16.mxu1 %v18654_v7  ;;  %v18718_v7 = vld [vmem:[%s24098_s7 + $0x3a0] ss:$8 sps:$4 sm:$0xff]  }
 0x794   : > { %9227 = vmatpush1.bf16.msra.mxu0 %v18649_v13  ;;  %v18723_v13 = vld [vmem:[%s24098_s7 + $0x434] ss:$8 sps:$4 sm:$0xff]  }
 0x795   : > { %9268 = vmatpush1.bf16.msra.mxu1 %v18652_v59  ;;  %9228 = vmatprep.subr.bf16.mxu0 %v18657_v2  ;;  %v18726_v59 = vld [vmem:[%s24098_s7 + $0x3b4] ss:$8 sps:$4 sm:$0xff]   ;;  %v18721_v2 = vld [vmem:[%s24098_s7 + $0x430] ss:$8 sps:$4 sm:$0xff]  }
 0x796   : > { %9610 = vmatprep.subr.bf16.mxu1 %v18660_v3  ;;  %v18729_v3 = vld [vmem:[%s24098_s7 + $0x444] ss:$8 sps:$4 sm:$0xff]  }
 0x798   : > { %9229 = vmatpush1.bf16.msra.mxu0 %v18655_v58  ;;  %9286 = vmatmul.mubr.bf16.vlgmr.msra.gmra.mrb[40].mxu1 %v8968_v26  ;;  %v9712_v58 = vcombine.low %v22561_v25, %v22564_v5  ;;  %v18730_v26 = vld [vmem:[%s24098_s7 + $0x3c0] ss:$8 sps:$4 sm:$0xff]   ;;  %v18738_v25 = vld [vmem:[%s24098_s7 + $0x3d4] ss:$8 sps:$4 sm:$0xff]  }
 0x799   : > { %9611 = vmatpush1.bf16.msra.mxu1 %v18658_v12  ;;  %9642 = vmatprep.mubr.bf16.mxu1 %v9365_v50  ;;  %v18727_v12 = vld [vmem:[%s24098_s7 + $0x440] ss:$8 sps:$4 sm:$0xff]   ;;  %v18736_v50 = vld [vmem:[%s24098_s7 + $0x3d0] ss:$8 sps:$4 sm:$0xff]  }
 0x79a   : > { %9230 = vmatprep.subr.bf16.mxu0 %v18663_v48  ;;  %9612 = vmatprep.subr.bf16.mxu1 %v18666_v53  ;;  %v18735_v48 = vld [vmem:[%s24098_s7 + $0x454] ss:$8 sps:$4 sm:$0xff]   ;;  %v22871_v5 = vrot.slane %v9712_v58, %v21186_v6  ;;  %v18733_v53 = vld [vmem:[%s24098_s7 + $0x450] ss:$8 sps:$4 sm:$0xff]  }
 0x79b   : > { %v18796_v58 = vld [vmem:[%s24098_s7 + $0x4f4] ss:$8 sps:$4 sm:$0xff]  }
 0x79c   : > { %9231 = vmatpush1.bf16.msra.mxu0 %v18661_v20  ;;  %v18741_v20 = vld [vmem:[%s24098_s7 + $0x464] ss:$8 sps:$4 sm:$0xff]  }
 0x79d   : > { %9613 = vmatpush1.bf16.msra.mxu1 %v18664_v47  ;;  %9232 = vmatprep.subr.bf16.mxu0 %v18669_v42  ;;  %v18744_v47 = vld [vmem:[%s24098_s7 + $0x3e4] ss:$8 sps:$4 sm:$0xff]   ;;  %v9769_v42 = vcombine.low %v22570_v41, %v22871_v5  ;;  %v18750_v41 = vld [vmem:[%s24098_s7 + $0x3f4] ss:$8 sps:$4 sm:$0xff]  }
 0x79e   : > { %9614 = vmatprep.subr.bf16.mxu1 %v18672_v39  ;;  %v18739_v39 = vld [vmem:[%s24098_s7 + $0x460] ss:$8 sps:$4 sm:$0xff]  }
 0x7a0   : > { %9233 = vmatpush1.bf16.msra.mxu0 %v18667_v45  ;;  %v18742_v45 = vld [vmem:[%s24098_s7 + $0x3e0] ss:$8 sps:$4 sm:$0xff]  }
 0x7a1   : > { %9615 = vmatpush1.bf16.msra.mxu1 %v18670_v37  ;;  %9234 = vmatprep.subr.bf16.mxu0 %v18675_v21  ;;  %v18747_v37 = vld [vmem:[%s24098_s7 + $0x474] ss:$8 sps:$4 sm:$0xff]   ;;  %v22900_v21 = vrot.slane %v9769_v42, %v21186_v6  ;;  %v18803_v42 = vld [vmem:[%s24098_s7 + $0x600] ss:$8 sps:$4 sm:$0xff]  }
 0x7a2   : > { %9616 = vmatprep.subr.bf16.mxu1 %v18678_v44  ;;  %v18745_v44 = vld [vmem:[%s24098_s7 + $0x470] ss:$8 sps:$4 sm:$0xff]  }
 0x7a4   : > { %9235 = vmatpush1.bf16.msra.mxu0 %v18673_v52  ;;  %v18748_v52 = vld [vmem:[%s24098_s7 + $0x3f0] ss:$8 sps:$4 sm:$0xff]  }
 0x7a5   : > { %9617 = vmatpush1.bf16.msra.mxu1 %v18676_v4  ;;  %9236 = vmatprep.subr.bf16.mxu0 %v18681_v31  ;;  %v9358_v4 = vrot.slane %v22687_v14, %v21186_v6  ;;  %v18753_v31 = vld [vmem:[%s24098_s7 + $0x484] ss:$8 sps:$4 sm:$0xff]   ;;  %v18755_v14 = vld [vmem:[%s24098_s7 + $0x580] ss:$8 sps:$4 sm:$0xff]  }
 0x7a6   : > { %9618 = vmatprep.subr.bf16.mxu1 %v18684_v54  ;;  %v18757_v54 = vld [vmem:[%s24098_s7 + $0x584] ss:$8 sps:$4 sm:$0xff]  }
 0x7a8   : > { %9237 = vmatpush1.bf16.msra.mxu0 %v18679_v9  ;;  %v9777_v9 = vcombine.high %v22900_v21, %v22900_v21 }
 0x7a9   : > { %9619 = vmatpush1.bf16.msra.mxu1 %v18682_v19  ;;  %9238 = vmatprep.subr.bf16.mxu0 %v18687_v40  ;;  %v18751_v19 = vld [vmem:[%s24098_s7 + $0x480] ss:$8 sps:$4 sm:$0xff]   ;;  %v9366_v40 = vcombine.high %v9358_v4, %v9358_v4 }
 0x7aa   : > { %9620 = vmatprep.subr.bf16.mxu1 %v18690_v51  ;;  %v18760_v51 = vld [vmem:[%s24098_s7 + $0x494] ss:$8 sps:$4 sm:$0xff]  }
 0x7ac   : > { %9239 = vmatpush1.bf16.msra.mxu0 %v18685_v1  ;;  %v18763_v1 = vld [vmem:[%s24098_s7 + $0x594] ss:$8 sps:$4 sm:$0xff]  }
 0x7ad   : > { %9621 = vmatpush1.bf16.msra.mxu1 %v18688_v29  ;;  %9240 = vmatprep.subr.bf16.mxu0 %v18693_v46  ;;  %v9791_v29 = vrot.slane %v9777_v9, %v21186_v6  ;;  %v18758_v46 = vld [vmem:[%s24098_s7 + $0x490] ss:$8 sps:$4 sm:$0xff]   ;;  %v18820_v9 = vld [vmem:[%s24098_s7 + $0x534] ss:$8 sps:$4 sm:$0xff]  }
 0x7ae   : > { %9622 = vmatprep.subr.bf16.mxu1 %v18696_v16  ;;  %v18761_v16 = vld [vmem:[%s24098_s7 + $0x590] ss:$8 sps:$4 sm:$0xff]  }
 0x7b0   : > { %9241 = vmatpush1.bf16.msra.mxu0 %v18691_v10  ;;  %v18766_v10 = vld [vmem:[%s24098_s7 + $0x4a4] ss:$8 sps:$4 sm:$0xff]  }
 0x7b1   : > { %9623 = vmatpush1.bf16.msra.mxu1 %v18694_v17  ;;  %9242 = vmatprep.subr.bf16.mxu0 %v18699_v43  ;;  %v18769_v17 = vld [vmem:[%s24098_s7 + $0x5a4] ss:$8 sps:$4 sm:$0xff]   ;;  %v18764_v43 = vld [vmem:[%s24098_s7 + $0x4a0] ss:$8 sps:$4 sm:$0xff]  }
 0x7b2   : > { %9624 = vmatprep.subr.bf16.mxu1 %v18702_v22  ;;  %v18767_v22 = vld [vmem:[%s24098_s7 + $0x5a0] ss:$8 sps:$4 sm:$0xff]  }
 0x7b4   : > { %9243 = vmatpush1.bf16.msra.mxu0 %v18697_v56  ;;  %v18772_v56 = vld [vmem:[%s24098_s7 + $0x4b4] ss:$8 sps:$4 sm:$0xff]  }
 0x7b5   : > { %9625 = vmatpush1.bf16.msra.mxu1 %v18700_v0  ;;  %9651 = vmatprep.subr.bf16.mxu0 %v18705_v35  ;;  %v18775_v0 = vld [vmem:[%s24098_s7 + $0x5b4] ss:$8 sps:$4 sm:$0xff]   ;;  %v18770_v35 = vld [vmem:[%s24098_s7 + $0x4b0] ss:$8 sps:$4 sm:$0xff]  }
 0x7b6   : > { %9626 = vmatprep.subr.bf16.mxu1 %v18708_v55  ;;  %v18773_v55 = vld [vmem:[%s24098_s7 + $0x5b0] ss:$8 sps:$4 sm:$0xff]  }
 0x7b7   : > { %9245 = vmatmul.mubr.bf16.vlgmr.msra.gmra.mrb[60].mxu0 %v22700_v32  ;;  %v18724_v32 = vld [vmem:[%s24098_s7 + $0x3b0] ss:$8 sps:$4 sm:$0xff]  }
 0x7b8   : > { %9652 = vmatpush1.bf16.msra.mxu0 %v18703_v8  ;;  %9683 = vmatprep.mubr.bf16.mxu0 %v19802_v24  ;;  %v18778_v8 = vld [vmem:[%s24098_s7 + $0x4c4] ss:$8 sps:$4 sm:$0xff]  }
 0x7b9   : > { %9627 = vmatpush1.bf16.msra.mxu1 %v18706_v23  ;;  %9653 = vmatprep.subr.bf16.mxu0 %v18711_v18  ;;  %v18781_v23 = vld [vmem:[%s24098_s7 + $0x5c4] ss:$8 sps:$4 sm:$0xff]   ;;  %v18776_v18 = vld [vmem:[%s24098_s7 + $0x4c0] ss:$8 sps:$4 sm:$0xff]  }
 0x7ba   : > { %9628 = vmatprep.subr.bf16.mxu1 %v18714_v49  ;;  %v10129_v49 = vshrl.u32 %v22871_v5, 16 }
 0x7bc   : > { %9654 = vmatpush1.bf16.msra.mxu0 %v18709_v33  ;;  %v10134_v33 = vshll.u32 %v22576_v63, 16 }
 0x7bd   : > { %9629 = vmatpush1.bf16.msra.mxu1 %v18712_v61  ;;  %9655 = vmatprep.subr.bf16.mxu0 %v18717_v60  ;;  %v18779_v61 = vld [vmem:[%s24098_s7 + $0x5c0] ss:$8 sps:$4 sm:$0xff]   ;;  %v18784_v60 = vld [vmem:[%s24098_s7 + $0x4d4] ss:$8 sps:$4 sm:$0xff]  }
 0x7be   : > { %9630 = vmatprep.subr.bf16.mxu1 %v18720_v28  ;;  %v18787_v28 = vld [vmem:[%s24098_s7 + $0x5d4] ss:$8 sps:$4 sm:$0xff]  }
 0x7c0   : > { %9656 = vmatpush1.bf16.msra.mxu0 %v18715_v15  ;;  %v18782_v15 = vld [vmem:[%s24098_s7 + $0x4d0] ss:$8 sps:$4 sm:$0xff]  }
 0x7c1   : > { %9631 = vmatpush1.bf16.msra.mxu1 %v18718_v7  ;;  %9657 = vmatprep.subr.bf16.mxu0 %v18723_v13  ;;  %v22987_v7 = vsel %vm21205_vm14, %v10129_v49, %v10134_v33  ;;  %v18785_v13 = vld [vmem:[%s24098_s7 + $0x5d0] ss:$8 sps:$4 sm:$0xff]   ;;  %v18850_v49 = vld [vmem:[%s24098_s7 + $0x704] ss:$8 sps:$4 sm:$0xff]  }
 0x7c2   : > { %9632 = vmatprep.subr.bf16.mxu1 %v18726_v59  ;;  %v18790_v59 = vld [vmem:[%s24098_s7 + $0x4e4] ss:$8 sps:$4 sm:$0xff]  }
 0x7c3   : > { %v18853_v33 = vld [vmem:[%s24098_s7 + $0x684] ss:$8 sps:$4 sm:$0xff]  }
 0x7c4   : > { %9658 = vmatpush1.bf16.msra.mxu0 %v18721_v2  ;;  %v18793_v2 = vld [vmem:[%s24098_s7 + $0x5e4] ss:$8 sps:$4 sm:$0xff]  }
 0x7c5   : > { %9633 = vmatpush1.bf16.msra.mxu1 %v18724_v32  ;;  %9659 = vmatprep.subr.bf16.mxu0 %v18729_v3  ;;  %v10186_v32 = vcombine.low %v22587_v38, %v22987_v7  ;;  %v18788_v3 = vld [vmem:[%s24098_s7 + $0x4e0] ss:$8 sps:$4 sm:$0xff]   ;;  %v18799_v38 = vld [vmem:[%s24098_s7 + $0x5f4] ss:$8 sps:$4 sm:$0xff]  }
 0x7c6   : > { %9634 = vmatprep.subr.bf16.mxu1 %v18732_v27  ;;  %v18791_v27 = vld [vmem:[%s24098_s7 + $0x5e0] ss:$8 sps:$4 sm:$0xff]  }
 0x7c8   : > { %9660 = vmatpush1.bf16.msra.mxu0 %v18727_v12  ;;  %v23013_v12 = vrot.slane %v10186_v32, %v21186_v6  ;;  %v18865_v32 = vld [vmem:[%s24098_s7 + $0x6a4] ss:$8 sps:$4 sm:$0xff]  }
 0x7c9   : > { %9635 = vmatpush1.bf16.msra.mxu1 %v18730_v26  ;;  %9661 = vmatprep.subr.bf16.mxu0 %v18735_v48  ;;  %v18794_v26 = vld [vmem:[%s24098_s7 + $0x4f0] ss:$8 sps:$4 sm:$0xff]  }
 0x7ca   : > { %9636 = vmatprep.subr.bf16.mxu1 %v18738_v25  ;;  %v18797_v48 = vld [vmem:[%s24098_s7 + $0x5f0] ss:$8 sps:$4 sm:$0xff]   ;;  %v18802_v25 = vld [vmem:[%s24098_s7 + $0x504] ss:$8 sps:$4 sm:$0xff]  }
 0x7cc   : > { %9662 = vmatpush1.bf16.msra.mxu0 %v18733_v53  ;;  %v23026_v53 = vrot.slane %v22900_v21, %v21186_v6  ;;  %v18806_v21 = vld [vmem:[%s24098_s7 + $0x510] ss:$8 sps:$4 sm:$0xff]  }
 0x7cd   : > { %9637 = vmatpush1.bf16.msra.mxu1 %v18736_v50  ;;  %9663 = vmatprep.subr.bf16.mxu0 %v18741_v20  ;;  %v18805_v50 = vld [vmem:[%s24098_s7 + $0x604] ss:$8 sps:$4 sm:$0xff]   ;;  %v10194_v20 = vcombine.high %v23013_v12, %v23013_v12 }
 0x7ce   : > { %9638 = vmatprep.subr.bf16.mxu1 %v18744_v47  ;;  %v18800_v47 = vld [vmem:[%s24098_s7 + $0x500] ss:$8 sps:$4 sm:$0xff]  }
 0x7d0   : > { %9664 = vmatpush1.bf16.msra.mxu0 %v18739_v39  ;;  %v9792_v39 = vcombine.high %v23026_v53, %v23026_v53 }
 0x7d1   : > { %9639 = vmatpush1.bf16.msra.mxu1 %v18742_v45  ;;  %9665 = vmatprep.subr.bf16.mxu0 %v18747_v37  ;;  %v18808_v45 = vld [vmem:[%s24098_s7 + $0x514] ss:$8 sps:$4 sm:$0xff]  }
 0x7d2   : > { %9640 = vmatprep.subr.bf16.mxu1 %v18750_v41  ;;  %v18811_v37 = vld [vmem:[%s24098_s7 + $0x614] ss:$8 sps:$4 sm:$0xff]   ;;  %v10208_v41 = vrot.slane %v10194_v20, %v21186_v6  ;;  %v18875_v20 = vld [vmem:[%s24098_s7 + $0x6c0] ss:$8 sps:$4 sm:$0xff]  }
 0x7d4   : > { %9666 = vmatpush1.bf16.msra.mxu0 %v18745_v44  ;;  %v18809_v44 = vld [vmem:[%s24098_s7 + $0x610] ss:$8 sps:$4 sm:$0xff]  }
 0x7d5   : > { %9641 = vmatpush1.bf16.msra.mxu1 %v18748_v52  ;;  %10036 = vmatprep.subr.bf16.mxu0 %v18753_v31  ;;  %v18814_v52 = vld [vmem:[%s24098_s7 + $0x524] ss:$8 sps:$4 sm:$0xff]   ;;  %v18812_v31 = vld [vmem:[%s24098_s7 + $0x520] ss:$8 sps:$4 sm:$0xff]  }
 0x7d6   : > { %10077 = vmatprep.subr.bf16.mxu1 %v18757_v54  ;;  %v18815_v54 = vld [vmem:[%s24098_s7 + $0x620] ss:$8 sps:$4 sm:$0xff]  }
 0x7d7   : > { %9684 = vmatmul.mubr.bf16.vlgmr.msra.gmra.mrb[64].mxu0 %v9366_v40  ;;  %v18818_v40 = vld [vmem:[%s24098_s7 + $0x530] ss:$8 sps:$4 sm:$0xff]  }
 0x7d8   : > { %9643 = vmatmul.mubr.bf16.vlgmr.msra.gmra.mrb[44].mxu1 %v9358_v4  ;;  %10037 = vmatpush1.bf16.msra.mxu0 %v18751_v19  ;;  %v18817_v4 = vld [vmem:[%s24098_s7 + $0x624] ss:$8 sps:$4 sm:$0xff]   ;;  %v18823_v19 = vld [vmem:[%s24098_s7 + $0x634] ss:$8 sps:$4 sm:$0xff]  }
 0x7d9   : > { %10068 = vmatprep.mubr.bf16.mxu0 %v9791_v29  ;;  %10078 = vmatpush1.bf16.msra.mxu1 %v18755_v14  ;;  %v18821_v14 = vld [vmem:[%s24098_s7 + $0x630] ss:$8 sps:$4 sm:$0xff]   ;;  %v18824_v29 = vld [vmem:[%s24098_s7 + $0x540] ss:$8 sps:$4 sm:$0xff]  }
 0x7da   : > { %10038 = vmatprep.subr.bf16.mxu0 %v18760_v51  ;;  %10079 = vmatprep.subr.bf16.mxu1 %v18763_v1  ;;  %v18826_v51 = vld [vmem:[%s24098_s7 + $0x544] ss:$8 sps:$4 sm:$0xff]  }
 0x7db   : > { %10109 = vmatprep.mubr.bf16.mxu1 %v19802_v24  ;;  %v18829_v1 = vld [vmem:[%s24098_s7 + $0x644] ss:$8 sps:$4 sm:$0xff]  }
 0x7dc   : > { %10039 = vmatpush1.bf16.msra.mxu0 %v18758_v46  ;;  %v18827_v46 = vld [vmem:[%s24098_s7 + $0x640] ss:$8 sps:$4 sm:$0xff]  }
 0x7dd   : > { %10080 = vmatpush1.bf16.msra.mxu1 %v18761_v16  ;;  %10040 = vmatprep.subr.bf16.mxu0 %v18766_v10  ;;  %v18832_v16 = vld [vmem:[%s24098_s7 + $0x554] ss:$8 sps:$4 sm:$0xff]  }
 0x7de   : > { %10081 = vmatprep.subr.bf16.mxu1 %v18769_v17  ;;  %v18835_v10 = vld [vmem:[%s24098_s7 + $0x654] ss:$8 sps:$4 sm:$0xff]   ;;  %v18830_v17 = vld [vmem:[%s24098_s7 + $0x550] ss:$8 sps:$4 sm:$0xff]  }
 0x7e0   : > { %10041 = vmatpush1.bf16.msra.mxu0 %v18764_v43  ;;  %v18833_v43 = vld [vmem:[%s24098_s7 + $0x650] ss:$8 sps:$4 sm:$0xff]  }
 0x7e1   : > { %10082 = vmatpush1.bf16.msra.mxu1 %v18767_v22  ;;  %10042 = vmatprep.subr.bf16.mxu0 %v18772_v56  ;;  %v18838_v22 = vld [vmem:[%s24098_s7 + $0x564] ss:$8 sps:$4 sm:$0xff]  }
 0x7e2   : > { %10083 = vmatprep.subr.bf16.mxu1 %v18775_v0  ;;  %v18841_v56 = vld [vmem:[%s24098_s7 + $0x664] ss:$8 sps:$4 sm:$0xff]   ;;  %v18836_v0 = vld [vmem:[%s24098_s7 + $0x560] ss:$8 sps:$4 sm:$0xff]  }
 0x7e4   : > { %10043 = vmatpush1.bf16.msra.mxu0 %v18770_v35  ;;  %v18839_v35 = vld [vmem:[%s24098_s7 + $0x660] ss:$8 sps:$4 sm:$0xff]  }
 0x7e5   : > { %10084 = vmatpush1.bf16.msra.mxu1 %v18773_v55  ;;  %10044 = vmatprep.subr.bf16.mxu0 %v18778_v8  ;;  %v18844_v55 = vld [vmem:[%s24098_s7 + $0x574] ss:$8 sps:$4 sm:$0xff]  }
 0x7e6   : > { %10085 = vmatprep.subr.bf16.mxu1 %v18781_v23  ;;  %v18847_v8 = vld [vmem:[%s24098_s7 + $0x674] ss:$8 sps:$4 sm:$0xff]   ;;  %v18842_v23 = vld [vmem:[%s24098_s7 + $0x570] ss:$8 sps:$4 sm:$0xff]  }
 0x7e8   : > { %10045 = vmatpush1.bf16.msra.mxu0 %v18776_v18  ;;  %v18845_v18 = vld [vmem:[%s24098_s7 + $0x670] ss:$8 sps:$4 sm:$0xff]  }
 0x7e9   : > { %10086 = vmatpush1.bf16.msra.mxu1 %v18779_v61  ;;  %10046 = vmatprep.subr.bf16.mxu0 %v18784_v60  ;;  %v18848_v61 = vld [vmem:[%s24098_s7 + $0x700] ss:$8 sps:$4 sm:$0xff]  }
 0x7ea   : > { %10087 = vmatprep.subr.bf16.mxu1 %v18787_v28  ;;  %v18851_v60 = vld [vmem:[%s24098_s7 + $0x680] ss:$8 sps:$4 sm:$0xff]   ;;  %v18856_v28 = vld [vmem:[%s24098_s7 + $0x714] ss:$8 sps:$4 sm:$0xff]  }
 0x7ec   : > { %10047 = vmatpush1.bf16.msra.mxu0 %v18782_v15  ;;  %v18859_v15 = vld [vmem:[%s24098_s7 + $0x694] ss:$8 sps:$4 sm:$0xff]  }
 0x7ed   : > { %10088 = vmatpush1.bf16.msra.mxu1 %v18785_v13  ;;  %10048 = vmatprep.subr.bf16.mxu0 %v18790_v59  ;;  %v18854_v13 = vld [vmem:[%s24098_s7 + $0x710] ss:$8 sps:$4 sm:$0xff]  }
 0x7ee   : > { %10089 = vmatprep.subr.bf16.mxu1 %v18793_v2  ;;  %v18857_v59 = vld [vmem:[%s24098_s7 + $0x690] ss:$8 sps:$4 sm:$0xff]   ;;  %v18862_v2 = vld [vmem:[%s24098_s7 + $0x724] ss:$8 sps:$4 sm:$0xff]  }
 0x7f0   : > { %10049 = vmatpush1.bf16.msra.mxu0 %v18788_v3  ;;  %v18860_v3 = vld [vmem:[%s24098_s7 + $0x720] ss:$8 sps:$4 sm:$0xff]  }
 0x7f1   : > { %10090 = vmatpush1.bf16.msra.mxu1 %v18791_v27  ;;  %10050 = vmatprep.subr.bf16.mxu0 %v18796_v58  ;;  %v18863_v27 = vld [vmem:[%s24098_s7 + $0x6a0] ss:$8 sps:$4 sm:$0xff]   ;;  %v18868_v58 = vld [vmem:[%s24098_s7 + $0x734] ss:$8 sps:$4 sm:$0xff]  }
 0x7f2   : > { %10091 = vmatprep.subr.bf16.mxu1 %v18799_v38  ;;  %v18871_v38 = vld [vmem:[%s24098_s7 + $0x6b4] ss:$8 sps:$4 sm:$0xff]  }
 0x7f4   : > { %10051 = vmatpush1.bf16.msra.mxu0 %v18794_v26  ;;  %v18866_v26 = vld [vmem:[%s24098_s7 + $0x730] ss:$8 sps:$4 sm:$0xff]  }
 0x7f5   : > { %10092 = vmatpush1.bf16.msra.mxu1 %v18797_v48  ;;  %10052 = vmatprep.subr.bf16.mxu0 %v18802_v25  ;;  %v18869_v48 = vld [vmem:[%s24098_s7 + $0x6b0] ss:$8 sps:$4 sm:$0xff]   ;;  %v18874_v25 = vld [vmem:[%s24098_s7 + $0x744] ss:$8 sps:$4 sm:$0xff]  }
 0x7f6   : > { %10453 = vmatprep.subr.bf16.mxu1 %v18805_v50  ;;  %v18872_v50 = vld [vmem:[%s24098_s7 + $0x740] ss:$8 sps:$4 sm:$0xff]  }
 0x7f8   : > { %10053 = vmatpush1.bf16.msra.mxu0 %v18800_v47  ;;  %10110 = vmatmul.mubr.bf16.vlgmr.msra.gmra.mrb[48].mxu1 %v9792_v39  ;;  %v18880_v47 = vld [vmem:[%s24098_s7 + $0x754] ss:$8 sps:$4 sm:$0xff]   ;;  %v18878_v39 = vld [vmem:[%s24098_s7 + $0x750] ss:$8 sps:$4 sm:$0xff]  }
 0x7f9   : > { %10454 = vmatpush1.bf16.msra.mxu1 %v18803_v42  ;;  %10485 = vmatprep.mubr.bf16.mxu1 %v10208_v41  ;;  %v18883_v42 = vld [vmem:[%s24098_s7 + $0x6d4] ss:$8 sps:$4 sm:$0xff]   ;;  %v18889_v41 = vld [vmem:[%s24098_s7 + $0x6e4] ss:$8 sps:$4 sm:$0xff]  }
 0x7fa   : > { %10054 = vmatprep.subr.bf16.mxu0 %v18808_v45  ;;  %10455 = vmatprep.subr.bf16.mxu1 %v18811_v37  ;;  %v18881_v45 = vld [vmem:[%s24098_s7 + $0x6d0] ss:$8 sps:$4 sm:$0xff]   ;;  %v18886_v37 = vld [vmem:[%s24098_s7 + $0x764] ss:$8 sps:$4 sm:$0xff]  }
 0x7fc   : > { %10055 = vmatpush1.bf16.msra.mxu0 %v18806_v21  ;;  %v18884_v21 = vld [vmem:[%s24098_s7 + $0x760] ss:$8 sps:$4 sm:$0xff]  }
 0x7fd   : > { %10456 = vmatpush1.bf16.msra.mxu1 %v18809_v44  ;;  %10056 = vmatprep.subr.bf16.mxu0 %v18814_v52  ;;  %v18887_v44 = vld [vmem:[%s24098_s7 + $0x6e0] ss:$8 sps:$4 sm:$0xff]   ;;  %v18892_v52 = vld [vmem:[%s24098_s7 + $0x774] ss:$8 sps:$4 sm:$0xff]  }
 0x7fe   : > { %10457 = vmatprep.subr.bf16.mxu1 %v18817_v4  ;;  %v18895_v4 = vld [vmem:[%s24098_s7 + $0x6f4] ss:$8 sps:$4 sm:$0xff]  }
 0x800   : > { %10057 = vmatpush1.bf16.msra.mxu0 %v18812_v31  ;;  %v23222_v31 = vrot.slane %v10586_v30, %v21186_v6  ;;  %v18901_v30 = vld [vmem:[%s24098_s7 + $0x884] ss:$8 sps:$4 sm:$0xff]  }
 0x801   : > { %10458 = vmatpush1.bf16.msra.mxu1 %v18815_v54  ;;  %10058 = vmatprep.subr.bf16.mxu0 %v18820_v9  ;;  %v18890_v54 = vld [vmem:[%s24098_s7 + $0x770] ss:$8 sps:$4 sm:$0xff]  }
 0x802   : > { %10459 = vmatprep.subr.bf16.mxu1 %v18823_v19  ;;  %v18893_v9 = vld [vmem:[%s24098_s7 + $0x6f0] ss:$8 sps:$4 sm:$0xff]   ;;  %v10201_v19 = vrot.slane %v23013_v12, %v21186_v6  ;;  %v18899_v12 = vld [vmem:[%s24098_s7 + $0x880] ss:$8 sps:$4 sm:$0xff]  }
 0x804   : > { %10059 = vmatpush1.bf16.msra.mxu0 %v18818_v40  ;;  %v10594_v40 = vcombine.high %v23222_v31, %v23222_v31 }
 0x805   : > { %10460 = vmatpush1.bf16.msra.mxu1 %v18821_v14  ;;  %10060 = vmatprep.subr.bf16.mxu0 %v18826_v51  ;;  %v18896_v14 = vld [vmem:[%s24098_s7 + $0x780] ss:$8 sps:$4 sm:$0xff]   ;;  %v10209_v51 = vcombine.high %v10201_v19, %v10201_v19 }
 0x806   : > { %10461 = vmatprep.subr.bf16.mxu1 %v18829_v1  ;;  %v18904_v1 = vld [vmem:[%s24098_s7 + $0x794] ss:$8 sps:$4 sm:$0xff]  }
 0x808   : > { %10061 = vmatpush1.bf16.msra.mxu0 %v18824_v29  ;;  %v18907_v29 = vld [vmem:[%s24098_s7 + $0x894] ss:$8 sps:$4 sm:$0xff]  }
 0x809   : > { %10462 = vmatpush1.bf16.msra.mxu1 %v18827_v46  ;;  %10062 = vmatprep.subr.bf16.mxu0 %v18832_v16  ;;  %v10608_v46 = vrot.slane %v10594_v40, %v21186_v6  ;;  %v18902_v16 = vld [vmem:[%s24098_s7 + $0x790] ss:$8 sps:$4 sm:$0xff]   ;;  %v18947_v40 = vld [vmem:[%s24098_s7 + $0x900] ss:$8 sps:$4 sm:$0xff]  }
 0x80a   : > { %10463 = vmatprep.subr.bf16.mxu1 %v18835_v10  ;;  %v8388_v10 = vld [vmem:[#allocation4 + $0x2c] sm:$0xf] }
 0x80c   : > { %10063 = vmatpush1.bf16.msra.mxu0 %v18830_v17  ;;  %v18905_v17 = vld [vmem:[%s24098_s7 + $0x890] ss:$8 sps:$4 sm:$0xff]  }
 0x80d   : > { %10464 = vmatpush1.bf16.msra.mxu1 %v18833_v43  ;;  %10064 = vmatprep.subr.bf16.mxu0 %v18838_v22  ;;  %v18910_v43 = vld [vmem:[%s24098_s7 + $0x7a4] ss:$8 sps:$4 sm:$0xff]  }
 0x80e   : > { %10465 = vmatprep.subr.bf16.mxu1 %v18841_v56  ;;  %v18913_v22 = vld [vmem:[%s24098_s7 + $0x8a4] ss:$8 sps:$4 sm:$0xff]   ;;  %v8412_v56 = vpack.c.bf16 %v8388_v10, %v8388_v10  ;;  %v18956_v10 = vld [vmem:[%s24098_s7 + $0x820] ss:$8 sps:$4 sm:$0xff]  }
 0x810   : > { %10065 = vmatpush1.bf16.msra.mxu0 %v18836_v0  ;;  %v18908_v0 = vld [vmem:[%s24098_s7 + $0x7a0] ss:$8 sps:$4 sm:$0xff]  }
 0x811   : > { %10466 = vmatpush1.bf16.msra.mxu1 %v18839_v35  ;;  %10066 = vmatprep.subr.bf16.mxu0 %v18844_v55  ;;  %v18911_v35 = vld [vmem:[%s24098_s7 + $0x8a0] ss:$8 sps:$4 sm:$0xff]   ;;  %v18916_v55 = vld [vmem:[%s24098_s7 + $0x7b4] ss:$8 sps:$4 sm:$0xff]  }
 0x812   : > { %10467 = vmatprep.subr.bf16.mxu1 %v18847_v8  ;;  %v18919_v8 = vld [vmem:[%s24098_s7 + $0x8b4] ss:$8 sps:$4 sm:$0xff]  }
 0x814   : > { %10067 = vmatpush1.bf16.msra.mxu0 %v18842_v23  ;;  %v23279_v23 = vrot.slane %v8412_v56, %v21186_v6  ;;  %v18962_v56 = vld [vmem:[%s24098_s7 + $0x830] ss:$8 sps:$4 sm:$0xff]  }
 0x815   : > { %10468 = vmatpush1.bf16.msra.mxu1 %v18845_v18  ;;  %10494 = vmatprep.subr.bf16.mxu0 %v18850_v49  ;;  %v18914_v18 = vld [vmem:[%s24098_s7 + $0x7b0] ss:$8 sps:$4 sm:$0xff]  }
 0x816   : > { %10469 = vmatprep.subr.bf16.mxu1 %v18853_v33  ;;  %v18917_v49 = vld [vmem:[%s24098_s7 + $0x8b0] ss:$8 sps:$4 sm:$0xff]   ;;  %v18922_v33 = vld [vmem:[%s24098_s7 + $0x7c4] ss:$8 sps:$4 sm:$0xff]  }
 0x817   : > { %10069 = vmatmul.mubr.bf16.vlgmr.msra.gmra.mrb[68].mxu0 %v23026_v53  ;;  %v18877_v53 = vld [vmem:[%s24098_s7 + $0x6c4] ss:$8 sps:$4 sm:$0xff]  }
 0x818   : > { %10495 = vmatpush1.bf16.msra.mxu0 %v18848_v61  ;;  %10526 = vmatprep.mubr.bf16.mxu0 %v19802_v24  ;;  %v18925_v61 = vld [vmem:[%s24098_s7 + $0x8c4] ss:$8 sps:$4 sm:$0xff]  }
 0x819   : > { %10470 = vmatpush1.bf16.msra.mxu1 %v18851_v60  ;;  %10496 = vmatprep.subr.bf16.mxu0 %v18856_v28  ;;  %v10955_v60 = vcombine.low %v22549_v36, %v23279_v23  ;;  %v18920_v28 = vld [vmem:[%s24098_s7 + $0x7c0] ss:$8 sps:$4 sm:$0xff]  }
 0x81a   : > { %10471 = vmatprep.subr.bf16.mxu1 %v18859_v15  ;;  %v18923_v15 = vld [vmem:[%s24098_s7 + $0x8c0] ss:$8 sps:$4 sm:$0xff]  }
 0x81c   : > { %10497 = vmatpush1.bf16.msra.mxu0 %v18854_v13  ;;  %v18928_v13 = vld [vmem:[%s24098_s7 + $0x7d4] ss:$8 sps:$4 sm:$0xff]  }
 0x81d   : > { %10472 = vmatpush1.bf16.msra.mxu1 %v18857_v59  ;;  %10498 = vmatprep.subr.bf16.mxu0 %v18862_v2  ;;  %v18931_v59 = vld [vmem:[%s24098_s7 + $0x8d4] ss:$8 sps:$4 sm:$0xff]   ;;  %v23308_v2 = vrot.slane %v10955_v60, %v21186_v6  ;;  %v18977_v60 = vld [vmem:[%s24098_s7 + $0x950] ss:$8 sps:$4 sm:$0xff]  }
 0x81e   : > { %10473 = vmatprep.subr.bf16.mxu1 %v18865_v32  ;;  %v18926_v32 = vld [vmem:[%s24098_s7 + $0x7d0] ss:$8 sps:$4 sm:$0xff]  }
 0x820   : > { %10499 = vmatpush1.bf16.msra.mxu0 %v18860_v3  ;;  %v18929_v3 = vld [vmem:[%s24098_s7 + $0x8d0] ss:$8 sps:$4 sm:$0xff]  }
 0x821   : > { %10474 = vmatpush1.bf16.msra.mxu1 %v18863_v27  ;;  %10500 = vmatprep.subr.bf16.mxu0 %v18868_v58  ;;  %v18934_v27 = vld [vmem:[%s24098_s7 + $0x7e4] ss:$8 sps:$4 sm:$0xff]  }
 0x822   : > { %10475 = vmatprep.subr.bf16.mxu1 %v18871_v38  ;;  %v18937_v38 = vld [vmem:[%s24098_s7 + $0x8e4] ss:$8 sps:$4 sm:$0xff]  }
 0x824   : > { %10501 = vmatpush1.bf16.msra.mxu0 %v18866_v26 }
 0x825   : > { %10476 = vmatpush1.bf16.msra.mxu1 %v18869_v48  ;;  %10502 = vmatprep.subr.bf16.mxu0 %v18874_v25  ;;  %v11012_v25 = vcombine.low %v22871_v5, %v23308_v2  ;;  %v18940_v5 = vld [vmem:[%s24098_s7 + $0x7f4] ss:$8 sps:$4 sm:$0xff]  }
 0x826   : > { %10477 = vmatprep.subr.bf16.mxu1 %v18877_v53 }
 0x828   : > { %10503 = vmatpush1.bf16.msra.mxu0 %v18872_v50 }
 0x829   : > { %10478 = vmatpush1.bf16.msra.mxu1 %v18875_v20  ;;  %10504 = vmatprep.subr.bf16.mxu0 %v18880_v47  ;;  %v18932_v47 = vld [vmem:[%s24098_s7 + $0x7e0] ss:$8 sps:$4 sm:$0xff]  }
 0x82a   : > { %10479 = vmatprep.subr.bf16.mxu1 %v18883_v42 }
 0x82c   : > { %10505 = vmatpush1.bf16.msra.mxu0 %v18878_v39 }
 0x82d   : > { %10480 = vmatpush1.bf16.msra.mxu1 %v18881_v45  ;;  %10506 = vmatprep.subr.bf16.mxu0 %v18886_v37  ;;  %v18935_v37 = vld [vmem:[%s24098_s7 + $0x8e0] ss:$8 sps:$4 sm:$0xff]  }
 0x82e   : > { %10481 = vmatprep.subr.bf16.mxu1 %v18889_v41 }
 0x830   : > { %10507 = vmatpush1.bf16.msra.mxu0 %v18884_v21  ;;  %v18943_v21 = vld [vmem:[%s24098_s7 + $0x8f4] ss:$8 sps:$4 sm:$0xff]  }
 0x831   : > { %10482 = vmatpush1.bf16.msra.mxu1 %v18887_v44  ;;  %10508 = vmatprep.subr.bf16.mxu0 %v18892_v52  ;;  %v23341_v44 = vrot.slane %v11012_v25, %v21186_v6  ;;  %v18938_v52 = vld [vmem:[%s24098_s7 + $0x7f0] ss:$8 sps:$4 sm:$0xff]  }
 0x832   : > { %10483 = vmatprep.subr.bf16.mxu1 %v18895_v4  ;;  %v18941_v4 = vld [vmem:[%s24098_s7 + $0x8f0] ss:$8 sps:$4 sm:$0xff]  }
 0x833   : > { %v18989_v25 = vld [vmem:[%s24098_s7 + $0x970] ss:$8 sps:$4 sm:$0xff]  }
 0x834   : > { %10509 = vmatpush1.bf16.msra.mxu0 %v18890_v54  ;;  %v18946_v54 = vld [vmem:[%s24098_s7 + $0x804] ss:$8 sps:$4 sm:$0xff]  }
 0x835   : > { %10484 = vmatpush1.bf16.msra.mxu1 %v18893_v9  ;;  %10853 = vmatprep.subr.bf16.mxu0 %v18898_v57  ;;  %v23354_v9 = vrot.slane %v23222_v31, %v21186_v6  ;;  %v11020_v57 = vcombine.high %v23341_v44, %v23341_v44 }
 0x836   : > { %10894 = vmatprep.subr.bf16.mxu1 %v18901_v30  ;;  %v18944_v30 = vld [vmem:[%s24098_s7 + $0x800] ss:$8 sps:$4 sm:$0xff]  }
 0x837   : > { %10527 = vmatmul.mubr.bf16.vlgmr.msra.gmra.mrb[72].mxu0 %v10209_v51  ;;  %v10609_v31 = vcombine.high %v23354_v9, %v23354_v9  ;;  %v18955_v51 = vld [vmem:[%s24098_s7 + $0x914] ss:$8 sps:$4 sm:$0xff]  }
 0x838   : > { %10486 = vmatmul.mubr.bf16.vlgmr.msra.gmra.mrb[52].mxu1 %v10201_v19  ;;  %10854 = vmatpush1.bf16.msra.mxu0 %v18896_v14  ;;  %v18949_v19 = vld [vmem:[%s24098_s7 + $0x904] ss:$8 sps:$4 sm:$0xff]   ;;  %v18952_v14 = vld [vmem:[%s24098_s7 + $0x814] ss:$8 sps:$4 sm:$0xff]  }
 0x839   : > { %10885 = vmatprep.mubr.bf16.mxu0 %v10608_v46  ;;  %10895 = vmatpush1.bf16.msra.mxu1 %v18899_v12  ;;  %v11034_v12 = vrot.slane %v11020_v57, %v21186_v6  ;;  %v18958_v46 = vld [vmem:[%s24098_s7 + $0x824] ss:$8 sps:$4 sm:$0xff]  }
 0x83a   : > { %10855 = vmatprep.subr.bf16.mxu0 %v18904_v1  ;;  %10896 = vmatprep.subr.bf16.mxu1 %v18907_v29  ;;  %v18950_v1 = vld [vmem:[%s24098_s7 + $0x810] ss:$8 sps:$4 sm:$0xff]  }
 0x83b   : > { %10926 = vmatprep.mubr.bf16.mxu1 %v19802_v24  ;;  %v18953_v29 = vld [vmem:[%s24098_s7 + $0x910] ss:$8 sps:$4 sm:$0xff]  }
 0x83c   : > { %10856 = vmatpush1.bf16.msra.mxu0 %v18902_v16  ;;  %v18961_v16 = vld [vmem:[%s24098_s7 + $0x924] ss:$8 sps:$4 sm:$0xff]  }
 0x83d   : > { %10897 = vmatpush1.bf16.msra.mxu1 %v18905_v17  ;;  %10857 = vmatprep.subr.bf16.mxu0 %v18910_v43  ;;  %v18959_v17 = vld [vmem:[%s24098_s7 + $0x920] ss:$8 sps:$4 sm:$0xff]   ;;  %v18964_v43 = vld [vmem:[%s24098_s7 + $0x834] ss:$8 sps:$4 sm:$0xff]  }
 0x83e   : > { %10898 = vmatprep.subr.bf16.mxu1 %v18913_v22  ;;  %v18967_v22 = vld [vmem:[%s24098_s7 + $0x934] ss:$8 sps:$4 sm:$0xff]  }
 0x840   : > { %10858 = vmatpush1.bf16.msra.mxu0 %v18908_v0  ;;  %v18965_v0 = vld [vmem:[%s24098_s7 + $0x930] ss:$8 sps:$4 sm:$0xff]  }
 0x841   : > { %10899 = vmatpush1.bf16.msra.mxu1 %v18911_v35  ;;  %10859 = vmatprep.subr.bf16.mxu0 %v18916_v55  ;;  %v18970_v35 = vld [vmem:[%s24098_s7 + $0x844] ss:$8 sps:$4 sm:$0xff]  }
 0x842   : > { %10900 = vmatprep.subr.bf16.mxu1 %v18919_v8  ;;  %v18973_v55 = vld [vmem:[%s24098_s7 + $0x944] ss:$8 sps:$4 sm:$0xff]   ;;  %v18968_v8 = vld [vmem:[%s24098_s7 + $0x840] ss:$8 sps:$4 sm:$0xff]  }
 0x844   : > { %10860 = vmatpush1.bf16.msra.mxu0 %v18914_v18  ;;  %v18971_v18 = vld [vmem:[%s24098_s7 + $0x940] ss:$8 sps:$4 sm:$0xff]  }
 0x845   : > { %10901 = vmatpush1.bf16.msra.mxu1 %v18917_v49  ;;  %10861 = vmatprep.subr.bf16.mxu0 %v18922_v33  ;;  %v18976_v49 = vld [vmem:[%s24098_s7 + $0x854] ss:$8 sps:$4 sm:$0xff]  }
 0x846   : > { %10902 = vmatprep.subr.bf16.mxu1 %v18925_v61  ;;  %v18979_v33 = vld [vmem:[%s24098_s7 + $0x954] ss:$8 sps:$4 sm:$0xff]   ;;  %v18974_v61 = vld [vmem:[%s24098_s7 + $0x850] ss:$8 sps:$4 sm:$0xff]  }
 0x848   : > { %10862 = vmatpush1.bf16.msra.mxu0 %v18920_v28  ;;  %v18982_v28 = vld [vmem:[%s24098_s7 + $0x864] ss:$8 sps:$4 sm:$0xff]  }
 0x849   : > { %10903 = vmatpush1.bf16.msra.mxu1 %v18923_v15  ;;  %10863 = vmatprep.subr.bf16.mxu0 %v18928_v13  ;;  %v18985_v15 = vld [vmem:[%s24098_s7 + $0x964] ss:$8 sps:$4 sm:$0xff]  }
 0x84a   : > { %v8938_v58 = vpop.f32.mrb[56].mxu0  ;;  %10904 = vmatprep.subr.bf16.mxu1 %v18931_v59 }
 0x84b   : > { %v8897_v26 = vpop.f32.mrb[36].mxu1  ;;  %v8940_v48 = vpop.f32.mrb[57].mxu0 }
 0x84c   : > { %v23324_v53 = vadd.f32 %v8938_v58, %v8897_v26  ;;  %10864 = vmatpush1.bf16.msra.mxu0 %v18926_v32  ;;  %v8899_v50 = vpop.f32.mrb[37].mxu1  ;;  %v8942_v20 = vpop.f32.mrb[58].mxu0  ;;  %v18980_v32 = vld [vmem:[%s24098_s7 + $0x860] ss:$8 sps:$4 sm:$0xff]   ;;  %v18988_v58 = vld [vmem:[%s24098_s7 + $0x874] ss:$8 sps:$4 sm:$0xff]  }
 0x84d   : > { %v23329_v42 = vadd.f32 %v8940_v48, %v8899_v50  ;;  %10905 = vmatpush1.bf16.msra.mxu1 %v18929_v3  ;;  %v8901_v39 = vpop.f32.mrb[38].mxu1  ;;  %v8943_v45 = vpop.f32.mrb[59].mxu0  ;;  %10865 = vmatprep.subr.bf16.mxu0 %v18934_v27  ;;  %v18983_v27 = vld [vmem:[%s24098_s7 + $0x960] ss:$8 sps:$4 sm:$0xff]   ;;  %v18991_v26 = vld [vmem:[%s24098_s7 + $0x974] ss:$8 sps:$4 sm:$0xff]  }
 0x84e   : > { %v8902_v41 = vpop.f32.mrb[39].mxu1  ;;  %10906 = vmatprep.subr.bf16.mxu1 %v18937_v38  ;;  %v18986_v48 = vld [vmem:[%s24098_s7 + $0x870] ss:$8 sps:$4 sm:$0xff]   ;;  %v18994_v50 = vld [vmem:[%s24098_s7 + $0xa04] ss:$8 sps:$4 sm:$0xff]  }
 0x84f   : > { %v18997_v20 = vld [vmem:[%s24098_s7 + $0x984] ss:$8 sps:$4 sm:$0xff]   ;;  %v18995_v39 = vld [vmem:[%s24098_s7 + $0x980] ss:$8 sps:$4 sm:$0xff]   ;;  %v19000_v45 = vld [vmem:[%s24098_s7 + $0xa14] ss:$8 sps:$4 sm:$0xff]  }
 0x850   : > { %10866 = vmatpush1.bf16.msra.mxu0 %v18932_v47  ;;  %v18992_v47 = vld [vmem:[%s24098_s7 + $0xa00] ss:$8 sps:$4 sm:$0xff]   ;;  %v19001_v41 = vld [vmem:[%s24098_s7 + $0x990] ss:$8 sps:$4 sm:$0xff]  }
 0x851   : > { %10907 = vmatpush1.bf16.msra.mxu1 %v18935_v37  ;;  %10867 = vmatprep.subr.bf16.mxu0 %v18940_v5  ;;  %v19003_v37 = vld [vmem:[%s24098_s7 + $0x994] ss:$8 sps:$4 sm:$0xff]   ;;  %v18998_v5 = vld [vmem:[%s24098_s7 + $0xa10] ss:$8 sps:$4 sm:$0xff]  }
 0x852   : > { %10908 = vmatprep.subr.bf16.mxu1 %v18943_v21  ;;  %v19006_v21 = vld [vmem:[%s24098_s7 + $0xa24] ss:$8 sps:$4 sm:$0xff]  }
 0x854   : > { %10868 = vmatpush1.bf16.msra.mxu0 %v18938_v52  ;;  %v19009_v52 = vld [vmem:[%s24098_s7 + $0x9a4] ss:$8 sps:$4 sm:$0xff]  }
 0x855   : > { %10909 = vmatpush1.bf16.msra.mxu1 %v18941_v4  ;;  %10869 = vmatprep.subr.bf16.mxu0 %v18946_v54  ;;  %v11363_v4 = vcombine.high %v22549_v36, %v23279_v23  ;;  %v19004_v54 = vld [vmem:[%s24098_s7 + $0xa20] ss:$8 sps:$4 sm:$0xff]   ;;  %v19015_v36 = vld [vmem:[%s24098_s7 + $0x9b4] ss:$8 sps:$4 sm:$0xff]   ;;  %v19010_v23 = vld [vmem:[%s24098_s7 + $0xa30] ss:$8 sps:$4 sm:$0xff]  }
 0x856   : > { %11279 = vmatprep.subr.bf16.mxu1 %v18949_v19  ;;  %v19012_v19 = vld [vmem:[%s24098_s7 + $0xa34] ss:$8 sps:$4 sm:$0xff]  }
 0x857   : > { %v23508_v57 = vrot.slane %v11363_v4, %v21186_v6  ;;  %v19069_v4 = vld [vmem:[%s24098_s7 + $0xbc4] ss:$8 sps:$4 sm:$0xff]  }
 0x858   : > { %10870 = vmatpush1.bf16.msra.mxu0 %v18944_v30  ;;  %10927 = vmatmul.mubr.bf16.vlgmr.msra.gmra.mrb[56].mxu1 %v10609_v31  ;;  %v19013_v30 = vld [vmem:[%s24098_s7 + $0x9b0] ss:$8 sps:$4 sm:$0xff]   ;;  %v19021_v31 = vld [vmem:[%s24098_s7 + $0x9c4] ss:$8 sps:$4 sm:$0xff]  }
 0x859   : > { %11280 = vmatpush1.bf16.msra.mxu1 %v18947_v40  ;;  %11311 = vmatprep.mubr.bf16.mxu1 %v11034_v12  ;;  %v19018_v40 = vld [vmem:[%s24098_s7 + $0xa44] ss:$8 sps:$4 sm:$0xff]   ;;  %v11377_v12 = vshll.u32 %v23508_v57, 16 }
 0x85a   : > { %10871 = vmatprep.subr.bf16.mxu0 %v18952_v14  ;;  %11281 = vmatprep.subr.bf16.mxu1 %v18955_v51  ;;  %v11372_v14 = vshrl.u32 %v23308_v2, 16  ;;  %v19016_v51 = vld [vmem:[%s24098_s7 + $0xa40] ss:$8 sps:$4 sm:$0xff]   ;;  %v19027_v2 = vld [vmem:[%s24098_s7 + $0x9d4] ss:$8 sps:$4 sm:$0xff]  }
 0x85c   : > { %10872 = vmatpush1.bf16.msra.mxu0 %v18950_v1  ;;  %v19019_v1 = vld [vmem:[%s24098_s7 + $0x9c0] ss:$8 sps:$4 sm:$0xff]  }
 0x85d   : > { %11282 = vmatpush1.bf16.msra.mxu1 %v18953_v29  ;;  %10873 = vmatprep.subr.bf16.mxu0 %v18958_v46  ;;  %v19024_v29 = vld [vmem:[%s24098_s7 + $0xa54] ss:$8 sps:$4 sm:$0xff]   ;;  %v19022_v46 = vld [vmem:[%s24098_s7 + $0xa50] ss:$8 sps:$4 sm:$0xff]  }
 0x85e   : > { %11283 = vmatprep.subr.bf16.mxu1 %v18961_v16  ;;  %v11379_v16 = vsel %vm21205_vm14, %v11372_v14, %v11377_v12  ;;  %v19081_v14 = vld [vmem:[%s24098_s7 + $0xbe4] ss:$8 sps:$4 sm:$0xff]  }
 0x860   : > { %10874 = vmatpush1.bf16.msra.mxu0 %v18956_v10  ;;  %v19025_v10 = vld [vmem:[%s24098_s7 + $0x9d0] ss:$8 sps:$4 sm:$0xff]  }
 0x861   : > { %11284 = vmatpush1.bf16.msra.mxu1 %v18959_v17  ;;  %10875 = vmatprep.subr.bf16.mxu0 %v18964_v43  ;;  %v19030_v17 = vld [vmem:[%s24098_s7 + $0xa64] ss:$8 sps:$4 sm:$0xff]  }
 0x862   : > { %11285 = vmatprep.subr.bf16.mxu1 %v18967_v22  ;;  %v19033_v22 = vld [vmem:[%s24098_s7 + $0x9e4] ss:$8 sps:$4 sm:$0xff]  }
 0x864   : > { %10876 = vmatpush1.bf16.msra.mxu0 %v18962_v56 }
 0x865   : > { %11286 = vmatpush1.bf16.msra.mxu1 %v18965_v0  ;;  %10877 = vmatprep.subr.bf16.mxu0 %v18970_v35  ;;  %v11429_v35 = vcombine.low %v22987_v7, %v11379_v16  ;;  %v19036_v7 = vld [vmem:[%s24098_s7 + $0xa74] ss:$8 sps:$4 sm:$0xff]   ;;  %v19076_v16 = vld [vmem:[%s24098_s7 + $0xae0] ss:$8 sps:$4 sm:$0xff]  }
 0x866   : > { %11287 = vmatprep.subr.bf16.mxu1 %v18973_v55 }
 0x868   : > { %10878 = vmatpush1.bf16.msra.mxu0 %v18968_v8 }
 0x869   : > { %11288 = vmatpush1.bf16.msra.mxu1 %v18971_v18  ;;  %10879 = vmatprep.subr.bf16.mxu0 %v18976_v49  ;;  %v19028_v18 = vld [vmem:[%s24098_s7 + $0xa60] ss:$8 sps:$4 sm:$0xff]  }
 0x86a   : > { %11289 = vmatprep.subr.bf16.mxu1 %v18979_v33 }
 0x86b   : > { %v23436_v13 = vpop.f32.mrb[40].mxu1 }
 0x86c   : > { %v23438_v59 = vpop.f32.mrb[41].mxu1  ;;  %10880 = vmatpush1.bf16.msra.mxu0 %v18974_v61  ;;  %v19039_v61 = vld [vmem:[%s24098_s7 + $0x9f4] ss:$8 sps:$4 sm:$0xff]  }
 0x86d   : > { %v9291_v3 = vpop.f32.mrb[42].mxu1  ;;  %11290 = vmatpush1.bf16.msra.mxu1 %v18977_v60  ;;  %10881 = vmatprep.subr.bf16.mxu0 %v18982_v28  ;;  %v23569_v60 = vrot.slane %v11429_v35, %v21186_v6  ;;  %v19034_v28 = vld [vmem:[%s24098_s7 + $0xa70] ss:$8 sps:$4 sm:$0xff]  }
 0x86e   : > { %v9292_v38 = vpop.f32.mrb[43].mxu1  ;;  %11291 = vmatprep.subr.bf16.mxu1 %v18985_v15  ;;  %v19037_v15 = vld [vmem:[%s24098_s7 + $0x9f0] ss:$8 sps:$4 sm:$0xff]  }
 0x86f   : > { %v11437_v3 = vcombine.high %v23569_v60, %v23569_v60  ;;  %v19048_v38 = vld [vmem:[%s24098_s7 + $0xa94] ss:$8 sps:$4 sm:$0xff]  }
 0x870   : > { %10882 = vmatpush1.bf16.msra.mxu0 %v18980_v32  ;;  %v19045_v32 = vld [vmem:[%s24098_s7 + $0xb84] ss:$8 sps:$4 sm:$0xff]  }
 0x871   : > { %11292 = vmatpush1.bf16.msra.mxu1 %v18983_v27  ;;  %10883 = vmatprep.subr.bf16.mxu0 %v18988_v58  ;;  %v19040_v27 = vld [vmem:[%s24098_s7 + $0xa80] ss:$8 sps:$4 sm:$0xff]  }
 0x872   : > { %11293 = vmatprep.subr.bf16.mxu1 %v18991_v26  ;;  %v19051_v26 = vld [vmem:[%s24098_s7 + $0xb94] ss:$8 sps:$4 sm:$0xff]  }
 0x874   : > { %10884 = vmatpush1.bf16.msra.mxu0 %v18986_v48  ;;  %v11451_v48 = vrot.slane %v11437_v3, %v21186_v6  ;;  %v19102_v3 = vld [vmem:[%s24098_s7 + $0xb24] ss:$8 sps:$4 sm:$0xff]  }
 0x875   : > { %11294 = vmatpush1.bf16.msra.mxu1 %v18989_v25  ;;  %11320 = vmatprep.subr.bf16.mxu0 %v18994_v50  ;;  %v19046_v25 = vld [vmem:[%s24098_s7 + $0xa90] ss:$8 sps:$4 sm:$0xff]  }
 0x876   : > { %11295 = vmatprep.subr.bf16.mxu1 %v18997_v20  ;;  %v19049_v50 = vld [vmem:[%s24098_s7 + $0xb90] ss:$8 sps:$4 sm:$0xff]   ;;  %v19054_v20 = vld [vmem:[%s24098_s7 + $0xaa4] ss:$8 sps:$4 sm:$0xff]  }
 0x877   : > { %10886 = vmatmul.mubr.bf16.vlgmr.msra.gmra.mrb[76].mxu0 %v23354_v9  ;;  %v19007_v9 = vld [vmem:[%s24098_s7 + $0x9a0] ss:$8 sps:$4 sm:$0xff]  }
 0x878   : > { %11321 = vmatpush1.bf16.msra.mxu0 %v18992_v47  ;;  %11352 = vmatprep.mubr.bf16.mxu0 %v19802_v24  ;;  %v19057_v47 = vld [vmem:[%s24098_s7 + $0xba4] ss:$8 sps:$4 sm:$0xff]  }
 0x879   : > { %11296 = vmatpush1.bf16.msra.mxu1 %v18995_v39  ;;  %11322 = vmatprep.subr.bf16.mxu0 %v19000_v45  ;;  %v19052_v39 = vld [vmem:[%s24098_s7 + $0xaa0] ss:$8 sps:$4 sm:$0xff]  }
 0x87a   : > { %11297 = vmatprep.subr.bf16.mxu1 %v19003_v37  ;;  %v19055_v45 = vld [vmem:[%s24098_s7 + $0xba0] ss:$8 sps:$4 sm:$0xff]   ;;  %v19060_v37 = vld [vmem:[%s24098_s7 + $0xab4] ss:$8 sps:$4 sm:$0xff]  }
 0x87c   : > { %11323 = vmatpush1.bf16.msra.mxu0 %v18998_v5  ;;  %v19063_v5 = vld [vmem:[%s24098_s7 + $0xbb4] ss:$8 sps:$4 sm:$0xff]  }
 0x87d   : > { %11298 = vmatpush1.bf16.msra.mxu1 %v19001_v41  ;;  %11324 = vmatprep.subr.bf16.mxu0 %v19006_v21  ;;  %v19058_v41 = vld [vmem:[%s24098_s7 + $0xab0] ss:$8 sps:$4 sm:$0xff]  }
 0x87e   : > { %11299 = vmatprep.subr.bf16.mxu1 %v19009_v52  ;;  %v19061_v21 = vld [vmem:[%s24098_s7 + $0xbb0] ss:$8 sps:$4 sm:$0xff]   ;;  %v19066_v52 = vld [vmem:[%s24098_s7 + $0xac4] ss:$8 sps:$4 sm:$0xff]  }
 0x880   : > { %11325 = vmatpush1.bf16.msra.mxu0 %v19004_v54  ;;  %v19064_v54 = vld [vmem:[%s24098_s7 + $0xac0] ss:$8 sps:$4 sm:$0xff]  }
 0x881   : > { %11300 = vmatpush1.bf16.msra.mxu1 %v19007_v9  ;;  %11326 = vmatprep.subr.bf16.mxu0 %v19012_v19  ;;  %v19067_v9 = vld [vmem:[%s24098_s7 + $0xbc0] ss:$8 sps:$4 sm:$0xff]   ;;  %v19072_v19 = vld [vmem:[%s24098_s7 + $0xad4] ss:$8 sps:$4 sm:$0xff]  }
 0x882   : > { %11301 = vmatprep.subr.bf16.mxu1 %v19015_v36  ;;  %v19075_v36 = vld [vmem:[%s24098_s7 + $0xbd4] ss:$8 sps:$4 sm:$0xff]  }
 0x884   : > { %11327 = vmatpush1.bf16.msra.mxu0 %v19010_v23  ;;  %v19070_v23 = vld [vmem:[%s24098_s7 + $0xad0] ss:$8 sps:$4 sm:$0xff]  }
 0x885   : > { %11302 = vmatpush1.bf16.msra.mxu1 %v19013_v30  ;;  %11328 = vmatprep.subr.bf16.mxu0 %v19018_v40  ;;  %v19073_v30 = vld [vmem:[%s24098_s7 + $0xbd0] ss:$8 sps:$4 sm:$0xff]   ;;  %v19078_v40 = vld [vmem:[%s24098_s7 + $0xae4] ss:$8 sps:$4 sm:$0xff]  }
 0x886   : > { %11303 = vmatprep.subr.bf16.mxu1 %v19021_v31 }
 0x888   : > { %11329 = vmatpush1.bf16.msra.mxu0 %v19016_v51 }
 0x889   : > { %11304 = vmatpush1.bf16.msra.mxu1 %v19019_v1  ;;  %11330 = vmatprep.subr.bf16.mxu0 %v19024_v29  ;;  %v11829_v1 = vcombine.low %v22576_v63, %v23508_v57  ;;  %v19084_v63 = vld [vmem:[%s24098_s7 + $0xaf4] ss:$8 sps:$4 sm:$0xff]  }
 0x88a   : > { %v9246_v43 = vpop.f32.mrb[60].mxu0  ;;  %11305 = vmatprep.subr.bf16.mxu1 %v19027_v2 }
 0x88b   : > { %v9247_v56 = vadd.f32 %v9246_v43, %v23324_v53  ;;  %v9248_v0 = vpop.f32.mrb[61].mxu0  ;;  %v19031_v53 = vld [vmem:[%s24098_s7 + $0x9e0] ss:$8 sps:$4 sm:$0xff]  }
 0x88c   : > { %v9249_v55 = vadd.f32 %v9248_v0, %v23329_v42  ;;  %v9250_v8 = vpop.f32.mrb[62].mxu0  ;;  %11331 = vmatpush1.bf16.msra.mxu0 %v19022_v46  ;;  %v19087_v0 = vld [vmem:[%s24098_s7 + $0xbf4] ss:$8 sps:$4 sm:$0xff]  }
 0x88d   : > { %v23554_v49 = vadd.f32 %v23436_v13, %v9247_v56  ;;  %v9251_v33 = vpop.f32.mrb[63].mxu0  ;;  %11306 = vmatpush1.bf16.msra.mxu1 %v19025_v10  ;;  %11332 = vmatprep.subr.bf16.mxu0 %v19030_v17  ;;  %v11027_v13 = vrot.slane %v23341_v44, %v21186_v6  ;;  %v19043_v44 = vld [vmem:[%s24098_s7 + $0xb80] ss:$8 sps:$4 sm:$0xff]   ;;  %v19082_v8 = vld [vmem:[%s24098_s7 + $0xaf0] ss:$8 sps:$4 sm:$0xff]  }
 0x88e   : > { %v23563_v42 = vadd.f32 %v23438_v59, %v9249_v55  ;;  %11307 = vmatprep.subr.bf16.mxu1 %v19033_v22  ;;  %v19042_v59 = vld [vmem:[%s24098_s7 + $0xa84] ss:$8 sps:$4 sm:$0xff]   ;;  %v19079_v22 = vld [vmem:[%s24098_s7 + $0xbe0] ss:$8 sps:$4 sm:$0xff]   ;;  %v23682_v55 = vrot.slane %v11829_v1, %v21186_v6  ;;  %v23695_v33 = vrot.slane %v23569_v60, %v21186_v6 }
 0x88f   : > { %v11035_v58 = vcombine.high %v11027_v13, %v11027_v13  ;;  %v19136_v1 = vld [vmem:[%s24098_s7 + $0xd00] ss:$8 sps:$4 sm:$0xff]  }
 0x890   : > { %11333 = vmatpush1.bf16.msra.mxu0 %v19028_v18  ;;  %v19085_v18 = vld [vmem:[%s24098_s7 + $0xbf0] ss:$8 sps:$4 sm:$0xff]   ;;  %v11452_v60 = vcombine.high %v23695_v33, %v23695_v33 }
 0x891   : > { %11308 = vmatpush1.bf16.msra.mxu1 %v19031_v53  ;;  %11334 = vmatprep.subr.bf16.mxu0 %v19036_v7  ;;  %v19093_v53 = vld [vmem:[%s24098_s7 + $0xc04] ss:$8 sps:$4 sm:$0xff]   ;;  %v11837_v7 = vcombine.high %v23682_v55, %v23682_v55 }
 0x892   : > { %11309 = vmatprep.subr.bf16.mxu1 %v19039_v61  ;;  %v19091_v61 = vld [vmem:[%s24098_s7 + $0xc00] ss:$8 sps:$4 sm:$0xff]  }
 0x894   : > { %11335 = vmatpush1.bf16.msra.mxu0 %v19034_v28  ;;  %v19096_v28 = vld [vmem:[%s24098_s7 + $0xb14] ss:$8 sps:$4 sm:$0xff]  }
 0x895   : > { %11310 = vmatpush1.bf16.msra.mxu1 %v19037_v15  ;;  %11696 = vmatprep.subr.bf16.mxu0 %v19042_v59  ;;  %v19099_v15 = vld [vmem:[%s24098_s7 + $0xc14] ss:$8 sps:$4 sm:$0xff]   ;;  %v19094_v59 = vld [vmem:[%s24098_s7 + $0xb10] ss:$8 sps:$4 sm:$0xff]  }
 0x896   : > { %11737 = vmatprep.subr.bf16.mxu1 %v19045_v32  ;;  %v19097_v32 = vld [vmem:[%s24098_s7 + $0xc10] ss:$8 sps:$4 sm:$0xff]  }
 0x897   : > { %11353 = vmatmul.mubr.bf16.vlgmr.msra.gmra.mrb[80].mxu0 %v11035_v58  ;;  %v19100_v58 = vld [vmem:[%s24098_s7 + $0xb20] ss:$8 sps:$4 sm:$0xff]  }
 0x898   : > { %11312 = vmatmul.mubr.bf16.vlgmr.msra.gmra.mrb[60].mxu1 %v11027_v13  ;;  %11697 = vmatpush1.bf16.msra.mxu0 %v19040_v27  ;;  %v11851_v13 = vrot.slane %v11837_v7, %v21186_v6  ;;  %v19105_v27 = vld [vmem:[%s24098_s7 + $0xc24] ss:$8 sps:$4 sm:$0xff]   ;;  %v19168_v7 = vld [vmem:[%s24098_s7 + $0xd54] ss:$8 sps:$4 sm:$0xff]  }
 0x899   : > { %11728 = vmatprep.mubr.bf16.mxu0 %v11451_v48  ;;  %11738 = vmatpush1.bf16.msra.mxu1 %v19043_v44  ;;  %v19103_v44 = vld [vmem:[%s24098_s7 + $0xc20] ss:$8 sps:$4 sm:$0xff]   ;;  %v19106_v48 = vld [vmem:[%s24098_s7 + $0xb30] ss:$8 sps:$4 sm:$0xff]  }
 0x89a   : > { %11698 = vmatprep.subr.bf16.mxu0 %v19048_v38  ;;  %11739 = vmatprep.subr.bf16.mxu1 %v19051_v26  ;;  %v19108_v38 = vld [vmem:[%s24098_s7 + $0xb34] ss:$8 sps:$4 sm:$0xff]  }
 0x89b   : > { %11769 = vmatprep.mubr.bf16.mxu1 %v19802_v24  ;;  %v19111_v26 = vld [vmem:[%s24098_s7 + $0xc34] ss:$8 sps:$4 sm:$0xff]  }
 0x89c   : > { %11699 = vmatpush1.bf16.msra.mxu0 %v19046_v25  ;;  %v19109_v25 = vld [vmem:[%s24098_s7 + $0xc30] ss:$8 sps:$4 sm:$0xff]  }
 0x89d   : > { %11740 = vmatpush1.bf16.msra.mxu1 %v19049_v50  ;;  %11700 = vmatprep.subr.bf16.mxu0 %v19054_v20  ;;  %v19114_v50 = vld [vmem:[%s24098_s7 + $0xb44] ss:$8 sps:$4 sm:$0xff]  }
 0x89e   : > { %11741 = vmatprep.subr.bf16.mxu1 %v19057_v47  ;;  %v19117_v20 = vld [vmem:[%s24098_s7 + $0xc44] ss:$8 sps:$4 sm:$0xff]   ;;  %v19112_v47 = vld [vmem:[%s24098_s7 + $0xb40] ss:$8 sps:$4 sm:$0xff]  }
 0x8a0   : > { %11701 = vmatpush1.bf16.msra.mxu0 %v19052_v39  ;;  %v19115_v39 = vld [vmem:[%s24098_s7 + $0xc40] ss:$8 sps:$4 sm:$0xff]  }
 0x8a1   : > { %11742 = vmatpush1.bf16.msra.mxu1 %v19055_v45  ;;  %11702 = vmatprep.subr.bf16.mxu0 %v19060_v37  ;;  %v19120_v45 = vld [vmem:[%s24098_s7 + $0xb54] ss:$8 sps:$4 sm:$0xff]  }
 0x8a2   : > { %11743 = vmatprep.subr.bf16.mxu1 %v19063_v5  ;;  %v19123_v37 = vld [vmem:[%s24098_s7 + $0xc54] ss:$8 sps:$4 sm:$0xff]   ;;  %v19118_v5 = vld [vmem:[%s24098_s7 + $0xb50] ss:$8 sps:$4 sm:$0xff]  }
 0x8a4   : > { %11703 = vmatpush1.bf16.msra.mxu0 %v19058_v41  ;;  %v19121_v41 = vld [vmem:[%s24098_s7 + $0xc50] ss:$8 sps:$4 sm:$0xff]  }
 0x8a5   : > { %11744 = vmatpush1.bf16.msra.mxu1 %v19061_v21  ;;  %11704 = vmatprep.subr.bf16.mxu0 %v19066_v52  ;;  %v19126_v21 = vld [vmem:[%s24098_s7 + $0xb64] ss:$8 sps:$4 sm:$0xff]  }
 0x8a6   : > { %11745 = vmatprep.subr.bf16.mxu1 %v19069_v4  ;;  %v19129_v52 = vld [vmem:[%s24098_s7 + $0xc64] ss:$8 sps:$4 sm:$0xff]  }
 0x8a8   : > { %11705 = vmatpush1.bf16.msra.mxu0 %v19064_v54 }
 0x8a9   : > { %11746 = vmatpush1.bf16.msra.mxu1 %v19067_v9  ;;  %11706 = vmatprep.subr.bf16.mxu0 %v19072_v19  ;;  %v19124_v9 = vld [vmem:[%s24098_s7 + $0xb60] ss:$8 sps:$4 sm:$0xff]  }
 0x8aa   : > { %v9685_v31 = vpop.f32.mrb[64].mxu0  ;;  %11747 = vmatprep.subr.bf16.mxu1 %v19075_v36  ;;  %v19127_v36 = vld [vmem:[%s24098_s7 + $0xc60] ss:$8 sps:$4 sm:$0xff]  }
 0x8ab   : > { %v9644_v51 = vpop.f32.mrb[44].mxu1  ;;  %v9687_v12 = vpop.f32.mrb[65].mxu0 }
 0x8ac   : > { %v9686_v29 = vadd.f32 %v9685_v31, %v9644_v51  ;;  %v9646_v2 = vpop.f32.mrb[45].mxu1  ;;  %v9689_v46 = vpop.f32.mrb[66].mxu0  ;;  %11707 = vmatpush1.bf16.msra.mxu0 %v19070_v23  ;;  %v19132_v23 = vld [vmem:[%s24098_s7 + $0xb74] ss:$8 sps:$4 sm:$0xff]   ;;  %v19130_v31 = vld [vmem:[%s24098_s7 + $0xb70] ss:$8 sps:$4 sm:$0xff]  }
 0x8ad   : > { %v9688_v10 = vadd.f32 %v9687_v12, %v9646_v2  ;;  %v9648_v17 = vpop.f32.mrb[46].mxu1  ;;  %v9690_v43 = vpop.f32.mrb[67].mxu0  ;;  %11748 = vmatpush1.bf16.msra.mxu1 %v19073_v30  ;;  %11708 = vmatprep.subr.bf16.mxu0 %v19078_v40  ;;  %v19135_v40 = vld [vmem:[%s24098_s7 + $0xc74] ss:$8 sps:$4 sm:$0xff]   ;;  %v19138_v51 = vld [vmem:[%s24098_s7 + $0xd04] ss:$8 sps:$4 sm:$0xff]  }
 0x8ae   : > { %v23673_v57 = vadd.f32 %v9686_v29, %v23554_v49  ;;  %v9649_v56 = vpop.f32.mrb[47].mxu1  ;;  %11749 = vmatprep.subr.bf16.mxu1 %v19081_v14  ;;  %v19090_v49 = vld [vmem:[%s24098_s7 + $0xb04] ss:$8 sps:$4 sm:$0xff]   ;;  %v19133_v14 = vld [vmem:[%s24098_s7 + $0xc70] ss:$8 sps:$4 sm:$0xff]  }
 0x8af   : > { %v23679_v35 = vadd.f32 %v9688_v10, %v23563_v42  ;;  %v19088_v42 = vld [vmem:[%s24098_s7 + $0xb00] ss:$8 sps:$4 sm:$0xff]   ;;  %v19141_v12 = vld [vmem:[%s24098_s7 + $0xc84] ss:$8 sps:$4 sm:$0xff]   ;;  %v19144_v2 = vld [vmem:[%s24098_s7 + $0xd14] ss:$8 sps:$4 sm:$0xff]  }
 0x8b0   : > { %11709 = vmatpush1.bf16.msra.mxu0 %v19076_v16  ;;  %v19139_v29 = vld [vmem:[%s24098_s7 + $0xc80] ss:$8 sps:$4 sm:$0xff]   ;;  %v19147_v46 = vld [vmem:[%s24098_s7 + $0xc94] ss:$8 sps:$4 sm:$0xff]   ;;  %v19142_v16 = vld [vmem:[%s24098_s7 + $0xd10] ss:$8 sps:$4 sm:$0xff]  }
 0x8b1   : > { %11750 = vmatpush1.bf16.msra.mxu1 %v19079_v22  ;;  %11710 = vmatprep.subr.bf16.mxu0 %v19084_v63  ;;  %v19145_v10 = vld [vmem:[%s24098_s7 + $0xc90] ss:$8 sps:$4 sm:$0xff]   ;;  %v19150_v17 = vld [vmem:[%s24098_s7 + $0xd24] ss:$8 sps:$4 sm:$0xff]   ;;  %v19151_v22 = vld [vmem:[%s24098_s7 + $0xca0] ss:$8 sps:$4 sm:$0xff]  }
 0x8b2   : > { %11751 = vmatprep.subr.bf16.mxu1 %v19087_v0  ;;  %v19153_v43 = vld [vmem:[%s24098_s7 + $0xca4] ss:$8 sps:$4 sm:$0xff]   ;;  %v19156_v63 = vld [vmem:[%s24098_s7 + $0xd34] ss:$8 sps:$4 sm:$0xff]   ;;  %v19154_v0 = vld [vmem:[%s24098_s7 + $0xd30] ss:$8 sps:$4 sm:$0xff]  }
 0x8b3   : > { %v19159_v56 = vld [vmem:[%s24098_s7 + $0xcb4] ss:$8 sps:$4 sm:$0xff]  }
 0x8b4   : > { %11711 = vmatpush1.bf16.msra.mxu0 %v19082_v8  ;;  %v19157_v8 = vld [vmem:[%s24098_s7 + $0xcb0] ss:$8 sps:$4 sm:$0xff]  }
 0x8b5   : > { %11752 = vmatpush1.bf16.msra.mxu1 %v19085_v18  ;;  %11712 = vmatprep.subr.bf16.mxu0 %v19090_v49  ;;  %v19162_v18 = vld [vmem:[%s24098_s7 + $0xd44] ss:$8 sps:$4 sm:$0xff]  }
 0x8b6   : > { %12096 = vmatprep.subr.bf16.mxu1 %v19093_v53  ;;  %v19165_v49 = vld [vmem:[%s24098_s7 + $0xcc4] ss:$8 sps:$4 sm:$0xff]   ;;  %v19163_v53 = vld [vmem:[%s24098_s7 + $0xcc0] ss:$8 sps:$4 sm:$0xff]  }
 0x8b8   : > { %11713 = vmatpush1.bf16.msra.mxu0 %v19088_v42  ;;  %11770 = vmatmul.mubr.bf16.vlgmr.msra.gmra.mrb[64].mxu1 %v11452_v60  ;;  %v19171_v42 = vld [vmem:[%s24098_s7 + $0xcd4] ss:$8 sps:$4 sm:$0xff]   ;;  %v19169_v60 = vld [vmem:[%s24098_s7 + $0xcd0] ss:$8 sps:$4 sm:$0xff]  }
 0x8b9   : > { %12097 = vmatpush1.bf16.msra.mxu1 %v19091_v61  ;;  %12128 = vmatprep.mubr.bf16.mxu1 %v11851_v13  ;;  %v19166_v61 = vld [vmem:[%s24098_s7 + $0xd50] ss:$8 sps:$4 sm:$0xff]   ;;  %v19177_v13 = vld [vmem:[%s24098_s7 + $0xce4] ss:$8 sps:$4 sm:$0xff]  }
 0x8ba   : > { %11714 = vmatprep.subr.bf16.mxu0 %v19096_v28  ;;  %12098 = vmatprep.subr.bf16.mxu1 %v19099_v15  ;;  %v19174_v28 = vld [vmem:[%s24098_s7 + $0xd64] ss:$8 sps:$4 sm:$0xff]  }
 0x8bc   : > { %11715 = vmatpush1.bf16.msra.mxu0 %v19094_v59 }
 0x8bd   : > { %12099 = vmatpush1.bf16.msra.mxu1 %v19097_v32  ;;  %11716 = vmatprep.subr.bf16.mxu0 %v19102_v3 }
 0x8be   : > { %12100 = vmatprep.subr.bf16.mxu1 %v19105_v27 }
 0x8c0   : > { %11717 = vmatpush1.bf16.msra.mxu0 %v19100_v58  ;;  %v19172_v58 = vld [vmem:[%s24098_s7 + $0xd60] ss:$8 sps:$4 sm:$0xff]  }
 0x8c1   : > { %12101 = vmatpush1.bf16.msra.mxu1 %v19103_v44  ;;  %11718 = vmatprep.subr.bf16.mxu0 %v19108_v38 }
 0x8c2   : > { %12102 = vmatprep.subr.bf16.mxu1 %v19111_v26  ;;  %v19175_v26 = vld [vmem:[%s24098_s7 + $0xce0] ss:$8 sps:$4 sm:$0xff]  }
 0x8c4   : > { %11719 = vmatpush1.bf16.msra.mxu0 %v19106_v48  ;;  %v19180_v48 = vld [vmem:[%s24098_s7 + $0xd74] ss:$8 sps:$4 sm:$0xff]  }
 0x8c5   : > { %12103 = vmatpush1.bf16.msra.mxu1 %v19109_v25  ;;  %11720 = vmatprep.subr.bf16.mxu0 %v19114_v50  ;;  %v19183_v50 = vld [vmem:[%s24098_s7 + $0xcf4] ss:$8 sps:$4 sm:$0xff]  }
 0x8c6   : > { %12104 = vmatprep.subr.bf16.mxu1 %v19117_v20  ;;  %v19181_v20 = vld [vmem:[%s24098_s7 + $0xcf0] ss:$8 sps:$4 sm:$0xff]  }
 0x8c8   : > { %11721 = vmatpush1.bf16.msra.mxu0 %v19112_v47  ;;  %v11844_v47 = vrot.slane %v23682_v55, %v21186_v6 }
 0x8c9   : > { %12105 = vmatpush1.bf16.msra.mxu1 %v19115_v39  ;;  %11722 = vmatprep.subr.bf16.mxu0 %v19120_v45 }
 0x8ca   : > { %12106 = vmatprep.subr.bf16.mxu1 %v19123_v37 }
 0x8cb   : > { %v23777_v4 = vpop.f32.mrb[48].mxu1 }
 0x8cc   : > { %v23779_v54 = vpop.f32.mrb[49].mxu1  ;;  %11723 = vmatpush1.bf16.msra.mxu0 %v19118_v5 }
 0x8cd   : > { %v10115_v19 = vpop.f32.mrb[50].mxu1  ;;  %12107 = vmatpush1.bf16.msra.mxu1 %v19121_v41  ;;  %11724 = vmatprep.subr.bf16.mxu0 %v19126_v21 }
 0x8ce   : > { %v10116_v30 = vpop.f32.mrb[51].mxu1  ;;  %12108 = vmatprep.subr.bf16.mxu1 %v19129_v52 }
 0x8d0   : > { %11725 = vmatpush1.bf16.msra.mxu0 %v19124_v9 }
 0x8d1   : > { %12109 = vmatpush1.bf16.msra.mxu1 %v19127_v36  ;;  %11726 = vmatprep.subr.bf16.mxu0 %v19132_v23 }
 0x8d2   : > { %12110 = vmatprep.subr.bf16.mxu1 %v19135_v40 }
 0x8d4   : > { %11727 = vmatpush1.bf16.msra.mxu0 %v19130_v31  ;;  %v19184_v31 = vld [vmem:[#allocation9] ss:$8 sps:$4 sm:$0xff]  }
 0x8d5   : > { %12111 = vmatpush1.bf16.msra.mxu1 %v19133_v14  ;;  %12137 = vmatprep.subr.bf16.mxu0 %v19138_v51  ;;  %v19186_v14 = vld [vmem:[#allocation9 + $0x4] ss:$8 sps:$4 sm:$0xff]   ;;  %v19189_v51 = vld [vmem:[#allocation9 + $0x14] ss:$8 sps:$4 sm:$0xff]  }
 0x8d6   : > { %12112 = vmatprep.subr.bf16.mxu1 %v19141_v12  ;;  %v19190_v12 = vld [vmem:[#allocation9 + $0x100] ss:$8 sps:$4 sm:$0xff]  }
 0x8d7   : > { %11729 = vmatmul.mubr.bf16.vlgmr.msra.gmra.mrb[84].mxu0 %v23695_v33  ;;  %v19160_v33 = vld [vmem:[%s24098_s7 + $0xd40] ss:$8 sps:$4 sm:$0xff]  }
 0x8d8   : > { %12138 = vmatpush1.bf16.msra.mxu0 %v19136_v1  ;;  %12169 = vmatprep.mubr.bf16.mxu0 %v19802_v24  ;;  %v19148_v24 = vld [vmem:[%s24098_s7 + $0xd20] ss:$8 sps:$4 sm:$0xff]   ;;  %v19192_v1 = vld [vmem:[#allocation9 + $0x104] ss:$8 sps:$4 sm:$0xff]  }
 0x8d9   : > { %12113 = vmatpush1.bf16.msra.mxu1 %v19139_v29  ;;  %12139 = vmatprep.subr.bf16.mxu0 %v19144_v2  ;;  %v19187_v29 = vld [vmem:[#allocation9 + $0x10] ss:$8 sps:$4 sm:$0xff]   ;;  %v19198_v2 = vld [vmem:[#allocation9 + $0x114] ss:$8 sps:$4 sm:$0xff]  }
 0x8da   : > { %12114 = vmatprep.subr.bf16.mxu1 %v19147_v46  ;;  %v19195_v46 = vld [vmem:[#allocation9 + $0x24] ss:$8 sps:$4 sm:$0xff]  }
 0x8dc   : > { %12140 = vmatpush1.bf16.msra.mxu0 %v19142_v16  ;;  %v19196_v16 = vld [vmem:[#allocation9 + $0x110] ss:$8 sps:$4 sm:$0xff]  }
 0x8dd   : > { %12115 = vmatpush1.bf16.msra.mxu1 %v19145_v10  ;;  %12141 = vmatprep.subr.bf16.mxu0 %v19150_v17  ;;  %v19204_v10 = vld [vmem:[#allocation9 + $0x124] ss:$8 sps:$4 sm:$0xff]   ;;  %v19193_v17 = vld [vmem:[#allocation9 + $0x20] ss:$8 sps:$4 sm:$0xff]  }
 0x8de   : > { %12116 = vmatprep.subr.bf16.mxu1 %v19153_v43  ;;  %v19201_v43 = vld [vmem:[#allocation9 + $0x34] ss:$8 sps:$4 sm:$0xff]  }
 0x8e0   : > { %12142 = vmatpush1.bf16.msra.mxu0 %v19148_v24  ;;  %v19202_v24 = vld [vmem:[#allocation9 + $0x120] ss:$8 sps:$4 sm:$0xff]  }
 0x8e1   : > { %12117 = vmatpush1.bf16.msra.mxu1 %v19151_v22  ;;  %12143 = vmatprep.subr.bf16.mxu0 %v19156_v63  ;;  %v19210_v22 = vld [vmem:[#allocation9 + $0x134] ss:$8 sps:$4 sm:$0xff]   ;;  %v19199_v63 = vld [vmem:[#allocation9 + $0x30] ss:$8 sps:$4 sm:$0xff]  }
 0x8e2   : > { %12118 = vmatprep.subr.bf16.mxu1 %v19159_v56  ;;  %v19207_v56 = vld [vmem:[#allocation9 + $0x44] ss:$8 sps:$4 sm:$0xff]  }
 0x8e4   : > { %12144 = vmatpush1.bf16.msra.mxu0 %v19154_v0  ;;  %v19208_v0 = vld [vmem:[#allocation9 + $0x130] ss:$8 sps:$4 sm:$0xff]  }
 0x8e5   : > { %12119 = vmatpush1.bf16.msra.mxu1 %v19157_v8  ;;  %12145 = vmatprep.subr.bf16.mxu0 %v19162_v18  ;;  %v19216_v8 = vld [vmem:[#allocation9 + $0x144] ss:$8 sps:$4 sm:$0xff]   ;;  %v19205_v18 = vld [vmem:[#allocation9 + $0x40] ss:$8 sps:$4 sm:$0xff]  }
 0x8e6   : > { %12120 = vmatprep.subr.bf16.mxu1 %v19165_v49  ;;  %v19213_v49 = vld [vmem:[#allocation9 + $0x54] ss:$8 sps:$4 sm:$0xff]  }
 0x8e8   : > { %12146 = vmatpush1.bf16.msra.mxu0 %v19160_v33  ;;  %v19214_v33 = vld [vmem:[#allocation9 + $0x140] ss:$8 sps:$4 sm:$0xff]  }
 0x8e9   : > { %12121 = vmatpush1.bf16.msra.mxu1 %v19163_v53  ;;  %12147 = vmatprep.subr.bf16.mxu0 %v19168_v7  ;;  %v19211_v53 = vld [vmem:[#allocation9 + $0x50] ss:$8 sps:$4 sm:$0xff]   ;;  %v19219_v7 = vld [vmem:[#allocation9 + $0x64] ss:$8 sps:$4 sm:$0xff]  }
 0x8ea   : > { %v10070_v15 = vpop.f32.mrb[68].mxu0  ;;  %12122 = vmatprep.subr.bf16.mxu1 %v19171_v42  ;;  %v19217_v42 = vld [vmem:[#allocation9 + $0x60] ss:$8 sps:$4 sm:$0xff]  }
 0x8eb   : > { %v10112_v59 = vadd.f32 %v23777_v4, %v10070_v15  ;;  %v10072_v32 = vpop.f32.mrb[69].mxu0 }
 0x8ec   : > { %v10114_v3 = vadd.f32 %v23779_v54, %v10072_v32  ;;  %v10074_v27 = vpop.f32.mrb[70].mxu0  ;;  %12148 = vmatpush1.bf16.msra.mxu0 %v19166_v61 }
 0x8ed   : > { %v10118_v44 = vadd.f32 %v10112_v59, %v23673_v57  ;;  %v10075_v38 = vpop.f32.mrb[71].mxu0  ;;  %12123 = vmatpush1.bf16.msra.mxu1 %v19169_v60  ;;  %12149 = vmatprep.subr.bf16.mxu0 %v19174_v28  ;;  %v19178_v57 = vld [vmem:[%s24098_s7 + $0xd70] ss:$8 sps:$4 sm:$0xff]   ;;  %v19220_v60 = vld [vmem:[#allocation9 + $0x150] ss:$8 sps:$4 sm:$0xff]  }
 0x8ee   : > { %v10119_v25 = vadd.f32 %v10114_v3, %v23679_v35  ;;  %12124 = vmatprep.subr.bf16.mxu1 %v19177_v13  ;;  %v11852_v35 = vcombine.high %v11844_v47, %v11844_v47  ;;  %v19222_v28 = vld [vmem:[#allocation9 + $0x154] ss:$8 sps:$4 sm:$0xff]  }
 0x8ef   : > { %v19225_v38 = vld [vmem:[#allocation9 + $0x74] ss:$8 sps:$4 sm:$0xff]  }
 0x8f0   : > { %12150 = vmatpush1.bf16.msra.mxu0 %v19172_v58 }
 0x8f1   : > { %12125 = vmatpush1.bf16.msra.mxu1 %v19175_v26  ;;  %12151 = vmatprep.subr.bf16.mxu0 %v19180_v48  ;;  %v19226_v26 = vld [vmem:[#allocation9 + $0x160] ss:$8 sps:$4 sm:$0xff]   ;;  %v19228_v48 = vld [vmem:[#allocation9 + $0x164] ss:$8 sps:$4 sm:$0xff]  }
 0x8f2   : > { %12126 = vmatprep.subr.bf16.mxu1 %v19183_v50  ;;  %v19234_v50 = vld [vmem:[#allocation9 + $0x174] ss:$8 sps:$4 sm:$0xff]  }
 0x8f4   : > { %12152 = vmatpush1.bf16.msra.mxu0 %v19178_v57  ;;  %v19229_v57 = vld [vmem:[#allocation9 + $0x80] ss:$8 sps:$4 sm:$0xff]  }
 0x8f5   : > { %12127 = vmatpush1.bf16.msra.mxu1 %v19181_v20  ;;  %12554 = vmatprep.subr.bf16.mxu0 %v19192_v1  ;;  %v19232_v20 = vld [vmem:[#allocation9 + $0x170] ss:$8 sps:$4 sm:$0xff]  }
 0x8f6   : > { %12780 = vmatprep.subr.bf16.mxu1 %v19186_v14 }
 0x8f7   : > { %12170 = vmatmul.mubr.bf16.vlgmr.msra.gmra.mrb[88].mxu0 %v11852_v35  ;;  %v19240_v35 = vld [vmem:[#allocation9 + $0x184] ss:$8 sps:$4 sm:$0xff]  }
 0x8f8   : > { %12129 = vmatmul.mubr.bf16.vlgmr.msra.gmra.mrb[68].mxu1 %v11844_v47  ;;  %12555 = vmatpush1.bf16.msra.mxu0 %v19190_v12  ;;  %v19237_v47 = vld [vmem:[#allocation9 + $0x94] ss:$8 sps:$4 sm:$0xff]  }
 0x8f9   : > { %12781 = vmatpush1.bf16.msra.mxu1 %v19184_v31  ;;  %12556 = vmatprep.subr.bf16.mxu0 %v19198_v2  ;;  %v19256_v2 = vld [vmem:[#allocation9 + $0x1b0] ss:$8 sps:$4 sm:$0xff]  }
 0x8fa   : > { %12782 = vmatprep.subr.bf16.mxu1 %v19189_v51  ;;  %v19253_v51 = vld [vmem:[#allocation9 + $0xc0] ss:$8 sps:$4 sm:$0xff]  }
 0x8fc   : > { %12557 = vmatpush1.bf16.msra.mxu0 %v19196_v16 }
 0x8fd   : > { %12783 = vmatpush1.bf16.msra.mxu1 %v19187_v29  ;;  %12558 = vmatprep.subr.bf16.mxu0 %v19204_v10 }
 0x8fe   : > { %12784 = vmatprep.subr.bf16.mxu1 %v19195_v46  ;;  %v19261_v46 = vld [vmem:[#allocation9 + $0xd4] ss:$8 sps:$4 sm:$0xff]  }
 0x900   : > { %12559 = vmatpush1.bf16.msra.mxu0 %v19202_v24  ;;  %v19259_v24 = vld [vmem:[#allocation9 + $0xd0] ss:$8 sps:$4 sm:$0xff]  }
 0x901   : > { %12785 = vmatpush1.bf16.msra.mxu1 %v19193_v17  ;;  %12560 = vmatprep.subr.bf16.mxu0 %v19210_v22  ;;  %v19264_v17 = vld [vmem:[#allocation9 + $0x1c4] ss:$8 sps:$4 sm:$0xff]   ;;  %v19262_v22 = vld [vmem:[#allocation9 + $0x1c0] ss:$8 sps:$4 sm:$0xff]  }
 0x902   : > { %12786 = vmatprep.subr.bf16.mxu1 %v19201_v43 }
 0x904   : > { %12561 = vmatpush1.bf16.msra.mxu0 %v19208_v0  ;;  %v19265_v0 = vld [vmem:[#allocation9 + $0xe0] ss:$8 sps:$4 sm:$0xff]  }
 0x905   : > { %12787 = vmatpush1.bf16.msra.mxu1 %v19199_v63  ;;  %12562 = vmatprep.subr.bf16.mxu0 %v19216_v8  ;;  %v19267_v63 = vld [vmem:[#allocation9 + $0xe4] ss:$8 sps:$4 sm:$0xff]   ;;  %v19268_v8 = vld [vmem:[#allocation9 + $0x1d0] ss:$8 sps:$4 sm:$0xff]  }
 0x906   : > { %12788 = vmatprep.subr.bf16.mxu1 %v19207_v56  ;;  %v19270_v56 = vld [vmem:[#allocation9 + $0x1d4] ss:$8 sps:$4 sm:$0xff]  }
 0x908   : > { %12563 = vmatpush1.bf16.msra.mxu0 %v19214_v33  ;;  %v19271_v33 = vld [vmem:[#allocation9 + $0xf0] ss:$8 sps:$4 sm:$0xff]  }
 0x909   : > { %12789 = vmatpush1.bf16.msra.mxu1 %v19205_v18  ;;  %12564 = vmatprep.subr.bf16.mxu0 %v19222_v28  ;;  %v19273_v18 = vld [vmem:[#allocation9 + $0xf4] ss:$8 sps:$4 sm:$0xff]  }
 0x90a   : > { %v10528_v39 = vpop.f32.mrb[72].mxu0  ;;  %12790 = vmatprep.subr.bf16.mxu1 %v19213_v49  ;;  %v19276_v49 = vld [vmem:[#allocation9 + $0x1e4] ss:$8 sps:$4 sm:$0xff]  }
 0x90b   : > { %v10487_v45 = vpop.f32.mrb[52].mxu1  ;;  %v10530_v37 = vpop.f32.mrb[73].mxu0 }
 0x90c   : > { %v10529_v5 = vadd.f32 %v10528_v39, %v10487_v45  ;;  %v10489_v41 = vpop.f32.mrb[53].mxu1  ;;  %v10532_v21 = vpop.f32.mrb[74].mxu0  ;;  %12565 = vmatpush1.bf16.msra.mxu0 %v19220_v60  ;;  %v19235_v39 = vld [vmem:[#allocation9 + $0x90] ss:$8 sps:$4 sm:$0xff]   ;;  %v19238_v45 = vld [vmem:[#allocation9 + $0x180] ss:$8 sps:$4 sm:$0xff]  }
 0x90d   : > { %v10531_v52 = vadd.f32 %v10530_v37, %v10489_v41  ;;  %v10491_v4 = vpop.f32.mrb[54].mxu1  ;;  %v10533_v54 = vpop.f32.mrb[75].mxu0  ;;  %12791 = vmatpush1.bf16.msra.mxu1 %v19211_v53  ;;  %12566 = vmatprep.subr.bf16.mxu0 %v19228_v48  ;;  %v19243_v37 = vld [vmem:[#allocation9 + $0xa4] ss:$8 sps:$4 sm:$0xff]   ;;  %v19241_v41 = vld [vmem:[#allocation9 + $0xa0] ss:$8 sps:$4 sm:$0xff]  }
 0x90e   : > { %v23903_v9 = vadd.f32 %v10529_v5, %v10118_v44  ;;  %v10492_v19 = vpop.f32.mrb[55].mxu1  ;;  %12792 = vmatprep.subr.bf16.mxu1 %v19219_v7  ;;  %v19223_v44 = vld [vmem:[#allocation9 + $0x70] ss:$8 sps:$4 sm:$0xff]   ;;  %v19246_v5 = vld [vmem:[#allocation9 + $0x194] ss:$8 sps:$4 sm:$0xff]  }
 0x90f   : > { %v23905_v36 = vadd.f32 %v10531_v52, %v10119_v25  ;;  %v19231_v25 = vld [vmem:[#allocation9 + $0x84] ss:$8 sps:$4 sm:$0xff]   ;;  %v19244_v21 = vld [vmem:[#allocation9 + $0x190] ss:$8 sps:$4 sm:$0xff]   ;;  %v19249_v52 = vld [vmem:[#allocation9 + $0xb4] ss:$8 sps:$4 sm:$0xff]  }
 0x910   : > { %12567 = vmatpush1.bf16.msra.mxu0 %v19226_v26  ;;  %v19252_v4 = vld [vmem:[#allocation9 + $0x1a4] ss:$8 sps:$4 sm:$0xff]   ;;  %v19247_v54 = vld [vmem:[#allocation9 + $0xb0] ss:$8 sps:$4 sm:$0xff]   ;;  %v19274_v53 = vld [vmem:[#allocation9 + $0x1e0] ss:$8 sps:$4 sm:$0xff]  }
 0x911   : > { %12793 = vmatpush1.bf16.msra.mxu1 %v19217_v42  ;;  %12568 = vmatprep.subr.bf16.mxu0 %v19234_v50  ;;  %v19255_v19 = vld [vmem:[#allocation9 + $0xc4] ss:$8 sps:$4 sm:$0xff]   ;;  %v19283_v42 = vld [vmem:[#allocation9 + $0x1f4] ss:$8 sps:$4 sm:$0xff]  }
 0x912   : > { %12794 = vmatprep.subr.bf16.mxu1 %v19225_v38  ;;  %v19280_v7 = vld [vmem:[#allocation9 + $0x304] ss:$8 sps:$4 sm:$0xff]  }
 0x913   : > { %v19290_v60 = vld [vmem:[#allocation9 + $0x204] ss:$8 sps:$4 sm:$0xff]  }
 0x914   : > { %12569 = vmatpush1.bf16.msra.mxu0 %v19232_v20 }
 0x915   : > { %12795 = vmatpush1.bf16.msra.mxu1 %v19223_v44  ;;  %12570 = vmatprep.subr.bf16.mxu0 %v19240_v35 }
 0x916   : > { %12796 = vmatprep.subr.bf16.mxu1 %v19231_v25  ;;  %v12180_v25 = vld [vmem:[%s24099_s8] sm:$0x3] }
 0x917   : > { %v12185_v35 = vrot.slane %v12180_v25, %v21175_v34 }
 0x918   : > { %12571 = vmatpush1.bf16.msra.mxu0 %v19238_v45 }
 0x919   : > { %12797 = vmatpush1.bf16.msra.mxu1 %v19229_v57  ;;  %12572 = vmatprep.subr.bf16.mxu0 %v19246_v5  ;;  %v12189_v5 = vrot.slane %v12180_v25, %v21181_v11 }
 0x91a   : > { %12798 = vmatprep.subr.bf16.mxu1 %v19237_v47 }
 0x91c   : > { %12573 = vmatpush1.bf16.msra.mxu0 %v19244_v21 }
 0x91d   : > { %12799 = vmatpush1.bf16.msra.mxu1 %v19235_v39  ;;  %12574 = vmatprep.subr.bf16.mxu0 %v19252_v4 }
 0x91e   : > { %12800 = vmatprep.subr.bf16.mxu1 %v19243_v37 }
 0x921   : > { %12801 = vmatpush1.bf16.msra.mxu1 %v19241_v41 }
 0x922   : > { %12802 = vmatprep.subr.bf16.mxu1 %v19249_v52 }
 0x925   : > { %12803 = vmatpush1.bf16.msra.mxu1 %v19247_v54 }
 0x926   : > { %12804 = vmatprep.subr.bf16.mxu1 %v19255_v19 }
 0x929   : > { %12805 = vmatpush1.bf16.msra.mxu1 %v19253_v51 }
 0x92a   : > { %12806 = vmatprep.subr.bf16.mxu1 %v19261_v46 }
 0x92b   : > { %v10928_v55 = vpop.f32.mrb[56].mxu1 }
 0x92c   : > { %v10930_v23 = vpop.f32.mrb[57].mxu1 }
 0x92d   : > { %v10932_v30 = vpop.f32.mrb[58].mxu1  ;;  %12807 = vmatpush1.bf16.msra.mxu1 %v19259_v24 }
 0x92e   : > { %v10933_v40 = vpop.f32.mrb[59].mxu1  ;;  %12808 = vmatprep.subr.bf16.mxu1 %v19267_v63 }
 0x931   : > { %12809 = vmatpush1.bf16.msra.mxu1 %v19265_v0 }
 0x932   : > { %12810 = vmatprep.subr.bf16.mxu1 %v19273_v18 }
 0x935   : > { %12811 = vmatpush1.bf16.msra.mxu1 %v19271_v33 }
 0x936   : > { %13317 = vmatprep.subr.bf16.mxu1 %v19280_v7 }
 0x94a   : > { %v10887_v61 = vpop.f32.mrb[76].mxu0 }
 0x94b   : > { %v10929_v15 = vadd.f32 %v10928_v55, %v10887_v61  ;;  %v10889_v13 = vpop.f32.mrb[77].mxu0  ;;  %v19258_v55 = vld [vmem:[#allocation9 + $0x1b4] ss:$8 sps:$4 sm:$0xff]   ;;  %v19281_v61 = vld [vmem:[#allocation9 + $0x1f0] ss:$8 sps:$4 sm:$0xff]  }
 0x94c   : > { %v10931_v59 = vadd.f32 %v10930_v23, %v10889_v13  ;;  %v10891_v32 = vpop.f32.mrb[78].mxu0 }
 0x94d   : > { %v10935_v3 = vadd.f32 %v10929_v15, %v23903_v9  ;;  %v10892_v27 = vpop.f32.mrb[79].mxu0  ;;  %v19250_v9 = vld [vmem:[#allocation9 + $0x1a0] ss:$8 sps:$4 sm:$0xff]  }
 0x94e   : > { %v10936_v58 = vadd.f32 %v10931_v59, %v23905_v36  ;;  %12575 = vmatpush1.bf16.msra.mxu0 %v19250_v9 }
 0x94f   : > { %12576 = vmatprep.subr.bf16.mxu0 %v19258_v55  ;;  %v19637_v55 = vld [vmem:[#allocation4] sm:$0xff] }
 0x952   : > { %12577 = vmatpush1.bf16.msra.mxu0 %v19256_v2 }
 0x953   : > { %12578 = vmatprep.subr.bf16.mxu0 %v19264_v17 }
 0x956   : > { %12579 = vmatpush1.bf16.msra.mxu0 %v19262_v22 }
 0x957   : > { %12580 = vmatprep.subr.bf16.mxu0 %v19270_v56 }
 0x95a   : > { %12581 = vmatpush1.bf16.msra.mxu0 %v19268_v8 }
 0x95b   : > { %12582 = vmatprep.subr.bf16.mxu0 %v19276_v49 }
 0x95e   : > { %12583 = vmatpush1.bf16.msra.mxu0 %v19274_v53 }
 0x95f   : > { %12584 = vmatprep.subr.bf16.mxu0 %v19283_v42 }
 0x962   : > { %12585 = vmatpush1.bf16.msra.mxu0 %v19281_v61 }
 0x963   : > { %13039 = vmatprep.subr.bf16.mxu0 %v19290_v60 }
 0x96a   : > { %v11354_v36 = vpop.f32.mrb[80].mxu0 }
 0x96b   : > { %v11313_v23 = vpop.f32.mrb[60].mxu1  ;;  %v11356_v30 = vpop.f32.mrb[81].mxu0 }
 0x96c   : > { %v11355_v40 = vadd.f32 %v11354_v36, %v11313_v23  ;;  %v11315_v31 = vpop.f32.mrb[61].mxu1  ;;  %v11358_v14 = vpop.f32.mrb[82].mxu0  ;;  %v12220_v23 = vcombine.high %v19637_v55, %v19637_v55 }
 0x96d   : > { %v11357_v12 = vadd.f32 %v11356_v30, %v11315_v31  ;;  %v11317_v1 = vpop.f32.mrb[62].mxu1  ;;  %v11359_v29 = vpop.f32.mrb[83].mxu0 }
 0x96e   : > { %v11361_v16 = vadd.f32 %v11355_v40, %v10935_v3  ;;  %v11318_v10 = vpop.f32.mrb[63].mxu1  ;;  %v16997_v31 = vpack.c.bf16 %v12220_v23, %v19637_v55  ;;  %v19294_v55 = vld [vmem:[#allocation9 + $0x210] ss:$8 sps:$4 sm:$0xff]   ;;  %v19299_v23 = vld [vmem:[#allocation9 + $0x334] ss:$8 sps:$4 sm:$0xff]  }
 0x96f   : > { %v11362_v43 = vadd.f32 %v11357_v12, %v10936_v58 }
 0x970   : > { %v12247_v12 = vrot.slane %v16997_v31, %v21186_v6  ;;  %v19300_v31 = vld [vmem:[#allocation9 + $0x220] ss:$8 sps:$4 sm:$0xff]  }
 0x972   : > { %v12302_v1 = vcombine.high %v12247_v12, %v12247_v12  ;;  %v23919_v24 = vrot.slane %v12247_v12, %v21186_v6  ;;  %v19303_v12 = vld [vmem:[#allocation9 + $0x340] ss:$8 sps:$4 sm:$0xff]  }
 0x974   : > { %v23916_v10 = vrot.slane %v12302_v1, %v21186_v6  ;;  %v12319_v56 = vshrl.u32 %v23919_v24, 16  ;;  %v19306_v1 = vld [vmem:[#allocation9 + $0x230] ss:$8 sps:$4 sm:$0xff]  }
 0x976   : > { %v12324_v0 = vshll.u32 %v23916_v10, 16 }
 0x978   : > { %v23936_v61 = vsel %vm21205_vm14, %v12319_v56, %v12324_v0  ;;  %v19323_v56 = vld [vmem:[#allocation9 + $0x374] ss:$8 sps:$4 sm:$0xff]   ;;  %v19326_v0 = vld [vmem:[#allocation9 + $0x264] ss:$8 sps:$4 sm:$0xff]  }
 0x98b   : > { %v11771_v28 = vpop.f32.mrb[64].mxu1 }
 0x98c   : > { %v11773_v15 = vpop.f32.mrb[65].mxu1 }
 0x98d   : > { %v11775_v13 = vpop.f32.mrb[66].mxu1 }
 0x98e   : > { %v11776_v59 = vpop.f32.mrb[67].mxu1 }
 0x9aa   : > { %v11730_v32 = vpop.f32.mrb[84].mxu0 }
 0x9ab   : > { %v11772_v3 = vadd.f32 %v11771_v28, %v11730_v32  ;;  %v11732_v27 = vpop.f32.mrb[85].mxu0 }
 0x9ac   : > { %v11774_v58 = vadd.f32 %v11773_v15, %v11732_v27  ;;  %v11734_v44 = vpop.f32.mrb[86].mxu0 }
 0x9ad   : > { %v11778_v38 = vadd.f32 %v11772_v3, %v11361_v16  ;;  %v11735_v26 = vpop.f32.mrb[87].mxu0 }
 0x9ae   : > { %v11779_v48 = vadd.f32 %v11774_v58, %v11362_v43 }
 0x9ca   : > { %v12171_v50 = vpop.f32.mrb[88].mxu0 }
 0x9cb   : > { %v12130_v57 = vpop.f32.mrb[68].mxu1  ;;  %v12173_v20 = vpop.f32.mrb[89].mxu0 }
 0x9cc   : > { %v12172_v47 = vadd.f32 %v12171_v50, %v12130_v57  ;;  %v12132_v39 = vpop.f32.mrb[69].mxu1  ;;  %v12175_v45 = vpop.f32.mrb[90].mxu0  ;;  %v19278_v50 = vld [vmem:[#allocation9 + $0x300] ss:$8 sps:$4 sm:$0xff]  }
 0x9cd   : > { %v12174_v37 = vadd.f32 %v12173_v20, %v12132_v39  ;;  %v12134_v41 = vpop.f32.mrb[70].mxu1  ;;  %v12176_v21 = vpop.f32.mrb[91].mxu0 }
 0x9ce   : > { %v12178_v52 = vadd.f32 %v12172_v47, %v11778_v38  ;;  %v12135_v4 = vpop.f32.mrb[71].mxu1  ;;  %v19287_v47 = vld [vmem:[#allocation9 + $0x314] ss:$8 sps:$4 sm:$0xff]   ;;  %v19285_v41 = vld [vmem:[#allocation9 + $0x310] ss:$8 sps:$4 sm:$0xff]  }
 0x9cf   : > { %v12179_v54 = vadd.f32 %v12174_v37, %v11779_v48 }
 0x9d0   : > { %v12192_v9 = vadd.f32 %v12185_v35, %v12178_v52  ;;  %v19288_v52 = vld [vmem:[#allocation9 + $0x200] ss:$8 sps:$4 sm:$0xff]  }
 0x9d1   : > { %v12193_v19 = vadd.f32 %v12189_v5, %v12179_v54  ;;  %v19293_v54 = vld [vmem:[#allocation9 + $0x324] ss:$8 sps:$4 sm:$0xff]  }
 0x9d2   : > { %v12194_v36 = vmax.f32 %v12192_v9, 0.0  ;;  %v19296_v9 = vld [vmem:[#allocation9 + $0x214] ss:$8 sps:$4 sm:$0xff]  }
 0x9d3   : > { %v12195_v30 = vmax.f32 %v12193_v19, 0.0 }
 0x9d5   : > { %v12202_v40 = vcombine.low %v12194_v36, %v12195_v30  ;;  %v19291_v36 = vld [vmem:[#allocation9 + $0x320] ss:$8 sps:$4 sm:$0xff]   ;;  %v19302_v30 = vld [vmem:[#allocation9 + $0x224] ss:$8 sps:$4 sm:$0xff]  }
 0x9d7   : > { %v12203_v14 = vrot.slane %v12202_v40, 7  ;;  %v16996_v51 = vrot.slane %v12202_v40, 9  ;;  %v19297_v40 = vld [vmem:[#allocation9 + $0x330] ss:$8 sps:$4 sm:$0xff]  }
 0x9d9   : > { %12206 = vst [vmem:[#allocation5 + $0x8] sm:$0x66] %v12203_v14  ;;  %12211 = vst [vmem:[#allocation5 + $0x10] sm:$0x66] %v16996_v51  ;;  %v19305_v14 = vld [vmem:[#allocation9 + $0x344] ss:$8 sps:$4 sm:$0xff]  }
 0x9da   : > { %v19308_v51 = vld [vmem:[#allocation9 + $0x234] ss:$8 sps:$4 sm:$0xff]  }
 0x9e0   : > { %v12213_v29 = vld [vmem:[#allocation5 + $0x8] sm:$0xff]  ;;  %v12214_v2 = vld [vmem:[#allocation5 + $0x10] sm:$0xff] }
 0x9e1   : > { %v12221_v46 = vcombine.high %v12213_v29, %v12213_v29  ;;  %v12222_v16 = vcombine.high %v12214_v2, %v12214_v2 }
 0x9e3   : > { %v16998_v17 = vpack.c.bf16 %v12221_v46, %v12213_v29  ;;  %v17097_v43 = vpack.c.bf16 %v12222_v16, %v12214_v2  ;;  %v19311_v29 = vld [vmem:[#allocation9 + $0x354] ss:$8 sps:$4 sm:$0xff]   ;;  %v19314_v2 = vld [vmem:[#allocation9 + $0x244] ss:$8 sps:$4 sm:$0xff]   ;;  %v19309_v46 = vld [vmem:[#allocation9 + $0x350] ss:$8 sps:$4 sm:$0xff]  }
 0x9e4   : > { %v19312_v16 = vld [vmem:[#allocation9 + $0x240] ss:$8 sps:$4 sm:$0xff]  }
 0x9e5   : > { %v12262_v22 = vrot.slane %v16998_v17, %v21186_v6  ;;  %v13091_v63 = vrot.slane %v17097_v43, %v21186_v6  ;;  %v19317_v17 = vld [vmem:[#allocation9 + $0x364] ss:$8 sps:$4 sm:$0xff]   ;;  %v19320_v43 = vld [vmem:[#allocation9 + $0x254] ss:$8 sps:$4 sm:$0xff]  }
 0x9e7   : > { %v12269_v8 = vrot.slane %v12262_v22, %v21186_v6  ;;  %v12310_v18 = vcombine.high %v12262_v22, %v12262_v22  ;;  %v23927_v49 = vrot.slane %v13091_v63, %v21186_v6  ;;  %v13360_v33 = vcombine.high %v13091_v63, %v13091_v63  ;;  %v19315_v22 = vld [vmem:[#allocation9 + $0x360] ss:$8 sps:$4 sm:$0xff]   ;;  %v19318_v63 = vld [vmem:[#allocation9 + $0x250] ss:$8 sps:$4 sm:$0xff]  }
 0x9e9   : > { %v12595_v53 = vcombine.low %v23919_v24, %v12269_v8  ;;  %v13132_v7 = vcombine.low %v12269_v8, %v23927_v49  ;;  %v23932_v42 = vrot.slane %v12310_v18, %v21186_v6  ;;  %v12328_v60 = vshrl.u32 %v12269_v8, 16  ;;  %v19321_v8 = vld [vmem:[#allocation9 + $0x370] ss:$8 sps:$4 sm:$0xff]   ;;  %v19324_v18 = vld [vmem:[#allocation9 + $0x260] ss:$8 sps:$4 sm:$0xff]  }
 0x9ea   : > { %v23939_v28 = vrot.slane %v13360_v33, %v21186_v6  ;;  %v13369_v38 = vshrl.u32 %v23927_v49, 16  ;;  %v19329_v33 = vld [vmem:[#allocation9 + $0x384] ss:$8 sps:$4 sm:$0xff]  }
 0x9eb   : > { %v12602_v15 = vrot.slane %v12595_v53, %v21186_v6  ;;  %v23943_v13 = vrot.slane %v13132_v7, %v21186_v6  ;;  %v12333_v59 = vshll.u32 %v23932_v42, 16  ;;  %v12854_v32 = vcombine.low %v23916_v10, %v23932_v42  ;;  %v19332_v53 = vld [vmem:[#allocation9 + $0x274] ss:$8 sps:$4 sm:$0xff]   ;;  %v19327_v7 = vld [vmem:[#allocation9 + $0x380] ss:$8 sps:$4 sm:$0xff]  }
 0x9ec   : > { %v13374_v3 = vshll.u32 %v23939_v28, 16 }
 0x9ed   : > { %v12603_v27 = vcombine.high %v12602_v15, %v12602_v15  ;;  %v13140_v58 = vcombine.high %v23943_v13, %v23943_v13  ;;  %v23953_v44 = vsel %vm21205_vm14, %v12328_v60, %v12333_v59  ;;  %v23959_v48 = vrot.slane %v12854_v32, %v21186_v6  ;;  %v19330_v60 = vld [vmem:[#allocation9 + $0x270] ss:$8 sps:$4 sm:$0xff]   ;;  %v19338_v59 = vld [vmem:[#allocation9 + $0x284] ss:$8 sps:$4 sm:$0xff]  }
 0x9ee   : > { %v12369_v26 = vcombine.low %v23936_v61, %v23953_v44  ;;  %v23964_v57 = vsel %vm21205_vm14, %v13369_v38, %v13374_v3  ;;  %v12610_v20 = vrot.slane %v12602_v15, %v21186_v6  ;;  %v19335_v15 = vld [vmem:[#allocation9 + $0x394] ss:$8 sps:$4 sm:$0xff]   ;;  %v19333_v32 = vld [vmem:[#allocation9 + $0x390] ss:$8 sps:$4 sm:$0xff]   ;;  %v19336_v3 = vld [vmem:[#allocation9 + $0x280] ss:$8 sps:$4 sm:$0xff]  }
 0x9ef   : > { %v12617_v25 = vrot.slane %v12603_v27, %v21186_v6  ;;  %v13154_v39 = vrot.slane %v13140_v58, %v21186_v6  ;;  %v13410_v45 = vcombine.low %v23953_v44, %v23964_v57  ;;  %v14227_v37 = vcombine.low %v23964_v57, %v23936_v61  ;;  %v19341_v27 = vld [vmem:[#allocation9 + $0x3a4] ss:$8 sps:$4 sm:$0xff]   ;;  %v19344_v58 = vld [vmem:[#allocation9 + $0x294] ss:$8 sps:$4 sm:$0xff]   ;;  %v19339_v38 = vld [vmem:[#allocation9 + $0x3a0] ss:$8 sps:$4 sm:$0xff]  }
 0x9f0   : > { %v12376_v35 = vrot.slane %v12369_v26, %v21186_v6  ;;  %v12862_v62 = vcombine.high %v23959_v48, %v23959_v48  ;;  %v19342_v26 = vld [vmem:[#allocation9 + $0x290] ss:$8 sps:$4 sm:$0xff]   ;;  %v19471_v61 = vld [vmem:[#allocation9 + $0x700] ss:$8 sps:$4 sm:$0xff]   ;;  %v19479_v57 = vld [vmem:[#allocation9 + $0x714] ss:$8 sps:$4 sm:$0xff]  }
 0x9f1   : > { %12812 = vmatprep.mubr.bf16.mxu1 %v12617_v25  ;;  %v19347_v25 = vld [vmem:[#allocation9 + $0x3b4] ss:$8 sps:$4 sm:$0xff]   ;;  %v19381_v44 = vld [vmem:[#allocation9 + $0x510] ss:$8 sps:$4 sm:$0xff]  }
 0x9f2   : > { %12813 = vmatmul.mubr.bf16.vlgmr.msra.gmra.mrb[72].mxu1 %v12610_v20  ;;  %v12377_v5 = vcombine.high %v12376_v35, %v12376_v35  ;;  %v12384_v4 = vrot.slane %v12376_v35, %v21186_v6  ;;  %v12876_v19 = vrot.slane %v12862_v62, %v21186_v6  ;;  %v19345_v20 = vld [vmem:[#allocation9 + $0x3b0] ss:$8 sps:$4 sm:$0xff]   ;;  %v19353_v35 = vld [vmem:[#allocation9 + $0x3c4] ss:$8 sps:$4 sm:$0xff]  }
 0x9f3   : > { %13318 = vmatpush1.bf16.msra.mxu1 %v19278_v50  ;;  %13349 = vmatprep.mubr.bf16.mxu1 %v13154_v39  ;;  %v19350_v50 = vld [vmem:[#allocation9 + $0x2a4] ss:$8 sps:$4 sm:$0xff]   ;;  %v19356_v39 = vld [vmem:[#allocation9 + $0x2b4] ss:$8 sps:$4 sm:$0xff]   ;;  %v19354_v62 = vld [vmem:[#allocation9 + $0x2b0] ss:$8 sps:$4 sm:$0xff]  }
 0x9f4   : > { %13319 = vmatprep.subr.bf16.mxu1 %v19287_v47  ;;  %v12391_v21 = vrot.slane %v12377_v5, %v21186_v6  ;;  %v19348_v47 = vld [vmem:[#allocation9 + $0x2a0] ss:$8 sps:$4 sm:$0xff]  }
 0x9f5   : > { %v19351_v5 = vld [vmem:[#allocation9 + $0x3c0] ss:$8 sps:$4 sm:$0xff]  }
 0x9f6   : > { %12586 = vmatprep.mubr.bf16.mxu0 %v12391_v21  ;;  %v19362_v21 = vld [vmem:[#allocation9 + $0x2c4] ss:$8 sps:$4 sm:$0xff]  }
 0x9f7   : > { %13320 = vmatpush1.bf16.msra.mxu1 %v19285_v41  ;;  %12587 = vmatmul.mubr.bf16.vlgmr.msra.gmra.mrb[92].mxu0 %v12384_v4  ;;  %v19359_v41 = vld [vmem:[#allocation9 + $0x3d4] ss:$8 sps:$4 sm:$0xff]   ;;  %v19360_v4 = vld [vmem:[#allocation9 + $0x2c0] ss:$8 sps:$4 sm:$0xff]  }
 0x9f8   : > { %13040 = vmatpush1.bf16.msra.mxu0 %v19288_v52  ;;  %13071 = vmatprep.mubr.bf16.mxu0 %v12876_v19  ;;  %v19357_v52 = vld [vmem:[#allocation9 + $0x3d0] ss:$8 sps:$4 sm:$0xff]   ;;  %v13671_v19 = vcombine.low %v23932_v42, %v23939_v28 }
 0x9f9   : > { %13321 = vmatprep.subr.bf16.mxu1 %v19293_v54  ;;  %13041 = vmatprep.subr.bf16.mxu0 %v19296_v9  ;;  %v19365_v54 = vld [vmem:[#allocation9 + $0x3e4] ss:$8 sps:$4 sm:$0xff]   ;;  %v19368_v9 = vld [vmem:[#allocation9 + $0x2d4] ss:$8 sps:$4 sm:$0xff]  }
 0x9fb   : > { %13322 = vmatpush1.bf16.msra.mxu1 %v19291_v36  ;;  %v19363_v36 = vld [vmem:[#allocation9 + $0x3e0] ss:$8 sps:$4 sm:$0xff]  }
 0x9fc   : > { %13042 = vmatpush1.bf16.msra.mxu0 %v19294_v55  ;;  %13323 = vmatprep.subr.bf16.mxu1 %v19299_v23  ;;  %v19366_v55 = vld [vmem:[#allocation9 + $0x2d0] ss:$8 sps:$4 sm:$0xff]   ;;  %v19371_v23 = vld [vmem:[#allocation9 + $0x3f4] ss:$8 sps:$4 sm:$0xff]  }
 0x9fd   : > { %13043 = vmatprep.subr.bf16.mxu0 %v19302_v30  ;;  %v19374_v30 = vld [vmem:[#allocation9 + $0x2e4] ss:$8 sps:$4 sm:$0xff]  }
 0x9ff   : > { %13324 = vmatpush1.bf16.msra.mxu1 %v19297_v40  ;;  %v23981_v40 = vrot.slane %v13671_v19, %v21186_v6  ;;  %v19432_v19 = vld [vmem:[#allocation9 + $0x480] ss:$8 sps:$4 sm:$0xff]  }
 0xa00   : > { %13044 = vmatpush1.bf16.msra.mxu0 %v19300_v31  ;;  %13325 = vmatprep.subr.bf16.mxu1 %v19305_v14  ;;  %v19369_v31 = vld [vmem:[#allocation9 + $0x3f0] ss:$8 sps:$4 sm:$0xff]   ;;  %v19372_v14 = vld [vmem:[#allocation9 + $0x2e0] ss:$8 sps:$4 sm:$0xff]  }
 0xa01   : > { %13045 = vmatprep.subr.bf16.mxu0 %v19308_v51  ;;  %v19377_v51 = vld [vmem:[#allocation9 + $0x504] ss:$8 sps:$4 sm:$0xff]   ;;  %v13679_v42 = vcombine.high %v23981_v40, %v23981_v40 }
 0xa03   : > { %13326 = vmatpush1.bf16.msra.mxu1 %v19303_v12  ;;  %v19380_v12 = vld [vmem:[#allocation9 + $0x2f4] ss:$8 sps:$4 sm:$0xff]  }
 0xa04   : > { %13046 = vmatpush1.bf16.msra.mxu0 %v19306_v1  ;;  %13327 = vmatprep.subr.bf16.mxu1 %v19311_v29  ;;  %v23989_v1 = vrot.slane %v13410_v45, %v21186_v6  ;;  %v19375_v29 = vld [vmem:[#allocation9 + $0x500] ss:$8 sps:$4 sm:$0xff]  }
 0xa05   : > { %13047 = vmatprep.subr.bf16.mxu0 %v19314_v2  ;;  %v13147_v2 = vrot.slane %v23943_v13, %v21186_v6  ;;  %v19384_v45 = vld [vmem:[#allocation9 + $0x400] ss:$8 sps:$4 sm:$0xff]   ;;  %v12869_v13 = vrot.slane %v23959_v48, %v21186_v6 }
 0xa06   : > { %v19396_v48 = vld [vmem:[#allocation9 + $0x420] ss:$8 sps:$4 sm:$0xff]  }
 0xa07   : > { %13328 = vmatpush1.bf16.msra.mxu1 %v19309_v46  ;;  %v19378_v46 = vld [vmem:[#allocation9 + $0x2f0] ss:$8 sps:$4 sm:$0xff]  }
 0xa08   : > { %13048 = vmatpush1.bf16.msra.mxu0 %v19312_v16  ;;  %13329 = vmatprep.subr.bf16.mxu1 %v19317_v17  ;;  %v19383_v16 = vld [vmem:[#allocation9 + $0x514] ss:$8 sps:$4 sm:$0xff]   ;;  %v13693_v17 = vrot.slane %v13679_v42, %v21186_v6  ;;  %v19449_v42 = vld [vmem:[#allocation9 + $0x5c4] ss:$8 sps:$4 sm:$0xff]  }
 0xa09   : > { %13049 = vmatprep.subr.bf16.mxu0 %v19320_v43  ;;  %v19386_v43 = vld [vmem:[#allocation9 + $0x404] ss:$8 sps:$4 sm:$0xff]  }
 0xa0b   : > { %13330 = vmatpush1.bf16.msra.mxu1 %v19315_v22  ;;  %v13418_v22 = vcombine.high %v23989_v1, %v23989_v1 }
 0xa0c   : > { %13050 = vmatpush1.bf16.msra.mxu0 %v19318_v63  ;;  %13331 = vmatprep.subr.bf16.mxu1 %v19323_v56  ;;  %v19389_v63 = vld [vmem:[#allocation9 + $0x524] ss:$8 sps:$4 sm:$0xff]   ;;  %v19392_v56 = vld [vmem:[#allocation9 + $0x414] ss:$8 sps:$4 sm:$0xff]  }
 0xa0d   : > { %13051 = vmatprep.subr.bf16.mxu0 %v19326_v0  ;;  %v13432_v0 = vrot.slane %v13418_v22, %v21186_v6  ;;  %v19456_v22 = vld [vmem:[#allocation9 + $0x4c0] ss:$8 sps:$4 sm:$0xff]  }
 0xa0f   : > { %13332 = vmatpush1.bf16.msra.mxu1 %v19321_v8  ;;  %v19387_v8 = vld [vmem:[#allocation9 + $0x520] ss:$8 sps:$4 sm:$0xff]  }
 0xa10   : > { %13052 = vmatpush1.bf16.msra.mxu0 %v19324_v18  ;;  %13333 = vmatprep.subr.bf16.mxu1 %v19329_v33  ;;  %v19390_v18 = vld [vmem:[#allocation9 + $0x410] ss:$8 sps:$4 sm:$0xff]   ;;  %v19395_v33 = vld [vmem:[#allocation9 + $0x534] ss:$8 sps:$4 sm:$0xff]  }
 0xa11   : > { %13053 = vmatprep.subr.bf16.mxu0 %v19332_v53  ;;  %v19398_v53 = vld [vmem:[#allocation9 + $0x424] ss:$8 sps:$4 sm:$0xff]  }
 0xa13   : > { %13334 = vmatpush1.bf16.msra.mxu1 %v19327_v7  ;;  %v19393_v7 = vld [vmem:[#allocation9 + $0x530] ss:$8 sps:$4 sm:$0xff]  }
 0xa14   : > { %13054 = vmatpush1.bf16.msra.mxu0 %v19330_v60  ;;  %13335 = vmatprep.subr.bf16.mxu1 %v19335_v15  ;;  %v19401_v60 = vld [vmem:[#allocation9 + $0x544] ss:$8 sps:$4 sm:$0xff]   ;;  %v19404_v15 = vld [vmem:[#allocation9 + $0x434] ss:$8 sps:$4 sm:$0xff]  }
 0xa15   : > { %13055 = vmatprep.subr.bf16.mxu0 %v19338_v59  ;;  %v19399_v59 = vld [vmem:[#allocation9 + $0x540] ss:$8 sps:$4 sm:$0xff]  }
 0xa17   : > { %13336 = vmatpush1.bf16.msra.mxu1 %v19333_v32  ;;  %v19402_v32 = vld [vmem:[#allocation9 + $0x430] ss:$8 sps:$4 sm:$0xff]  }
 0xa18   : > { %13056 = vmatpush1.bf16.msra.mxu0 %v19336_v3  ;;  %13337 = vmatprep.subr.bf16.mxu1 %v19341_v27  ;;  %v19407_v3 = vld [vmem:[#allocation9 + $0x554] ss:$8 sps:$4 sm:$0xff]   ;;  %v19410_v27 = vld [vmem:[#allocation9 + $0x444] ss:$8 sps:$4 sm:$0xff]  }
 0xa19   : > { %13057 = vmatprep.subr.bf16.mxu0 %v19344_v58  ;;  %v19405_v58 = vld [vmem:[#allocation9 + $0x550] ss:$8 sps:$4 sm:$0xff]  }
 0xa1b   : > { %13338 = vmatpush1.bf16.msra.mxu1 %v19339_v38  ;;  %v19408_v38 = vld [vmem:[#allocation9 + $0x440] ss:$8 sps:$4 sm:$0xff]  }
 0xa1c   : > { %13058 = vmatpush1.bf16.msra.mxu0 %v19342_v26  ;;  %13339 = vmatprep.subr.bf16.mxu1 %v19347_v25  ;;  %v19413_v26 = vld [vmem:[#allocation9 + $0x564] ss:$8 sps:$4 sm:$0xff]   ;;  %v19416_v25 = vld [vmem:[#allocation9 + $0x454] ss:$8 sps:$4 sm:$0xff]  }
 0xa1d   : > { %13059 = vmatprep.subr.bf16.mxu0 %v19350_v50  ;;  %v19411_v50 = vld [vmem:[#allocation9 + $0x560] ss:$8 sps:$4 sm:$0xff]  }
 0xa1f   : > { %13340 = vmatpush1.bf16.msra.mxu1 %v19345_v20  ;;  %v19414_v20 = vld [vmem:[#allocation9 + $0x450] ss:$8 sps:$4 sm:$0xff]  }
 0xa20   : > { %13060 = vmatpush1.bf16.msra.mxu0 %v19348_v47  ;;  %13341 = vmatprep.subr.bf16.mxu1 %v19353_v35  ;;  %v19419_v47 = vld [vmem:[#allocation9 + $0x574] ss:$8 sps:$4 sm:$0xff]   ;;  %v19422_v35 = vld [vmem:[#allocation9 + $0x464] ss:$8 sps:$4 sm:$0xff]  }
 0xa21   : > { %13061 = vmatprep.subr.bf16.mxu0 %v19356_v39  ;;  %v19417_v39 = vld [vmem:[#allocation9 + $0x570] ss:$8 sps:$4 sm:$0xff]  }
 0xa23   : > { %13342 = vmatpush1.bf16.msra.mxu1 %v19351_v5  ;;  %v19420_v5 = vld [vmem:[#allocation9 + $0x460] ss:$8 sps:$4 sm:$0xff]  }
 0xa24   : > { %13062 = vmatpush1.bf16.msra.mxu0 %v19354_v62  ;;  %13343 = vmatprep.subr.bf16.mxu1 %v19359_v41  ;;  %v19425_v62 = vld [vmem:[#allocation9 + $0x584] ss:$8 sps:$4 sm:$0xff]   ;;  %v19428_v41 = vld [vmem:[#allocation9 + $0x474] ss:$8 sps:$4 sm:$0xff]  }
 0xa25   : > { %13063 = vmatprep.subr.bf16.mxu0 %v19362_v21  ;;  %v19423_v21 = vld [vmem:[#allocation9 + $0x580] ss:$8 sps:$4 sm:$0xff]  }
 0xa27   : > { %13344 = vmatpush1.bf16.msra.mxu1 %v19357_v52  ;;  %v19426_v52 = vld [vmem:[#allocation9 + $0x470] ss:$8 sps:$4 sm:$0xff]  }
 0xa28   : > { %13064 = vmatpush1.bf16.msra.mxu0 %v19360_v4  ;;  %13345 = vmatprep.subr.bf16.mxu1 %v19365_v54  ;;  %v19431_v4 = vld [vmem:[#allocation9 + $0x594] ss:$8 sps:$4 sm:$0xff]   ;;  %v19434_v54 = vld [vmem:[#allocation9 + $0x484] ss:$8 sps:$4 sm:$0xff]  }
 0xa29   : > { %13065 = vmatprep.subr.bf16.mxu0 %v19368_v9  ;;  %v19429_v9 = vld [vmem:[#allocation9 + $0x590] ss:$8 sps:$4 sm:$0xff]  }
 0xa2b   : > { %13346 = vmatpush1.bf16.msra.mxu1 %v19363_v36  ;;  %v19437_v36 = vld [vmem:[#allocation9 + $0x5a4] ss:$8 sps:$4 sm:$0xff]  }
 0xa2c   : > { %13066 = vmatpush1.bf16.msra.mxu0 %v19366_v55  ;;  %13347 = vmatprep.subr.bf16.mxu1 %v19371_v23  ;;  %v19440_v55 = vld [vmem:[#allocation9 + $0x494] ss:$8 sps:$4 sm:$0xff]   ;;  %v19435_v23 = vld [vmem:[#allocation9 + $0x5a0] ss:$8 sps:$4 sm:$0xff]  }
 0xa2d   : > { %13067 = vmatprep.subr.bf16.mxu0 %v19374_v30  ;;  %v19438_v30 = vld [vmem:[#allocation9 + $0x490] ss:$8 sps:$4 sm:$0xff]  }
 0xa2f   : > { %13348 = vmatpush1.bf16.msra.mxu1 %v19369_v31  ;;  %v19443_v31 = vld [vmem:[#allocation9 + $0x5b4] ss:$8 sps:$4 sm:$0xff]  }
 0xa30   : > { %13068 = vmatpush1.bf16.msra.mxu0 %v19372_v14  ;;  %13856 = vmatprep.subr.bf16.mxu1 %v19377_v51  ;;  %v19446_v14 = vld [vmem:[#allocation9 + $0x4a4] ss:$8 sps:$4 sm:$0xff]   ;;  %v19441_v51 = vld [vmem:[#allocation9 + $0x5b0] ss:$8 sps:$4 sm:$0xff]  }
 0xa31   : > { %13069 = vmatprep.subr.bf16.mxu0 %v19380_v12  ;;  %v19444_v12 = vld [vmem:[#allocation9 + $0x4a0] ss:$8 sps:$4 sm:$0xff]  }
 0xa32   : > { %13350 = vmatmul.mubr.bf16.vlgmr.msra.gmra.mrb[76].mxu1 %v13147_v2  ;;  %v19447_v2 = vld [vmem:[#allocation9 + $0x5c0] ss:$8 sps:$4 sm:$0xff]  }
 0xa33   : > { %13857 = vmatpush1.bf16.msra.mxu1 %v19375_v29  ;;  %13888 = vmatprep.mubr.bf16.mxu1 %v13693_v17  ;;  %v19452_v29 = vld [vmem:[#allocation9 + $0x4b4] ss:$8 sps:$4 sm:$0xff]   ;;  %v19458_v17 = vld [vmem:[#allocation9 + $0x4c4] ss:$8 sps:$4 sm:$0xff]  }
 0xa34   : > { %13070 = vmatpush1.bf16.msra.mxu0 %v19378_v46  ;;  %13858 = vmatprep.subr.bf16.mxu1 %v19383_v16  ;;  %v19450_v46 = vld [vmem:[#allocation9 + $0x4b0] ss:$8 sps:$4 sm:$0xff]   ;;  %v19455_v16 = vld [vmem:[#allocation9 + $0x5d4] ss:$8 sps:$4 sm:$0xff]  }
 0xa35   : > { %13595 = vmatprep.subr.bf16.mxu0 %v19386_v43  ;;  %v19453_v43 = vld [vmem:[#allocation9 + $0x5d0] ss:$8 sps:$4 sm:$0xff]  }
 0xa37   : > { %13072 = vmatmul.mubr.bf16.vlgmr.msra.gmra.mrb[96].mxu0 %v12869_v13  ;;  %13859 = vmatpush1.bf16.msra.mxu1 %v19381_v44  ;;  %v19461_v44 = vld [vmem:[#allocation9 + $0x5e4] ss:$8 sps:$4 sm:$0xff]   ;;  %v19459_v13 = vld [vmem:[#allocation9 + $0x5e0] ss:$8 sps:$4 sm:$0xff]  }
 0xa38   : > { %13596 = vmatpush1.bf16.msra.mxu0 %v19384_v45  ;;  %13627 = vmatprep.mubr.bf16.mxu0 %v13432_v0  ;;  %v19464_v45 = vld [vmem:[#allocation9 + $0x4d4] ss:$8 sps:$4 sm:$0xff]   ;;  %v19470_v0 = vld [vmem:[#allocation9 + $0x4e4] ss:$8 sps:$4 sm:$0xff]  }
 0xa39   : > { %13860 = vmatprep.subr.bf16.mxu1 %v19389_v63  ;;  %13597 = vmatprep.subr.bf16.mxu0 %v19392_v56  ;;  %v19462_v63 = vld [vmem:[#allocation9 + $0x4d0] ss:$8 sps:$4 sm:$0xff]   ;;  %v19467_v56 = vld [vmem:[#allocation9 + $0x5f4] ss:$8 sps:$4 sm:$0xff]  }
 0xa3b   : > { %13861 = vmatpush1.bf16.msra.mxu1 %v19387_v8  ;;  %v24003_v8 = vrot.slane %v14227_v37, %v21186_v6 }
 0xa3c   : > { %13598 = vmatpush1.bf16.msra.mxu0 %v19390_v18  ;;  %13862 = vmatprep.subr.bf16.mxu1 %v19395_v33  ;;  %v13949_v18 = vcombine.low %v23927_v49, %v23919_v24  ;;  %v19465_v33 = vld [vmem:[#allocation9 + $0x5f0] ss:$8 sps:$4 sm:$0xff]   ;;  %v13686_v24 = vrot.slane %v23981_v40, %v21186_v6  ;;  %v13425_v40 = vrot.slane %v23989_v1, %v21186_v6  ;;  %v19492_v1 = vld [vmem:[#allocation9 + $0x620] ss:$8 sps:$4 sm:$0xff]  }
 0xa3d   : > { %13599 = vmatprep.subr.bf16.mxu0 %v19398_v53  ;;  %v19468_v53 = vld [vmem:[#allocation9 + $0x4e0] ss:$8 sps:$4 sm:$0xff]   ;;  %v19474_v49 = vld [vmem:[#allocation9 + $0x4f0] ss:$8 sps:$4 sm:$0xff]  }
 0xa3f   : > { %13863 = vmatpush1.bf16.msra.mxu1 %v19393_v7  ;;  %v19473_v7 = vld [vmem:[#allocation9 + $0x704] ss:$8 sps:$4 sm:$0xff]  }
 0xa40   : > { %13600 = vmatpush1.bf16.msra.mxu0 %v19396_v48  ;;  %13864 = vmatprep.subr.bf16.mxu1 %v19401_v60  ;;  %v19476_v48 = vld [vmem:[#allocation9 + $0x4f4] ss:$8 sps:$4 sm:$0xff]   ;;  %v14235_v60 = vcombine.high %v24003_v8, %v24003_v8 }
 0xa41   : > { %13601 = vmatprep.subr.bf16.mxu0 %v19404_v15  ;;  %v24010_v15 = vrot.slane %v13949_v18, %v21186_v6  ;;  %v19545_v18 = vld [vmem:[#allocation9 + $0x7c4] ss:$8 sps:$4 sm:$0xff]  }
 0xa42   : > { %v14249_v37 = vrot.slane %v14235_v60, %v21186_v6  ;;  %v19554_v60 = vld [vmem:[#allocation9 + $0x6c4] ss:$8 sps:$4 sm:$0xff]  }
 0xa43   : > { %13865 = vmatpush1.bf16.msra.mxu1 %v19399_v59  ;;  %v19482_v59 = vld [vmem:[#allocation9 + $0x604] ss:$8 sps:$4 sm:$0xff]  }
 0xa44   : > { %13602 = vmatpush1.bf16.msra.mxu0 %v19402_v32  ;;  %13866 = vmatprep.subr.bf16.mxu1 %v19407_v3  ;;  %v13957_v32 = vcombine.high %v24010_v15, %v24010_v15  ;;  %v19477_v3 = vld [vmem:[#allocation9 + $0x710] ss:$8 sps:$4 sm:$0xff]  }
 0xa45   : > { %13603 = vmatprep.subr.bf16.mxu0 %v19410_v27  ;;  %v19480_v27 = vld [vmem:[#allocation9 + $0x600] ss:$8 sps:$4 sm:$0xff]  }
 0xa47   : > { %13867 = vmatpush1.bf16.msra.mxu1 %v19405_v58  ;;  %v19485_v58 = vld [vmem:[#allocation9 + $0x724] ss:$8 sps:$4 sm:$0xff]  }
 0xa48   : > { %13604 = vmatpush1.bf16.msra.mxu0 %v19408_v38  ;;  %13868 = vmatprep.subr.bf16.mxu1 %v19413_v26  ;;  %v19488_v38 = vld [vmem:[#allocation9 + $0x614] ss:$8 sps:$4 sm:$0xff]   ;;  %v13971_v26 = vrot.slane %v13957_v32, %v21186_v6 }
 0xa49   : > { %13605 = vmatprep.subr.bf16.mxu0 %v19416_v25  ;;  %v19483_v25 = vld [vmem:[#allocation9 + $0x720] ss:$8 sps:$4 sm:$0xff]   ;;  %v19563_v32 = vld [vmem:[#allocation9 + $0x7f4] ss:$8 sps:$4 sm:$0xff]  }
 0xa4b   : > { %13869 = vmatpush1.bf16.msra.mxu1 %v19411_v50  ;;  %v19486_v50 = vld [vmem:[#allocation9 + $0x610] ss:$8 sps:$4 sm:$0xff]  }
 0xa4c   : > { %13606 = vmatpush1.bf16.msra.mxu0 %v19414_v20  ;;  %13870 = vmatprep.subr.bf16.mxu1 %v19419_v47  ;;  %v19491_v20 = vld [vmem:[#allocation9 + $0x734] ss:$8 sps:$4 sm:$0xff]   ;;  %v19494_v47 = vld [vmem:[#allocation9 + $0x624] ss:$8 sps:$4 sm:$0xff]  }
 0xa4d   : > { %13607 = vmatprep.subr.bf16.mxu0 %v19422_v35  ;;  %v19489_v35 = vld [vmem:[#allocation9 + $0x730] ss:$8 sps:$4 sm:$0xff]  }
 0xa4f   : > { %13871 = vmatpush1.bf16.msra.mxu1 %v19417_v39  ;;  %v19497_v39 = vld [vmem:[#allocation9 + $0x744] ss:$8 sps:$4 sm:$0xff]  }
 0xa50   : > { %13608 = vmatpush1.bf16.msra.mxu0 %v19420_v5  ;;  %13872 = vmatprep.subr.bf16.mxu1 %v19425_v62  ;;  %v19500_v5 = vld [vmem:[#allocation9 + $0x634] ss:$8 sps:$4 sm:$0xff]   ;;  %v19495_v62 = vld [vmem:[#allocation9 + $0x740] ss:$8 sps:$4 sm:$0xff]  }
 0xa51   : > { %13609 = vmatprep.subr.bf16.mxu0 %v19428_v41  ;;  %v19498_v41 = vld [vmem:[#allocation9 + $0x630] ss:$8 sps:$4 sm:$0xff]  }
 0xa53   : > { %13873 = vmatpush1.bf16.msra.mxu1 %v19423_v21  ;;  %v19503_v21 = vld [vmem:[#allocation9 + $0x754] ss:$8 sps:$4 sm:$0xff]  }
 0xa54   : > { %13610 = vmatpush1.bf16.msra.mxu0 %v19426_v52  ;;  %13874 = vmatprep.subr.bf16.mxu1 %v19431_v4  ;;  %v19506_v52 = vld [vmem:[#allocation9 + $0x644] ss:$8 sps:$4 sm:$0xff]   ;;  %v19501_v4 = vld [vmem:[#allocation9 + $0x750] ss:$8 sps:$4 sm:$0xff]  }
 0xa55   : > { %13611 = vmatprep.subr.bf16.mxu0 %v19434_v54  ;;  %v19504_v54 = vld [vmem:[#allocation9 + $0x640] ss:$8 sps:$4 sm:$0xff]  }
 0xa57   : > { %13875 = vmatpush1.bf16.msra.mxu1 %v19429_v9  ;;  %v19509_v9 = vld [vmem:[#allocation9 + $0x764] ss:$8 sps:$4 sm:$0xff]  }
 0xa58   : > { %13612 = vmatpush1.bf16.msra.mxu0 %v19432_v19  ;;  %13876 = vmatprep.subr.bf16.mxu1 %v19437_v36  ;;  %v19512_v19 = vld [vmem:[#allocation9 + $0x654] ss:$8 sps:$4 sm:$0xff]   ;;  %v19507_v36 = vld [vmem:[#allocation9 + $0x760] ss:$8 sps:$4 sm:$0xff]  }
 0xa59   : > { %13613 = vmatprep.subr.bf16.mxu0 %v19440_v55  ;;  %v19510_v55 = vld [vmem:[#allocation9 + $0x650] ss:$8 sps:$4 sm:$0xff]  }
 0xa5b   : > { %13877 = vmatpush1.bf16.msra.mxu1 %v19435_v23  ;;  %v19515_v23 = vld [vmem:[#allocation9 + $0x774] ss:$8 sps:$4 sm:$0xff]  }
 0xa5c   : > { %13614 = vmatpush1.bf16.msra.mxu0 %v19438_v30  ;;  %13878 = vmatprep.subr.bf16.mxu1 %v19443_v31  ;;  %v19518_v30 = vld [vmem:[#allocation9 + $0x664] ss:$8 sps:$4 sm:$0xff]   ;;  %v19513_v31 = vld [vmem:[#allocation9 + $0x770] ss:$8 sps:$4 sm:$0xff]  }
 0xa5d   : > { %13615 = vmatprep.subr.bf16.mxu0 %v19446_v14  ;;  %v19516_v14 = vld [vmem:[#allocation9 + $0x660] ss:$8 sps:$4 sm:$0xff]  }
 0xa5f   : > { %13879 = vmatpush1.bf16.msra.mxu1 %v19441_v51  ;;  %v19521_v51 = vld [vmem:[#allocation9 + $0x784] ss:$8 sps:$4 sm:$0xff]  }
 0xa60   : > { %13616 = vmatpush1.bf16.msra.mxu0 %v19444_v12  ;;  %13880 = vmatprep.subr.bf16.mxu1 %v19449_v42  ;;  %v19524_v12 = vld [vmem:[#allocation9 + $0x674] ss:$8 sps:$4 sm:$0xff]   ;;  %v19519_v42 = vld [vmem:[#allocation9 + $0x780] ss:$8 sps:$4 sm:$0xff]  }
 0xa61   : > { %13617 = vmatprep.subr.bf16.mxu0 %v19452_v29  ;;  %v19522_v29 = vld [vmem:[#allocation9 + $0x670] ss:$8 sps:$4 sm:$0xff]  }
 0xa63   : > { %13881 = vmatpush1.bf16.msra.mxu1 %v19447_v2  ;;  %v19527_v2 = vld [vmem:[#allocation9 + $0x794] ss:$8 sps:$4 sm:$0xff]  }
 0xa64   : > { %13618 = vmatpush1.bf16.msra.mxu0 %v19450_v46  ;;  %13882 = vmatprep.subr.bf16.mxu1 %v19455_v16  ;;  %v19530_v46 = vld [vmem:[#allocation9 + $0x684] ss:$8 sps:$4 sm:$0xff]   ;;  %v19525_v16 = vld [vmem:[#allocation9 + $0x790] ss:$8 sps:$4 sm:$0xff]  }
 0xa65   : > { %13619 = vmatprep.subr.bf16.mxu0 %v19458_v17  ;;  %v19528_v17 = vld [vmem:[#allocation9 + $0x680] ss:$8 sps:$4 sm:$0xff]  }
 0xa67   : > { %13883 = vmatpush1.bf16.msra.mxu1 %v19453_v43  ;;  %v19533_v43 = vld [vmem:[#allocation9 + $0x7a4] ss:$8 sps:$4 sm:$0xff]  }
 0xa68   : > { %13620 = vmatpush1.bf16.msra.mxu0 %v19456_v22  ;;  %13884 = vmatprep.subr.bf16.mxu1 %v19461_v44  ;;  %v19536_v22 = vld [vmem:[#allocation9 + $0x694] ss:$8 sps:$4 sm:$0xff]   ;;  %v19531_v44 = vld [vmem:[#allocation9 + $0x7a0] ss:$8 sps:$4 sm:$0xff]  }
 0xa69   : > { %13621 = vmatprep.subr.bf16.mxu0 %v19464_v45  ;;  %v19534_v45 = vld [vmem:[#allocation9 + $0x690] ss:$8 sps:$4 sm:$0xff]  }
 0xa6b   : > { %13885 = vmatpush1.bf16.msra.mxu1 %v19459_v13  ;;  %v19539_v13 = vld [vmem:[#allocation9 + $0x7b4] ss:$8 sps:$4 sm:$0xff]  }
 0xa6c   : > { %13622 = vmatpush1.bf16.msra.mxu0 %v19462_v63  ;;  %13886 = vmatprep.subr.bf16.mxu1 %v19467_v56  ;;  %v19542_v63 = vld [vmem:[#allocation9 + $0x6a4] ss:$8 sps:$4 sm:$0xff]   ;;  %v19537_v56 = vld [vmem:[#allocation9 + $0x7b0] ss:$8 sps:$4 sm:$0xff]  }
 0xa6d   : > { %13623 = vmatprep.subr.bf16.mxu0 %v19470_v0  ;;  %v19540_v0 = vld [vmem:[#allocation9 + $0x6a0] ss:$8 sps:$4 sm:$0xff]  }
 0xa6f   : > { %13887 = vmatpush1.bf16.msra.mxu1 %v19465_v33  ;;  %v19548_v33 = vld [vmem:[#allocation9 + $0x6b4] ss:$8 sps:$4 sm:$0xff]  }
 0xa70   : > { %13624 = vmatpush1.bf16.msra.mxu0 %v19468_v53  ;;  %14412 = vmatprep.subr.bf16.mxu1 %v19473_v7  ;;  %v19543_v53 = vld [vmem:[#allocation9 + $0x7c0] ss:$8 sps:$4 sm:$0xff]   ;;  %v19546_v7 = vld [vmem:[#allocation9 + $0x6b0] ss:$8 sps:$4 sm:$0xff]  }
 0xa71   : > { %13625 = vmatprep.subr.bf16.mxu0 %v19476_v48  ;;  %v19551_v48 = vld [vmem:[#allocation9 + $0x7d4] ss:$8 sps:$4 sm:$0xff]  }
 0xa72   : > { %13889 = vmatmul.mubr.bf16.vlgmr.msra.gmra.mrb[80].mxu1 %v13686_v24  ;;  %v19552_v24 = vld [vmem:[#allocation9 + $0x6c0] ss:$8 sps:$4 sm:$0xff]  }
 0xa73   : > { %14413 = vmatpush1.bf16.msra.mxu1 %v19471_v61  ;;  %14444 = vmatprep.mubr.bf16.mxu1 %v14249_v37  ;;  %v19549_v61 = vld [vmem:[#allocation9 + $0x7d0] ss:$8 sps:$4 sm:$0xff]   ;;  %v19555_v37 = vld [vmem:[#allocation9 + $0x7e0] ss:$8 sps:$4 sm:$0xff]  }
 0xa74   : > { %13626 = vmatpush1.bf16.msra.mxu0 %v19474_v49  ;;  %14414 = vmatprep.subr.bf16.mxu1 %v19479_v57  ;;  %v19557_v49 = vld [vmem:[#allocation9 + $0x7e4] ss:$8 sps:$4 sm:$0xff]   ;;  %v19560_v57 = vld [vmem:[#allocation9 + $0x6d4] ss:$8 sps:$4 sm:$0xff]  }
 0xa75   : > { %14134 = vmatprep.subr.bf16.mxu0 %v19482_v59  ;;  %v19558_v59 = vld [vmem:[#allocation9 + $0x6d0] ss:$8 sps:$4 sm:$0xff]  }
 0xa77   : > { %13628 = vmatmul.mubr.bf16.vlgmr.msra.gmra.mrb[100].mxu0 %v13425_v40  ;;  %14415 = vmatpush1.bf16.msra.mxu1 %v19477_v3  ;;  %v19566_v3 = vld [vmem:[#allocation9 + $0x6e4] ss:$8 sps:$4 sm:$0xff]   ;;  %v19561_v40 = vld [vmem:[#allocation9 + $0x7f0] ss:$8 sps:$4 sm:$0xff]  }
 0xa78   : > { %14135 = vmatpush1.bf16.msra.mxu0 %v19480_v27  ;;  %14166 = vmatprep.mubr.bf16.mxu0 %v13971_v26  ;;  %v14488_v27 = vcombine.low %v23939_v28, %v23916_v10  ;;  %v19570_v28 = vld [vmem:[#allocation9 + $0x800] ss:$8 sps:$4 sm:$0xff]  }
 0xa79   : > { %14416 = vmatprep.subr.bf16.mxu1 %v19485_v58  ;;  %14136 = vmatprep.subr.bf16.mxu0 %v19488_v38  ;;  %v19564_v58 = vld [vmem:[#allocation9 + $0x6e0] ss:$8 sps:$4 sm:$0xff]   ;;  %v19569_v38 = vld [vmem:[#allocation9 + $0x6f4] ss:$8 sps:$4 sm:$0xff]  }
 0xa7a   : > { %v24023_v26 = vrot.slane %v14488_v27, %v21186_v6 }
 0xa7b   : > { %14417 = vmatpush1.bf16.msra.mxu1 %v19483_v25  ;;  %v14242_v25 = vrot.slane %v24003_v8, %v21186_v6  ;;  %v19573_v8 = vld [vmem:[#allocation9 + $0x810] ss:$8 sps:$4 sm:$0xff]  }
 0xa7c   : > { %14137 = vmatpush1.bf16.msra.mxu0 %v19486_v50  ;;  %14418 = vmatprep.subr.bf16.mxu1 %v19491_v20  ;;  %v19567_v50 = vld [vmem:[#allocation9 + $0x6f0] ss:$8 sps:$4 sm:$0xff]   ;;  %v19572_v20 = vld [vmem:[#allocation9 + $0x804] ss:$8 sps:$4 sm:$0xff]   ;;  %v14496_v10 = vcombine.high %v24023_v26, %v24023_v26 }
 0xa7d   : > { %14138 = vmatprep.subr.bf16.mxu0 %v19494_v47  ;;  %v13964_v47 = vrot.slane %v24010_v15, %v21186_v6  ;;  %v19582_v15 = vld [vmem:[#allocation9 + $0x840] ss:$8 sps:$4 sm:$0xff]  }
 0xa7f   : > { %14419 = vmatpush1.bf16.msra.mxu1 %v19489_v35  ;;  %v19575_v35 = vld [vmem:[#allocation9 + $0x814] ss:$8 sps:$4 sm:$0xff]  }
 0xa80   : > { %14139 = vmatpush1.bf16.msra.mxu0 %v19492_v1  ;;  %14420 = vmatprep.subr.bf16.mxu1 %v19497_v39  ;;  %v14510_v1 = vrot.slane %v14496_v10, %v21186_v6  ;;  %v19578_v39 = vld [vmem:[#allocation9 + $0x824] ss:$8 sps:$4 sm:$0xff]  }
 0xa81   : > { %14140 = vmatprep.subr.bf16.mxu0 %v19500_v5  ;;  %v19576_v5 = vld [vmem:[#allocation9 + $0x820] ss:$8 sps:$4 sm:$0xff]  }
 0xa82   : > { %v19621_v10 = vld [vmem:[#allocation11 + $0x8] sm:$0xff]  }
 0xa83   : > { %14421 = vmatpush1.bf16.msra.mxu1 %v19495_v62  ;;  %v19581_v62 = vld [vmem:[#allocation9 + $0x834] ss:$8 sps:$4 sm:$0xff]  }
 0xa84   : > { %14141 = vmatpush1.bf16.msra.mxu0 %v19498_v41  ;;  %14422 = vmatprep.subr.bf16.mxu1 %v19503_v21  ;;  %v19579_v41 = vld [vmem:[#allocation9 + $0x830] ss:$8 sps:$4 sm:$0xff]   ;;  %v19584_v21 = vld [vmem:[#allocation9 + $0x844] ss:$8 sps:$4 sm:$0xff]  }
 0xa85   : > { %14142 = vmatprep.subr.bf16.mxu0 %v19506_v52 }
 0xa87   : > { %14423 = vmatpush1.bf16.msra.mxu1 %v19501_v4  ;;  %v19587_v4 = vld [vmem:[#allocation9 + $0x854] ss:$8 sps:$4 sm:$0xff]  }
 0xa88   : > { %14143 = vmatpush1.bf16.msra.mxu0 %v19504_v54  ;;  %14424 = vmatprep.subr.bf16.mxu1 %v19509_v9 }
 0xa89   : > { %14144 = vmatprep.subr.bf16.mxu0 %v19512_v19 }
 0xa8b   : > { %14425 = vmatpush1.bf16.msra.mxu1 %v19507_v36  ;;  %v19585_v36 = vld [vmem:[#allocation9 + $0x850] ss:$8 sps:$4 sm:$0xff]  }
 0xa8c   : > { %14145 = vmatpush1.bf16.msra.mxu0 %v19510_v55  ;;  %14426 = vmatprep.subr.bf16.mxu1 %v19515_v23  ;;  %v19590_v55 = vld [vmem:[#allocation9 + $0x864] ss:$8 sps:$4 sm:$0xff]  }
 0xa8d   : > { %14146 = vmatprep.subr.bf16.mxu0 %v19518_v30 }
 0xa8f   : > { %14427 = vmatpush1.bf16.msra.mxu1 %v19513_v31 }
 0xa90   : > { %14147 = vmatpush1.bf16.msra.mxu0 %v19516_v14  ;;  %14428 = vmatprep.subr.bf16.mxu1 %v19521_v51 }
 0xa91   : > { %14148 = vmatprep.subr.bf16.mxu0 %v19524_v12  ;;  %v19588_v12 = vld [vmem:[#allocation9 + $0x860] ss:$8 sps:$4 sm:$0xff]  }
 0xa93   : > { %14429 = vmatpush1.bf16.msra.mxu1 %v19519_v42 }
 0xa94   : > { %14149 = vmatpush1.bf16.msra.mxu0 %v19522_v29  ;;  %14430 = vmatprep.subr.bf16.mxu1 %v19527_v2  ;;  %v19593_v29 = vld [vmem:[#allocation9 + $0x874] ss:$8 sps:$4 sm:$0xff]   ;;  %v19591_v2 = vld [vmem:[#allocation9 + $0x870] ss:$8 sps:$4 sm:$0xff]  }
 0xa95   : > { %14150 = vmatprep.subr.bf16.mxu0 %v19530_v46  ;;  %v19596_v46 = vld [vmem:[#allocation9 + $0x884] ss:$8 sps:$4 sm:$0xff]  }
 0xa97   : > { %14431 = vmatpush1.bf16.msra.mxu1 %v19525_v16  ;;  %v19594_v16 = vld [vmem:[#allocation9 + $0x880] ss:$8 sps:$4 sm:$0xff]  }
 0xa98   : > { %14151 = vmatpush1.bf16.msra.mxu0 %v19528_v17  ;;  %14432 = vmatprep.subr.bf16.mxu1 %v19533_v43  ;;  %v19599_v17 = vld [vmem:[#allocation9 + $0x894] ss:$8 sps:$4 sm:$0xff]   ;;  %v19597_v43 = vld [vmem:[#allocation9 + $0x890] ss:$8 sps:$4 sm:$0xff]  }
 0xa99   : > { %14152 = vmatprep.subr.bf16.mxu0 %v19536_v22  ;;  %v19602_v22 = vld [vmem:[#allocation9 + $0x8a4] ss:$8 sps:$4 sm:$0xff]  }
 0xa9b   : > { %14433 = vmatpush1.bf16.msra.mxu1 %v19531_v44  ;;  %v19600_v44 = vld [vmem:[#allocation9 + $0x8a0] ss:$8 sps:$4 sm:$0xff]  }
 0xa9c   : > { %14153 = vmatpush1.bf16.msra.mxu0 %v19534_v45  ;;  %14434 = vmatprep.subr.bf16.mxu1 %v19539_v13  ;;  %v19605_v45 = vld [vmem:[#allocation9 + $0x8b4] ss:$8 sps:$4 sm:$0xff]   ;;  %v19603_v13 = vld [vmem:[#allocation9 + $0x8b0] ss:$8 sps:$4 sm:$0xff]  }
 0xa9d   : > { %14154 = vmatprep.subr.bf16.mxu0 %v19542_v63  ;;  %v19608_v63 = vld [vmem:[#allocation9 + $0x8c4] ss:$8 sps:$4 sm:$0xff]  }
 0xa9f   : > { %14435 = vmatpush1.bf16.msra.mxu1 %v19537_v56  ;;  %v19606_v56 = vld [vmem:[#allocation9 + $0x8c0] ss:$8 sps:$4 sm:$0xff]  }
 0xaa0   : > { %14155 = vmatpush1.bf16.msra.mxu0 %v19540_v0  ;;  %14436 = vmatprep.subr.bf16.mxu1 %v19545_v18  ;;  %v19611_v0 = vld [vmem:[#allocation9 + $0x8d4] ss:$8 sps:$4 sm:$0xff]   ;;  %v19609_v18 = vld [vmem:[#allocation9 + $0x8d0] ss:$8 sps:$4 sm:$0xff]  }
 0xaa1   : > { %14156 = vmatprep.subr.bf16.mxu0 %v19548_v33  ;;  %v19614_v33 = vld [vmem:[#allocation9 + $0x8e4] ss:$8 sps:$4 sm:$0xff]  }
 0xaa3   : > { %14437 = vmatpush1.bf16.msra.mxu1 %v19543_v53  ;;  %v19612_v53 = vld [vmem:[#allocation9 + $0x8e0] ss:$8 sps:$4 sm:$0xff]  }
 0xaa4   : > { %14157 = vmatpush1.bf16.msra.mxu0 %v19546_v7  ;;  %14438 = vmatprep.subr.bf16.mxu1 %v19551_v48  ;;  %v19617_v7 = vld [vmem:[#allocation9 + $0x8f4] ss:$8 sps:$4 sm:$0xff]   ;;  %v19615_v48 = vld [vmem:[#allocation9 + $0x8f0] ss:$8 sps:$4 sm:$0xff]  }
 0xaa5   : > { %14158 = vmatprep.subr.bf16.mxu0 %v19554_v60  ;;  %v14503_v60 = vrot.slane %v24023_v26, %v21186_v6 }
 0xaa7   : > { %14439 = vmatpush1.bf16.msra.mxu1 %v19549_v61 }
 0xaa8   : > { %14159 = vmatpush1.bf16.msra.mxu0 %v19552_v24  ;;  %14440 = vmatprep.subr.bf16.mxu1 %v19557_v49 }
 0xaa9   : > { %14160 = vmatprep.subr.bf16.mxu0 %v19560_v57 }
 0xaab   : > { %14441 = vmatpush1.bf16.msra.mxu1 %v19555_v37 }
 0xaac   : > { %14161 = vmatpush1.bf16.msra.mxu0 %v19558_v59  ;;  %14442 = vmatprep.subr.bf16.mxu1 %v19563_v32 }
 0xaad   : > { %14162 = vmatprep.subr.bf16.mxu0 %v19566_v3 }
 0xaaf   : > { %14443 = vmatpush1.bf16.msra.mxu1 %v19561_v40 }
 0xab0   : > { %14163 = vmatpush1.bf16.msra.mxu0 %v19564_v58 }
 0xab1   : > { %14164 = vmatprep.subr.bf16.mxu0 %v19569_v38  ;;  %v19618_v38 = vld [vmem:[#allocation11 + $0x40] sm:$0xff]  }
 0xab2   : > { %14445 = vmatmul.mubr.bf16.vlgmr.msra.gmra.mrb[84].mxu1 %v14242_v25  ;;  %v19619_v25 = vld [vmem:[#allocation11] sm:$0xff]   ;;  %17375 = vmatprep.subr.bf16.mxu1 %v19618_v38 }
 0xab3   : > { %17376 = vmatpush3.bf16.msra.mxu1 %v19619_v25 }
 0xab4   : > { %14165 = vmatpush1.bf16.msra.mxu0 %v19567_v50  ;;  %v19620_v50 = vld [vmem:[#allocation11 + $0x48] sm:$0xff]  }
 0xab5   : > { %14673 = vmatprep.subr.bf16.mxu0 %v19572_v20  ;;  %17377 = vmatprep.subr.bf16.mxu1 %v19620_v50 }
 0xab7   : > { %14167 = vmatmul.mubr.bf16.vlgmr.msra.gmra.mrb[104].mxu0 %v13964_v47  ;;  %17378 = vmatpush3.bf16.msra.mxu1 %v19621_v10 }
 0xab8   : > { %14674 = vmatpush1.bf16.msra.mxu0 %v19570_v28  ;;  %14705 = vmatprep.mubr.bf16.mxu0 %v14510_v1 }
 0xab9   : > { %14675 = vmatprep.subr.bf16.mxu0 %v19575_v35 }
 0xabc   : > { %14676 = vmatpush1.bf16.msra.mxu0 %v19573_v8 }
 0xabd   : > { %14677 = vmatprep.subr.bf16.mxu0 %v19578_v39 }
 0xac0   : > { %14678 = vmatpush1.bf16.msra.mxu0 %v19576_v5 }
 0xac1   : > { %14679 = vmatprep.subr.bf16.mxu0 %v19581_v62 }
 0xac4   : > { %14680 = vmatpush1.bf16.msra.mxu0 %v19579_v41 }
 0xac5   : > { %v12814_v52 = vpop.f32.mrb[72].mxu1  ;;  %14681 = vmatprep.subr.bf16.mxu0 %v19584_v21 }
 0xac6   : > { %v12816_v54 = vpop.f32.mrb[73].mxu1 }
 0xac7   : > { %v12818_v9 = vpop.f32.mrb[74].mxu1 }
 0xac8   : > { %14682 = vmatpush1.bf16.msra.mxu0 %v19582_v15  ;;  %v12819_v19 = vpop.f32.mrb[75].mxu1  ;;  %v19622_v15 = vld [vmem:[#allocation11 + $0x50] sm:$0xff]   ;;  %v19626_v9 = vld [vmem:[#allocation11 + $0x60] sm:$0xff]  }
 0xac9   : > { %14683 = vmatprep.subr.bf16.mxu0 %v19587_v4  ;;  %v19624_v4 = vld [vmem:[#allocation11 + $0x58] sm:$0xff]   ;;  %17379 = vmatprep.subr.bf16.mxu1 %v19622_v15  ;;  %v19627_v19 = vld [vmem:[#allocation11 + $0x20] sm:$0xff]  }
 0xaca   : > { %v12588_v23 = vpop.f32.mrb[92].mxu0 }
 0xacb   : > { %v12815_v30 = vadd.f32 %v12814_v52, %v12588_v23  ;;  %v12590_v31 = vpop.f32.mrb[93].mxu0  ;;  %v19623_v52 = vld [vmem:[#allocation11 + $0x10] sm:$0xff]  }
 0xacc   : > { %v12817_v14 = vadd.f32 %v12816_v54, %v12590_v31  ;;  %14684 = vmatpush1.bf16.msra.mxu0 %v19585_v36  ;;  %v12592_v51 = vpop.f32.mrb[94].mxu0  ;;  %17380 = vmatpush3.bf16.msra.mxu1 %v19623_v52  ;;  %v19625_v54 = vld [vmem:[#allocation11 + $0x18] sm:$0xff]   ;;  %v19628_v36 = vld [vmem:[#allocation11 + $0x68] sm:$0xff]   ;;  %v19630_v23 = vld [vmem:[#allocation11 + $0x70] sm:$0xff]  }
 0xacd   : > { %v12593_v42 = vpop.f32.mrb[95].mxu0  ;;  %14685 = vmatprep.subr.bf16.mxu0 %v19590_v55  ;;  %17381 = vmatprep.subr.bf16.mxu1 %v19624_v4  ;;  %v19629_v55 = vld [vmem:[#allocation11 + $0x28] sm:$0xff]   ;;  %v19632_v31 = vld [vmem:[#allocation11 + $0x78] sm:$0xff]  }
 0xad0   : > { %14686 = vmatpush1.bf16.msra.mxu0 %v19588_v12  ;;  %17382 = vmatpush3.bf16.msra.mxu1 %v19625_v54 }
 0xad1   : > { %14687 = vmatprep.subr.bf16.mxu0 %v19593_v29  ;;  %17383 = vmatprep.subr.bf16.mxu1 %v19626_v9 }
 0xad4   : > { %14688 = vmatpush1.bf16.msra.mxu0 %v19591_v2  ;;  %17384 = vmatpush3.bf16.msra.mxu1 %v19627_v19 }
 0xad5   : > { %14689 = vmatprep.subr.bf16.mxu0 %v19596_v46  ;;  %17385 = vmatprep.subr.bf16.mxu1 %v19628_v36 }
 0xad8   : > { %14690 = vmatpush1.bf16.msra.mxu0 %v19594_v16  ;;  %17386 = vmatpush3.bf16.msra.mxu1 %v19629_v55 }
 0xad9   : > { %14691 = vmatprep.subr.bf16.mxu0 %v19599_v17  ;;  %17387 = vmatprep.subr.bf16.mxu1 %v19630_v23 }
 0xadc   : > { %14692 = vmatpush1.bf16.msra.mxu0 %v19597_v43 }
 0xadd   : > { %14693 = vmatprep.subr.bf16.mxu0 %v19602_v22 }
 0xae0   : > { %14694 = vmatpush1.bf16.msra.mxu0 %v19600_v44 }
 0xae1   : > { %14695 = vmatprep.subr.bf16.mxu0 %v19605_v45 }
 0xae4   : > { %14696 = vmatpush1.bf16.msra.mxu0 %v19603_v13  ;;  %v14716_v13 = vld [vmem:[%s24101_s10] sm:$0x3] }
 0xae5   : > { %14697 = vmatprep.subr.bf16.mxu0 %v19608_v63  ;;  %v14721_v63 = vrot.slane %v14716_v13, %v21175_v34 }
 0xae8   : > { %14698 = vmatpush1.bf16.msra.mxu0 %v19606_v56 }
 0xae9   : > { %14699 = vmatprep.subr.bf16.mxu0 %v19611_v0  ;;  %v14725_v0 = vrot.slane %v14716_v13, %v21181_v11 }
 0xaec   : > { %14700 = vmatpush1.bf16.msra.mxu0 %v19609_v18 }
 0xaed   : > { %14701 = vmatprep.subr.bf16.mxu0 %v19614_v33 }
 0xaf0   : > { %14702 = vmatpush1.bf16.msra.mxu0 %v19612_v53 }
 0xaf1   : > { %14703 = vmatprep.subr.bf16.mxu0 %v19617_v7 }
 0xaf4   : > { %14704 = vmatpush1.bf16.msra.mxu0 %v19615_v48 }
 0xaf7   : > { %14706 = vmatmul.mubr.bf16.vlgmr.msra.gmra.mrb[108].mxu0 %v14503_v60 }
 0xb05   : > { %v13351_v61 = vpop.f32.mrb[76].mxu1 }
 0xb06   : > { %v13353_v24 = vpop.f32.mrb[77].mxu1 }
 0xb07   : > { %v13355_v49 = vpop.f32.mrb[78].mxu1 }
 0xb08   : > { %v13356_v57 = vpop.f32.mrb[79].mxu1 }
 0xb0a   : > { %v13073_v37 = vpop.f32.mrb[96].mxu0 }
 0xb0b   : > { %v13080_v59 = vadd.f32 %v13073_v37, %v12815_v30  ;;  %v13075_v32 = vpop.f32.mrb[97].mxu0  ;;  %v19631_v30 = vld [vmem:[#allocation11 + $0x30] sm:$0xff]  }
 0xb0c   : > { %v13081_v3 = vadd.f32 %v13075_v32, %v12817_v14  ;;  %v13077_v27 = vpop.f32.mrb[98].mxu0  ;;  %17388 = vmatpush3.bf16.msra.mxu1 %v19631_v30  ;;  %v19633_v14 = vld [vmem:[#allocation11 + $0x38] sm:$0xff]  }
 0xb0d   : > { %v13078_v40 = vpop.f32.mrb[99].mxu0  ;;  %v13358_v58 = vadd.f32 %v13351_v61, %v13080_v59  ;;  %17389 = vmatprep.subr.bf16.mxu1 %v19632_v31 }
 0xb0e   : > { %v13359_v20 = vadd.f32 %v13353_v24, %v13081_v3 }
 0xb10   : > { %17390 = vmatpush3.bf16.msra.mxu1 %v19633_v14 }
 0xb45   : > { %v13890_v6 = vpop.f32.mrb[80].mxu1 }
 0xb46   : > { %v13892_v26 = vpop.f32.mrb[81].mxu1 }
 0xb47   : > { %v13894_v28 = vpop.f32.mrb[82].mxu1 }
 0xb48   : > { %v13895_v47 = vpop.f32.mrb[83].mxu1  ;;  %v14780_v28 = vld [vmem:[%s24213_s18] sm:$0x1] }
 0xb4a   : > { %v13629_v35 = vpop.f32.mrb[100].mxu0 }
 0xb4b   : > { %v13636_v1 = vadd.f32 %v13629_v35, %v13358_v58  ;;  %v13631_v8 = vpop.f32.mrb[101].mxu0 }
 0xb4c   : > { %v13637_v39 = vadd.f32 %v13631_v8, %v13359_v20  ;;  %v13633_v5 = vpop.f32.mrb[102].mxu0 }
 0xb4d   : > { %v13634_v62 = vpop.f32.mrb[103].mxu0  ;;  %v13897_v41 = vadd.f32 %v13890_v6, %v13636_v1 }
 0xb4e   : > { %v13898_v21 = vadd.f32 %v13892_v26, %v13637_v39 }
 0xb85   : > { %v14446_v51 = vpop.f32.mrb[84].mxu1 }
 0xb86   : > { %v14448_v12 = vpop.f32.mrb[85].mxu1 }
 0xb87   : > { %v14450_v42 = vpop.f32.mrb[86].mxu1 }
 0xb88   : > { %v14451_v29 = vpop.f32.mrb[87].mxu1 }
 0xb8a   : > { %v14168_v2 = vpop.f32.mrb[104].mxu0 }
 0xb8b   : > { %v14175_v46 = vadd.f32 %v14168_v2, %v13897_v41  ;;  %v14170_v16 = vpop.f32.mrb[105].mxu0 }
 0xb8c   : > { %v14176_v17 = vadd.f32 %v14170_v16, %v13898_v21  ;;  %v14172_v43 = vpop.f32.mrb[106].mxu0 }
 0xb8d   : > { %v14173_v22 = vpop.f32.mrb[107].mxu0  ;;  %v14453_v44 = vadd.f32 %v14446_v51, %v14175_v46 }
 0xb8e   : > { %v14454_v45 = vadd.f32 %v14448_v12, %v14176_v17 }
 0xbca   : > { %v14707_v56 = vpop.f32.mrb[108].mxu0 }
 0xbcb   : > { %v14714_v18 = vadd.f32 %v14707_v56, %v14453_v44  ;;  %v14709_v33 = vpop.f32.mrb[109].mxu0 }
 0xbcc   : > { %v14715_v53 = vadd.f32 %v14709_v33, %v14454_v45  ;;  %v14711_v7 = vpop.f32.mrb[110].mxu0 }
 0xbcd   : > { %v14728_v48 = vadd.f32 %v14721_v63, %v14714_v18  ;;  %v14712_v60 = vpop.f32.mrb[111].mxu0 }
 0xbce   : > { %v14729_v61 = vadd.f32 %v14725_v0, %v14715_v53 }
 0xbcf   : > { %v14730_v24 = vmax.f32 %v14728_v48, 0.0 }
 0xbd0   : > { %v14731_v49 = vmax.f32 %v14729_v61, 0.0 }
 0xbd1   : > { %v14732_v57 = vsel %vm4905_vm13, %v14730_v24, -inf }
 0xbd2   : > { %v14733_v37 = vrot.slane %v14732_v57, 4  ;;  %v14739_v59 = vsel %vm4905_vm13, %v14731_v49, -inf }
 0xbd3   : > { %v14740_v32 = vrot.slane %v14739_v59, 4 }
 0xbd4   : > { %v14734_v34 = vmax.f32 %v14732_v57, %v14733_v37 }
 0xbd5   : > { %v14741_v3 = vmax.f32 %v14739_v59, %v14740_v32 }
 0xbd6   : > { %v14735_v27 = vrot.slane %v14734_v34, 2 }
 0xbd7   : > { %v14742_v11 = vrot.slane %v14741_v3, 2 }
 0xbd8   : > { %v14736_v40 = vmax.f32 %v14734_v34, %v14735_v27 }
 0xbd9   : > { %v14743_v58 = vmax.f32 %v14741_v3, %v14742_v11 }
 0xbda   : > { %v14737_v38 = vrot.slane %v14736_v40, 1 }
 0xbdb   : > { %v14744_v25 = vrot.slane %v14743_v58, 1 }
 0xbdc   : > { %v14738_v50 = vmax.f32 %v14736_v40, %v14737_v38 }
 0xbdd   : > { %v14745_v20 = vmax.f32 %v14743_v58, %v14744_v25 }
 0xbde   : > { %v14746_v6 = vpack.c.bf16 %v14738_v50, %v14738_v50 }
 0xbdf   : > { %v14747_v10 = vpack.c.bf16 %v14745_v20, %v14745_v20 }
 0xbe1   : > { %14909 = vmatprep.mubr.bf16.mxu1 %v14747_v10 }
 0xbe2   : > { %14910 = vmatmul.mubr.bf16.vlgmr.msra.gmra.mrb[88].mxu1 %v14746_v6 }
 0xcb5   : > { %v17391_v26 = vpop.f32.mrb[88].mxu1 }
 0xcb6   : > { %v17392_v47 = vpop.f32.mrb[89].mxu1 }
 0xcb7   : > { %v17393_v35 = vadd.f32 %v17392_v47, %v17391_v26  ;;  %v17394_v1 = vpop.f32.mrb[90].mxu1 }
 0xcb8   : > { %v17395_v8 = vpop.f32.mrb[91].mxu1 }
 0xcb9   : > { %v14912_v39 = vadd.f32 %v17393_v35, %v14780_v28 }
 0xcbb   : > { %14917 = vst [vmem:[%s476_s19] sm:$0x1] %v14912_v39 }
 0xcbc   : > { %19735 = shalt.err (!%p19732_p9)
}
 0xcbd   : > { %s19736_s23 = scalar_lea.hbm %s24049_s30, 16  ;;  %s19740_s18 = scalar_lea.hbm %s24216_s22, 32 }
 0xcbe   : > { %p19737_p2 = scmp.ne.s32.totalorder %s24049_s30, %s19736_s23  ;;  %p19741_p5 = scmp.lt.u32.totalorder %s24049_s30, %s24216_s22 }
 0xcbf   : > { %p19742_p10 = scmp.lt.u32.totalorder %s19740_s18, %s19736_s23  ;;  %p19744_p12 = scmp.lt.u32.totalorder %s19736_s23, %s24049_s30 }
 0xcc0   : > { %p19738_p3 = pnand %p19737_p2, %p24217_p7 }
 0xcc1   : > { %p19743_p4 = por %p19742_p10, %p19741_p5 }
 0xcc2   : > { %p19739_p0 = pneg %p19738_p3 }
 0xcc3   : > { %p19745_p8 = por %p19744_p12, %p19743_p4 }
 0xcc5   : > { %p19746_p11 = pnand %p19745_p8, %p19739_p0 }
 0xcc7   : > { %19749 = shalt.err (!%p19746_p11)
}
 0xcc8   : > { %17696 = dma.vmem_to_hbm [thread:$0]  (%p24217_p7), %s24051_s21, 16, %s24049_s30, %s14919_s17  }
 0xcc9 PF: > { %s24218_s24 = sld [smem:[#allocation18_spill]]  ;;  %s24219_s15 = sld [smem:[#allocation16_spill]] }
 0xcca   : > { %s24220_s27 = sld [smem:[#allocation22_spill]] }
 0xccf   : > { %p17718_p13 = scmp.ge.s32.totalorder %s24218_s24, 2  ;;  %s14943_s14 = sand.u32 1, %s24219_s15  }
 0xcd0   : > { %p24221_p1 = scmp.ne.s32.totalorder %s24220_s27, 0  ;;  %s14944_s29 = scalar_lea.sflag [#allocation8], %s14943_s14 }
 0xcd2   : > { %p17709_p6 = pnand %p17718_p13, %p24221_p1 }
 0xcd4   : > { %19775 = dma.done.wait (!%p17709_p6), %s14944_s29, 16  }
 0xcd5   : > { %19777 = vsyncadd (!%p17709_p6), %s14944_s29, 4294967280  ;;  %s24222_s28 = sld [smem:[#allocation19_spill]]  ;;  %s24223_s12 = sld [smem:[#allocation17_spill]] }
 0xcd6   : > { %s24224_s27 = sld [smem:[#allocation20_spill]]  ;;  %s24225_s25 = smov %s19784_s26 }
 0xcdb   : > { %p25_p9 = scmp.ge.s32.totalorder %s24222_s28, 4   ;;  %s24226_s26 = smov %s24223_s12 }
 0xcdd   :  { %27 = sbr.rel (!%p25_p9) target bundleno = 8 (0x8), region = 190 }
 0xce4   :  { %14948 = vsyncpa [#allocation7], 1 }
 0xce5   :  { %14950 = vsyncpa [#allocation7 + $0x1], 1 }
 0xce6   :  { %14951 = vsyncpa [#allocation10], 1 }
 0xce7   :  { %14952 = vsyncpa [#allocation8], 1 }
 0xce8   :  { %14954 = vsyncpa [#allocation8 + $0x1], 1 }

</bundles_post_ra>
